<compile_context>
chip_gen: v7x
topology: tpu7x:2x2x1
jax: 0.10.0
libtpu: 0.0.40
codegen_flags: <defaults>
</compile_context>

<pallas_src>
import math
import numpy as np

import jax
import jax.numpy as jnp
from jax import lax
from jax.experimental import pallas as pl
from jax.experimental.pallas import tpu as pltpu

# ---------------- small synthetic config ----------------
VOCAB = 20
D_MODEL = 32            # encoder_hidden == decoder_hidden
N_HEAD = 2
D_K = 16
D_V = 16
D_INNER = 64            # FFT conv filter size
FFT_K = (9, 1)          # FFT conv kernel sizes
N_ENC_LAYERS = 1
N_DEC_LAYERS = 1
VAR_FILTER = 32         # variance predictor filter size
VAR_K = 3
N_BINS = 16
N_MEL = 16
POSTNET_DIM = 32
POSTNET_K = 5
POSTNET_LAYERS = 5
N_SPEAKERS = 4
N_SENTIMENTS = 3
MAX_SEQ_LEN = 64

HDK = N_HEAD * D_K
HDV = N_HEAD * D_V


def _pspec(*shape):
    """Full-array BlockSpec for PrefetchScalarGridSpec(grid=(1,)) — index_map
    receives (grid_i, lens_ref) positionally."""
    zeros = tuple(0 for _ in shape)
    return pl.BlockSpec(shape, lambda i, lens, _z=zeros: _z)


def _gspec(*shape):
    """Full-array BlockSpec for a plain grid=(1,)."""
    zeros = tuple(0 for _ in shape)
    return pl.BlockSpec(shape, lambda i, _z=zeros: _z)


def _ln(x, g, b, eps=1e-5):
    """Row-wise LayerNorm over the last dim (used inside kernels)."""
    mean = jnp.mean(x, axis=-1, keepdims=True)
    c = x - mean
    var = jnp.mean(c * c, axis=-1, keepdims=True)
    return c * lax.rsqrt(var + eps) * g + b


# ---------------- fused Pallas kernels ----------------
def fused_fft_block(x, lens, p):
    """One full FFT block (fused-QKV MHA + 9-tap conv FFN) for the whole batch
    in a single grid step.

    x:    [B, T, D] float32
    lens: [B]       int32 valid lengths (masks built in-kernel from SMEM scalars)
    """
    B, T, D = x.shape
    K1 = FFT_K[0]
    PAD1 = (K1 - 1) // 2
    TP = 8 + T + PAD1          # zero-halo scratch; data starts at aligned row 8
    scale = 1.0 / math.sqrt(D_K)

    def kernel(lens_ref, x_ref, wqkv_ref, bqkv_ref, wo_ref, bo_ref,
               ln1g_ref, ln1b_ref, c1w_ref, c1b_ref, c2w_ref, c2b_ref,
               ln2g_ref, ln2b_ref, o_ref, pad_sc):
        # Single grid step: zero the halo scratch once; data rows are fully
        # rewritten below, only the halo rows actually rely on this.
        pad_sc[...] = jnp.zeros_like(pad_sc)

        x3 = x_ref[...]                                        # [B, T, D]
        xf = x3.reshape(B * T, D)

        # ---- fused QKV projection: one [B*T, D] @ [D, 3*H*Dk] matmul ----
        qkv = jnp.dot(xf, wqkv_ref[...],
                      preferred_element_type=jnp.float32) + bqkv_ref[...]
        qkv3 = qkv.reshape(B, T, 3 * HDK)

        key_pos = lax.broadcasted_iota(jnp.int32, (1, T), 1)    # [1, T]
        col_pos = lax.broadcasted_iota(jnp.int32, (1, T, 1), 1)  # [1, T, 1]

        col_masks, h1_rows = [], []
        for b in range(B):
            ln = lens_ref[b]
            key_bias = jnp.where(key_pos >= ln, -1e9, 0.0)      # hoisted over heads
            cmask = jnp.where(col_pos >= ln, 0.0, 1.0)          # [1, T, 1]
            col_masks.append(cmask)

            qkv_b = qkv3[b]                                     # [T, 3*H*Dk]
            ctxs = []
            for h in range(N_HEAD):
                q = qkv_b[:, h * D_K:(h + 1) * D_K]
                k = qkv_b[:, HDK + h * D_K:HDK + (h + 1) * D_K]
                v = qkv_b[:, 2 * HDK + h * D_K:2 * HDK + (h + 1) * D_K]
                s = jnp.dot(q, k.T, preferred_element_type=jnp.float32) * scale + key_bias
                mx = jnp.max(s, axis=-1, keepdims=True)
                e = jnp.exp(s - mx)
                pr = e * pl.reciprocal(jnp.sum(e, axis=-1, keepdims=True), approx=True)
                ctxs.append(jnp.dot(pr, v, preferred_element_type=jnp.float32))
            # heads concatenated once -> single [T, H*Dv] @ [H*Dv, D] out-proj
            ctx = jnp.concatenate(ctxs, axis=-1)
            attn_b = jnp.dot(ctx, wo_ref[...],
                             preferred_element_type=jnp.float32) + bo_ref[...]
            h1_b = _ln(attn_b + x3[b], ln1g_ref[...], ln1b_ref[...]) * cmask[0]
            h1_rows.append(h1_b[None])

        col_mask3 = jnp.concatenate(col_masks, axis=0)          # [B, T, 1]
        h1_full = jnp.concatenate(h1_rows, axis=0)              # [B, T, D]

        # ---- position-wise conv FFN: Conv1d(k=9, pad=4) -> ReLU -> Conv1d(k=1),
        #      batched over B (B*T sublanes per tap matmul) ----
        pad_sc[:, 8:8 + T, :] = h1_full
        acc = jnp.zeros((B * T, D_INNER), jnp.float32)
        for kk in range(K1):
            o = 8 - PAD1 + kk
            acc = acc + jnp.dot(pad_sc[:, o:o + T, :].reshape(B * T, D), c1w_ref[kk],
                                preferred_element_type=jnp.float32)
        hf = jnp.maximum(acc + c1b_ref[...], 0.0)
        hf = jnp.dot(hf, c2w_ref[...], preferred_element_type=jnp.float32) + c2b_ref[...]
        h1f = h1_full.reshape(B * T, D)
        out = _ln(hf + h1f, ln2g_ref[...], ln2b_ref[...]).reshape(B, T, D)
        o_ref[...] = out * col_mask3

    grid_spec = pltpu.PrefetchScalarGridSpec(
        num_scalar_prefetch=1, grid=(1,),
        in_specs=[
            _pspec(B, T, D),
            _pspec(D, 3 * HDK), _pspec(1, 3 * HDK),
            _pspec(HDV, D), _pspec(1, D),
            _pspec(1, D), _pspec(1, D),
            _pspec(K1, D, D_INNER), _pspec(1, D_INNER),
            _pspec(D_INNER, D), _pspec(1, D),
            _pspec(1, D), _pspec(1, D),
        ],
        out_specs=_pspec(B, T, D),
        scratch_shapes=[pltpu.VMEM((B, TP, D), jnp.float32)],
    )
    return pl.pallas_call(
        kernel,
        out_shape=jax.ShapeDtypeStruct((B, T, D), jnp.float32),
        grid_spec=grid_spec,
        compiler_params=pltpu.CompilerParams(dimension_semantics=("arbitrary",)),
    )(lens, x, p['wqkv'], p['bqkv'], p['wo'], p['bo'],
      p['ln1_g'], p['ln1_b'], p['c1_w'], p['c1_b'], p['c2_w'], p['c2_b'],
      p['ln2_g'], p['ln2_b'])


def fused_variance_predictors(x, lens, p):
    """P stacked variance predictors (Conv->ReLU->LN x2 + Linear(1)) sharing one
    input DMA / launch / scratch.  x:[B,T,D] lens:[B] -> [P, B, T] (lane-dense,
    masked to 0 at padded positions)."""
    B, T, D = x.shape
    F = VAR_FILTER
    assert D == F, "single scratch buffer assumes conv in/out widths match"
    P = p['c1_w'].shape[0]
    PADV = (VAR_K - 1) // 2
    TP = 8 + T + PADV

    def kernel(lens_ref, x_ref, c1w_ref, c1b_ref, ln1g_ref, ln1b_ref,
               c2w_ref, c2b_ref, ln2g_ref, ln2b_ref, lw_ref, lb_ref,
               o_ref, pad_sc):
        pad_sc[...] = jnp.zeros_like(pad_sc)
        x3 = x_ref[...]                                        # [B, T, D]

        pos = lax.broadcasted_iota(jnp.int32, (1, T), 1)
        mask_bt = jnp.concatenate(
            [jnp.where(pos >= lens_ref[b], 0.0, 1.0) for b in range(B)], axis=0)  # [B, T]

        def conv_relu_ln(h3, pi, w_ref, b_ref, g_ref, bb_ref):
            pad_sc[:, 8:8 + T, :] = h3
            acc = jnp.zeros((B * T, F), jnp.float32)
            for kk in range(VAR_K):
                o = 8 - PADV + kk
                acc = acc + jnp.dot(pad_sc[:, o:o + T, :].reshape(B * T, F),
                                    w_ref[pi, kk], preferred_element_type=jnp.float32)
            h = jnp.maximum(acc + b_ref[pi], 0.0)
            return _ln(h, g_ref[pi], bb_ref[pi]).reshape(B, T, F)

        for pi in range(P):
            h = conv_relu_ln(x3, pi, c1w_ref, c1b_ref, ln1g_ref, ln1b_ref)
            h = conv_relu_ln(h, pi, c2w_ref, c2b_ref, ln2g_ref, ln2b_ref)
            # Linear(F -> 1) as VPU multiply + lane reduction -> lane-dense [B, T]
            res = jnp.sum(h * lw_ref[pi], axis=-1) + lb_ref[pi]
            o_ref[pi] = res * mask_bt

    grid_spec = pltpu.PrefetchScalarGridSpec(
        num_scalar_prefetch=1, grid=(1,),
        in_specs=[
            _pspec(B, T, D),
            _pspec(P, VAR_K, D, F), _pspec(P, 1, F),
            _pspec(P, 1, F), _pspec(P, 1, F),
            _pspec(P, VAR_K, F, F), _pspec(P, 1, F),
            _pspec(P, 1, F), _pspec(P, 1, F),
            _pspec(P, 1, F), _pspec(P, 1, 1),
        ],
        out_specs=_pspec(P, B, T),
        scratch_shapes=[pltpu.VMEM((B, TP, F), jnp.float32)],
    )
    return pl.pallas_call(
        kernel,
        out_shape=jax.ShapeDtypeStruct((P, B, T), jnp.float32),
        grid_spec=grid_spec,
        compiler_params=pltpu.CompilerParams(dimension_semantics=("arbitrary",)),
    )(lens, x, p['c1_w'], p['c1_b'], p['ln1_g'], p['ln1_b'],
      p['c2_w'], p['c2_b'], p['ln2_g'], p['ln2_b'], p['lin_w'], p['lin_b'])


def fused_mel_postnet(x, mel_w, mel_b, pn_w, pn_s, pn_h):
    """mel_linear + 5x(Conv k=5 -> BN(+bias folded) -> tanh) PostNet + residual,
    whole batch in one grid step.  x:[B,M,D] -> (mel, mel+postnet) each [B,M,N_MEL]."""
    B, M, D = x.shape
    C = POSTNET_DIM                      # padded channel width (>= N_MEL)
    PADP = (POSTNET_K - 1) // 2
    TP = 8 + M + PADP

    def kernel(x_ref, mw_ref, mb_ref, pw_ref, ps_ref, ph_ref,
               mel_ref, post_ref, pad_sc):
        pad_sc[...] = jnp.zeros_like(pad_sc)
        xf = x_ref[...].reshape(B * M, D)
        mel = jnp.dot(xf, mw_ref[...], preferred_element_type=jnp.float32) + mb_ref[...]
        mel3 = mel.reshape(B, M, N_MEL)
        mel_ref[...] = mel3
        # layer-0 input has N_MEL channels; lanes N_MEL:C stay zero from the init
        pad_sc[:, 8:8 + M, 0:N_MEL] = mel3
        y = mel
        for i in range(POSTNET_LAYERS):
            acc = jnp.zeros((B * M, C), jnp.float32)
            for kk in range(POSTNET_K):
                o = 8 - PADP + kk
                acc = acc + jnp.dot(pad_sc[:, o:o + M, :].reshape(B * M, C), pw_ref[i, kk],
                                    preferred_element_type=jnp.float32)
            y = acc * ps_ref[i] + ph_ref[i]      # conv bias + BatchNorm (running stats) folded
            if i < POSTNET_LAYERS - 1:
                y = jnp.tanh(y)
                pad_sc[:, 8:8 + M, :] = y.reshape(B, M, C)
        post_ref[...] = y.reshape(B, M, C)[:, :, 0:N_MEL] + mel3

    return pl.pallas_call(
        kernel,
        out_shape=(jax.ShapeDtypeStruct((B, M, N_MEL), jnp.float32),
                   jax.ShapeDtypeStruct((B, M, N_MEL), jnp.float32)),
        grid=(1,),
        in_specs=[_gspec(B, M, D),
                  _gspec(D, N_MEL), _gspec(1, N_MEL),
                  _gspec(POSTNET_LAYERS, POSTNET_K, C, C),
                  _gspec(POSTNET_LAYERS, 1, C), _gspec(POSTNET_LAYERS, 1, C)],
        out_specs=(_gspec(B, M, N_MEL), _gspec(B, M, N_MEL)),
        scratch_shapes=[pltpu.VMEM((B, TP, C), jnp.float32)],
        compiler_params=pltpu.CompilerParams(dimension_semantics=("arbitrary",)),
    )(x, mel_w, mel_b, pn_w, pn_s, pn_h)


# ---------------- plain-JAX glue ----------------
def get_mask_from_lengths(lengths, max_len):
    ids = jnp.arange(max_len)
    return ids[None, :] >= lengths[:, None]          # True = padded


def get_sinusoid_encoding_table(n_position, d_hid):
    pos = np.arange(n_position)[:, None].astype(np.float64)
    i = np.arange(d_hid)[None, :]
    angle = pos / np.power(10000, 2 * (i // 2) / d_hid)
    table = np.zeros((n_position, d_hid))
    table[:, 0::2] = np.sin(angle[:, 0::2])
    table[:, 1::2] = np.cos(angle[:, 1::2])
    return jnp.asarray(table, jnp.float32)


POS_TABLE = get_sinusoid_encoding_table(MAX_SEQ_LEN, D_MODEL)


def length_regulator(x, durations, max_len):
    # TODO(synk): data-dependent expansion (gather) stays in plain JAX.
    B, T, D = x.shape
    cum = jnp.cumsum(durations, axis=1)                              # [B, T]
    mel_len = cum[:, -1]
    pos = jnp.arange(max_len)
    idx = jnp.sum(pos[None, :, None] >= cum[:, None, :], axis=-1)    # [B, M]
    idx = jnp.minimum(idx, T - 1)
    expanded = jnp.take_along_axis(x, idx[..., None], axis=1)
    pad_mask = pos[None, :] >= mel_len[:, None]
    expanded = jnp.where(pad_mask[..., None], 0.0, expanded)
    return expanded, mel_len


# ---------------- parameters ----------------
def make_params():
    keys = iter(jax.random.split(jax.random.PRNGKey(42), 256))

    def nrm(shape, scale=0.05):
        return jax.random.normal(next(keys), shape, jnp.float32) * scale

    def zeros(n):
        return jnp.zeros((n,), jnp.float32)

    def ones(n):
        return jnp.ones((n,), jnp.float32)

    def fft_block_params():
        return dict(
            wq=nrm((D_MODEL, N_HEAD * D_K)), bq=zeros(N_HEAD * D_K),
            wk=nrm((D_MODEL, N_HEAD * D_K)), bk=zeros(N_HEAD * D_K),
            wv=nrm((D_MODEL, N_HEAD * D_V)), bv=zeros(N_HEAD * D_V),
            wo=nrm((N_HEAD * D_V, D_MODEL)), bo=zeros(D_MODEL),
            ln1_g=ones(D_MODEL), ln1_b=zeros(D_MODEL),
            c1_w=nrm((FFT_K[0], D_MODEL, D_INNER)), c1_b=zeros(D_INNER),
            c2_w=nrm((FFT_K[1], D_INNER, D_MODEL)), c2_b=zeros(D_MODEL),
            ln2_g=ones(D_MODEL), ln2_b=zeros(D_MODEL),
        )

    def var_pred_params():
        return dict(
            c1_w=nrm((VAR_K, D_MODEL, VAR_FILTER)), c1_b=zeros(VAR_FILTER),
            ln1_g=ones(VAR_FILTER), ln1_b=zeros(VAR_FILTER),
            c2_w=nrm((VAR_K, VAR_FILTER, VAR_FILTER)), c2_b=zeros(VAR_FILTER),
            ln2_g=ones(VAR_FILTER), ln2_b=zeros(VAR_FILTER),
            lin_w=nrm((VAR_FILTER, 1)), lin_b=zeros(1),
        )

    word_emb = nrm((VOCAB, D_MODEL), 0.1).at[0].set(0.0)     # padding_idx = 0

    pn_channels = [N_MEL] + [POSTNET_DIM] * (POSTNET_LAYERS - 1) + [N_MEL]
    pn_w, pn_b, pn_bn_g, pn_bn_b = [], [], [], []
    for i in range(POSTNET_LAYERS):
        cin, cout = pn_channels[i], pn_channels[i + 1]
        pn_w.append(nrm((POSTNET_K, cin, cout)))
        pn_b.append(zeros(cout))
        pn_bn_g.append(1.0 + nrm((cout,), 0.05))
        pn_bn_b.append(nrm((cout,), 0.05))

    return dict(
        word_emb=word_emb,
        enc_blocks=[fft_block_params() for _ in range(N_ENC_LAYERS)],
        dec_blocks=[fft_block_params() for _ in range(N_DEC_LAYERS)],
        speaker_emb=nrm((N_SPEAKERS, D_MODEL), 0.1),
        sentiment_emb=nrm((N_SENTIMENTS, D_MODEL), 0.1),
        dur_pred=var_pred_params(),
        pitch_pred=var_pred_params(),
        energy_pred=var_pred_params(),
        pitch_bins=jnp.linspace(-2.5, 2.5, N_BINS - 1),
        energy_bins=jnp.linspace(-2.5, 2.5, N_BINS - 1),
        pitch_emb=nrm((N_BINS, D_MODEL), 0.1),
        energy_emb=nrm((N_BINS, D_MODEL), 0.1),
        mel_w=nrm((D_MODEL, N_MEL)), mel_b=zeros(N_MEL),
        pn_w=pn_w, pn_b=pn_b, pn_bn_g=pn_bn_g, pn_bn_b=pn_bn_b,
    )


def prepare_params(params):
    """Pack torch-style params into kernel-friendly fused layouts (done once)."""
    assert D_K == D_V

    def r1(a):
        return a.reshape(1, -1)

    def fuse_fft(p):
        return dict(
            # fused QKV weight [D, 3*H*Dk] / bias [1, 3*H*Dk]
            wqkv=jnp.concatenate([p['wq'], p['wk'], p['wv']], axis=1),
            bqkv=jnp.concatenate([p['bq'], p['bk'], p['bv']]).reshape(1, -1),
            wo=p['wo'], bo=r1(p['bo']),
            ln1_g=r1(p['ln1_g']), ln1_b=r1(p['ln1_b']),
            c1_w=p['c1_w'], c1_b=r1(p['c1_b']),
            c2_w=p['c2_w'][0],                # kernel-1 conv == plain matmul
            c2_b=r1(p['c2_b']),
            ln2_g=r1(p['ln2_g']), ln2_b=r1(p['ln2_b']),
        )

    def stack_var(preds):
        """Stack P variance predictors along a leading axis for one fused call."""
        return dict(
            c1_w=jnp.stack([q['c1_w'] for q in preds]),
            c1_b=jnp.stack([r1(q['c1_b']) for q in preds]),
            ln1_g=jnp.stack([r1(q['ln1_g']) for q in preds]),
            ln1_b=jnp.stack([r1(q['ln1_b']) for q in preds]),
            c2_w=jnp.stack([q['c2_w'] for q in preds]),
            c2_b=jnp.stack([r1(q['c2_b']) for q in preds]),
            ln2_g=jnp.stack([r1(q['ln2_g']) for q in preds]),
            ln2_b=jnp.stack([r1(q['ln2_b']) for q in preds]),
            lin_w=jnp.stack([q['lin_w'].reshape(1, -1) for q in preds]),   # [P,1,F]
            lin_b=jnp.stack([q['lin_b'].reshape(1, 1) for q in preds]),    # [P,1,1]
        )

    # PostNet: fold conv bias + BatchNorm (inference: running_mean=0, running_var=1)
    # and zero-pad channels to a uniform width so one kernel loop handles all layers.
    C = POSTNET_DIM
    pn_w, pn_s, pn_h = [], [], []
    for i in range(POSTNET_LAYERS):
        w = params['pn_w'][i]                 # [K, Cin, Cout]
        cb = params['pn_b'][i]
        scale = params['pn_bn_g'][i] / jnp.sqrt(1.0 + 1e-5)
        shift = params['pn_bn_b'][i] + cb * scale
        _, cin, cout = w.shape
        pn_w.append(jnp.pad(w, ((0, 0), (0, C - cin), (0, C - cout))))
        pn_s.append(jnp.pad(scale, (0, C - cout)).reshape(1, C))
        pn_h.append(jnp.pad(shift, (0, C - cout)).reshape(1, C))

    return dict(
        word_emb=params['word_emb'],
        speaker_emb=params['speaker_emb'],
        sentiment_emb=params['sentiment_emb'],
        pitch_bins=params['pitch_bins'], energy_bins=params['energy_bins'],
        pitch_emb=params['pitch_emb'], energy_emb=params['energy_emb'],
        enc_blocks=[fuse_fft(p) for p in params['enc_blocks']],
        dec_blocks=[fuse_fft(p) for p in params['dec_blocks']],
        dp_pred=stack_var([params['dur_pred'], params['pitch_pred']]),   # merged call
        en_pred=stack_var([params['energy_pred']]),
        mel_w=params['mel_w'], mel_b=params['mel_b'].reshape(1, N_MEL),
        pn_w=jnp.stack(pn_w), pn_s=jnp.stack(pn_s), pn_h=jnp.stack(pn_h),
    )


# ---------------- FastSpeech2 forward ----------------
def fastspeech2_forward(fp, texts, text_lens, text_len_max,
                        speakers, sentiments, pitches, energies,
                        durations, mel_lens, mel_len_max,
                        p_control=1.0, e_control=1.0, d_control=1.0):
    text_masks = get_mask_from_lengths(text_lens, text_len_max)
    mel_masks = get_mask_from_lengths(mel_lens, mel_len_max)

    # ---- Encoder ----
    x = jnp.take(fp['word_emb'], texts, axis=0) + POS_TABLE[:text_len_max][None, :, :]
    for p in fp['enc_blocks']:
        x = fused_fft_block(x, text_lens, p)

    # speaker / sentiment embeddings (broadcast over time)
    x = x + jnp.take(fp['speaker_emb'], speakers, axis=0)[:, None, :]
    x = x + jnp.take(fp['sentiment_emb'], sentiments, axis=0)[:, None, :]

    # ---- Variance adaptor (phoneme-level pitch & energy, target-conditioned) ----
    dp = fused_variance_predictors(x, text_lens, fp['dp_pred'])       # [2, B, T]
    log_dur_pred, pitch_pred = dp[0], dp[1]
    # side='left' == torch.bucketize(..., right=False)
    pitch_idx = jnp.searchsorted(fp['pitch_bins'], pitches, side='left')
    x = x + jnp.take(fp['pitch_emb'], pitch_idx, axis=0)

    energy_pred = fused_variance_predictors(x, text_lens, fp['en_pred'])[0]
    energy_idx = jnp.searchsorted(fp['energy_bins'], energies, side='left')
    x = x + jnp.take(fp['energy_emb'], energy_idx, axis=0)

    x, mel_len = length_regulator(x, durations, mel_len_max)   # ground-truth durations
    duration_rounded = durations

    # ---- Decoder ----
    x = x + POS_TABLE[:mel_len_max][None, :, :]
    for p in fp['dec_blocks']:
        x = fused_fft_block(x, mel_lens, p)

    # ---- Mel linear + PostNet + residual (single fused kernel) ----
    mel, post = fused_mel_postnet(x, fp['mel_w'], fp['mel_b'],
                                  fp['pn_w'], fp['pn_s'], fp['pn_h'])

    return dict(
        output=mel,
        postnet_output=post,
        pitch_predictions=pitch_pred,
        energy_predictions=energy_pred,
        log_duration_predictions=log_dur_pred,
        duration_rounded=duration_rounded,
        text_masks=text_masks,
        mel_masks=mel_masks,
        text_lens=text_lens,
        mel_lens=mel_len,
    )


# ---------------- main ----------------
if __name__ == "__main__":
    B = 2
    T_TEXT = 8

    key = jax.random.PRNGKey(0)
    k_text, k_pitch, k_energy = jax.random.split(key, 3)

    text_lens_np = np.array([8, 5], dtype=np.int32)
    texts = jax.random.randint(k_text, (B, T_TEXT), 1, VOCAB, dtype=jnp.int32)
    pad_np = np.arange(T_TEXT)[None, :] >= text_lens_np[:, None]
    texts = jnp.where(jnp.asarray(pad_np), 0, texts)              # pad token = 0

    durations_np = np.array([[2, 1, 3, 2, 2, 2, 2, 2],
                             [3, 2, 1, 2, 2, 0, 0, 0]], dtype=np.int32)
    mel_lens_np = durations_np.sum(axis=1).astype(np.int32)
    MEL_MAX = int(mel_lens_np.max())

    speakers = jnp.array([0, 2], dtype=jnp.int32)
    sentiments = jnp.array([1, 0], dtype=jnp.int32)
    pitches = jax.random.normal(k_pitch, (B, T_TEXT), jnp.float32)
    energies = jax.random.normal(k_energy, (B, T_TEXT), jnp.float32)

    text_lens = jnp.asarray(text_lens_np)
    durations = jnp.asarray(durations_np)
    mel_lens = jnp.asarray(mel_lens_np)

    params = make_params()
    fparams = prepare_params(params)

    fwd = jax.jit(lambda prm, tx, tl, sp, st, pi, en, du, ml:
                  fastspeech2_forward(prm, tx, tl, T_TEXT, sp, st, pi, en, du, ml, MEL_MAX))

    out = fwd(fparams, texts, text_lens, speakers, sentiments,
              pitches, energies, durations, mel_lens)
    jax.block_until_ready(out)

    assert out["output"].shape == (B, MEL_MAX, N_MEL)
    assert out["postnet_output"].shape == (B, MEL_MAX, N_MEL)
    assert out["log_duration_predictions"].shape == (B, T_TEXT)
    assert out["pitch_predictions"].shape == (B, T_TEXT)
    assert out["energy_predictions"].shape == (B, T_TEXT)
    assert bool(jnp.all(jnp.isfinite(out["postnet_output"])))
    assert bool(jnp.all(jnp.isfinite(out["output"])))
    print("KERNEL_OK")
</pallas_src>

<mosaic_0001>
module attributes {stable_mosaic.version = 11 : i64} {
  func.func @kernel(%arg0: i32, %arg1: memref<2xi32, #tpu.memory_space<smem>>, %arg2: memref<2x8x32xf32, #tpu.memory_space<vmem>>, %arg3: memref<32x96xf32, #tpu.memory_space<vmem>>, %arg4: memref<1x96xf32, #tpu.memory_space<vmem>>, %arg5: memref<32x32xf32, #tpu.memory_space<vmem>>, %arg6: memref<1x32xf32, #tpu.memory_space<vmem>>, %arg7: memref<1x32xf32, #tpu.memory_space<vmem>>, %arg8: memref<1x32xf32, #tpu.memory_space<vmem>>, %arg9: memref<9x32x64xf32, #tpu.memory_space<vmem>>, %arg10: memref<1x64xf32, #tpu.memory_space<vmem>>, %arg11: memref<64x32xf32, #tpu.memory_space<vmem>>, %arg12: memref<1x32xf32, #tpu.memory_space<vmem>>, %arg13: memref<1x32xf32, #tpu.memory_space<vmem>>, %arg14: memref<1x32xf32, #tpu.memory_space<vmem>>, %arg15: memref<2x8x32xf32, #tpu.memory_space<vmem>>, %arg16: memref<2x20x32xf32, #tpu.memory_space<vmem>>) attributes {dimension_semantics = [#tpu.dimension_semantics<arbitrary>], iteration_bounds = array<i64: 1>, scalar_prefetch = 1 : i64, scratch_operands = 1 : i64, tpu.core_type = #tpu.core_type<tc>, window_params = [{pipeline_mode = #tpu.pipeline_mode<synchronous>, transform_indices = @transform_0, window_bounds = array<i64: 2, 8, 32>}, {pipeline_mode = #tpu.pipeline_mode<synchronous>, transform_indices = @transform_1, window_bounds = array<i64: 32, 96>}, {pipeline_mode = #tpu.pipeline_mode<synchronous>, transform_indices = @transform_2, window_bounds = array<i64: 1, 96>}, {pipeline_mode = #tpu.pipeline_mode<synchronous>, transform_indices = @transform_3, window_bounds = array<i64: 32, 32>}, {pipeline_mode = #tpu.pipeline_mode<synchronous>, transform_indices = @transform_4, window_bounds = array<i64: 1, 32>}, {pipeline_mode = #tpu.pipeline_mode<synchronous>, transform_indices = @transform_5, window_bounds = array<i64: 1, 32>}, {pipeline_mode = #tpu.pipeline_mode<synchronous>, transform_indices = @transform_6, window_bounds = array<i64: 1, 32>}, {pipeline_mode = #tpu.pipeline_mode<synchronous>, transform_indices = @transform_7, window_bounds = array<i64: 9, 32, 64>}, {pipeline_mode = #tpu.pipeline_mode<synchronous>, transform_indices = @transform_8, window_bounds = array<i64: 1, 64>}, {pipeline_mode = #tpu.pipeline_mode<synchronous>, transform_indices = @transform_9, window_bounds = array<i64: 64, 32>}, {pipeline_mode = #tpu.pipeline_mode<synchronous>, transform_indices = @transform_10, window_bounds = array<i64: 1, 32>}, {pipeline_mode = #tpu.pipeline_mode<synchronous>, transform_indices = @transform_11, window_bounds = array<i64: 1, 32>}, {pipeline_mode = #tpu.pipeline_mode<synchronous>, transform_indices = @transform_12, window_bounds = array<i64: 1, 32>}, {pipeline_mode = #tpu.pipeline_mode<synchronous>, transform_indices = @transform_13, window_bounds = array<i64: 2, 8, 32>}]} {
    %cst = arith.constant 0.000000e+00 : f32
    %0 = vector.broadcast %cst : f32 to vector<2x20x32xf32>
    %c0 = arith.constant 0 : index
    %c0_0 = arith.constant 0 : index
    %c0_1 = arith.constant 0 : index
    %1 = vector.load %arg16[%c0, %c0_0, %c0_1] : memref<2x20x32xf32, #tpu.memory_space<vmem>>, vector<2x20x32xf32>
    tpu.vector_store %arg16[%c0, %c0_0, %c0_1], %0 {strides = array<i32>} : memref<2x20x32xf32, #tpu.memory_space<vmem>>, vector<2x20x32xf32>,
    %c0_2 = arith.constant 0 : index
    %c0_3 = arith.constant 0 : index
    %c0_4 = arith.constant 0 : index
    %2 = vector.load %arg2[%c0_2, %c0_3, %c0_4] : memref<2x8x32xf32, #tpu.memory_space<vmem>>, vector<2x8x32xf32>
    %3 = vector.shape_cast %2 : vector<2x8x32xf32> to vector<16x32xf32>
    %c0_5 = arith.constant 0 : index
    %c0_6 = arith.constant 0 : index
    %4 = vector.load %arg3[%c0_5, %c0_6] : memref<32x96xf32, #tpu.memory_space<vmem>>, vector<32x96xf32>
    %cst_7 = arith.constant dense<0.000000e+00> : vector<16x96xf32>
    %5 = tpu.matmul %3, %4, %cst_7 {dimension_numbers = #tpu.dot_dimension_numbers<[1], [0], [0], [1], [0, 0, 1, 1], [], []>} : vector<16x32xf32>, vector<32x96xf32>, vector<16x96xf32> -> vector<16x96xf32>
    %c0_8 = arith.constant 0 : index
    %c0_9 = arith.constant 0 : index
    %6 = vector.load %arg4[%c0_8, %c0_9] : memref<1x96xf32, #tpu.memory_space<vmem>>, vector<1x96xf32>
    %7 = vector.broadcast %6 : vector<1x96xf32> to vector<16x96xf32>
    %8 = arith.addf %5, %7 : vector<16x96xf32>
    %9 = vector.shape_cast %8 : vector<16x96xf32> to vector<2x8x96xf32>
    %10 = tpu.iota {dimensions = array<i32: 1>} : vector<1x8xi32>
    %11 = tpu.iota {dimensions = array<i32: 1>} : vector<1x8x1xi32>
    %c0_10 = arith.constant 0 : index
    %12 = memref.load %arg1[%c0_10] : memref<2xi32, #tpu.memory_space<smem>>
    %13 = vector.broadcast %12 : i32 to vector<1x8xi32>
    %14 = arith.cmpi sge, %10, %13 : vector<1x8xi32>
    %cst_11 = arith.constant -1.000000e+09 : f32
    %cst_12 = arith.constant 0.000000e+00 : f32
    %15 = vector.broadcast %cst_11 : f32 to vector<1x8xf32>
    %16 = vector.broadcast %cst_12 : f32 to vector<1x8xf32>
    %17 = arith.select %14, %15, %16 : vector<1x8xi1>, vector<1x8xf32>
    %18 = vector.broadcast %12 : i32 to vector<1x8x1xi32>
    %19 = arith.cmpi sge, %11, %18 : vector<1x8x1xi32>
    %cst_13 = arith.constant 0.000000e+00 : f32
    %cst_14 = arith.constant 1.000000e+00 : f32
    %20 = vector.broadcast %cst_13 : f32 to vector<1x8x1xf32>
    %21 = vector.broadcast %cst_14 : f32 to vector<1x8x1xf32>
    %22 = arith.select %19, %20, %21 : vector<1x8x1xi1>, vector<1x8x1xf32>
    %23 = vector.extract_strided_slice %9 {offsets = [0, 0, 0], sizes = [1, 8, 96], strides = [1, 1, 1]} : vector<2x8x96xf32> to vector<1x8x96xf32>
    %24 = vector.shape_cast %23 : vector<1x8x96xf32> to vector<8x96xf32>
    %25 = vector.extract_strided_slice %24 {offsets = [0, 0], sizes = [8, 16], strides = [1, 1]} : vector<8x96xf32> to vector<8x16xf32>
    %26 = vector.extract_strided_slice %24 {offsets = [0, 32], sizes = [8, 16], strides = [1, 1]} : vector<8x96xf32> to vector<8x16xf32>
    %27 = vector.extract_strided_slice %24 {offsets = [0, 64], sizes = [8, 16], strides = [1, 1]} : vector<8x96xf32> to vector<8x16xf32>
    %28 = tpu.transpose %26, [1, 0] : vector<8x16xf32> -> vector<16x8xf32>
    %cst_15 = arith.constant dense<0.000000e+00> : vector<8x8xf32>
    %29 = tpu.matmul %25, %28, %cst_15 {dimension_numbers = #tpu.dot_dimension_numbers<[1], [0], [0], [1], [0, 0, 1, 1], [], []>} : vector<8x16xf32>, vector<16x8xf32>, vector<8x8xf32> -> vector<8x8xf32>
    %cst_16 = arith.constant 2.500000e-01 : f32
    %30 = vector.broadcast %cst_16 : f32 to vector<8x8xf32>
    %31 = arith.mulf %29, %30 : vector<8x8xf32>
    %32 = vector.broadcast %17 : vector<1x8xf32> to vector<8x8xf32>
    %33 = arith.addf %31, %32 : vector<8x8xf32>
    %cst_17 = arith.constant dense<0xFF800000> : vector<8xf32>
    %34 = vector.multi_reduction <maximumf>, %33, %cst_17 [1] : vector<8x8xf32> to vector<8xf32>
    %35 = vector.shape_cast %34 : vector<8xf32> to vector<8x1xf32>
    %36 = vector.broadcast %35 : vector<8x1xf32> to vector<8x8xf32>
    %37 = arith.subf %33, %36 : vector<8x8xf32>
    %38 = math.exp %37 : vector<8x8xf32>
    %cst_18 = arith.constant dense<0.000000e+00> : vector<8xf32>
    %39 = vector.multi_reduction <add>, %38, %cst_18 [1] : vector<8x8xf32> to vector<8xf32>
    %40 = vector.shape_cast %39 : vector<8xf32> to vector<8x1xf32>
    %41 = tpu.reciprocal %40 {approx = true} : vector<8x1xf32> -> vector<8x1xf32>
    %42 = vector.broadcast %41 : vector<8x1xf32> to vector<8x8xf32>
    %43 = arith.mulf %38, %42 : vector<8x8xf32>
    %cst_19 = arith.constant dense<0.000000e+00> : vector<8x16xf32>
    %44 = tpu.matmul %43, %27, %cst_19 {dimension_numbers = #tpu.dot_dimension_numbers<[1], [0], [0], [1], [0, 0, 1, 1], [], []>} : vector<8x8xf32>, vector<8x16xf32>, vector<8x16xf32> -> vector<8x16xf32>
    %45 = vector.extract_strided_slice %24 {offsets = [0, 16], sizes = [8, 16], strides = [1, 1]} : vector<8x96xf32> to vector<8x16xf32>
    %46 = vector.extract_strided_slice %24 {offsets = [0, 48], sizes = [8, 16], strides = [1, 1]} : vector<8x96xf32> to vector<8x16xf32>
    %47 = vector.extract_strided_slice %24 {offsets = [0, 80], sizes = [8, 16], strides = [1, 1]} : vector<8x96xf32> to vector<8x16xf32>
    %48 = tpu.transpose %46, [1, 0] : vector<8x16xf32> -> vector<16x8xf32>
    %cst_20 = arith.constant dense<0.000000e+00> : vector<8x8xf32>
    %49 = tpu.matmul %45, %48, %cst_20 {dimension_numbers = #tpu.dot_dimension_numbers<[1], [0], [0], [1], [0, 0, 1, 1], [], []>} : vector<8x16xf32>, vector<16x8xf32>, vector<8x8xf32> -> vector<8x8xf32>
    %cst_21 = arith.constant 2.500000e-01 : f32
    %50 = vector.broadcast %cst_21 : f32 to vector<8x8xf32>
    %51 = arith.mulf %49, %50 : vector<8x8xf32>
    %52 = vector.broadcast %17 : vector<1x8xf32> to vector<8x8xf32>
    %53 = arith.addf %51, %52 : vector<8x8xf32>
    %cst_22 = arith.constant dense<0xFF800000> : vector<8xf32>
    %54 = vector.multi_reduction <maximumf>, %53, %cst_22 [1] : vector<8x8xf32> to vector<8xf32>
    %55 = vector.shape_cast %54 : vector<8xf32> to vector<8x1xf32>
    %56 = vector.broadcast %55 : vector<8x1xf32> to vector<8x8xf32>
    %57 = arith.subf %53, %56 : vector<8x8xf32>
    %58 = math.exp %57 : vector<8x8xf32>
    %cst_23 = arith.constant dense<0.000000e+00> : vector<8xf32>
    %59 = vector.multi_reduction <add>, %58, %cst_23 [1] : vector<8x8xf32> to vector<8xf32>
    %60 = vector.shape_cast %59 : vector<8xf32> to vector<8x1xf32>
    %61 = tpu.reciprocal %60 {approx = true} : vector<8x1xf32> -> vector<8x1xf32>
    %62 = vector.broadcast %61 : vector<8x1xf32> to vector<8x8xf32>
    %63 = arith.mulf %58, %62 : vector<8x8xf32>
    %cst_24 = arith.constant dense<0.000000e+00> : vector<8x16xf32>
    %64 = tpu.matmul %63, %47, %cst_24 {dimension_numbers = #tpu.dot_dimension_numbers<[1], [0], [0], [1], [0, 0, 1, 1], [], []>} : vector<8x8xf32>, vector<8x16xf32>, vector<8x16xf32> -> vector<8x16xf32>
    %65 = tpu.concatenate %44, %64 in 1 : vector<8x16xf32>, vector<8x16xf32> -> vector<8x32xf32>
    %c0_25 = arith.constant 0 : index
    %c0_26 = arith.constant 0 : index
    %66 = vector.load %arg5[%c0_25, %c0_26] : memref<32x32xf32, #tpu.memory_space<vmem>>, vector<32x32xf32>
    %cst_27 = arith.constant dense<0.000000e+00> : vector<8x32xf32>
    %67 = tpu.matmul %65, %66, %cst_27 {dimension_numbers = #tpu.dot_dimension_numbers<[1], [0], [0], [1], [0, 0, 1, 1], [], []>} : vector<8x32xf32>, vector<32x32xf32>, vector<8x32xf32> -> vector<8x32xf32>
    %c0_28 = arith.constant 0 : index
    %c0_29 = arith.constant 0 : index
    %68 = vector.load %arg6[%c0_28, %c0_29] : memref<1x32xf32, #tpu.memory_space<vmem>>, vector<1x32xf32>
    %69 = vector.broadcast %68 : vector<1x32xf32> to vector<8x32xf32>
    %70 = arith.addf %67, %69 : vector<8x32xf32>
    %71 = vector.extract_strided_slice %2 {offsets = [0, 0, 0], sizes = [1, 8, 32], strides = [1, 1, 1]} : vector<2x8x32xf32> to vector<1x8x32xf32>
    %72 = vector.shape_cast %71 : vector<1x8x32xf32> to vector<8x32xf32>
    %73 = arith.addf %70, %72 : vector<8x32xf32>
    %c0_30 = arith.constant 0 : index
    %c0_31 = arith.constant 0 : index
    %74 = vector.load %arg7[%c0_30, %c0_31] : memref<1x32xf32, #tpu.memory_space<vmem>>, vector<1x32xf32>
    %c0_32 = arith.constant 0 : index
    %c0_33 = arith.constant 0 : index
    %75 = vector.load %arg8[%c0_32, %c0_33] : memref<1x32xf32, #tpu.memory_space<vmem>>, vector<1x32xf32>
    %cst_34 = arith.constant dense<0.000000e+00> : vector<8xf32>
    %76 = vector.multi_reduction <add>, %73, %cst_34 [1] : vector<8x32xf32> to vector<8xf32>
    %77 = vector.shape_cast %76 : vector<8xf32> to vector<8x1xf32>
    %cst_35 = arith.constant 3.200000e+01 : f32
    %78 = vector.broadcast %cst_35 : f32 to vector<8x1xf32>
    %79 = arith.divf %77, %78 : vector<8x1xf32>
    %80 = vector.broadcast %79 : vector<8x1xf32> to vector<8x32xf32>
    %81 = arith.subf %73, %80 : vector<8x32xf32>
    %82 = arith.mulf %81, %81 : vector<8x32xf32>
    %cst_36 = arith.constant dense<0.000000e+00> : vector<8xf32>
    %83 = vector.multi_reduction <add>, %82, %cst_36 [1] : vector<8x32xf32> to vector<8xf32>
    %84 = vector.shape_cast %83 : vector<8xf32> to vector<8x1xf32>
    %cst_37 = arith.constant 3.200000e+01 : f32
    %85 = vector.broadcast %cst_37 : f32 to vector<8x1xf32>
    %86 = arith.divf %84, %85 : vector<8x1xf32>
    %cst_38 = arith.constant 9.99999974E-6 : f32
    %87 = vector.broadcast %cst_38 : f32 to vector<8x1xf32>
    %88 = arith.addf %86, %87 : vector<8x1xf32>
    %89 = math.rsqrt %88 : vector<8x1xf32>
    %90 = vector.broadcast %89 : vector<8x1xf32> to vector<8x32xf32>
    %91 = arith.mulf %81, %90 : vector<8x32xf32>
    %92 = vector.broadcast %74 : vector<1x32xf32> to vector<8x32xf32>
    %93 = arith.mulf %91, %92 : vector<8x32xf32>
    %94 = vector.broadcast %75 : vector<1x32xf32> to vector<8x32xf32>
    %95 = arith.addf %93, %94 : vector<8x32xf32>
    %96 = vector.shape_cast %22 : vector<1x8x1xf32> to vector<8x1xf32>
    %97 = vector.broadcast %96 : vector<8x1xf32> to vector<8x32xf32>
    %98 = arith.mulf %95, %97 : vector<8x32xf32>
    %99 = vector.shape_cast %98 : vector<8x32xf32> to vector<1x8x32xf32>
    %c1 = arith.constant 1 : index
    %100 = memref.load %arg1[%c1] : memref<2xi32, #tpu.memory_space<smem>>
    %101 = vector.broadcast %100 : i32 to vector<1x8xi32>
    %102 = arith.cmpi sge, %10, %101 : vector<1x8xi32>
    %cst_39 = arith.constant -1.000000e+09 : f32
    %cst_40 = arith.constant 0.000000e+00 : f32
    %103 = vector.broadcast %cst_39 : f32 to vector<1x8xf32>
    %104 = vector.broadcast %cst_40 : f32 to vector<1x8xf32>
    %105 = arith.select %102, %103, %104 : vector<1x8xi1>, vector<1x8xf32>
    %106 = vector.broadcast %100 : i32 to vector<1x8x1xi32>
    %107 = arith.cmpi sge, %11, %106 : vector<1x8x1xi32>
    %cst_41 = arith.constant 0.000000e+00 : f32
    %cst_42 = arith.constant 1.000000e+00 : f32
    %108 = vector.broadcast %cst_41 : f32 to vector<1x8x1xf32>
    %109 = vector.broadcast %cst_42 : f32 to vector<1x8x1xf32>
    %110 = arith.select %107, %108, %109 : vector<1x8x1xi1>, vector<1x8x1xf32>
    %111 = vector.extract_strided_slice %9 {offsets = [1, 0, 0], sizes = [1, 8, 96], strides = [1, 1, 1]} : vector<2x8x96xf32> to vector<1x8x96xf32>
    %112 = vector.shape_cast %111 : vector<1x8x96xf32> to vector<8x96xf32>
    %113 = vector.extract_strided_slice %112 {offsets = [0, 0], sizes = [8, 16], strides = [1, 1]} : vector<8x96xf32> to vector<8x16xf32>
    %114 = vector.extract_strided_slice %112 {offsets = [0, 32], sizes = [8, 16], strides = [1, 1]} : vector<8x96xf32> to vector<8x16xf32>
    %115 = vector.extract_strided_slice %112 {offsets = [0, 64], sizes = [8, 16], strides = [1, 1]} : vector<8x96xf32> to vector<8x16xf32>
    %116 = tpu.transpose %114, [1, 0] : vector<8x16xf32> -> vector<16x8xf32>
    %cst_43 = arith.constant dense<0.000000e+00> : vector<8x8xf32>
    %117 = tpu.matmul %113, %116, %cst_43 {dimension_numbers = #tpu.dot_dimension_numbers<[1], [0], [0], [1], [0, 0, 1, 1], [], []>} : vector<8x16xf32>, vector<16x8xf32>, vector<8x8xf32> -> vector<8x8xf32>
    %cst_44 = arith.constant 2.500000e-01 : f32
    %118 = vector.broadcast %cst_44 : f32 to vector<8x8xf32>
    %119 = arith.mulf %117, %118 : vector<8x8xf32>
    %120 = vector.broadcast %105 : vector<1x8xf32> to vector<8x8xf32>
    %121 = arith.addf %119, %120 : vector<8x8xf32>
    %cst_45 = arith.constant dense<0xFF800000> : vector<8xf32>
    %122 = vector.multi_reduction <maximumf>, %121, %cst_45 [1] : vector<8x8xf32> to vector<8xf32>
    %123 = vector.shape_cast %122 : vector<8xf32> to vector<8x1xf32>
    %124 = vector.broadcast %123 : vector<8x1xf32> to vector<8x8xf32>
    %125 = arith.subf %121, %124 : vector<8x8xf32>
    %126 = math.exp %125 : vector<8x8xf32>
    %cst_46 = arith.constant dense<0.000000e+00> : vector<8xf32>
    %127 = vector.multi_reduction <add>, %126, %cst_46 [1] : vector<8x8xf32> to vector<8xf32>
    %128 = vector.shape_cast %127 : vector<8xf32> to vector<8x1xf32>
    %129 = tpu.reciprocal %128 {approx = true} : vector<8x1xf32> -> vector<8x1xf32>
    %130 = vector.broadcast %129 : vector<8x1xf32> to vector<8x8xf32>
    %131 = arith.mulf %126, %130 : vector<8x8xf32>
    %cst_47 = arith.constant dense<0.000000e+00> : vector<8x16xf32>
    %132 = tpu.matmul %131, %115, %cst_47 {dimension_numbers = #tpu.dot_dimension_numbers<[1], [0], [0], [1], [0, 0, 1, 1], [], []>} : vector<8x8xf32>, vector<8x16xf32>, vector<8x16xf32> -> vector<8x16xf32>
    %133 = vector.extract_strided_slice %112 {offsets = [0, 16], sizes = [8, 16], strides = [1, 1]} : vector<8x96xf32> to vector<8x16xf32>
    %134 = vector.extract_strided_slice %112 {offsets = [0, 48], sizes = [8, 16], strides = [1, 1]} : vector<8x96xf32> to vector<8x16xf32>
    %135 = vector.extract_strided_slice %112 {offsets = [0, 80], sizes = [8, 16], strides = [1, 1]} : vector<8x96xf32> to vector<8x16xf32>
    %136 = tpu.transpose %134, [1, 0] : vector<8x16xf32> -> vector<16x8xf32>
    %cst_48 = arith.constant dense<0.000000e+00> : vector<8x8xf32>
    %137 = tpu.matmul %133, %136, %cst_48 {dimension_numbers = #tpu.dot_dimension_numbers<[1], [0], [0], [1], [0, 0, 1, 1], [], []>} : vector<8x16xf32>, vector<16x8xf32>, vector<8x8xf32> -> vector<8x8xf32>
    %cst_49 = arith.constant 2.500000e-01 : f32
    %138 = vector.broadcast %cst_49 : f32 to vector<8x8xf32>
    %139 = arith.mulf %137, %138 : vector<8x8xf32>
    %140 = vector.broadcast %105 : vector<1x8xf32> to vector<8x8xf32>
    %141 = arith.addf %139, %140 : vector<8x8xf32>
    %cst_50 = arith.constant dense<0xFF800000> : vector<8xf32>
    %142 = vector.multi_reduction <maximumf>, %141, %cst_50 [1] : vector<8x8xf32> to vector<8xf32>
    %143 = vector.shape_cast %142 : vector<8xf32> to vector<8x1xf32>
    %144 = vector.broadcast %143 : vector<8x1xf32> to vector<8x8xf32>
    %145 = arith.subf %141, %144 : vector<8x8xf32>
    %146 = math.exp %145 : vector<8x8xf32>
    %cst_51 = arith.constant dense<0.000000e+00> : vector<8xf32>
    %147 = vector.multi_reduction <add>, %146, %cst_51 [1] : vector<8x8xf32> to vector<8xf32>
    %148 = vector.shape_cast %147 : vector<8xf32> to vector<8x1xf32>
    %149 = tpu.reciprocal %148 {approx = true} : vector<8x1xf32> -> vector<8x1xf32>
    %150 = vector.broadcast %149 : vector<8x1xf32> to vector<8x8xf32>
    %151 = arith.mulf %146, %150 : vector<8x8xf32>
    %cst_52 = arith.constant dense<0.000000e+00> : vector<8x16xf32>
    %152 = tpu.matmul %151, %135, %cst_52 {dimension_numbers = #tpu.dot_dimension_numbers<[1], [0], [0], [1], [0, 0, 1, 1], [], []>} : vector<8x8xf32>, vector<8x16xf32>, vector<8x16xf32> -> vector<8x16xf32>
    %153 = tpu.concatenate %132, %152 in 1 : vector<8x16xf32>, vector<8x16xf32> -> vector<8x32xf32>
    %c0_53 = arith.constant 0 : index
    %c0_54 = arith.constant 0 : index
    %154 = vector.load %arg5[%c0_53, %c0_54] : memref<32x32xf32, #tpu.memory_space<vmem>>, vector<32x32xf32>
    %cst_55 = arith.constant dense<0.000000e+00> : vector<8x32xf32>
    %155 = tpu.matmul %153, %154, %cst_55 {dimension_numbers = #tpu.dot_dimension_numbers<[1], [0], [0], [1], [0, 0, 1, 1], [], []>} : vector<8x32xf32>, vector<32x32xf32>, vector<8x32xf32> -> vector<8x32xf32>
    %c0_56 = arith.constant 0 : index
    %c0_57 = arith.constant 0 : index
    %156 = vector.load %arg6[%c0_56, %c0_57] : memref<1x32xf32, #tpu.memory_space<vmem>>, vector<1x32xf32>
    %157 = vector.broadcast %156 : vector<1x32xf32> to vector<8x32xf32>
    %158 = arith.addf %155, %157 : vector<8x32xf32>
    %159 = vector.extract_strided_slice %2 {offsets = [1, 0, 0], sizes = [1, 8, 32], strides = [1, 1, 1]} : vector<2x8x32xf32> to vector<1x8x32xf32>
    %160 = vector.shape_cast %159 : vector<1x8x32xf32> to vector<8x32xf32>
    %161 = arith.addf %158, %160 : vector<8x32xf32>
    %c0_58 = arith.constant 0 : index
    %c0_59 = arith.constant 0 : index
    %162 = vector.load %arg7[%c0_58, %c0_59] : memref<1x32xf32, #tpu.memory_space<vmem>>, vector<1x32xf32>
    %c0_60 = arith.constant 0 : index
    %c0_61 = arith.constant 0 : index
    %163 = vector.load %arg8[%c0_60, %c0_61] : memref<1x32xf32, #tpu.memory_space<vmem>>, vector<1x32xf32>
    %cst_62 = arith.constant dense<0.000000e+00> : vector<8xf32>
    %164 = vector.multi_reduction <add>, %161, %cst_62 [1] : vector<8x32xf32> to vector<8xf32>
    %165 = vector.shape_cast %164 : vector<8xf32> to vector<8x1xf32>
    %cst_63 = arith.constant 3.200000e+01 : f32
    %166 = vector.broadcast %cst_63 : f32 to vector<8x1xf32>
    %167 = arith.divf %165, %166 : vector<8x1xf32>
    %168 = vector.broadcast %167 : vector<8x1xf32> to vector<8x32xf32>
    %169 = arith.subf %161, %168 : vector<8x32xf32>
    %170 = arith.mulf %169, %169 : vector<8x32xf32>
    %cst_64 = arith.constant dense<0.000000e+00> : vector<8xf32>
    %171 = vector.multi_reduction <add>, %170, %cst_64 [1] : vector<8x32xf32> to vector<8xf32>
    %172 = vector.shape_cast %171 : vector<8xf32> to vector<8x1xf32>
    %cst_65 = arith.constant 3.200000e+01 : f32
    %173 = vector.broadcast %cst_65 : f32 to vector<8x1xf32>
    %174 = arith.divf %172, %173 : vector<8x1xf32>
    %cst_66 = arith.constant 9.99999974E-6 : f32
    %175 = vector.broadcast %cst_66 : f32 to vector<8x1xf32>
    %176 = arith.addf %174, %175 : vector<8x1xf32>
    %177 = math.rsqrt %176 : vector<8x1xf32>
    %178 = vector.broadcast %177 : vector<8x1xf32> to vector<8x32xf32>
    %179 = arith.mulf %169, %178 : vector<8x32xf32>
    %180 = vector.broadcast %162 : vector<1x32xf32> to vector<8x32xf32>
    %181 = arith.mulf %179, %180 : vector<8x32xf32>
    %182 = vector.broadcast %163 : vector<1x32xf32> to vector<8x32xf32>
    %183 = arith.addf %181, %182 : vector<8x32xf32>
    %184 = vector.shape_cast %110 : vector<1x8x1xf32> to vector<8x1xf32>
    %185 = vector.broadcast %184 : vector<8x1xf32> to vector<8x32xf32>
    %186 = arith.mulf %183, %185 : vector<8x32xf32>
    %187 = vector.shape_cast %186 : vector<8x32xf32> to vector<1x8x32xf32>
    %188 = tpu.concatenate %22, %110 in 0 : vector<1x8x1xf32>, vector<1x8x1xf32> -> vector<2x8x1xf32>
    %189 = tpu.concatenate %99, %187 in 0 : vector<1x8x32xf32>, vector<1x8x32xf32> -> vector<2x8x32xf32>
    %c0_67 = arith.constant 0 : index
    %c8 = arith.constant 8 : index
    %c0_68 = arith.constant 0 : index
    %190 = vector.load %arg16[%c0_67, %c8, %c0_68] : memref<2x20x32xf32, #tpu.memory_space<vmem>>, vector<2x8x32xf32>
    tpu.vector_store %arg16[%c0_67, %c8, %c0_68], %189 {strides = array<i32>} : memref<2x20x32xf32, #tpu.memory_space<vmem>>, vector<2x8x32xf32>,
    %cst_69 = arith.constant 0.000000e+00 : f32
    %191 = vector.broadcast %cst_69 : f32 to vector<16x64xf32>
    %c0_70 = arith.constant 0 : index
    %c4 = arith.constant 4 : index
    %c0_71 = arith.constant 0 : index
    %192 = vector.load %arg16[%c0_70, %c4, %c0_71] : memref<2x20x32xf32, #tpu.memory_space<vmem>>, vector<2x8x32xf32>
    %193 = vector.shape_cast %192 : vector<2x8x32xf32> to vector<16x32xf32>
    %c0_72 = arith.constant 0 : index
    %c0_73 = arith.constant 0 : index
    %c0_74 = arith.constant 0 : index
    %194 = vector.load %arg9[%c0_72, %c0_73, %c0_74] : memref<9x32x64xf32, #tpu.memory_space<vmem>>, vector<1x32x64xf32>
    %195 = vector.shape_cast %194 : vector<1x32x64xf32> to vector<32x64xf32>
    %cst_75 = arith.constant dense<0.000000e+00> : vector<16x64xf32>
    %196 = tpu.matmul %193, %195, %cst_75 {dimension_numbers = #tpu.dot_dimension_numbers<[1], [0], [0], [1], [0, 0, 1, 1], [], []>} : vector<16x32xf32>, vector<32x64xf32>, vector<16x64xf32> -> vector<16x64xf32>
    %197 = arith.addf %191, %196 : vector<16x64xf32>
    %c0_76 = arith.constant 0 : index
    %c5 = arith.constant 5 : index
    %c0_77 = arith.constant 0 : index
    %198 = vector.load %arg16[%c0_76, %c5, %c0_77] : memref<2x20x32xf32, #tpu.memory_space<vmem>>, vector<2x8x32xf32>
    %199 = vector.shape_cast %198 : vector<2x8x32xf32> to vector<16x32xf32>
    %c1_78 = arith.constant 1 : index
    %c0_79 = arith.constant 0 : index
    %c0_80 = arith.constant 0 : index
    %200 = vector.load %arg9[%c1_78, %c0_79, %c0_80] : memref<9x32x64xf32, #tpu.memory_space<vmem>>, vector<1x32x64xf32>
    %201 = vector.shape_cast %200 : vector<1x32x64xf32> to vector<32x64xf32>
    %cst_81 = arith.constant dense<0.000000e+00> : vector<16x64xf32>
    %202 = tpu.matmul %199, %201, %cst_81 {dimension_numbers = #tpu.dot_dimension_numbers<[1], [0], [0], [1], [0, 0, 1, 1], [], []>} : vector<16x32xf32>, vector<32x64xf32>, vector<16x64xf32> -> vector<16x64xf32>
    %203 = arith.addf %197, %202 : vector<16x64xf32>
    %c0_82 = arith.constant 0 : index
    %c6 = arith.constant 6 : index
    %c0_83 = arith.constant 0 : index
    %204 = vector.load %arg16[%c0_82, %c6, %c0_83] : memref<2x20x32xf32, #tpu.memory_space<vmem>>, vector<2x8x32xf32>
    %205 = vector.shape_cast %204 : vector<2x8x32xf32> to vector<16x32xf32>
    %c2 = arith.constant 2 : index
    %c0_84 = arith.constant 0 : index
    %c0_85 = arith.constant 0 : index
    %206 = vector.load %arg9[%c2, %c0_84, %c0_85] : memref<9x32x64xf32, #tpu.memory_space<vmem>>, vector<1x32x64xf32>
    %207 = vector.shape_cast %206 : vector<1x32x64xf32> to vector<32x64xf32>
    %cst_86 = arith.constant dense<0.000000e+00> : vector<16x64xf32>
    %208 = tpu.matmul %205, %207, %cst_86 {dimension_numbers = #tpu.dot_dimension_numbers<[1], [0], [0], [1], [0, 0, 1, 1], [], []>} : vector<16x32xf32>, vector<32x64xf32>, vector<16x64xf32> -> vector<16x64xf32>
    %209 = arith.addf %203, %208 : vector<16x64xf32>
    %c0_87 = arith.constant 0 : index
    %c7 = arith.constant 7 : index
    %c0_88 = arith.constant 0 : index
    %210 = vector.load %arg16[%c0_87, %c7, %c0_88] : memref<2x20x32xf32, #tpu.memory_space<vmem>>, vector<2x8x32xf32>
    %211 = vector.shape_cast %210 : vector<2x8x32xf32> to vector<16x32xf32>
    %c3 = arith.constant 3 : index
    %c0_89 = arith.constant 0 : index
    %c0_90 = arith.constant 0 : index
    %212 = vector.load %arg9[%c3, %c0_89, %c0_90] : memref<9x32x64xf32, #tpu.memory_space<vmem>>, vector<1x32x64xf32>
    %213 = vector.shape_cast %212 : vector<1x32x64xf32> to vector<32x64xf32>
    %cst_91 = arith.constant dense<0.000000e+00> : vector<16x64xf32>
    %214 = tpu.matmul %211, %213, %cst_91 {dimension_numbers = #tpu.dot_dimension_numbers<[1], [0], [0], [1], [0, 0, 1, 1], [], []>} : vector<16x32xf32>, vector<32x64xf32>, vector<16x64xf32> -> vector<16x64xf32>
    %215 = arith.addf %209, %214 : vector<16x64xf32>
    %c0_92 = arith.constant 0 : index
    %c8_93 = arith.constant 8 : index
    %c0_94 = arith.constant 0 : index
    %216 = vector.load %arg16[%c0_92, %c8_93, %c0_94] : memref<2x20x32xf32, #tpu.memory_space<vmem>>, vector<2x8x32xf32>
    %217 = vector.shape_cast %216 : vector<2x8x32xf32> to vector<16x32xf32>
    %c4_95 = arith.constant 4 : index
    %c0_96 = arith.constant 0 : index
    %c0_97 = arith.constant 0 : index
    %218 = vector.load %arg9[%c4_95, %c0_96, %c0_97] : memref<9x32x64xf32, #tpu.memory_space<vmem>>, vector<1x32x64xf32>
    %219 = vector.shape_cast %218 : vector<1x32x64xf32> to vector<32x64xf32>
    %cst_98 = arith.constant dense<0.000000e+00> : vector<16x64xf32>
    %220 = tpu.matmul %217, %219, %cst_98 {dimension_numbers = #tpu.dot_dimension_numbers<[1], [0], [0], [1], [0, 0, 1, 1], [], []>} : vector<16x32xf32>, vector<32x64xf32>, vector<16x64xf32> -> vector<16x64xf32>
    %221 = arith.addf %215, %220 : vector<16x64xf32>
    %c0_99 = arith.constant 0 : index
    %c9 = arith.constant 9 : index
    %c0_100 = arith.constant 0 : index
    %222 = vector.load %arg16[%c0_99, %c9, %c0_100] : memref<2x20x32xf32, #tpu.memory_space<vmem>>, vector<2x8x32xf32>
    %223 = vector.shape_cast %222 : vector<2x8x32xf32> to vector<16x32xf32>
    %c5_101 = arith.constant 5 : index
    %c0_102 = arith.constant 0 : index
    %c0_103 = arith.constant 0 : index
    %224 = vector.load %arg9[%c5_101, %c0_102, %c0_103] : memref<9x32x64xf32, #tpu.memory_space<vmem>>, vector<1x32x64xf32>
    %225 = vector.shape_cast %224 : vector<1x32x64xf32> to vector<32x64xf32>
    %cst_104 = arith.constant dense<0.000000e+00> : vector<16x64xf32>
    %226 = tpu.matmul %223, %225, %cst_104 {dimension_numbers = #tpu.dot_dimension_numbers<[1], [0], [0], [1], [0, 0, 1, 1], [], []>} : vector<16x32xf32>, vector<32x64xf32>, vector<16x64xf32> -> vector<16x64xf32>
    %227 = arith.addf %221, %226 : vector<16x64xf32>
    %c0_105 = arith.constant 0 : index
    %c10 = arith.constant 10 : index
    %c0_106 = arith.constant 0 : index
    %228 = vector.load %arg16[%c0_105, %c10, %c0_106] : memref<2x20x32xf32, #tpu.memory_space<vmem>>, vector<2x8x32xf32>
    %229 = vector.shape_cast %228 : vector<2x8x32xf32> to vector<16x32xf32>
    %c6_107 = arith.constant 6 : index
    %c0_108 = arith.constant 0 : index
    %c0_109 = arith.constant 0 : index
    %230 = vector.load %arg9[%c6_107, %c0_108, %c0_109] : memref<9x32x64xf32, #tpu.memory_space<vmem>>, vector<1x32x64xf32>
    %231 = vector.shape_cast %230 : vector<1x32x64xf32> to vector<32x64xf32>
    %cst_110 = arith.constant dense<0.000000e+00> : vector<16x64xf32>
    %232 = tpu.matmul %229, %231, %cst_110 {dimension_numbers = #tpu.dot_dimension_numbers<[1], [0], [0], [1], [0, 0, 1, 1], [], []>} : vector<16x32xf32>, vector<32x64xf32>, vector<16x64xf32> -> vector<16x64xf32>
    %233 = arith.addf %227, %232 : vector<16x64xf32>
    %c0_111 = arith.constant 0 : index
    %c11 = arith.constant 11 : index
    %c0_112 = arith.constant 0 : index
    %234 = vector.load %arg16[%c0_111, %c11, %c0_112] : memref<2x20x32xf32, #tpu.memory_space<vmem>>, vector<2x8x32xf32>
    %235 = vector.shape_cast %234 : vector<2x8x32xf32> to vector<16x32xf32>
    %c7_113 = arith.constant 7 : index
    %c0_114 = arith.constant 0 : index
    %c0_115 = arith.constant 0 : index
    %236 = vector.load %arg9[%c7_113, %c0_114, %c0_115] : memref<9x32x64xf32, #tpu.memory_space<vmem>>, vector<1x32x64xf32>
    %237 = vector.shape_cast %236 : vector<1x32x64xf32> to vector<32x64xf32>
    %cst_116 = arith.constant dense<0.000000e+00> : vector<16x64xf32>
    %238 = tpu.matmul %235, %237, %cst_116 {dimension_numbers = #tpu.dot_dimension_numbers<[1], [0], [0], [1], [0, 0, 1, 1], [], []>} : vector<16x32xf32>, vector<32x64xf32>, vector<16x64xf32> -> vector<16x64xf32>
    %239 = arith.addf %233, %238 : vector<16x64xf32>
    %c0_117 = arith.constant 0 : index
    %c12 = arith.constant 12 : index
    %c0_118 = arith.constant 0 : index
    %240 = vector.load %arg16[%c0_117, %c12, %c0_118] : memref<2x20x32xf32, #tpu.memory_space<vmem>>, vector<2x8x32xf32>
    %241 = vector.shape_cast %240 : vector<2x8x32xf32> to vector<16x32xf32>
    %c8_119 = arith.constant 8 : index
    %c0_120 = arith.constant 0 : index
    %c0_121 = arith.constant 0 : index
    %242 = vector.load %arg9[%c8_119, %c0_120, %c0_121] : memref<9x32x64xf32, #tpu.memory_space<vmem>>, vector<1x32x64xf32>
    %243 = vector.shape_cast %242 : vector<1x32x64xf32> to vector<32x64xf32>
    %cst_122 = arith.constant dense<0.000000e+00> : vector<16x64xf32>
    %244 = tpu.matmul %241, %243, %cst_122 {dimension_numbers = #tpu.dot_dimension_numbers<[1], [0], [0], [1], [0, 0, 1, 1], [], []>} : vector<16x32xf32>, vector<32x64xf32>, vector<16x64xf32> -> vector<16x64xf32>
    %245 = arith.addf %239, %244 : vector<16x64xf32>
    %c0_123 = arith.constant 0 : index
    %c0_124 = arith.constant 0 : index
    %246 = vector.load %arg10[%c0_123, %c0_124] : memref<1x64xf32, #tpu.memory_space<vmem>>, vector<1x64xf32>
    %247 = vector.broadcast %246 : vector<1x64xf32> to vector<16x64xf32>
    %248 = arith.addf %245, %247 : vector<16x64xf32>
    %cst_125 = arith.constant 0.000000e+00 : f32
    %249 = vector.broadcast %cst_125 : f32 to vector<16x64xf32>
    %250 = arith.maximumf %248, %249 : vector<16x64xf32>
    %c0_126 = arith.constant 0 : index
    %c0_127 = arith.constant 0 : index
    %251 = vector.load %arg11[%c0_126, %c0_127] : memref<64x32xf32, #tpu.memory_space<vmem>>, vector<64x32xf32>
    %cst_128 = arith.constant dense<0.000000e+00> : vector<16x32xf32>
    %252 = tpu.matmul %250, %251, %cst_128 {dimension_numbers = #tpu.dot_dimension_numbers<[1], [0], [0], [1], [0, 0, 1, 1], [], []>} : vector<16x64xf32>, vector<64x32xf32>, vector<16x32xf32> -> vector<16x32xf32>
    %c0_129 = arith.constant 0 : index
    %c0_130 = arith.constant 0 : index
    %253 = vector.load %arg12[%c0_129, %c0_130] : memref<1x32xf32, #tpu.memory_space<vmem>>, vector<1x32xf32>
    %254 = vector.broadcast %253 : vector<1x32xf32> to vector<16x32xf32>
    %255 = arith.addf %252, %254 : vector<16x32xf32>
    %256 = vector.shape_cast %189 : vector<2x8x32xf32> to vector<16x32xf32>
    %257 = arith.addf %255, %256 : vector<16x32xf32>
    %c0_131 = arith.constant 0 : index
    %c0_132 = arith.constant 0 : index
    %258 = vector.load %arg13[%c0_131, %c0_132] : memref<1x32xf32, #tpu.memory_space<vmem>>, vector<1x32xf32>
    %c0_133 = arith.constant 0 : index
    %c0_134 = arith.constant 0 : index
    %259 = vector.load %arg14[%c0_133, %c0_134] : memref<1x32xf32, #tpu.memory_space<vmem>>, vector<1x32xf32>
    %cst_135 = arith.constant dense<0.000000e+00> : vector<16xf32>
    %260 = vector.multi_reduction <add>, %257, %cst_135 [1] : vector<16x32xf32> to vector<16xf32>
    %261 = vector.shape_cast %260 : vector<16xf32> to vector<16x1xf32>
    %cst_136 = arith.constant 3.200000e+01 : f32
    %262 = vector.broadcast %cst_136 : f32 to vector<16x1xf32>
    %263 = arith.divf %261, %262 : vector<16x1xf32>
    %264 = vector.broadcast %263 : vector<16x1xf32> to vector<16x32xf32>
    %265 = arith.subf %257, %264 : vector<16x32xf32>
    %266 = arith.mulf %265, %265 : vector<16x32xf32>
    %cst_137 = arith.constant dense<0.000000e+00> : vector<16xf32>
    %267 = vector.multi_reduction <add>, %266, %cst_137 [1] : vector<16x32xf32> to vector<16xf32>
    %268 = vector.shape_cast %267 : vector<16xf32> to vector<16x1xf32>
    %cst_138 = arith.constant 3.200000e+01 : f32
    %269 = vector.broadcast %cst_138 : f32 to vector<16x1xf32>
    %270 = arith.divf %268, %269 : vector<16x1xf32>
    %cst_139 = arith.constant 9.99999974E-6 : f32
    %271 = vector.broadcast %cst_139 : f32 to vector<16x1xf32>
    %272 = arith.addf %270, %271 : vector<16x1xf32>
    %273 = math.rsqrt %272 : vector<16x1xf32>
    %274 = vector.broadcast %273 : vector<16x1xf32> to vector<16x32xf32>
    %275 = arith.mulf %265, %274 : vector<16x32xf32>
    %276 = vector.broadcast %258 : vector<1x32xf32> to vector<16x32xf32>
    %277 = arith.mulf %275, %276 : vector<16x32xf32>
    %278 = vector.broadcast %259 : vector<1x32xf32> to vector<16x32xf32>
    %279 = arith.addf %277, %278 : vector<16x32xf32>
    %280 = vector.shape_cast %279 : vector<16x32xf32> to vector<2x8x32xf32>
    %281 = vector.broadcast %188 : vector<2x8x1xf32> to vector<2x8x32xf32>
    %282 = arith.mulf %280, %281 : vector<2x8x32xf32>
    %c0_140 = arith.constant 0 : index
    %c0_141 = arith.constant 0 : index
    %c0_142 = arith.constant 0 : index
    %283 = vector.load %arg15[%c0_140, %c0_141, %c0_142] : memref<2x8x32xf32, #tpu.memory_space<vmem>>, vector<2x8x32xf32>
    tpu.vector_store %arg15[%c0_140, %c0_141, %c0_142], %282 {strides = array<i32>} : memref<2x8x32xf32, #tpu.memory_space<vmem>>, vector<2x8x32xf32>,
    return
  }
  func.func @transform_0(%arg0: i32, %arg1: memref<2xi32, #tpu.memory_space<smem>>) -> (i32, i32, i32) {
    %c0_i32 = arith.constant 0 : i32
    %c0_i32_0 = arith.constant 0 : i32
    %c0_i32_1 = arith.constant 0 : i32
    %c0_i32_2 = arith.constant 0 : i32
    return %c0_i32, %c0_i32_0, %c0_i32_1 : i32, i32, i32
  }
  func.func @transform_1(%arg0: i32, %arg1: memref<2xi32, #tpu.memory_space<smem>>) -> (i32, i32) {
    %c0_i32 = arith.constant 0 : i32
    %c0_i32_0 = arith.constant 0 : i32
    %c0_i32_1 = arith.constant 0 : i32
    return %c0_i32, %c0_i32_0 : i32, i32
  }
  func.func @transform_2(%arg0: i32, %arg1: memref<2xi32, #tpu.memory_space<smem>>) -> (i32, i32) {
    %c0_i32 = arith.constant 0 : i32
    %c0_i32_0 = arith.constant 0 : i32
    %c0_i32_1 = arith.constant 0 : i32
    return %c0_i32, %c0_i32_0 : i32, i32
  }
  func.func @transform_3(%arg0: i32, %arg1: memref<2xi32, #tpu.memory_space<smem>>) -> (i32, i32) {
    %c0_i32 = arith.constant 0 : i32
    %c0_i32_0 = arith.constant 0 : i32
    %c0_i32_1 = arith.constant 0 : i32
    return %c0_i32, %c0_i32_0 : i32, i32
  }
  func.func @transform_4(%arg0: i32, %arg1: memref<2xi32, #tpu.memory_space<smem>>) -> (i32, i32) {
    %c0_i32 = arith.constant 0 : i32
    %c0_i32_0 = arith.constant 0 : i32
    %c0_i32_1 = arith.constant 0 : i32
    return %c0_i32, %c0_i32_0 : i32, i32
  }
  func.func @transform_5(%arg0: i32, %arg1: memref<2xi32, #tpu.memory_space<smem>>) -> (i32, i32) {
    %c0_i32 = arith.constant 0 : i32
    %c0_i32_0 = arith.constant 0 : i32
    %c0_i32_1 = arith.constant 0 : i32
    return %c0_i32, %c0_i32_0 : i32, i32
  }
  func.func @transform_6(%arg0: i32, %arg1: memref<2xi32, #tpu.memory_space<smem>>) -> (i32, i32) {
    %c0_i32 = arith.constant 0 : i32
    %c0_i32_0 = arith.constant 0 : i32
    %c0_i32_1 = arith.constant 0 : i32
    return %c0_i32, %c0_i32_0 : i32, i32
  }
  func.func @transform_7(%arg0: i32, %arg1: memref<2xi32, #tpu.memory_space<smem>>) -> (i32, i32, i32) {
    %c0_i32 = arith.constant 0 : i32
    %c0_i32_0 = arith.constant 0 : i32
    %c0_i32_1 = arith.constant 0 : i32
    %c0_i32_2 = arith.constant 0 : i32
    return %c0_i32, %c0_i32_0, %c0_i32_1 : i32, i32, i32
  }
  func.func @transform_8(%arg0: i32, %arg1: memref<2xi32, #tpu.memory_space<smem>>) -> (i32, i32) {
    %c0_i32 = arith.constant 0 : i32
    %c0_i32_0 = arith.constant 0 : i32
    %c0_i32_1 = arith.constant 0 : i32
    return %c0_i32, %c0_i32_0 : i32, i32
  }
  func.func @transform_9(%arg0: i32, %arg1: memref<2xi32, #tpu.memory_space<smem>>) -> (i32, i32) {
    %c0_i32 = arith.constant 0 : i32
    %c0_i32_0 = arith.constant 0 : i32
    %c0_i32_1 = arith.constant 0 : i32
    return %c0_i32, %c0_i32_0 : i32, i32
  }
  func.func @transform_10(%arg0: i32, %arg1: memref<2xi32, #tpu.memory_space<smem>>) -> (i32, i32) {
    %c0_i32 = arith.constant 0 : i32
    %c0_i32_0 = arith.constant 0 : i32
    %c0_i32_1 = arith.constant 0 : i32
    return %c0_i32, %c0_i32_0 : i32, i32
  }
  func.func @transform_11(%arg0: i32, %arg1: memref<2xi32, #tpu.memory_space<smem>>) -> (i32, i32) {
    %c0_i32 = arith.constant 0 : i32
    %c0_i32_0 = arith.constant 0 : i32
    %c0_i32_1 = arith.constant 0 : i32
    return %c0_i32, %c0_i32_0 : i32, i32
  }
  func.func @transform_12(%arg0: i32, %arg1: memref<2xi32, #tpu.memory_space<smem>>) -> (i32, i32) {
    %c0_i32 = arith.constant 0 : i32
    %c0_i32_0 = arith.constant 0 : i32
    %c0_i32_1 = arith.constant 0 : i32
    return %c0_i32, %c0_i32_0 : i32, i32
  }
  func.func @transform_13(%arg0: i32, %arg1: memref<2xi32, #tpu.memory_space<smem>>) -> (i32, i32, i32) {
    %c0_i32 = arith.constant 0 : i32
    %c0_i32_0 = arith.constant 0 : i32
    %c0_i32_1 = arith.constant 0 : i32
    %c0_i32_2 = arith.constant 0 : i32
    return %c0_i32, %c0_i32_0, %c0_i32_1 : i32, i32, i32
  }
}

module attributes {stable_mosaic.version = 11 : i64} {
  func.func @kernel(%arg0: i32, %arg1: memref<2xi32, #tpu.memory_space<smem>>, %arg2: memref<2x8x32xf32, #tpu.memory_space<vmem>>, %arg3: memref<1x3x32x32xf32, #tpu.memory_space<vmem>>, %arg4: memref<1x1x32xf32, #tpu.memory_space<vmem>>, %arg5: memref<1x1x32xf32, #tpu.memory_space<vmem>>, %arg6: memref<1x1x32xf32, #tpu.memory_space<vmem>>, %arg7: memref<1x3x32x32xf32, #tpu.memory_space<vmem>>, %arg8: memref<1x1x32xf32, #tpu.memory_space<vmem>>, %arg9: memref<1x1x32xf32, #tpu.memory_space<vmem>>, %arg10: memref<1x1x32xf32, #tpu.memory_space<vmem>>, %arg11: memref<1x1x32xf32, #tpu.memory_space<vmem>>, %arg12: memref<1x1x1xf32, #tpu.memory_space<vmem>>, %arg13: memref<1x2x8xf32, #tpu.memory_space<vmem>>, %arg14: memref<2x17x32xf32, #tpu.memory_space<vmem>>) attributes {dimension_semantics = [#tpu.dimension_semantics<arbitrary>], iteration_bounds = array<i64: 1>, scalar_prefetch = 1 : i64, scratch_operands = 1 : i64, tpu.core_type = #tpu.core_type<tc>, window_params = [{pipeline_mode = #tpu.pipeline_mode<synchronous>, transform_indices = @transform_0, window_bounds = array<i64: 2, 8, 32>}, {pipeline_mode = #tpu.pipeline_mode<synchronous>, transform_indices = @transform_1, window_bounds = array<i64: 1, 3, 32, 32>}, {pipeline_mode = #tpu.pipeline_mode<synchronous>, transform_indices = @transform_2, window_bounds = array<i64: 1, 1, 32>}, {pipeline_mode = #tpu.pipeline_mode<synchronous>, transform_indices = @transform_3, window_bounds = array<i64: 1, 1, 32>}, {pipeline_mode = #tpu.pipeline_mode<synchronous>, transform_indices = @transform_4, window_bounds = array<i64: 1, 1, 32>}, {pipeline_mode = #tpu.pipeline_mode<synchronous>, transform_indices = @transform_5, window_bounds = array<i64: 1, 3, 32, 32>}, {pipeline_mode = #tpu.pipeline_mode<synchronous>, transform_indices = @transform_6, window_bounds = array<i64: 1, 1, 32>}, {pipeline_mode = #tpu.pipeline_mode<synchronous>, transform_indices = @transform_7, window_bounds = array<i64: 1, 1, 32>}, {pipeline_mode = #tpu.pipeline_mode<synchronous>, transform_indices = @transform_8, window_bounds = array<i64: 1, 1, 32>}, {pipeline_mode = #tpu.pipeline_mode<synchronous>, transform_indices = @transform_9, window_bounds = array<i64: 1, 1, 32>}, {pipeline_mode = #tpu.pipeline_mode<synchronous>, transform_indices = @transform_10, window_bounds = array<i64: 1, 1, 1>}, {pipeline_mode = #tpu.pipeline_mode<synchronous>, transform_indices = @transform_11, window_bounds = array<i64: 1, 2, 8>}]} {
    %cst = arith.constant 0.000000e+00 : f32
    %0 = vector.broadcast %cst : f32 to vector<2x17x32xf32>
    %c0 = arith.constant 0 : index
    %c0_0 = arith.constant 0 : index
    %c0_1 = arith.constant 0 : index
    %1 = vector.load %arg14[%c0, %c0_0, %c0_1] : memref<2x17x32xf32, #tpu.memory_space<vmem>>, vector<2x17x32xf32>
    tpu.vector_store %arg14[%c0, %c0_0, %c0_1], %0 {strides = array<i32>} : memref<2x17x32xf32, #tpu.memory_space<vmem>>, vector<2x17x32xf32>,
    %c0_2 = arith.constant 0 : index
    %c0_3 = arith.constant 0 : index
    %c0_4 = arith.constant 0 : index
    %2 = vector.load %arg2[%c0_2, %c0_3, %c0_4] : memref<2x8x32xf32, #tpu.memory_space<vmem>>, vector<2x8x32xf32>
    %3 = tpu.iota {dimensions = array<i32: 1>} : vector<1x8xi32>
    %c0_5 = arith.constant 0 : index
    %4 = memref.load %arg1[%c0_5] : memref<2xi32, #tpu.memory_space<smem>>
    %5 = vector.broadcast %4 : i32 to vector<1x8xi32>
    %6 = arith.cmpi sge, %3, %5 : vector<1x8xi32>
    %cst_6 = arith.constant 0.000000e+00 : f32
    %cst_7 = arith.constant 1.000000e+00 : f32
    %7 = vector.broadcast %cst_6 : f32 to vector<1x8xf32>
    %8 = vector.broadcast %cst_7 : f32 to vector<1x8xf32>
    %9 = arith.select %6, %7, %8 : vector<1x8xi1>, vector<1x8xf32>
    %c1 = arith.constant 1 : index
    %10 = memref.load %arg1[%c1] : memref<2xi32, #tpu.memory_space<smem>>
    %11 = vector.broadcast %10 : i32 to vector<1x8xi32>
    %12 = arith.cmpi sge, %3, %11 : vector<1x8xi32>
    %cst_8 = arith.constant 0.000000e+00 : f32
    %cst_9 = arith.constant 1.000000e+00 : f32
    %13 = vector.broadcast %cst_8 : f32 to vector<1x8xf32>
    %14 = vector.broadcast %cst_9 : f32 to vector<1x8xf32>
    %15 = arith.select %12, %13, %14 : vector<1x8xi1>, vector<1x8xf32>
    %16 = tpu.concatenate %9, %15 in 0 : vector<1x8xf32>, vector<1x8xf32> -> vector<2x8xf32>
    %c0_10 = arith.constant 0 : index
    %c8 = arith.constant 8 : index
    %c0_11 = arith.constant 0 : index
    %17 = vector.load %arg14[%c0_10, %c8, %c0_11] : memref<2x17x32xf32, #tpu.memory_space<vmem>>, vector<2x8x32xf32>
    tpu.vector_store %arg14[%c0_10, %c8, %c0_11], %2 {strides = array<i32>} : memref<2x17x32xf32, #tpu.memory_space<vmem>>, vector<2x8x32xf32>,
    %cst_12 = arith.constant 0.000000e+00 : f32
    %18 = vector.broadcast %cst_12 : f32 to vector<16x32xf32>
    %c0_13 = arith.constant 0 : index
    %c7 = arith.constant 7 : index
    %c0_14 = arith.constant 0 : index
    %19 = vector.load %arg14[%c0_13, %c7, %c0_14] : memref<2x17x32xf32, #tpu.memory_space<vmem>>, vector<2x8x32xf32>
    %20 = vector.shape_cast %19 : vector<2x8x32xf32> to vector<16x32xf32>
    %c0_15 = arith.constant 0 : index
    %c0_16 = arith.constant 0 : index
    %c0_17 = arith.constant 0 : index
    %c0_18 = arith.constant 0 : index
    %21 = vector.load %arg3[%c0_15, %c0_16, %c0_17, %c0_18] : memref<1x3x32x32xf32, #tpu.memory_space<vmem>>, vector<1x1x32x32xf32>
    %22 = vector.shape_cast %21 : vector<1x1x32x32xf32> to vector<32x32xf32>
    %cst_19 = arith.constant dense<0.000000e+00> : vector<16x32xf32>
    %23 = tpu.matmul %20, %22, %cst_19 {dimension_numbers = #tpu.dot_dimension_numbers<[1], [0], [0], [1], [0, 0, 1, 1], [], []>} : vector<16x32xf32>, vector<32x32xf32>, vector<16x32xf32> -> vector<16x32xf32>
    %24 = arith.addf %18, %23 : vector<16x32xf32>
    %c0_20 = arith.constant 0 : index
    %c8_21 = arith.constant 8 : index
    %c0_22 = arith.constant 0 : index
    %25 = vector.load %arg14[%c0_20, %c8_21, %c0_22] : memref<2x17x32xf32, #tpu.memory_space<vmem>>, vector<2x8x32xf32>
    %26 = vector.shape_cast %25 : vector<2x8x32xf32> to vector<16x32xf32>
    %c0_23 = arith.constant 0 : index
    %c1_24 = arith.constant 1 : index
    %c0_25 = arith.constant 0 : index
    %c0_26 = arith.constant 0 : index
    %27 = vector.load %arg3[%c0_23, %c1_24, %c0_25, %c0_26] : memref<1x3x32x32xf32, #tpu.memory_space<vmem>>, vector<1x1x32x32xf32>
    %28 = vector.shape_cast %27 : vector<1x1x32x32xf32> to vector<32x32xf32>
    %cst_27 = arith.constant dense<0.000000e+00> : vector<16x32xf32>
    %29 = tpu.matmul %26, %28, %cst_27 {dimension_numbers = #tpu.dot_dimension_numbers<[1], [0], [0], [1], [0, 0, 1, 1], [], []>} : vector<16x32xf32>, vector<32x32xf32>, vector<16x32xf32> -> vector<16x32xf32>
    %30 = arith.addf %24, %29 : vector<16x32xf32>
    %c0_28 = arith.constant 0 : index
    %c9 = arith.constant 9 : index
    %c0_29 = arith.constant 0 : index
    %31 = vector.load %arg14[%c0_28, %c9, %c0_29] : memref<2x17x32xf32, #tpu.memory_space<vmem>>, vector<2x8x32xf32>
    %32 = vector.shape_cast %31 : vector<2x8x32xf32> to vector<16x32xf32>
    %c0_30 = arith.constant 0 : index
    %c2 = arith.constant 2 : index
    %c0_31 = arith.constant 0 : index
    %c0_32 = arith.constant 0 : index
    %33 = vector.load %arg3[%c0_30, %c2, %c0_31, %c0_32] : memref<1x3x32x32xf32, #tpu.memory_space<vmem>>, vector<1x1x32x32xf32>
    %34 = vector.shape_cast %33 : vector<1x1x32x32xf32> to vector<32x32xf32>
    %cst_33 = arith.constant dense<0.000000e+00> : vector<16x32xf32>
    %35 = tpu.matmul %32, %34, %cst_33 {dimension_numbers = #tpu.dot_dimension_numbers<[1], [0], [0], [1], [0, 0, 1, 1], [], []>} : vector<16x32xf32>, vector<32x32xf32>, vector<16x32xf32> -> vector<16x32xf32>
    %36 = arith.addf %30, %35 : vector<16x32xf32>
    %c0_34 = arith.constant 0 : index
    %c0_35 = arith.constant 0 : index
    %c0_36 = arith.constant 0 : index
    %37 = vector.load %arg4[%c0_34, %c0_35, %c0_36] : memref<1x1x32xf32, #tpu.memory_space<vmem>>, vector<1x1x32xf32>
    %38 = vector.shape_cast %37 : vector<1x1x32xf32> to vector<1x32xf32>
    %39 = vector.broadcast %38 : vector<1x32xf32> to vector<16x32xf32>
    %40 = arith.addf %36, %39 : vector<16x32xf32>
    %cst_37 = arith.constant 0.000000e+00 : f32
    %41 = vector.broadcast %cst_37 : f32 to vector<16x32xf32>
    %42 = arith.maximumf %40, %41 : vector<16x32xf32>
    %c0_38 = arith.constant 0 : index
    %c0_39 = arith.constant 0 : index
    %c0_40 = arith.constant 0 : index
    %43 = vector.load %arg5[%c0_38, %c0_39, %c0_40] : memref<1x1x32xf32, #tpu.memory_space<vmem>>, vector<1x1x32xf32>
    %44 = vector.shape_cast %43 : vector<1x1x32xf32> to vector<1x32xf32>
    %c0_41 = arith.constant 0 : index
    %c0_42 = arith.constant 0 : index
    %c0_43 = arith.constant 0 : index
    %45 = vector.load %arg6[%c0_41, %c0_42, %c0_43] : memref<1x1x32xf32, #tpu.memory_space<vmem>>, vector<1x1x32xf32>
    %46 = vector.shape_cast %45 : vector<1x1x32xf32> to vector<1x32xf32>
    %cst_44 = arith.constant dense<0.000000e+00> : vector<16xf32>
    %47 = vector.multi_reduction <add>, %42, %cst_44 [1] : vector<16x32xf32> to vector<16xf32>
    %48 = vector.shape_cast %47 : vector<16xf32> to vector<16x1xf32>
    %cst_45 = arith.constant 3.200000e+01 : f32
    %49 = vector.broadcast %cst_45 : f32 to vector<16x1xf32>
    %50 = arith.divf %48, %49 : vector<16x1xf32>
    %51 = vector.broadcast %50 : vector<16x1xf32> to vector<16x32xf32>
    %52 = arith.subf %42, %51 : vector<16x32xf32>
    %53 = arith.mulf %52, %52 : vector<16x32xf32>
    %cst_46 = arith.constant dense<0.000000e+00> : vector<16xf32>
    %54 = vector.multi_reduction <add>, %53, %cst_46 [1] : vector<16x32xf32> to vector<16xf32>
    %55 = vector.shape_cast %54 : vector<16xf32> to vector<16x1xf32>
    %cst_47 = arith.constant 3.200000e+01 : f32
    %56 = vector.broadcast %cst_47 : f32 to vector<16x1xf32>
    %57 = arith.divf %55, %56 : vector<16x1xf32>
    %cst_48 = arith.constant 9.99999974E-6 : f32
    %58 = vector.broadcast %cst_48 : f32 to vector<16x1xf32>
    %59 = arith.addf %57, %58 : vector<16x1xf32>
    %60 = math.rsqrt %59 : vector<16x1xf32>
    %61 = vector.broadcast %60 : vector<16x1xf32> to vector<16x32xf32>
    %62 = arith.mulf %52, %61 : vector<16x32xf32>
    %63 = vector.broadcast %44 : vector<1x32xf32> to vector<16x32xf32>
    %64 = arith.mulf %62, %63 : vector<16x32xf32>
    %65 = vector.broadcast %46 : vector<1x32xf32> to vector<16x32xf32>
    %66 = arith.addf %64, %65 : vector<16x32xf32>
    %67 = vector.shape_cast %66 : vector<16x32xf32> to vector<2x8x32xf32>
    %c0_49 = arith.constant 0 : index
    %c8_50 = arith.constant 8 : index
    %c0_51 = arith.constant 0 : index
    %68 = vector.load %arg14[%c0_49, %c8_50, %c0_51] : memref<2x17x32xf32, #tpu.memory_space<vmem>>, vector<2x8x32xf32>
    tpu.vector_store %arg14[%c0_49, %c8_50, %c0_51], %67 {strides = array<i32>} : memref<2x17x32xf32, #tpu.memory_space<vmem>>, vector<2x8x32xf32>,
    %cst_52 = arith.constant 0.000000e+00 : f32
    %69 = vector.broadcast %cst_52 : f32 to vector<16x32xf32>
    %c0_53 = arith.constant 0 : index
    %c7_54 = arith.constant 7 : index
    %c0_55 = arith.constant 0 : index
    %70 = vector.load %arg14[%c0_53, %c7_54, %c0_55] : memref<2x17x32xf32, #tpu.memory_space<vmem>>, vector<2x8x32xf32>
    %71 = vector.shape_cast %70 : vector<2x8x32xf32> to vector<16x32xf32>
    %c0_56 = arith.constant 0 : index
    %c0_57 = arith.constant 0 : index
    %c0_58 = arith.constant 0 : index
    %c0_59 = arith.constant 0 : index
    %72 = vector.load %arg7[%c0_56, %c0_57, %c0_58, %c0_59] : memref<1x3x32x32xf32, #tpu.memory_space<vmem>>, vector<1x1x32x32xf32>
    %73 = vector.shape_cast %72 : vector<1x1x32x32xf32> to vector<32x32xf32>
    %cst_60 = arith.constant dense<0.000000e+00> : vector<16x32xf32>
    %74 = tpu.matmul %71, %73, %cst_60 {dimension_numbers = #tpu.dot_dimension_numbers<[1], [0], [0], [1], [0, 0, 1, 1], [], []>} : vector<16x32xf32>, vector<32x32xf32>, vector<16x32xf32> -> vector<16x32xf32>
    %75 = arith.addf %69, %74 : vector<16x32xf32>
    %c0_61 = arith.constant 0 : index
    %c8_62 = arith.constant 8 : index
    %c0_63 = arith.constant 0 : index
    %76 = vector.load %arg14[%c0_61, %c8_62, %c0_63] : memref<2x17x32xf32, #tpu.memory_space<vmem>>, vector<2x8x32xf32>
    %77 = vector.shape_cast %76 : vector<2x8x32xf32> to vector<16x32xf32>
    %c0_64 = arith.constant 0 : index
    %c1_65 = arith.constant 1 : index
    %c0_66 = arith.constant 0 : index
    %c0_67 = arith.constant 0 : index
    %78 = vector.load %arg7[%c0_64, %c1_65, %c0_66, %c0_67] : memref<1x3x32x32xf32, #tpu.memory_space<vmem>>, vector<1x1x32x32xf32>
    %79 = vector.shape_cast %78 : vector<1x1x32x32xf32> to vector<32x32xf32>
    %cst_68 = arith.constant dense<0.000000e+00> : vector<16x32xf32>
    %80 = tpu.matmul %77, %79, %cst_68 {dimension_numbers = #tpu.dot_dimension_numbers<[1], [0], [0], [1], [0, 0, 1, 1], [], []>} : vector<16x32xf32>, vector<32x32xf32>, vector<16x32xf32> -> vector<16x32xf32>
    %81 = arith.addf %75, %80 : vector<16x32xf32>
    %c0_69 = arith.constant 0 : index
    %c9_70 = arith.constant 9 : index
    %c0_71 = arith.constant 0 : index
    %82 = vector.load %arg14[%c0_69, %c9_70, %c0_71] : memref<2x17x32xf32, #tpu.memory_space<vmem>>, vector<2x8x32xf32>
    %83 = vector.shape_cast %82 : vector<2x8x32xf32> to vector<16x32xf32>
    %c0_72 = arith.constant 0 : index
    %c2_73 = arith.constant 2 : index
    %c0_74 = arith.constant 0 : index
    %c0_75 = arith.constant 0 : index
    %84 = vector.load %arg7[%c0_72, %c2_73, %c0_74, %c0_75] : memref<1x3x32x32xf32, #tpu.memory_space<vmem>>, vector<1x1x32x32xf32>
    %85 = vector.shape_cast %84 : vector<1x1x32x32xf32> to vector<32x32xf32>
    %cst_76 = arith.constant dense<0.000000e+00> : vector<16x32xf32>
    %86 = tpu.matmul %83, %85, %cst_76 {dimension_numbers = #tpu.dot_dimension_numbers<[1], [0], [0], [1], [0, 0, 1, 1], [], []>} : vector<16x32xf32>, vector<32x32xf32>, vector<16x32xf32> -> vector<16x32xf32>
    %87 = arith.addf %81, %86 : vector<16x32xf32>
    %c0_77 = arith.constant 0 : index
    %c0_78 = arith.constant 0 : index
    %c0_79 = arith.constant 0 : index
    %88 = vector.load %arg8[%c0_77, %c0_78, %c0_79] : memref<1x1x32xf32, #tpu.memory_space<vmem>>, vector<1x1x32xf32>
    %89 = vector.shape_cast %88 : vector<1x1x32xf32> to vector<1x32xf32>
    %90 = vector.broadcast %89 : vector<1x32xf32> to vector<16x32xf32>
    %91 = arith.addf %87, %90 : vector<16x32xf32>
    %cst_80 = arith.constant 0.000000e+00 : f32
    %92 = vector.broadcast %cst_80 : f32 to vector<16x32xf32>
    %93 = arith.maximumf %91, %92 : vector<16x32xf32>
    %c0_81 = arith.constant 0 : index
    %c0_82 = arith.constant 0 : index
    %c0_83 = arith.constant 0 : index
    %94 = vector.load %arg9[%c0_81, %c0_82, %c0_83] : memref<1x1x32xf32, #tpu.memory_space<vmem>>, vector<1x1x32xf32>
    %95 = vector.shape_cast %94 : vector<1x1x32xf32> to vector<1x32xf32>
    %c0_84 = arith.constant 0 : index
    %c0_85 = arith.constant 0 : index
    %c0_86 = arith.constant 0 : index
    %96 = vector.load %arg10[%c0_84, %c0_85, %c0_86] : memref<1x1x32xf32, #tpu.memory_space<vmem>>, vector<1x1x32xf32>
    %97 = vector.shape_cast %96 : vector<1x1x32xf32> to vector<1x32xf32>
    %cst_87 = arith.constant dense<0.000000e+00> : vector<16xf32>
    %98 = vector.multi_reduction <add>, %93, %cst_87 [1] : vector<16x32xf32> to vector<16xf32>
    %99 = vector.shape_cast %98 : vector<16xf32> to vector<16x1xf32>
    %cst_88 = arith.constant 3.200000e+01 : f32
    %100 = vector.broadcast %cst_88 : f32 to vector<16x1xf32>
    %101 = arith.divf %99, %100 : vector<16x1xf32>
    %102 = vector.broadcast %101 : vector<16x1xf32> to vector<16x32xf32>
    %103 = arith.subf %93, %102 : vector<16x32xf32>
    %104 = arith.mulf %103, %103 : vector<16x32xf32>
    %cst_89 = arith.constant dense<0.000000e+00> : vector<16xf32>
    %105 = vector.multi_reduction <add>, %104, %cst_89 [1] : vector<16x32xf32> to vector<16xf32>
    %106 = vector.shape_cast %105 : vector<16xf32> to vector<16x1xf32>
    %cst_90 = arith.constant 3.200000e+01 : f32
    %107 = vector.broadcast %cst_90 : f32 to vector<16x1xf32>
    %108 = arith.divf %106, %107 : vector<16x1xf32>
    %cst_91 = arith.constant 9.99999974E-6 : f32
    %109 = vector.broadcast %cst_91 : f32 to vector<16x1xf32>
    %110 = arith.addf %108, %109 : vector<16x1xf32>
    %111 = math.rsqrt %110 : vector<16x1xf32>
    %112 = vector.broadcast %111 : vector<16x1xf32> to vector<16x32xf32>
    %113 = arith.mulf %103, %112 : vector<16x32xf32>
    %114 = vector.broadcast %95 : vector<1x32xf32> to vector<16x32xf32>
    %115 = arith.mulf %113, %114 : vector<16x32xf32>
    %116 = vector.broadcast %97 : vector<1x32xf32> to vector<16x32xf32>
    %117 = arith.addf %115, %116 : vector<16x32xf32>
    %118 = vector.shape_cast %117 : vector<16x32xf32> to vector<2x8x32xf32>
    %c0_92 = arith.constant 0 : index
    %c0_93 = arith.constant 0 : index
    %c0_94 = arith.constant 0 : index
    %119 = vector.load %arg11[%c0_92, %c0_93, %c0_94] : memref<1x1x32xf32, #tpu.memory_space<vmem>>, vector<1x1x32xf32>
    %120 = vector.shape_cast %119 : vector<1x1x32xf32> to vector<1x32xf32>
    %121 = vector.shape_cast %120 : vector<1x32xf32> to vector<1x1x32xf32>
    %122 = vector.broadcast %121 : vector<1x1x32xf32> to vector<2x8x32xf32>
    %123 = arith.mulf %118, %122 : vector<2x8x32xf32>
    %cst_95 = arith.constant dense<0.000000e+00> : vector<2x8xf32>
    %124 = vector.multi_reduction <add>, %123, %cst_95 [2] : vector<2x8x32xf32> to vector<2x8xf32>
    %c0_96 = arith.constant 0 : index
    %c0_97 = arith.constant 0 : index
    %c0_98 = arith.constant 0 : index
    %125 = vector.load %arg12[%c0_96, %c0_97, %c0_98] : memref<1x1x1xf32, #tpu.memory_space<vmem>>, vector<1x1x1xf32>
    %126 = vector.shape_cast %125 : vector<1x1x1xf32> to vector<1x1xf32>
    %127 = vector.broadcast %126 : vector<1x1xf32> to vector<2x8xf32>
    %128 = arith.addf %124, %127 : vector<2x8xf32>
    %129 = arith.mulf %128, %16 : vector<2x8xf32>
    %c0_99 = arith.constant 0 : index
    %c0_100 = arith.constant 0 : index
    %c0_101 = arith.constant 0 : index
    %130 = vector.load %arg13[%c0_99, %c0_100, %c0_101] : memref<1x2x8xf32, #tpu.memory_space<vmem>>, vector<1x2x8xf32>
    %131 = vector.shape_cast %130 : vector<1x2x8xf32> to vector<2x8xf32>
    %132 = vector.shape_cast %129 : vector<2x8xf32> to vector<1x2x8xf32>
    tpu.vector_store %arg13[%c0_99, %c0_100, %c0_101], %132 {strides = array<i32>} : memref<1x2x8xf32, #tpu.memory_space<vmem>>, vector<1x2x8xf32>,
    return
  }
  func.func @transform_0(%arg0: i32, %arg1: memref<2xi32, #tpu.memory_space<smem>>) -> (i32, i32, i32) {
    %c0_i32 = arith.constant 0 : i32
    %c0_i32_0 = arith.constant 0 : i32
    %c0_i32_1 = arith.constant 0 : i32
    %c0_i32_2 = arith.constant 0 : i32
    return %c0_i32, %c0_i32_0, %c0_i32_1 : i32, i32, i32
  }
  func.func @transform_1(%arg0: i32, %arg1: memref<2xi32, #tpu.memory_space<smem>>) -> (i32, i32, i32, i32) {
    %c0_i32 = arith.constant 0 : i32
    %c0_i32_0 = arith.constant 0 : i32
    %c0_i32_1 = arith.constant 0 : i32
    %c0_i32_2 = arith.constant 0 : i32
    %c0_i32_3 = arith.constant 0 : i32
    return %c0_i32, %c0_i32_0, %c0_i32_1, %c0_i32_2 : i32, i32, i32, i32
  }
  func.func @transform_2(%arg0: i32, %arg1: memref<2xi32, #tpu.memory_space<smem>>) -> (i32, i32, i32) {
    %c0_i32 = arith.constant 0 : i32
    %c0_i32_0 = arith.constant 0 : i32
    %c0_i32_1 = arith.constant 0 : i32
    %c0_i32_2 = arith.constant 0 : i32
    return %c0_i32, %c0_i32_0, %c0_i32_1 : i32, i32, i32
  }
  func.func @transform_3(%arg0: i32, %arg1: memref<2xi32, #tpu.memory_space<smem>>) -> (i32, i32, i32) {
    %c0_i32 = arith.constant 0 : i32
    %c0_i32_0 = arith.constant 0 : i32
    %c0_i32_1 = arith.constant 0 : i32
    %c0_i32_2 = arith.constant 0 : i32
    return %c0_i32, %c0_i32_0, %c0_i32_1 : i32, i32, i32
  }
  func.func @transform_4(%arg0: i32, %arg1: memref<2xi32, #tpu.memory_space<smem>>) -> (i32, i32, i32) {
    %c0_i32 = arith.constant 0 : i32
    %c0_i32_0 = arith.constant 0 : i32
    %c0_i32_1 = arith.constant 0 : i32
    %c0_i32_2 = arith.constant 0 : i32
    return %c0_i32, %c0_i32_0, %c0_i32_1 : i32, i32, i32
  }
  func.func @transform_5(%arg0: i32, %arg1: memref<2xi32, #tpu.memory_space<smem>>) -> (i32, i32, i32, i32) {
    %c0_i32 = arith.constant 0 : i32
    %c0_i32_0 = arith.constant 0 : i32
    %c0_i32_1 = arith.constant 0 : i32
    %c0_i32_2 = arith.constant 0 : i32
    %c0_i32_3 = arith.constant 0 : i32
    return %c0_i32, %c0_i32_0, %c0_i32_1, %c0_i32_2 : i32, i32, i32, i32
  }
  func.func @transform_6(%arg0: i32, %arg1: memref<2xi32, #tpu.memory_space<smem>>) -> (i32, i32, i32) {
    %c0_i32 = arith.constant 0 : i32
    %c0_i32_0 = arith.constant 0 : i32
    %c0_i32_1 = arith.constant 0 : i32
    %c0_i32_2 = arith.constant 0 : i32
    return %c0_i32, %c0_i32_0, %c0_i32_1 : i32, i32, i32
  }
  func.func @transform_7(%arg0: i32, %arg1: memref<2xi32, #tpu.memory_space<smem>>) -> (i32, i32, i32) {
    %c0_i32 = arith.constant 0 : i32
    %c0_i32_0 = arith.constant 0 : i32
    %c0_i32_1 = arith.constant 0 : i32
    %c0_i32_2 = arith.constant 0 : i32
    return %c0_i32, %c0_i32_0, %c0_i32_1 : i32, i32, i32
  }
  func.func @transform_8(%arg0: i32, %arg1: memref<2xi32, #tpu.memory_space<smem>>) -> (i32, i32, i32) {
    %c0_i32 = arith.constant 0 : i32
    %c0_i32_0 = arith.constant 0 : i32
    %c0_i32_1 = arith.constant 0 : i32
    %c0_i32_2 = arith.constant 0 : i32
    return %c0_i32, %c0_i32_0, %c0_i32_1 : i32, i32, i32
  }
  func.func @transform_9(%arg0: i32, %arg1: memref<2xi32, #tpu.memory_space<smem>>) -> (i32, i32, i32) {
    %c0_i32 = arith.constant 0 : i32
    %c0_i32_0 = arith.constant 0 : i32
    %c0_i32_1 = arith.constant 0 : i32
    %c0_i32_2 = arith.constant 0 : i32
    return %c0_i32, %c0_i32_0, %c0_i32_1 : i32, i32, i32
  }
  func.func @transform_10(%arg0: i32, %arg1: memref<2xi32, #tpu.memory_space<smem>>) -> (i32, i32, i32) {
    %c0_i32 = arith.constant 0 : i32
    %c0_i32_0 = arith.constant 0 : i32
    %c0_i32_1 = arith.constant 0 : i32
    %c0_i32_2 = arith.constant 0 : i32
    return %c0_i32, %c0_i32_0, %c0_i32_1 : i32, i32, i32
  }
  func.func @transform_11(%arg0: i32, %arg1: memref<2xi32, #tpu.memory_space<smem>>) -> (i32, i32, i32) {
    %c0_i32 = arith.constant 0 : i32
    %c0_i32_0 = arith.constant 0 : i32
    %c0_i32_1 = arith.constant 0 : i32
    %c0_i32_2 = arith.constant 0 : i32
    return %c0_i32, %c0_i32_0, %c0_i32_1 : i32, i32, i32
  }
}

module attributes {stable_mosaic.version = 11 : i64} {
  func.func @kernel(%arg0: i32, %arg1: memref<2xi32, #tpu.memory_space<smem>>, %arg2: memref<2x8x32xf32, #tpu.memory_space<vmem>>, %arg3: memref<2x3x32x32xf32, #tpu.memory_space<vmem>>, %arg4: memref<2x1x32xf32, #tpu.memory_space<vmem>>, %arg5: memref<2x1x32xf32, #tpu.memory_space<vmem>>, %arg6: memref<2x1x32xf32, #tpu.memory_space<vmem>>, %arg7: memref<2x3x32x32xf32, #tpu.memory_space<vmem>>, %arg8: memref<2x1x32xf32, #tpu.memory_space<vmem>>, %arg9: memref<2x1x32xf32, #tpu.memory_space<vmem>>, %arg10: memref<2x1x32xf32, #tpu.memory_space<vmem>>, %arg11: memref<2x1x32xf32, #tpu.memory_space<vmem>>, %arg12: memref<2x1x1xf32, #tpu.memory_space<vmem>>, %arg13: memref<2x2x8xf32, #tpu.memory_space<vmem>>, %arg14: memref<2x17x32xf32, #tpu.memory_space<vmem>>) attributes {dimension_semantics = [#tpu.dimension_semantics<arbitrary>], iteration_bounds = array<i64: 1>, scalar_prefetch = 1 : i64, scratch_operands = 1 : i64, tpu.core_type = #tpu.core_type<tc>, window_params = [{pipeline_mode = #tpu.pipeline_mode<synchronous>, transform_indices = @transform_0, window_bounds = array<i64: 2, 8, 32>}, {pipeline_mode = #tpu.pipeline_mode<synchronous>, transform_indices = @transform_1, window_bounds = array<i64: 2, 3, 32, 32>}, {pipeline_mode = #tpu.pipeline_mode<synchronous>, transform_indices = @transform_2, window_bounds = array<i64: 2, 1, 32>}, {pipeline_mode = #tpu.pipeline_mode<synchronous>, transform_indices = @transform_3, window_bounds = array<i64: 2, 1, 32>}, {pipeline_mode = #tpu.pipeline_mode<synchronous>, transform_indices = @transform_4, window_bounds = array<i64: 2, 1, 32>}, {pipeline_mode = #tpu.pipeline_mode<synchronous>, transform_indices = @transform_5, window_bounds = array<i64: 2, 3, 32, 32>}, {pipeline_mode = #tpu.pipeline_mode<synchronous>, transform_indices = @transform_6, window_bounds = array<i64: 2, 1, 32>}, {pipeline_mode = #tpu.pipeline_mode<synchronous>, transform_indices = @transform_7, window_bounds = array<i64: 2, 1, 32>}, {pipeline_mode = #tpu.pipeline_mode<synchronous>, transform_indices = @transform_8, window_bounds = array<i64: 2, 1, 32>}, {pipeline_mode = #tpu.pipeline_mode<synchronous>, transform_indices = @transform_9, window_bounds = array<i64: 2, 1, 32>}, {pipeline_mode = #tpu.pipeline_mode<synchronous>, transform_indices = @transform_10, window_bounds = array<i64: 2, 1, 1>}, {pipeline_mode = #tpu.pipeline_mode<synchronous>, transform_indices = @transform_11, window_bounds = array<i64: 2, 2, 8>}]} {
    %cst = arith.constant 0.000000e+00 : f32
    %0 = vector.broadcast %cst : f32 to vector<2x17x32xf32>
    %c0 = arith.constant 0 : index
    %c0_0 = arith.constant 0 : index
    %c0_1 = arith.constant 0 : index
    %1 = vector.load %arg14[%c0, %c0_0, %c0_1] : memref<2x17x32xf32, #tpu.memory_space<vmem>>, vector<2x17x32xf32>
    tpu.vector_store %arg14[%c0, %c0_0, %c0_1], %0 {strides = array<i32>} : memref<2x17x32xf32, #tpu.memory_space<vmem>>, vector<2x17x32xf32>,
    %c0_2 = arith.constant 0 : index
    %c0_3 = arith.constant 0 : index
    %c0_4 = arith.constant 0 : index
    %2 = vector.load %arg2[%c0_2, %c0_3, %c0_4] : memref<2x8x32xf32, #tpu.memory_space<vmem>>, vector<2x8x32xf32>
    %3 = tpu.iota {dimensions = array<i32: 1>} : vector<1x8xi32>
    %c0_5 = arith.constant 0 : index
    %4 = memref.load %arg1[%c0_5] : memref<2xi32, #tpu.memory_space<smem>>
    %5 = vector.broadcast %4 : i32 to vector<1x8xi32>
    %6 = arith.cmpi sge, %3, %5 : vector<1x8xi32>
    %cst_6 = arith.constant 0.000000e+00 : f32
    %cst_7 = arith.constant 1.000000e+00 : f32
    %7 = vector.broadcast %cst_6 : f32 to vector<1x8xf32>
    %8 = vector.broadcast %cst_7 : f32 to vector<1x8xf32>
    %9 = arith.select %6, %7, %8 : vector<1x8xi1>, vector<1x8xf32>
    %c1 = arith.constant 1 : index
    %10 = memref.load %arg1[%c1] : memref<2xi32, #tpu.memory_space<smem>>
    %11 = vector.broadcast %10 : i32 to vector<1x8xi32>
    %12 = arith.cmpi sge, %3, %11 : vector<1x8xi32>
    %cst_8 = arith.constant 0.000000e+00 : f32
    %cst_9 = arith.constant 1.000000e+00 : f32
    %13 = vector.broadcast %cst_8 : f32 to vector<1x8xf32>
    %14 = vector.broadcast %cst_9 : f32 to vector<1x8xf32>
    %15 = arith.select %12, %13, %14 : vector<1x8xi1>, vector<1x8xf32>
    %16 = tpu.concatenate %9, %15 in 0 : vector<1x8xf32>, vector<1x8xf32> -> vector<2x8xf32>
    %c0_10 = arith.constant 0 : index
    %c8 = arith.constant 8 : index
    %c0_11 = arith.constant 0 : index
    %17 = vector.load %arg14[%c0_10, %c8, %c0_11] : memref<2x17x32xf32, #tpu.memory_space<vmem>>, vector<2x8x32xf32>
    tpu.vector_store %arg14[%c0_10, %c8, %c0_11], %2 {strides = array<i32>} : memref<2x17x32xf32, #tpu.memory_space<vmem>>, vector<2x8x32xf32>,
    %cst_12 = arith.constant 0.000000e+00 : f32
    %18 = vector.broadcast %cst_12 : f32 to vector<16x32xf32>
    %c0_13 = arith.constant 0 : index
    %c7 = arith.constant 7 : index
    %c0_14 = arith.constant 0 : index
    %19 = vector.load %arg14[%c0_13, %c7, %c0_14] : memref<2x17x32xf32, #tpu.memory_space<vmem>>, vector<2x8x32xf32>
    %20 = vector.shape_cast %19 : vector<2x8x32xf32> to vector<16x32xf32>
    %c0_15 = arith.constant 0 : index
    %c0_16 = arith.constant 0 : index
    %c0_17 = arith.constant 0 : index
    %c0_18 = arith.constant 0 : index
    %21 = vector.load %arg3[%c0_15, %c0_16, %c0_17, %c0_18] : memref<2x3x32x32xf32, #tpu.memory_space<vmem>>, vector<1x1x32x32xf32>
    %22 = vector.shape_cast %21 : vector<1x1x32x32xf32> to vector<32x32xf32>
    %cst_19 = arith.constant dense<0.000000e+00> : vector<16x32xf32>
    %23 = tpu.matmul %20, %22, %cst_19 {dimension_numbers = #tpu.dot_dimension_numbers<[1], [0], [0], [1], [0, 0, 1, 1], [], []>} : vector<16x32xf32>, vector<32x32xf32>, vector<16x32xf32> -> vector<16x32xf32>
    %24 = arith.addf %18, %23 : vector<16x32xf32>
    %c0_20 = arith.constant 0 : index
    %c8_21 = arith.constant 8 : index
    %c0_22 = arith.constant 0 : index
    %25 = vector.load %arg14[%c0_20, %c8_21, %c0_22] : memref<2x17x32xf32, #tpu.memory_space<vmem>>, vector<2x8x32xf32>
    %26 = vector.shape_cast %25 : vector<2x8x32xf32> to vector<16x32xf32>
    %c0_23 = arith.constant 0 : index
    %c1_24 = arith.constant 1 : index
    %c0_25 = arith.constant 0 : index
    %c0_26 = arith.constant 0 : index
    %27 = vector.load %arg3[%c0_23, %c1_24, %c0_25, %c0_26] : memref<2x3x32x32xf32, #tpu.memory_space<vmem>>, vector<1x1x32x32xf32>
    %28 = vector.shape_cast %27 : vector<1x1x32x32xf32> to vector<32x32xf32>
    %cst_27 = arith.constant dense<0.000000e+00> : vector<16x32xf32>
    %29 = tpu.matmul %26, %28, %cst_27 {dimension_numbers = #tpu.dot_dimension_numbers<[1], [0], [0], [1], [0, 0, 1, 1], [], []>} : vector<16x32xf32>, vector<32x32xf32>, vector<16x32xf32> -> vector<16x32xf32>
    %30 = arith.addf %24, %29 : vector<16x32xf32>
    %c0_28 = arith.constant 0 : index
    %c9 = arith.constant 9 : index
    %c0_29 = arith.constant 0 : index
    %31 = vector.load %arg14[%c0_28, %c9, %c0_29] : memref<2x17x32xf32, #tpu.memory_space<vmem>>, vector<2x8x32xf32>
    %32 = vector.shape_cast %31 : vector<2x8x32xf32> to vector<16x32xf32>
    %c0_30 = arith.constant 0 : index
    %c2 = arith.constant 2 : index
    %c0_31 = arith.constant 0 : index
    %c0_32 = arith.constant 0 : index
    %33 = vector.load %arg3[%c0_30, %c2, %c0_31, %c0_32] : memref<2x3x32x32xf32, #tpu.memory_space<vmem>>, vector<1x1x32x32xf32>
    %34 = vector.shape_cast %33 : vector<1x1x32x32xf32> to vector<32x32xf32>
    %cst_33 = arith.constant dense<0.000000e+00> : vector<16x32xf32>
    %35 = tpu.matmul %32, %34, %cst_33 {dimension_numbers = #tpu.dot_dimension_numbers<[1], [0], [0], [1], [0, 0, 1, 1], [], []>} : vector<16x32xf32>, vector<32x32xf32>, vector<16x32xf32> -> vector<16x32xf32>
    %36 = arith.addf %30, %35 : vector<16x32xf32>
    %c0_34 = arith.constant 0 : index
    %c0_35 = arith.constant 0 : index
    %c0_36 = arith.constant 0 : index
    %37 = vector.load %arg4[%c0_34, %c0_35, %c0_36] : memref<2x1x32xf32, #tpu.memory_space<vmem>>, vector<1x1x32xf32>
    %38 = vector.shape_cast %37 : vector<1x1x32xf32> to vector<1x32xf32>
    %39 = vector.broadcast %38 : vector<1x32xf32> to vector<16x32xf32>
    %40 = arith.addf %36, %39 : vector<16x32xf32>
    %cst_37 = arith.constant 0.000000e+00 : f32
    %41 = vector.broadcast %cst_37 : f32 to vector<16x32xf32>
    %42 = arith.maximumf %40, %41 : vector<16x32xf32>
    %c0_38 = arith.constant 0 : index
    %c0_39 = arith.constant 0 : index
    %c0_40 = arith.constant 0 : index
    %43 = vector.load %arg5[%c0_38, %c0_39, %c0_40] : memref<2x1x32xf32, #tpu.memory_space<vmem>>, vector<1x1x32xf32>
    %44 = vector.shape_cast %43 : vector<1x1x32xf32> to vector<1x32xf32>
    %c0_41 = arith.constant 0 : index
    %c0_42 = arith.constant 0 : index
    %c0_43 = arith.constant 0 : index
    %45 = vector.load %arg6[%c0_41, %c0_42, %c0_43] : memref<2x1x32xf32, #tpu.memory_space<vmem>>, vector<1x1x32xf32>
    %46 = vector.shape_cast %45 : vector<1x1x32xf32> to vector<1x32xf32>
    %cst_44 = arith.constant dense<0.000000e+00> : vector<16xf32>
    %47 = vector.multi_reduction <add>, %42, %cst_44 [1] : vector<16x32xf32> to vector<16xf32>
    %48 = vector.shape_cast %47 : vector<16xf32> to vector<16x1xf32>
    %cst_45 = arith.constant 3.200000e+01 : f32
    %49 = vector.broadcast %cst_45 : f32 to vector<16x1xf32>
    %50 = arith.divf %48, %49 : vector<16x1xf32>
    %51 = vector.broadcast %50 : vector<16x1xf32> to vector<16x32xf32>
    %52 = arith.subf %42, %51 : vector<16x32xf32>
    %53 = arith.mulf %52, %52 : vector<16x32xf32>
    %cst_46 = arith.constant dense<0.000000e+00> : vector<16xf32>
    %54 = vector.multi_reduction <add>, %53, %cst_46 [1] : vector<16x32xf32> to vector<16xf32>
    %55 = vector.shape_cast %54 : vector<16xf32> to vector<16x1xf32>
    %cst_47 = arith.constant 3.200000e+01 : f32
    %56 = vector.broadcast %cst_47 : f32 to vector<16x1xf32>
    %57 = arith.divf %55, %56 : vector<16x1xf32>
    %cst_48 = arith.constant 9.99999974E-6 : f32
    %58 = vector.broadcast %cst_48 : f32 to vector<16x1xf32>
    %59 = arith.addf %57, %58 : vector<16x1xf32>
    %60 = math.rsqrt %59 : vector<16x1xf32>
    %61 = vector.broadcast %60 : vector<16x1xf32> to vector<16x32xf32>
    %62 = arith.mulf %52, %61 : vector<16x32xf32>
    %63 = vector.broadcast %44 : vector<1x32xf32> to vector<16x32xf32>
    %64 = arith.mulf %62, %63 : vector<16x32xf32>
    %65 = vector.broadcast %46 : vector<1x32xf32> to vector<16x32xf32>
    %66 = arith.addf %64, %65 : vector<16x32xf32>
    %67 = vector.shape_cast %66 : vector<16x32xf32> to vector<2x8x32xf32>
    %c0_49 = arith.constant 0 : index
    %c8_50 = arith.constant 8 : index
    %c0_51 = arith.constant 0 : index
    %68 = vector.load %arg14[%c0_49, %c8_50, %c0_51] : memref<2x17x32xf32, #tpu.memory_space<vmem>>, vector<2x8x32xf32>
    tpu.vector_store %arg14[%c0_49, %c8_50, %c0_51], %67 {strides = array<i32>} : memref<2x17x32xf32, #tpu.memory_space<vmem>>, vector<2x8x32xf32>,
    %cst_52 = arith.constant 0.000000e+00 : f32
    %69 = vector.broadcast %cst_52 : f32 to vector<16x32xf32>
    %c0_53 = arith.constant 0 : index
    %c7_54 = arith.constant 7 : index
    %c0_55 = arith.constant 0 : index
    %70 = vector.load %arg14[%c0_53, %c7_54, %c0_55] : memref<2x17x32xf32, #tpu.memory_space<vmem>>, vector<2x8x32xf32>
    %71 = vector.shape_cast %70 : vector<2x8x32xf32> to vector<16x32xf32>
    %c0_56 = arith.constant 0 : index
    %c0_57 = arith.constant 0 : index
    %c0_58 = arith.constant 0 : index
    %c0_59 = arith.constant 0 : index
    %72 = vector.load %arg7[%c0_56, %c0_57, %c0_58, %c0_59] : memref<2x3x32x32xf32, #tpu.memory_space<vmem>>, vector<1x1x32x32xf32>
    %73 = vector.shape_cast %72 : vector<1x1x32x32xf32> to vector<32x32xf32>
    %cst_60 = arith.constant dense<0.000000e+00> : vector<16x32xf32>
    %74 = tpu.matmul %71, %73, %cst_60 {dimension_numbers = #tpu.dot_dimension_numbers<[1], [0], [0], [1], [0, 0, 1, 1], [], []>} : vector<16x32xf32>, vector<32x32xf32>, vector<16x32xf32> -> vector<16x32xf32>
    %75 = arith.addf %69, %74 : vector<16x32xf32>
    %c0_61 = arith.constant 0 : index
    %c8_62 = arith.constant 8 : index
    %c0_63 = arith.constant 0 : index
    %76 = vector.load %arg14[%c0_61, %c8_62, %c0_63] : memref<2x17x32xf32, #tpu.memory_space<vmem>>, vector<2x8x32xf32>
    %77 = vector.shape_cast %76 : vector<2x8x32xf32> to vector<16x32xf32>
    %c0_64 = arith.constant 0 : index
    %c1_65 = arith.constant 1 : index
    %c0_66 = arith.constant 0 : index
    %c0_67 = arith.constant 0 : index
    %78 = vector.load %arg7[%c0_64, %c1_65, %c0_66, %c0_67] : memref<2x3x32x32xf32, #tpu.memory_space<vmem>>, vector<1x1x32x32xf32>
    %79 = vector.shape_cast %78 : vector<1x1x32x32xf32> to vector<32x32xf32>
    %cst_68 = arith.constant dense<0.000000e+00> : vector<16x32xf32>
    %80 = tpu.matmul %77, %79, %cst_68 {dimension_numbers = #tpu.dot_dimension_numbers<[1], [0], [0], [1], [0, 0, 1, 1], [], []>} : vector<16x32xf32>, vector<32x32xf32>, vector<16x32xf32> -> vector<16x32xf32>
    %81 = arith.addf %75, %80 : vector<16x32xf32>
    %c0_69 = arith.constant 0 : index
    %c9_70 = arith.constant 9 : index
    %c0_71 = arith.constant 0 : index
    %82 = vector.load %arg14[%c0_69, %c9_70, %c0_71] : memref<2x17x32xf32, #tpu.memory_space<vmem>>, vector<2x8x32xf32>
    %83 = vector.shape_cast %82 : vector<2x8x32xf32> to vector<16x32xf32>
    %c0_72 = arith.constant 0 : index
    %c2_73 = arith.constant 2 : index
    %c0_74 = arith.constant 0 : index
    %c0_75 = arith.constant 0 : index
    %84 = vector.load %arg7[%c0_72, %c2_73, %c0_74, %c0_75] : memref<2x3x32x32xf32, #tpu.memory_space<vmem>>, vector<1x1x32x32xf32>
    %85 = vector.shape_cast %84 : vector<1x1x32x32xf32> to vector<32x32xf32>
    %cst_76 = arith.constant dense<0.000000e+00> : vector<16x32xf32>
    %86 = tpu.matmul %83, %85, %cst_76 {dimension_numbers = #tpu.dot_dimension_numbers<[1], [0], [0], [1], [0, 0, 1, 1], [], []>} : vector<16x32xf32>, vector<32x32xf32>, vector<16x32xf32> -> vector<16x32xf32>
    %87 = arith.addf %81, %86 : vector<16x32xf32>
    %c0_77 = arith.constant 0 : index
    %c0_78 = arith.constant 0 : index
    %c0_79 = arith.constant 0 : index
    %88 = vector.load %arg8[%c0_77, %c0_78, %c0_79] : memref<2x1x32xf32, #tpu.memory_space<vmem>>, vector<1x1x32xf32>
    %89 = vector.shape_cast %88 : vector<1x1x32xf32> to vector<1x32xf32>
    %90 = vector.broadcast %89 : vector<1x32xf32> to vector<16x32xf32>
    %91 = arith.addf %87, %90 : vector<16x32xf32>
    %cst_80 = arith.constant 0.000000e+00 : f32
    %92 = vector.broadcast %cst_80 : f32 to vector<16x32xf32>
    %93 = arith.maximumf %91, %92 : vector<16x32xf32>
    %c0_81 = arith.constant 0 : index
    %c0_82 = arith.constant 0 : index
    %c0_83 = arith.constant 0 : index
    %94 = vector.load %arg9[%c0_81, %c0_82, %c0_83] : memref<2x1x32xf32, #tpu.memory_space<vmem>>, vector<1x1x32xf32>
    %95 = vector.shape_cast %94 : vector<1x1x32xf32> to vector<1x32xf32>
    %c0_84 = arith.constant 0 : index
    %c0_85 = arith.constant 0 : index
    %c0_86 = arith.constant 0 : index
    %96 = vector.load %arg10[%c0_84, %c0_85, %c0_86] : memref<2x1x32xf32, #tpu.memory_space<vmem>>, vector<1x1x32xf32>
    %97 = vector.shape_cast %96 : vector<1x1x32xf32> to vector<1x32xf32>
    %cst_87 = arith.constant dense<0.000000e+00> : vector<16xf32>
    %98 = vector.multi_reduction <add>, %93, %cst_87 [1] : vector<16x32xf32> to vector<16xf32>
    %99 = vector.shape_cast %98 : vector<16xf32> to vector<16x1xf32>
    %cst_88 = arith.constant 3.200000e+01 : f32
    %100 = vector.broadcast %cst_88 : f32 to vector<16x1xf32>
    %101 = arith.divf %99, %100 : vector<16x1xf32>
    %102 = vector.broadcast %101 : vector<16x1xf32> to vector<16x32xf32>
    %103 = arith.subf %93, %102 : vector<16x32xf32>
    %104 = arith.mulf %103, %103 : vector<16x32xf32>
    %cst_89 = arith.constant dense<0.000000e+00> : vector<16xf32>
    %105 = vector.multi_reduction <add>, %104, %cst_89 [1] : vector<16x32xf32> to vector<16xf32>
    %106 = vector.shape_cast %105 : vector<16xf32> to vector<16x1xf32>
    %cst_90 = arith.constant 3.200000e+01 : f32
    %107 = vector.broadcast %cst_90 : f32 to vector<16x1xf32>
    %108 = arith.divf %106, %107 : vector<16x1xf32>
    %cst_91 = arith.constant 9.99999974E-6 : f32
    %109 = vector.broadcast %cst_91 : f32 to vector<16x1xf32>
    %110 = arith.addf %108, %109 : vector<16x1xf32>
    %111 = math.rsqrt %110 : vector<16x1xf32>
    %112 = vector.broadcast %111 : vector<16x1xf32> to vector<16x32xf32>
    %113 = arith.mulf %103, %112 : vector<16x32xf32>
    %114 = vector.broadcast %95 : vector<1x32xf32> to vector<16x32xf32>
    %115 = arith.mulf %113, %114 : vector<16x32xf32>
    %116 = vector.broadcast %97 : vector<1x32xf32> to vector<16x32xf32>
    %117 = arith.addf %115, %116 : vector<16x32xf32>
    %118 = vector.shape_cast %117 : vector<16x32xf32> to vector<2x8x32xf32>
    %c0_92 = arith.constant 0 : index
    %c0_93 = arith.constant 0 : index
    %c0_94 = arith.constant 0 : index
    %119 = vector.load %arg11[%c0_92, %c0_93, %c0_94] : memref<2x1x32xf32, #tpu.memory_space<vmem>>, vector<1x1x32xf32>
    %120 = vector.shape_cast %119 : vector<1x1x32xf32> to vector<1x32xf32>
    %121 = vector.shape_cast %120 : vector<1x32xf32> to vector<1x1x32xf32>
    %122 = vector.broadcast %121 : vector<1x1x32xf32> to vector<2x8x32xf32>
    %123 = arith.mulf %118, %122 : vector<2x8x32xf32>
    %cst_95 = arith.constant dense<0.000000e+00> : vector<2x8xf32>
    %124 = vector.multi_reduction <add>, %123, %cst_95 [2] : vector<2x8x32xf32> to vector<2x8xf32>
    %c0_96 = arith.constant 0 : index
    %c0_97 = arith.constant 0 : index
    %c0_98 = arith.constant 0 : index
    %125 = vector.load %arg12[%c0_96, %c0_97, %c0_98] : memref<2x1x1xf32, #tpu.memory_space<vmem>>, vector<1x1x1xf32>
    %126 = vector.shape_cast %125 : vector<1x1x1xf32> to vector<1x1xf32>
    %127 = vector.broadcast %126 : vector<1x1xf32> to vector<2x8xf32>
    %128 = arith.addf %124, %127 : vector<2x8xf32>
    %129 = arith.mulf %128, %16 : vector<2x8xf32>
    %c0_99 = arith.constant 0 : index
    %c0_100 = arith.constant 0 : index
    %c0_101 = arith.constant 0 : index
    %130 = vector.load %arg13[%c0_99, %c0_100, %c0_101] : memref<2x2x8xf32, #tpu.memory_space<vmem>>, vector<1x2x8xf32>
    %131 = vector.shape_cast %130 : vector<1x2x8xf32> to vector<2x8xf32>
    %132 = vector.shape_cast %129 : vector<2x8xf32> to vector<1x2x8xf32>
    tpu.vector_store %arg13[%c0_99, %c0_100, %c0_101], %132 {strides = array<i32>} : memref<2x2x8xf32, #tpu.memory_space<vmem>>, vector<1x2x8xf32>,
    %c0_102 = arith.constant 0 : index
    %c8_103 = arith.constant 8 : index
    %c0_104 = arith.constant 0 : index
    %133 = vector.load %arg14[%c0_102, %c8_103, %c0_104] : memref<2x17x32xf32, #tpu.memory_space<vmem>>, vector<2x8x32xf32>
    tpu.vector_store %arg14[%c0_102, %c8_103, %c0_104], %2 {strides = array<i32>} : memref<2x17x32xf32, #tpu.memory_space<vmem>>, vector<2x8x32xf32>,
    %cst_105 = arith.constant 0.000000e+00 : f32
    %134 = vector.broadcast %cst_105 : f32 to vector<16x32xf32>
    %c0_106 = arith.constant 0 : index
    %c7_107 = arith.constant 7 : index
    %c0_108 = arith.constant 0 : index
    %135 = vector.load %arg14[%c0_106, %c7_107, %c0_108] : memref<2x17x32xf32, #tpu.memory_space<vmem>>, vector<2x8x32xf32>
    %136 = vector.shape_cast %135 : vector<2x8x32xf32> to vector<16x32xf32>
    %c1_109 = arith.constant 1 : index
    %c0_110 = arith.constant 0 : index
    %c0_111 = arith.constant 0 : index
    %c0_112 = arith.constant 0 : index
    %137 = vector.load %arg3[%c1_109, %c0_110, %c0_111, %c0_112] : memref<2x3x32x32xf32, #tpu.memory_space<vmem>>, vector<1x1x32x32xf32>
    %138 = vector.shape_cast %137 : vector<1x1x32x32xf32> to vector<32x32xf32>
    %cst_113 = arith.constant dense<0.000000e+00> : vector<16x32xf32>
    %139 = tpu.matmul %136, %138, %cst_113 {dimension_numbers = #tpu.dot_dimension_numbers<[1], [0], [0], [1], [0, 0, 1, 1], [], []>} : vector<16x32xf32>, vector<32x32xf32>, vector<16x32xf32> -> vector<16x32xf32>
    %140 = arith.addf %134, %139 : vector<16x32xf32>
    %c0_114 = arith.constant 0 : index
    %c8_115 = arith.constant 8 : index
    %c0_116 = arith.constant 0 : index
    %141 = vector.load %arg14[%c0_114, %c8_115, %c0_116] : memref<2x17x32xf32, #tpu.memory_space<vmem>>, vector<2x8x32xf32>
    %142 = vector.shape_cast %141 : vector<2x8x32xf32> to vector<16x32xf32>
    %c1_117 = arith.constant 1 : index
    %c1_118 = arith.constant 1 : index
    %c0_119 = arith.constant 0 : index
    %c0_120 = arith.constant 0 : index
    %143 = vector.load %arg3[%c1_117, %c1_118, %c0_119, %c0_120] : memref<2x3x32x32xf32, #tpu.memory_space<vmem>>, vector<1x1x32x32xf32>
    %144 = vector.shape_cast %143 : vector<1x1x32x32xf32> to vector<32x32xf32>
    %cst_121 = arith.constant dense<0.000000e+00> : vector<16x32xf32>
    %145 = tpu.matmul %142, %144, %cst_121 {dimension_numbers = #tpu.dot_dimension_numbers<[1], [0], [0], [1], [0, 0, 1, 1], [], []>} : vector<16x32xf32>, vector<32x32xf32>, vector<16x32xf32> -> vector<16x32xf32>
    %146 = arith.addf %140, %145 : vector<16x32xf32>
    %c0_122 = arith.constant 0 : index
    %c9_123 = arith.constant 9 : index
    %c0_124 = arith.constant 0 : index
    %147 = vector.load %arg14[%c0_122, %c9_123, %c0_124] : memref<2x17x32xf32, #tpu.memory_space<vmem>>, vector<2x8x32xf32>
    %148 = vector.shape_cast %147 : vector<2x8x32xf32> to vector<16x32xf32>
    %c1_125 = arith.constant 1 : index
    %c2_126 = arith.constant 2 : index
    %c0_127 = arith.constant 0 : index
    %c0_128 = arith.constant 0 : index
    %149 = vector.load %arg3[%c1_125, %c2_126, %c0_127, %c0_128] : memref<2x3x32x32xf32, #tpu.memory_space<vmem>>, vector<1x1x32x32xf32>
    %150 = vector.shape_cast %149 : vector<1x1x32x32xf32> to vector<32x32xf32>
    %cst_129 = arith.constant dense<0.000000e+00> : vector<16x32xf32>
    %151 = tpu.matmul %148, %150, %cst_129 {dimension_numbers = #tpu.dot_dimension_numbers<[1], [0], [0], [1], [0, 0, 1, 1], [], []>} : vector<16x32xf32>, vector<32x32xf32>, vector<16x32xf32> -> vector<16x32xf32>
    %152 = arith.addf %146, %151 : vector<16x32xf32>
    %c1_130 = arith.constant 1 : index
    %c0_131 = arith.constant 0 : index
    %c0_132 = arith.constant 0 : index
    %153 = vector.load %arg4[%c1_130, %c0_131, %c0_132] : memref<2x1x32xf32, #tpu.memory_space<vmem>>, vector<1x1x32xf32>
    %154 = vector.shape_cast %153 : vector<1x1x32xf32> to vector<1x32xf32>
    %155 = vector.broadcast %154 : vector<1x32xf32> to vector<16x32xf32>
    %156 = arith.addf %152, %155 : vector<16x32xf32>
    %cst_133 = arith.constant 0.000000e+00 : f32
    %157 = vector.broadcast %cst_133 : f32 to vector<16x32xf32>
    %158 = arith.maximumf %156, %157 : vector<16x32xf32>
    %c1_134 = arith.constant 1 : index
    %c0_135 = arith.constant 0 : index
    %c0_136 = arith.constant 0 : index
    %159 = vector.load %arg5[%c1_134, %c0_135, %c0_136] : memref<2x1x32xf32, #tpu.memory_space<vmem>>, vector<1x1x32xf32>
    %160 = vector.shape_cast %159 : vector<1x1x32xf32> to vector<1x32xf32>
    %c1_137 = arith.constant 1 : index
    %c0_138 = arith.constant 0 : index
    %c0_139 = arith.constant 0 : index
    %161 = vector.load %arg6[%c1_137, %c0_138, %c0_139] : memref<2x1x32xf32, #tpu.memory_space<vmem>>, vector<1x1x32xf32>
    %162 = vector.shape_cast %161 : vector<1x1x32xf32> to vector<1x32xf32>
    %cst_140 = arith.constant dense<0.000000e+00> : vector<16xf32>
    %163 = vector.multi_reduction <add>, %158, %cst_140 [1] : vector<16x32xf32> to vector<16xf32>
    %164 = vector.shape_cast %163 : vector<16xf32> to vector<16x1xf32>
    %cst_141 = arith.constant 3.200000e+01 : f32
    %165 = vector.broadcast %cst_141 : f32 to vector<16x1xf32>
    %166 = arith.divf %164, %165 : vector<16x1xf32>
    %167 = vector.broadcast %166 : vector<16x1xf32> to vector<16x32xf32>
    %168 = arith.subf %158, %167 : vector<16x32xf32>
    %169 = arith.mulf %168, %168 : vector<16x32xf32>
    %cst_142 = arith.constant dense<0.000000e+00> : vector<16xf32>
    %170 = vector.multi_reduction <add>, %169, %cst_142 [1] : vector<16x32xf32> to vector<16xf32>
    %171 = vector.shape_cast %170 : vector<16xf32> to vector<16x1xf32>
    %cst_143 = arith.constant 3.200000e+01 : f32
    %172 = vector.broadcast %cst_143 : f32 to vector<16x1xf32>
    %173 = arith.divf %171, %172 : vector<16x1xf32>
    %cst_144 = arith.constant 9.99999974E-6 : f32
    %174 = vector.broadcast %cst_144 : f32 to vector<16x1xf32>
    %175 = arith.addf %173, %174 : vector<16x1xf32>
    %176 = math.rsqrt %175 : vector<16x1xf32>
    %177 = vector.broadcast %176 : vector<16x1xf32> to vector<16x32xf32>
    %178 = arith.mulf %168, %177 : vector<16x32xf32>
    %179 = vector.broadcast %160 : vector<1x32xf32> to vector<16x32xf32>
    %180 = arith.mulf %178, %179 : vector<16x32xf32>
    %181 = vector.broadcast %162 : vector<1x32xf32> to vector<16x32xf32>
    %182 = arith.addf %180, %181 : vector<16x32xf32>
    %183 = vector.shape_cast %182 : vector<16x32xf32> to vector<2x8x32xf32>
    %c0_145 = arith.constant 0 : index
    %c8_146 = arith.constant 8 : index
    %c0_147 = arith.constant 0 : index
    %184 = vector.load %arg14[%c0_145, %c8_146, %c0_147] : memref<2x17x32xf32, #tpu.memory_space<vmem>>, vector<2x8x32xf32>
    tpu.vector_store %arg14[%c0_145, %c8_146, %c0_147], %183 {strides = array<i32>} : memref<2x17x32xf32, #tpu.memory_space<vmem>>, vector<2x8x32xf32>,
    %cst_148 = arith.constant 0.000000e+00 : f32
    %185 = vector.broadcast %cst_148 : f32 to vector<16x32xf32>
    %c0_149 = arith.constant 0 : index
    %c7_150 = arith.constant 7 : index
    %c0_151 = arith.constant 0 : index
    %186 = vector.load %arg14[%c0_149, %c7_150, %c0_151] : memref<2x17x32xf32, #tpu.memory_space<vmem>>, vector<2x8x32xf32>
    %187 = vector.shape_cast %186 : vector<2x8x32xf32> to vector<16x32xf32>
    %c1_152 = arith.constant 1 : index
    %c0_153 = arith.constant 0 : index
    %c0_154 = arith.constant 0 : index
    %c0_155 = arith.constant 0 : index
    %188 = vector.load %arg7[%c1_152, %c0_153, %c0_154, %c0_155] : memref<2x3x32x32xf32, #tpu.memory_space<vmem>>, vector<1x1x32x32xf32>
    %189 = vector.shape_cast %188 : vector<1x1x32x32xf32> to vector<32x32xf32>
    %cst_156 = arith.constant dense<0.000000e+00> : vector<16x32xf32>
    %190 = tpu.matmul %187, %189, %cst_156 {dimension_numbers = #tpu.dot_dimension_numbers<[1], [0], [0], [1], [0, 0, 1, 1], [], []>} : vector<16x32xf32>, vector<32x32xf32>, vector<16x32xf32> -> vector<16x32xf32>
    %191 = arith.addf %185, %190 : vector<16x32xf32>
    %c0_157 = arith.constant 0 : index
    %c8_158 = arith.constant 8 : index
    %c0_159 = arith.constant 0 : index
    %192 = vector.load %arg14[%c0_157, %c8_158, %c0_159] : memref<2x17x32xf32, #tpu.memory_space<vmem>>, vector<2x8x32xf32>
    %193 = vector.shape_cast %192 : vector<2x8x32xf32> to vector<16x32xf32>
    %c1_160 = arith.constant 1 : index
    %c1_161 = arith.constant 1 : index
    %c0_162 = arith.constant 0 : index
    %c0_163 = arith.constant 0 : index
    %194 = vector.load %arg7[%c1_160, %c1_161, %c0_162, %c0_163] : memref<2x3x32x32xf32, #tpu.memory_space<vmem>>, vector<1x1x32x32xf32>
    %195 = vector.shape_cast %194 : vector<1x1x32x32xf32> to vector<32x32xf32>
    %cst_164 = arith.constant dense<0.000000e+00> : vector<16x32xf32>
    %196 = tpu.matmul %193, %195, %cst_164 {dimension_numbers = #tpu.dot_dimension_numbers<[1], [0], [0], [1], [0, 0, 1, 1], [], []>} : vector<16x32xf32>, vector<32x32xf32>, vector<16x32xf32> -> vector<16x32xf32>
    %197 = arith.addf %191, %196 : vector<16x32xf32>
    %c0_165 = arith.constant 0 : index
    %c9_166 = arith.constant 9 : index
    %c0_167 = arith.constant 0 : index
    %198 = vector.load %arg14[%c0_165, %c9_166, %c0_167] : memref<2x17x32xf32, #tpu.memory_space<vmem>>, vector<2x8x32xf32>
    %199 = vector.shape_cast %198 : vector<2x8x32xf32> to vector<16x32xf32>
    %c1_168 = arith.constant 1 : index
    %c2_169 = arith.constant 2 : index
    %c0_170 = arith.constant 0 : index
    %c0_171 = arith.constant 0 : index
    %200 = vector.load %arg7[%c1_168, %c2_169, %c0_170, %c0_171] : memref<2x3x32x32xf32, #tpu.memory_space<vmem>>, vector<1x1x32x32xf32>
    %201 = vector.shape_cast %200 : vector<1x1x32x32xf32> to vector<32x32xf32>
    %cst_172 = arith.constant dense<0.000000e+00> : vector<16x32xf32>
    %202 = tpu.matmul %199, %201, %cst_172 {dimension_numbers = #tpu.dot_dimension_numbers<[1], [0], [0], [1], [0, 0, 1, 1], [], []>} : vector<16x32xf32>, vector<32x32xf32>, vector<16x32xf32> -> vector<16x32xf32>
    %203 = arith.addf %197, %202 : vector<16x32xf32>
    %c1_173 = arith.constant 1 : index
    %c0_174 = arith.constant 0 : index
    %c0_175 = arith.constant 0 : index
    %204 = vector.load %arg8[%c1_173, %c0_174, %c0_175] : memref<2x1x32xf32, #tpu.memory_space<vmem>>, vector<1x1x32xf32>
    %205 = vector.shape_cast %204 : vector<1x1x32xf32> to vector<1x32xf32>
    %206 = vector.broadcast %205 : vector<1x32xf32> to vector<16x32xf32>
    %207 = arith.addf %203, %206 : vector<16x32xf32>
    %cst_176 = arith.constant 0.000000e+00 : f32
    %208 = vector.broadcast %cst_176 : f32 to vector<16x32xf32>
    %209 = arith.maximumf %207, %208 : vector<16x32xf32>
    %c1_177 = arith.constant 1 : index
    %c0_178 = arith.constant 0 : index
    %c0_179 = arith.constant 0 : index
    %210 = vector.load %arg9[%c1_177, %c0_178, %c0_179] : memref<2x1x32xf32, #tpu.memory_space<vmem>>, vector<1x1x32xf32>
    %211 = vector.shape_cast %210 : vector<1x1x32xf32> to vector<1x32xf32>
    %c1_180 = arith.constant 1 : index
    %c0_181 = arith.constant 0 : index
    %c0_182 = arith.constant 0 : index
    %212 = vector.load %arg10[%c1_180, %c0_181, %c0_182] : memref<2x1x32xf32, #tpu.memory_space<vmem>>, vector<1x1x32xf32>
    %213 = vector.shape_cast %212 : vector<1x1x32xf32> to vector<1x32xf32>
    %cst_183 = arith.constant dense<0.000000e+00> : vector<16xf32>
    %214 = vector.multi_reduction <add>, %209, %cst_183 [1] : vector<16x32xf32> to vector<16xf32>
    %215 = vector.shape_cast %214 : vector<16xf32> to vector<16x1xf32>
    %cst_184 = arith.constant 3.200000e+01 : f32
    %216 = vector.broadcast %cst_184 : f32 to vector<16x1xf32>
    %217 = arith.divf %215, %216 : vector<16x1xf32>
    %218 = vector.broadcast %217 : vector<16x1xf32> to vector<16x32xf32>
    %219 = arith.subf %209, %218 : vector<16x32xf32>
    %220 = arith.mulf %219, %219 : vector<16x32xf32>
    %cst_185 = arith.constant dense<0.000000e+00> : vector<16xf32>
    %221 = vector.multi_reduction <add>, %220, %cst_185 [1] : vector<16x32xf32> to vector<16xf32>
    %222 = vector.shape_cast %221 : vector<16xf32> to vector<16x1xf32>
    %cst_186 = arith.constant 3.200000e+01 : f32
    %223 = vector.broadcast %cst_186 : f32 to vector<16x1xf32>
    %224 = arith.divf %222, %223 : vector<16x1xf32>
    %cst_187 = arith.constant 9.99999974E-6 : f32
    %225 = vector.broadcast %cst_187 : f32 to vector<16x1xf32>
    %226 = arith.addf %224, %225 : vector<16x1xf32>
    %227 = math.rsqrt %226 : vector<16x1xf32>
    %228 = vector.broadcast %227 : vector<16x1xf32> to vector<16x32xf32>
    %229 = arith.mulf %219, %228 : vector<16x32xf32>
    %230 = vector.broadcast %211 : vector<1x32xf32> to vector<16x32xf32>
    %231 = arith.mulf %229, %230 : vector<16x32xf32>
    %232 = vector.broadcast %213 : vector<1x32xf32> to vector<16x32xf32>
    %233 = arith.addf %231, %232 : vector<16x32xf32>
    %234 = vector.shape_cast %233 : vector<16x32xf32> to vector<2x8x32xf32>
    %c1_188 = arith.constant 1 : index
    %c0_189 = arith.constant 0 : index
    %c0_190 = arith.constant 0 : index
    %235 = vector.load %arg11[%c1_188, %c0_189, %c0_190] : memref<2x1x32xf32, #tpu.memory_space<vmem>>, vector<1x1x32xf32>
    %236 = vector.shape_cast %235 : vector<1x1x32xf32> to vector<1x32xf32>
    %237 = vector.shape_cast %236 : vector<1x32xf32> to vector<1x1x32xf32>
    %238 = vector.broadcast %237 : vector<1x1x32xf32> to vector<2x8x32xf32>
    %239 = arith.mulf %234, %238 : vector<2x8x32xf32>
    %cst_191 = arith.constant dense<0.000000e+00> : vector<2x8xf32>
    %240 = vector.multi_reduction <add>, %239, %cst_191 [2] : vector<2x8x32xf32> to vector<2x8xf32>
    %c1_192 = arith.constant 1 : index
    %c0_193 = arith.constant 0 : index
    %c0_194 = arith.constant 0 : index
    %241 = vector.load %arg12[%c1_192, %c0_193, %c0_194] : memref<2x1x1xf32, #tpu.memory_space<vmem>>, vector<1x1x1xf32>
    %242 = vector.shape_cast %241 : vector<1x1x1xf32> to vector<1x1xf32>
    %243 = vector.broadcast %242 : vector<1x1xf32> to vector<2x8xf32>
    %244 = arith.addf %240, %243 : vector<2x8xf32>
    %245 = arith.mulf %244, %16 : vector<2x8xf32>
    %c1_195 = arith.constant 1 : index
    %c0_196 = arith.constant 0 : index
    %c0_197 = arith.constant 0 : index
    %246 = vector.load %arg13[%c1_195, %c0_196, %c0_197] : memref<2x2x8xf32, #tpu.memory_space<vmem>>, vector<1x2x8xf32>
    %247 = vector.shape_cast %246 : vector<1x2x8xf32> to vector<2x8xf32>
    %248 = vector.shape_cast %245 : vector<2x8xf32> to vector<1x2x8xf32>
    tpu.vector_store %arg13[%c1_195, %c0_196, %c0_197], %248 {strides = array<i32>} : memref<2x2x8xf32, #tpu.memory_space<vmem>>, vector<1x2x8xf32>,
    return
  }
  func.func @transform_0(%arg0: i32, %arg1: memref<2xi32, #tpu.memory_space<smem>>) -> (i32, i32, i32) {
    %c0_i32 = arith.constant 0 : i32
    %c0_i32_0 = arith.constant 0 : i32
    %c0_i32_1 = arith.constant 0 : i32
    %c0_i32_2 = arith.constant 0 : i32
    return %c0_i32, %c0_i32_0, %c0_i32_1 : i32, i32, i32
  }
  func.func @transform_1(%arg0: i32, %arg1: memref<2xi32, #tpu.memory_space<smem>>) -> (i32, i32, i32, i32) {
    %c0_i32 = arith.constant 0 : i32
    %c0_i32_0 = arith.constant 0 : i32
    %c0_i32_1 = arith.constant 0 : i32
    %c0_i32_2 = arith.constant 0 : i32
    %c0_i32_3 = arith.constant 0 : i32
    return %c0_i32, %c0_i32_0, %c0_i32_1, %c0_i32_2 : i32, i32, i32, i32
  }
  func.func @transform_2(%arg0: i32, %arg1: memref<2xi32, #tpu.memory_space<smem>>) -> (i32, i32, i32) {
    %c0_i32 = arith.constant 0 : i32
    %c0_i32_0 = arith.constant 0 : i32
    %c0_i32_1 = arith.constant 0 : i32
    %c0_i32_2 = arith.constant 0 : i32
    return %c0_i32, %c0_i32_0, %c0_i32_1 : i32, i32, i32
  }
  func.func @transform_3(%arg0: i32, %arg1: memref<2xi32, #tpu.memory_space<smem>>) -> (i32, i32, i32) {
    %c0_i32 = arith.constant 0 : i32
    %c0_i32_0 = arith.constant 0 : i32
    %c0_i32_1 = arith.constant 0 : i32
    %c0_i32_2 = arith.constant 0 : i32
    return %c0_i32, %c0_i32_0, %c0_i32_1 : i32, i32, i32
  }
  func.func @transform_4(%arg0: i32, %arg1: memref<2xi32, #tpu.memory_space<smem>>) -> (i32, i32, i32) {
    %c0_i32 = arith.constant 0 : i32
    %c0_i32_0 = arith.constant 0 : i32
    %c0_i32_1 = arith.constant 0 : i32
    %c0_i32_2 = arith.constant 0 : i32
    return %c0_i32, %c0_i32_0, %c0_i32_1 : i32, i32, i32
  }
  func.func @transform_5(%arg0: i32, %arg1: memref<2xi32, #tpu.memory_space<smem>>) -> (i32, i32, i32, i32) {
    %c0_i32 = arith.constant 0 : i32
    %c0_i32_0 = arith.constant 0 : i32
    %c0_i32_1 = arith.constant 0 : i32
    %c0_i32_2 = arith.constant 0 : i32
    %c0_i32_3 = arith.constant 0 : i32
    return %c0_i32, %c0_i32_0, %c0_i32_1, %c0_i32_2 : i32, i32, i32, i32
  }
  func.func @transform_6(%arg0: i32, %arg1: memref<2xi32, #tpu.memory_space<smem>>) -> (i32, i32, i32) {
    %c0_i32 = arith.constant 0 : i32
    %c0_i32_0 = arith.constant 0 : i32
    %c0_i32_1 = arith.constant 0 : i32
    %c0_i32_2 = arith.constant 0 : i32
    return %c0_i32, %c0_i32_0, %c0_i32_1 : i32, i32, i32
  }
  func.func @transform_7(%arg0: i32, %arg1: memref<2xi32, #tpu.memory_space<smem>>) -> (i32, i32, i32) {
    %c0_i32 = arith.constant 0 : i32
    %c0_i32_0 = arith.constant 0 : i32
    %c0_i32_1 = arith.constant 0 : i32
    %c0_i32_2 = arith.constant 0 : i32
    return %c0_i32, %c0_i32_0, %c0_i32_1 : i32, i32, i32
  }
  func.func @transform_8(%arg0: i32, %arg1: memref<2xi32, #tpu.memory_space<smem>>) -> (i32, i32, i32) {
    %c0_i32 = arith.constant 0 : i32
    %c0_i32_0 = arith.constant 0 : i32
    %c0_i32_1 = arith.constant 0 : i32
    %c0_i32_2 = arith.constant 0 : i32
    return %c0_i32, %c0_i32_0, %c0_i32_1 : i32, i32, i32
  }
  func.func @transform_9(%arg0: i32, %arg1: memref<2xi32, #tpu.memory_space<smem>>) -> (i32, i32, i32) {
    %c0_i32 = arith.constant 0 : i32
    %c0_i32_0 = arith.constant 0 : i32
    %c0_i32_1 = arith.constant 0 : i32
    %c0_i32_2 = arith.constant 0 : i32
    return %c0_i32, %c0_i32_0, %c0_i32_1 : i32, i32, i32
  }
  func.func @transform_10(%arg0: i32, %arg1: memref<2xi32, #tpu.memory_space<smem>>) -> (i32, i32, i32) {
    %c0_i32 = arith.constant 0 : i32
    %c0_i32_0 = arith.constant 0 : i32
    %c0_i32_1 = arith.constant 0 : i32
    %c0_i32_2 = arith.constant 0 : i32
    return %c0_i32, %c0_i32_0, %c0_i32_1 : i32, i32, i32
  }
  func.func @transform_11(%arg0: i32, %arg1: memref<2xi32, #tpu.memory_space<smem>>) -> (i32, i32, i32) {
    %c0_i32 = arith.constant 0 : i32
    %c0_i32_0 = arith.constant 0 : i32
    %c0_i32_1 = arith.constant 0 : i32
    %c0_i32_2 = arith.constant 0 : i32
    return %c0_i32, %c0_i32_0, %c0_i32_1 : i32, i32, i32
  }
}

module attributes {stable_mosaic.version = 11 : i64} {
  func.func @kernel(%arg0: i32, %arg1: memref<2xi32, #tpu.memory_space<smem>>, %arg2: memref<2x16x32xf32, #tpu.memory_space<vmem>>, %arg3: memref<32x96xf32, #tpu.memory_space<vmem>>, %arg4: memref<1x96xf32, #tpu.memory_space<vmem>>, %arg5: memref<32x32xf32, #tpu.memory_space<vmem>>, %arg6: memref<1x32xf32, #tpu.memory_space<vmem>>, %arg7: memref<1x32xf32, #tpu.memory_space<vmem>>, %arg8: memref<1x32xf32, #tpu.memory_space<vmem>>, %arg9: memref<9x32x64xf32, #tpu.memory_space<vmem>>, %arg10: memref<1x64xf32, #tpu.memory_space<vmem>>, %arg11: memref<64x32xf32, #tpu.memory_space<vmem>>, %arg12: memref<1x32xf32, #tpu.memory_space<vmem>>, %arg13: memref<1x32xf32, #tpu.memory_space<vmem>>, %arg14: memref<1x32xf32, #tpu.memory_space<vmem>>, %arg15: memref<2x16x32xf32, #tpu.memory_space<vmem>>, %arg16: memref<2x28x32xf32, #tpu.memory_space<vmem>>) attributes {dimension_semantics = [#tpu.dimension_semantics<arbitrary>], iteration_bounds = array<i64: 1>, scalar_prefetch = 1 : i64, scratch_operands = 1 : i64, tpu.core_type = #tpu.core_type<tc>, window_params = [{pipeline_mode = #tpu.pipeline_mode<synchronous>, transform_indices = @transform_0, window_bounds = array<i64: 2, 16, 32>}, {pipeline_mode = #tpu.pipeline_mode<synchronous>, transform_indices = @transform_1, window_bounds = array<i64: 32, 96>}, {pipeline_mode = #tpu.pipeline_mode<synchronous>, transform_indices = @transform_2, window_bounds = array<i64: 1, 96>}, {pipeline_mode = #tpu.pipeline_mode<synchronous>, transform_indices = @transform_3, window_bounds = array<i64: 32, 32>}, {pipeline_mode = #tpu.pipeline_mode<synchronous>, transform_indices = @transform_4, window_bounds = array<i64: 1, 32>}, {pipeline_mode = #tpu.pipeline_mode<synchronous>, transform_indices = @transform_5, window_bounds = array<i64: 1, 32>}, {pipeline_mode = #tpu.pipeline_mode<synchronous>, transform_indices = @transform_6, window_bounds = array<i64: 1, 32>}, {pipeline_mode = #tpu.pipeline_mode<synchronous>, transform_indices = @transform_7, window_bounds = array<i64: 9, 32, 64>}, {pipeline_mode = #tpu.pipeline_mode<synchronous>, transform_indices = @transform_8, window_bounds = array<i64: 1, 64>}, {pipeline_mode = #tpu.pipeline_mode<synchronous>, transform_indices = @transform_9, window_bounds = array<i64: 64, 32>}, {pipeline_mode = #tpu.pipeline_mode<synchronous>, transform_indices = @transform_10, window_bounds = array<i64: 1, 32>}, {pipeline_mode = #tpu.pipeline_mode<synchronous>, transform_indices = @transform_11, window_bounds = array<i64: 1, 32>}, {pipeline_mode = #tpu.pipeline_mode<synchronous>, transform_indices = @transform_12, window_bounds = array<i64: 1, 32>}, {pipeline_mode = #tpu.pipeline_mode<synchronous>, transform_indices = @transform_13, window_bounds = array<i64: 2, 16, 32>}]} {
    %cst = arith.constant 0.000000e+00 : f32
    %0 = vector.broadcast %cst : f32 to vector<2x28x32xf32>
    %c0 = arith.constant 0 : index
    %c0_0 = arith.constant 0 : index
    %c0_1 = arith.constant 0 : index
    %1 = vector.load %arg16[%c0, %c0_0, %c0_1] : memref<2x28x32xf32, #tpu.memory_space<vmem>>, vector<2x28x32xf32>
    tpu.vector_store %arg16[%c0, %c0_0, %c0_1], %0 {strides = array<i32>} : memref<2x28x32xf32, #tpu.memory_space<vmem>>, vector<2x28x32xf32>,
    %c0_2 = arith.constant 0 : index
    %c0_3 = arith.constant 0 : index
    %c0_4 = arith.constant 0 : index
    %2 = vector.load %arg2[%c0_2, %c0_3, %c0_4] : memref<2x16x32xf32, #tpu.memory_space<vmem>>, vector<2x16x32xf32>
    %3 = vector.shape_cast %2 : vector<2x16x32xf32> to vector<32x32xf32>
    %c0_5 = arith.constant 0 : index
    %c0_6 = arith.constant 0 : index
    %4 = vector.load %arg3[%c0_5, %c0_6] : memref<32x96xf32, #tpu.memory_space<vmem>>, vector<32x96xf32>
    %cst_7 = arith.constant dense<0.000000e+00> : vector<32x96xf32>
    %5 = tpu.matmul %3, %4, %cst_7 {dimension_numbers = #tpu.dot_dimension_numbers<[1], [0], [0], [1], [0, 0, 1, 1], [], []>} : vector<32x32xf32>, vector<32x96xf32>, vector<32x96xf32> -> vector<32x96xf32>
    %c0_8 = arith.constant 0 : index
    %c0_9 = arith.constant 0 : index
    %6 = vector.load %arg4[%c0_8, %c0_9] : memref<1x96xf32, #tpu.memory_space<vmem>>, vector<1x96xf32>
    %7 = vector.broadcast %6 : vector<1x96xf32> to vector<32x96xf32>
    %8 = arith.addf %5, %7 : vector<32x96xf32>
    %9 = vector.shape_cast %8 : vector<32x96xf32> to vector<2x16x96xf32>
    %10 = tpu.iota {dimensions = array<i32: 1>} : vector<1x16xi32>
    %11 = tpu.iota {dimensions = array<i32: 1>} : vector<1x16x1xi32>
    %c0_10 = arith.constant 0 : index
    %12 = memref.load %arg1[%c0_10] : memref<2xi32, #tpu.memory_space<smem>>
    %13 = vector.broadcast %12 : i32 to vector<1x16xi32>
    %14 = arith.cmpi sge, %10, %13 : vector<1x16xi32>
    %cst_11 = arith.constant -1.000000e+09 : f32
    %cst_12 = arith.constant 0.000000e+00 : f32
    %15 = vector.broadcast %cst_11 : f32 to vector<1x16xf32>
    %16 = vector.broadcast %cst_12 : f32 to vector<1x16xf32>
    %17 = arith.select %14, %15, %16 : vector<1x16xi1>, vector<1x16xf32>
    %18 = vector.broadcast %12 : i32 to vector<1x16x1xi32>
    %19 = arith.cmpi sge, %11, %18 : vector<1x16x1xi32>
    %cst_13 = arith.constant 0.000000e+00 : f32
    %cst_14 = arith.constant 1.000000e+00 : f32
    %20 = vector.broadcast %cst_13 : f32 to vector<1x16x1xf32>
    %21 = vector.broadcast %cst_14 : f32 to vector<1x16x1xf32>
    %22 = arith.select %19, %20, %21 : vector<1x16x1xi1>, vector<1x16x1xf32>
    %23 = vector.extract_strided_slice %9 {offsets = [0, 0, 0], sizes = [1, 16, 96], strides = [1, 1, 1]} : vector<2x16x96xf32> to vector<1x16x96xf32>
    %24 = vector.shape_cast %23 : vector<1x16x96xf32> to vector<16x96xf32>
    %25 = vector.extract_strided_slice %24 {offsets = [0, 0], sizes = [16, 16], strides = [1, 1]} : vector<16x96xf32> to vector<16x16xf32>
    %26 = vector.extract_strided_slice %24 {offsets = [0, 32], sizes = [16, 16], strides = [1, 1]} : vector<16x96xf32> to vector<16x16xf32>
    %27 = vector.extract_strided_slice %24 {offsets = [0, 64], sizes = [16, 16], strides = [1, 1]} : vector<16x96xf32> to vector<16x16xf32>
    %28 = tpu.transpose %26, [1, 0] : vector<16x16xf32> -> vector<16x16xf32>
    %cst_15 = arith.constant dense<0.000000e+00> : vector<16x16xf32>
    %29 = tpu.matmul %25, %28, %cst_15 {dimension_numbers = #tpu.dot_dimension_numbers<[1], [0], [0], [1], [0, 0, 1, 1], [], []>} : vector<16x16xf32>, vector<16x16xf32>, vector<16x16xf32> -> vector<16x16xf32>
    %cst_16 = arith.constant 2.500000e-01 : f32
    %30 = vector.broadcast %cst_16 : f32 to vector<16x16xf32>
    %31 = arith.mulf %29, %30 : vector<16x16xf32>
    %32 = vector.broadcast %17 : vector<1x16xf32> to vector<16x16xf32>
    %33 = arith.addf %31, %32 : vector<16x16xf32>
    %cst_17 = arith.constant dense<0xFF800000> : vector<16xf32>
    %34 = vector.multi_reduction <maximumf>, %33, %cst_17 [1] : vector<16x16xf32> to vector<16xf32>
    %35 = vector.shape_cast %34 : vector<16xf32> to vector<16x1xf32>
    %36 = vector.broadcast %35 : vector<16x1xf32> to vector<16x16xf32>
    %37 = arith.subf %33, %36 : vector<16x16xf32>
    %38 = math.exp %37 : vector<16x16xf32>
    %cst_18 = arith.constant dense<0.000000e+00> : vector<16xf32>
    %39 = vector.multi_reduction <add>, %38, %cst_18 [1] : vector<16x16xf32> to vector<16xf32>
    %40 = vector.shape_cast %39 : vector<16xf32> to vector<16x1xf32>
    %41 = tpu.reciprocal %40 {approx = true} : vector<16x1xf32> -> vector<16x1xf32>
    %42 = vector.broadcast %41 : vector<16x1xf32> to vector<16x16xf32>
    %43 = arith.mulf %38, %42 : vector<16x16xf32>
    %cst_19 = arith.constant dense<0.000000e+00> : vector<16x16xf32>
    %44 = tpu.matmul %43, %27, %cst_19 {dimension_numbers = #tpu.dot_dimension_numbers<[1], [0], [0], [1], [0, 0, 1, 1], [], []>} : vector<16x16xf32>, vector<16x16xf32>, vector<16x16xf32> -> vector<16x16xf32>
    %45 = vector.extract_strided_slice %24 {offsets = [0, 16], sizes = [16, 16], strides = [1, 1]} : vector<16x96xf32> to vector<16x16xf32>
    %46 = vector.extract_strided_slice %24 {offsets = [0, 48], sizes = [16, 16], strides = [1, 1]} : vector<16x96xf32> to vector<16x16xf32>
    %47 = vector.extract_strided_slice %24 {offsets = [0, 80], sizes = [16, 16], strides = [1, 1]} : vector<16x96xf32> to vector<16x16xf32>
    %48 = tpu.transpose %46, [1, 0] : vector<16x16xf32> -> vector<16x16xf32>
    %cst_20 = arith.constant dense<0.000000e+00> : vector<16x16xf32>
    %49 = tpu.matmul %45, %48, %cst_20 {dimension_numbers = #tpu.dot_dimension_numbers<[1], [0], [0], [1], [0, 0, 1, 1], [], []>} : vector<16x16xf32>, vector<16x16xf32>, vector<16x16xf32> -> vector<16x16xf32>
    %cst_21 = arith.constant 2.500000e-01 : f32
    %50 = vector.broadcast %cst_21 : f32 to vector<16x16xf32>
    %51 = arith.mulf %49, %50 : vector<16x16xf32>
    %52 = vector.broadcast %17 : vector<1x16xf32> to vector<16x16xf32>
    %53 = arith.addf %51, %52 : vector<16x16xf32>
    %cst_22 = arith.constant dense<0xFF800000> : vector<16xf32>
    %54 = vector.multi_reduction <maximumf>, %53, %cst_22 [1] : vector<16x16xf32> to vector<16xf32>
    %55 = vector.shape_cast %54 : vector<16xf32> to vector<16x1xf32>
    %56 = vector.broadcast %55 : vector<16x1xf32> to vector<16x16xf32>
    %57 = arith.subf %53, %56 : vector<16x16xf32>
    %58 = math.exp %57 : vector<16x16xf32>
    %cst_23 = arith.constant dense<0.000000e+00> : vector<16xf32>
    %59 = vector.multi_reduction <add>, %58, %cst_23 [1] : vector<16x16xf32> to vector<16xf32>
    %60 = vector.shape_cast %59 : vector<16xf32> to vector<16x1xf32>
    %61 = tpu.reciprocal %60 {approx = true} : vector<16x1xf32> -> vector<16x1xf32>
    %62 = vector.broadcast %61 : vector<16x1xf32> to vector<16x16xf32>
    %63 = arith.mulf %58, %62 : vector<16x16xf32>
    %cst_24 = arith.constant dense<0.000000e+00> : vector<16x16xf32>
    %64 = tpu.matmul %63, %47, %cst_24 {dimension_numbers = #tpu.dot_dimension_numbers<[1], [0], [0], [1], [0, 0, 1, 1], [], []>} : vector<16x16xf32>, vector<16x16xf32>, vector<16x16xf32> -> vector<16x16xf32>
    %65 = tpu.concatenate %44, %64 in 1 : vector<16x16xf32>, vector<16x16xf32> -> vector<16x32xf32>
    %c0_25 = arith.constant 0 : index
    %c0_26 = arith.constant 0 : index
    %66 = vector.load %arg5[%c0_25, %c0_26] : memref<32x32xf32, #tpu.memory_space<vmem>>, vector<32x32xf32>
    %cst_27 = arith.constant dense<0.000000e+00> : vector<16x32xf32>
    %67 = tpu.matmul %65, %66, %cst_27 {dimension_numbers = #tpu.dot_dimension_numbers<[1], [0], [0], [1], [0, 0, 1, 1], [], []>} : vector<16x32xf32>, vector<32x32xf32>, vector<16x32xf32> -> vector<16x32xf32>
    %c0_28 = arith.constant 0 : index
    %c0_29 = arith.constant 0 : index
    %68 = vector.load %arg6[%c0_28, %c0_29] : memref<1x32xf32, #tpu.memory_space<vmem>>, vector<1x32xf32>
    %69 = vector.broadcast %68 : vector<1x32xf32> to vector<16x32xf32>
    %70 = arith.addf %67, %69 : vector<16x32xf32>
    %71 = vector.extract_strided_slice %2 {offsets = [0, 0, 0], sizes = [1, 16, 32], strides = [1, 1, 1]} : vector<2x16x32xf32> to vector<1x16x32xf32>
    %72 = vector.shape_cast %71 : vector<1x16x32xf32> to vector<16x32xf32>
    %73 = arith.addf %70, %72 : vector<16x32xf32>
    %c0_30 = arith.constant 0 : index
    %c0_31 = arith.constant 0 : index
    %74 = vector.load %arg7[%c0_30, %c0_31] : memref<1x32xf32, #tpu.memory_space<vmem>>, vector<1x32xf32>
    %c0_32 = arith.constant 0 : index
    %c0_33 = arith.constant 0 : index
    %75 = vector.load %arg8[%c0_32, %c0_33] : memref<1x32xf32, #tpu.memory_space<vmem>>, vector<1x32xf32>
    %cst_34 = arith.constant dense<0.000000e+00> : vector<16xf32>
    %76 = vector.multi_reduction <add>, %73, %cst_34 [1] : vector<16x32xf32> to vector<16xf32>
    %77 = vector.shape_cast %76 : vector<16xf32> to vector<16x1xf32>
    %cst_35 = arith.constant 3.200000e+01 : f32
    %78 = vector.broadcast %cst_35 : f32 to vector<16x1xf32>
    %79 = arith.divf %77, %78 : vector<16x1xf32>
    %80 = vector.broadcast %79 : vector<16x1xf32> to vector<16x32xf32>
    %81 = arith.subf %73, %80 : vector<16x32xf32>
    %82 = arith.mulf %81, %81 : vector<16x32xf32>
    %cst_36 = arith.constant dense<0.000000e+00> : vector<16xf32>
    %83 = vector.multi_reduction <add>, %82, %cst_36 [1] : vector<16x32xf32> to vector<16xf32>
    %84 = vector.shape_cast %83 : vector<16xf32> to vector<16x1xf32>
    %cst_37 = arith.constant 3.200000e+01 : f32
    %85 = vector.broadcast %cst_37 : f32 to vector<16x1xf32>
    %86 = arith.divf %84, %85 : vector<16x1xf32>
    %cst_38 = arith.constant 9.99999974E-6 : f32
    %87 = vector.broadcast %cst_38 : f32 to vector<16x1xf32>
    %88 = arith.addf %86, %87 : vector<16x1xf32>
    %89 = math.rsqrt %88 : vector<16x1xf32>
    %90 = vector.broadcast %89 : vector<16x1xf32> to vector<16x32xf32>
    %91 = arith.mulf %81, %90 : vector<16x32xf32>
    %92 = vector.broadcast %74 : vector<1x32xf32> to vector<16x32xf32>
    %93 = arith.mulf %91, %92 : vector<16x32xf32>
    %94 = vector.broadcast %75 : vector<1x32xf32> to vector<16x32xf32>
    %95 = arith.addf %93, %94 : vector<16x32xf32>
    %96 = vector.shape_cast %22 : vector<1x16x1xf32> to vector<16x1xf32>
    %97 = vector.broadcast %96 : vector<16x1xf32> to vector<16x32xf32>
    %98 = arith.mulf %95, %97 : vector<16x32xf32>
    %99 = vector.shape_cast %98 : vector<16x32xf32> to vector<1x16x32xf32>
    %c1 = arith.constant 1 : index
    %100 = memref.load %arg1[%c1] : memref<2xi32, #tpu.memory_space<smem>>
    %101 = vector.broadcast %100 : i32 to vector<1x16xi32>
    %102 = arith.cmpi sge, %10, %101 : vector<1x16xi32>
    %cst_39 = arith.constant -1.000000e+09 : f32
    %cst_40 = arith.constant 0.000000e+00 : f32
    %103 = vector.broadcast %cst_39 : f32 to vector<1x16xf32>
    %104 = vector.broadcast %cst_40 : f32 to vector<1x16xf32>
    %105 = arith.select %102, %103, %104 : vector<1x16xi1>, vector<1x16xf32>
    %106 = vector.broadcast %100 : i32 to vector<1x16x1xi32>
    %107 = arith.cmpi sge, %11, %106 : vector<1x16x1xi32>
    %cst_41 = arith.constant 0.000000e+00 : f32
    %cst_42 = arith.constant 1.000000e+00 : f32
    %108 = vector.broadcast %cst_41 : f32 to vector<1x16x1xf32>
    %109 = vector.broadcast %cst_42 : f32 to vector<1x16x1xf32>
    %110 = arith.select %107, %108, %109 : vector<1x16x1xi1>, vector<1x16x1xf32>
    %111 = vector.extract_strided_slice %9 {offsets = [1, 0, 0], sizes = [1, 16, 96], strides = [1, 1, 1]} : vector<2x16x96xf32> to vector<1x16x96xf32>
    %112 = vector.shape_cast %111 : vector<1x16x96xf32> to vector<16x96xf32>
    %113 = vector.extract_strided_slice %112 {offsets = [0, 0], sizes = [16, 16], strides = [1, 1]} : vector<16x96xf32> to vector<16x16xf32>
    %114 = vector.extract_strided_slice %112 {offsets = [0, 32], sizes = [16, 16], strides = [1, 1]} : vector<16x96xf32> to vector<16x16xf32>
    %115 = vector.extract_strided_slice %112 {offsets = [0, 64], sizes = [16, 16], strides = [1, 1]} : vector<16x96xf32> to vector<16x16xf32>
    %116 = tpu.transpose %114, [1, 0] : vector<16x16xf32> -> vector<16x16xf32>
    %cst_43 = arith.constant dense<0.000000e+00> : vector<16x16xf32>
    %117 = tpu.matmul %113, %116, %cst_43 {dimension_numbers = #tpu.dot_dimension_numbers<[1], [0], [0], [1], [0, 0, 1, 1], [], []>} : vector<16x16xf32>, vector<16x16xf32>, vector<16x16xf32> -> vector<16x16xf32>
    %cst_44 = arith.constant 2.500000e-01 : f32
    %118 = vector.broadcast %cst_44 : f32 to vector<16x16xf32>
    %119 = arith.mulf %117, %118 : vector<16x16xf32>
    %120 = vector.broadcast %105 : vector<1x16xf32> to vector<16x16xf32>
    %121 = arith.addf %119, %120 : vector<16x16xf32>
    %cst_45 = arith.constant dense<0xFF800000> : vector<16xf32>
    %122 = vector.multi_reduction <maximumf>, %121, %cst_45 [1] : vector<16x16xf32> to vector<16xf32>
    %123 = vector.shape_cast %122 : vector<16xf32> to vector<16x1xf32>
    %124 = vector.broadcast %123 : vector<16x1xf32> to vector<16x16xf32>
    %125 = arith.subf %121, %124 : vector<16x16xf32>
    %126 = math.exp %125 : vector<16x16xf32>
    %cst_46 = arith.constant dense<0.000000e+00> : vector<16xf32>
    %127 = vector.multi_reduction <add>, %126, %cst_46 [1] : vector<16x16xf32> to vector<16xf32>
    %128 = vector.shape_cast %127 : vector<16xf32> to vector<16x1xf32>
    %129 = tpu.reciprocal %128 {approx = true} : vector<16x1xf32> -> vector<16x1xf32>
    %130 = vector.broadcast %129 : vector<16x1xf32> to vector<16x16xf32>
    %131 = arith.mulf %126, %130 : vector<16x16xf32>
    %cst_47 = arith.constant dense<0.000000e+00> : vector<16x16xf32>
    %132 = tpu.matmul %131, %115, %cst_47 {dimension_numbers = #tpu.dot_dimension_numbers<[1], [0], [0], [1], [0, 0, 1, 1], [], []>} : vector<16x16xf32>, vector<16x16xf32>, vector<16x16xf32> -> vector<16x16xf32>
    %133 = vector.extract_strided_slice %112 {offsets = [0, 16], sizes = [16, 16], strides = [1, 1]} : vector<16x96xf32> to vector<16x16xf32>
    %134 = vector.extract_strided_slice %112 {offsets = [0, 48], sizes = [16, 16], strides = [1, 1]} : vector<16x96xf32> to vector<16x16xf32>
    %135 = vector.extract_strided_slice %112 {offsets = [0, 80], sizes = [16, 16], strides = [1, 1]} : vector<16x96xf32> to vector<16x16xf32>
    %136 = tpu.transpose %134, [1, 0] : vector<16x16xf32> -> vector<16x16xf32>
    %cst_48 = arith.constant dense<0.000000e+00> : vector<16x16xf32>
    %137 = tpu.matmul %133, %136, %cst_48 {dimension_numbers = #tpu.dot_dimension_numbers<[1], [0], [0], [1], [0, 0, 1, 1], [], []>} : vector<16x16xf32>, vector<16x16xf32>, vector<16x16xf32> -> vector<16x16xf32>
    %cst_49 = arith.constant 2.500000e-01 : f32
    %138 = vector.broadcast %cst_49 : f32 to vector<16x16xf32>
    %139 = arith.mulf %137, %138 : vector<16x16xf32>
    %140 = vector.broadcast %105 : vector<1x16xf32> to vector<16x16xf32>
    %141 = arith.addf %139, %140 : vector<16x16xf32>
    %cst_50 = arith.constant dense<0xFF800000> : vector<16xf32>
    %142 = vector.multi_reduction <maximumf>, %141, %cst_50 [1] : vector<16x16xf32> to vector<16xf32>
    %143 = vector.shape_cast %142 : vector<16xf32> to vector<16x1xf32>
    %144 = vector.broadcast %143 : vector<16x1xf32> to vector<16x16xf32>
    %145 = arith.subf %141, %144 : vector<16x16xf32>
    %146 = math.exp %145 : vector<16x16xf32>
    %cst_51 = arith.constant dense<0.000000e+00> : vector<16xf32>
    %147 = vector.multi_reduction <add>, %146, %cst_51 [1] : vector<16x16xf32> to vector<16xf32>
    %148 = vector.shape_cast %147 : vector<16xf32> to vector<16x1xf32>
    %149 = tpu.reciprocal %148 {approx = true} : vector<16x1xf32> -> vector<16x1xf32>
    %150 = vector.broadcast %149 : vector<16x1xf32> to vector<16x16xf32>
    %151 = arith.mulf %146, %150 : vector<16x16xf32>
    %cst_52 = arith.constant dense<0.000000e+00> : vector<16x16xf32>
    %152 = tpu.matmul %151, %135, %cst_52 {dimension_numbers = #tpu.dot_dimension_numbers<[1], [0], [0], [1], [0, 0, 1, 1], [], []>} : vector<16x16xf32>, vector<16x16xf32>, vector<16x16xf32> -> vector<16x16xf32>
    %153 = tpu.concatenate %132, %152 in 1 : vector<16x16xf32>, vector<16x16xf32> -> vector<16x32xf32>
    %c0_53 = arith.constant 0 : index
    %c0_54 = arith.constant 0 : index
    %154 = vector.load %arg5[%c0_53, %c0_54] : memref<32x32xf32, #tpu.memory_space<vmem>>, vector<32x32xf32>
    %cst_55 = arith.constant dense<0.000000e+00> : vector<16x32xf32>
    %155 = tpu.matmul %153, %154, %cst_55 {dimension_numbers = #tpu.dot_dimension_numbers<[1], [0], [0], [1], [0, 0, 1, 1], [], []>} : vector<16x32xf32>, vector<32x32xf32>, vector<16x32xf32> -> vector<16x32xf32>
    %c0_56 = arith.constant 0 : index
    %c0_57 = arith.constant 0 : index
    %156 = vector.load %arg6[%c0_56, %c0_57] : memref<1x32xf32, #tpu.memory_space<vmem>>, vector<1x32xf32>
    %157 = vector.broadcast %156 : vector<1x32xf32> to vector<16x32xf32>
    %158 = arith.addf %155, %157 : vector<16x32xf32>
    %159 = vector.extract_strided_slice %2 {offsets = [1, 0, 0], sizes = [1, 16, 32], strides = [1, 1, 1]} : vector<2x16x32xf32> to vector<1x16x32xf32>
    %160 = vector.shape_cast %159 : vector<1x16x32xf32> to vector<16x32xf32>
    %161 = arith.addf %158, %160 : vector<16x32xf32>
    %c0_58 = arith.constant 0 : index
    %c0_59 = arith.constant 0 : index
    %162 = vector.load %arg7[%c0_58, %c0_59] : memref<1x32xf32, #tpu.memory_space<vmem>>, vector<1x32xf32>
    %c0_60 = arith.constant 0 : index
    %c0_61 = arith.constant 0 : index
    %163 = vector.load %arg8[%c0_60, %c0_61] : memref<1x32xf32, #tpu.memory_space<vmem>>, vector<1x32xf32>
    %cst_62 = arith.constant dense<0.000000e+00> : vector<16xf32>
    %164 = vector.multi_reduction <add>, %161, %cst_62 [1] : vector<16x32xf32> to vector<16xf32>
    %165 = vector.shape_cast %164 : vector<16xf32> to vector<16x1xf32>
    %cst_63 = arith.constant 3.200000e+01 : f32
    %166 = vector.broadcast %cst_63 : f32 to vector<16x1xf32>
    %167 = arith.divf %165, %166 : vector<16x1xf32>
    %168 = vector.broadcast %167 : vector<16x1xf32> to vector<16x32xf32>
    %169 = arith.subf %161, %168 : vector<16x32xf32>
    %170 = arith.mulf %169, %169 : vector<16x32xf32>
    %cst_64 = arith.constant dense<0.000000e+00> : vector<16xf32>
    %171 = vector.multi_reduction <add>, %170, %cst_64 [1] : vector<16x32xf32> to vector<16xf32>
    %172 = vector.shape_cast %171 : vector<16xf32> to vector<16x1xf32>
    %cst_65 = arith.constant 3.200000e+01 : f32
    %173 = vector.broadcast %cst_65 : f32 to vector<16x1xf32>
    %174 = arith.divf %172, %173 : vector<16x1xf32>
    %cst_66 = arith.constant 9.99999974E-6 : f32
    %175 = vector.broadcast %cst_66 : f32 to vector<16x1xf32>
    %176 = arith.addf %174, %175 : vector<16x1xf32>
    %177 = math.rsqrt %176 : vector<16x1xf32>
    %178 = vector.broadcast %177 : vector<16x1xf32> to vector<16x32xf32>
    %179 = arith.mulf %169, %178 : vector<16x32xf32>
    %180 = vector.broadcast %162 : vector<1x32xf32> to vector<16x32xf32>
    %181 = arith.mulf %179, %180 : vector<16x32xf32>
    %182 = vector.broadcast %163 : vector<1x32xf32> to vector<16x32xf32>
    %183 = arith.addf %181, %182 : vector<16x32xf32>
    %184 = vector.shape_cast %110 : vector<1x16x1xf32> to vector<16x1xf32>
    %185 = vector.broadcast %184 : vector<16x1xf32> to vector<16x32xf32>
    %186 = arith.mulf %183, %185 : vector<16x32xf32>
    %187 = vector.shape_cast %186 : vector<16x32xf32> to vector<1x16x32xf32>
    %188 = tpu.concatenate %22, %110 in 0 : vector<1x16x1xf32>, vector<1x16x1xf32> -> vector<2x16x1xf32>
    %189 = tpu.concatenate %99, %187 in 0 : vector<1x16x32xf32>, vector<1x16x32xf32> -> vector<2x16x32xf32>
    %c0_67 = arith.constant 0 : index
    %c8 = arith.constant 8 : index
    %c0_68 = arith.constant 0 : index
    %190 = vector.load %arg16[%c0_67, %c8, %c0_68] : memref<2x28x32xf32, #tpu.memory_space<vmem>>, vector<2x16x32xf32>
    tpu.vector_store %arg16[%c0_67, %c8, %c0_68], %189 {strides = array<i32>} : memref<2x28x32xf32, #tpu.memory_space<vmem>>, vector<2x16x32xf32>,
    %cst_69 = arith.constant 0.000000e+00 : f32
    %191 = vector.broadcast %cst_69 : f32 to vector<32x64xf32>
    %c0_70 = arith.constant 0 : index
    %c4 = arith.constant 4 : index
    %c0_71 = arith.constant 0 : index
    %192 = vector.load %arg16[%c0_70, %c4, %c0_71] : memref<2x28x32xf32, #tpu.memory_space<vmem>>, vector<2x16x32xf32>
    %193 = vector.shape_cast %192 : vector<2x16x32xf32> to vector<32x32xf32>
    %c0_72 = arith.constant 0 : index
    %c0_73 = arith.constant 0 : index
    %c0_74 = arith.constant 0 : index
    %194 = vector.load %arg9[%c0_72, %c0_73, %c0_74] : memref<9x32x64xf32, #tpu.memory_space<vmem>>, vector<1x32x64xf32>
    %195 = vector.shape_cast %194 : vector<1x32x64xf32> to vector<32x64xf32>
    %cst_75 = arith.constant dense<0.000000e+00> : vector<32x64xf32>
    %196 = tpu.matmul %193, %195, %cst_75 {dimension_numbers = #tpu.dot_dimension_numbers<[1], [0], [0], [1], [0, 0, 1, 1], [], []>} : vector<32x32xf32>, vector<32x64xf32>, vector<32x64xf32> -> vector<32x64xf32>
    %197 = arith.addf %191, %196 : vector<32x64xf32>
    %c0_76 = arith.constant 0 : index
    %c5 = arith.constant 5 : index
    %c0_77 = arith.constant 0 : index
    %198 = vector.load %arg16[%c0_76, %c5, %c0_77] : memref<2x28x32xf32, #tpu.memory_space<vmem>>, vector<2x16x32xf32>
    %199 = vector.shape_cast %198 : vector<2x16x32xf32> to vector<32x32xf32>
    %c1_78 = arith.constant 1 : index
    %c0_79 = arith.constant 0 : index
    %c0_80 = arith.constant 0 : index
    %200 = vector.load %arg9[%c1_78, %c0_79, %c0_80] : memref<9x32x64xf32, #tpu.memory_space<vmem>>, vector<1x32x64xf32>
    %201 = vector.shape_cast %200 : vector<1x32x64xf32> to vector<32x64xf32>
    %cst_81 = arith.constant dense<0.000000e+00> : vector<32x64xf32>
    %202 = tpu.matmul %199, %201, %cst_81 {dimension_numbers = #tpu.dot_dimension_numbers<[1], [0], [0], [1], [0, 0, 1, 1], [], []>} : vector<32x32xf32>, vector<32x64xf32>, vector<32x64xf32> -> vector<32x64xf32>
    %203 = arith.addf %197, %202 : vector<32x64xf32>
    %c0_82 = arith.constant 0 : index
    %c6 = arith.constant 6 : index
    %c0_83 = arith.constant 0 : index
    %204 = vector.load %arg16[%c0_82, %c6, %c0_83] : memref<2x28x32xf32, #tpu.memory_space<vmem>>, vector<2x16x32xf32>
    %205 = vector.shape_cast %204 : vector<2x16x32xf32> to vector<32x32xf32>
    %c2 = arith.constant 2 : index
    %c0_84 = arith.constant 0 : index
    %c0_85 = arith.constant 0 : index
    %206 = vector.load %arg9[%c2, %c0_84, %c0_85] : memref<9x32x64xf32, #tpu.memory_space<vmem>>, vector<1x32x64xf32>
    %207 = vector.shape_cast %206 : vector<1x32x64xf32> to vector<32x64xf32>
    %cst_86 = arith.constant dense<0.000000e+00> : vector<32x64xf32>
    %208 = tpu.matmul %205, %207, %cst_86 {dimension_numbers = #tpu.dot_dimension_numbers<[1], [0], [0], [1], [0, 0, 1, 1], [], []>} : vector<32x32xf32>, vector<32x64xf32>, vector<32x64xf32> -> vector<32x64xf32>
    %209 = arith.addf %203, %208 : vector<32x64xf32>
    %c0_87 = arith.constant 0 : index
    %c7 = arith.constant 7 : index
    %c0_88 = arith.constant 0 : index
    %210 = vector.load %arg16[%c0_87, %c7, %c0_88] : memref<2x28x32xf32, #tpu.memory_space<vmem>>, vector<2x16x32xf32>
    %211 = vector.shape_cast %210 : vector<2x16x32xf32> to vector<32x32xf32>
    %c3 = arith.constant 3 : index
    %c0_89 = arith.constant 0 : index
    %c0_90 = arith.constant 0 : index
    %212 = vector.load %arg9[%c3, %c0_89, %c0_90] : memref<9x32x64xf32, #tpu.memory_space<vmem>>, vector<1x32x64xf32>
    %213 = vector.shape_cast %212 : vector<1x32x64xf32> to vector<32x64xf32>
    %cst_91 = arith.constant dense<0.000000e+00> : vector<32x64xf32>
    %214 = tpu.matmul %211, %213, %cst_91 {dimension_numbers = #tpu.dot_dimension_numbers<[1], [0], [0], [1], [0, 0, 1, 1], [], []>} : vector<32x32xf32>, vector<32x64xf32>, vector<32x64xf32> -> vector<32x64xf32>
    %215 = arith.addf %209, %214 : vector<32x64xf32>
    %c0_92 = arith.constant 0 : index
    %c8_93 = arith.constant 8 : index
    %c0_94 = arith.constant 0 : index
    %216 = vector.load %arg16[%c0_92, %c8_93, %c0_94] : memref<2x28x32xf32, #tpu.memory_space<vmem>>, vector<2x16x32xf32>
    %217 = vector.shape_cast %216 : vector<2x16x32xf32> to vector<32x32xf32>
    %c4_95 = arith.constant 4 : index
    %c0_96 = arith.constant 0 : index
    %c0_97 = arith.constant 0 : index
    %218 = vector.load %arg9[%c4_95, %c0_96, %c0_97] : memref<9x32x64xf32, #tpu.memory_space<vmem>>, vector<1x32x64xf32>
    %219 = vector.shape_cast %218 : vector<1x32x64xf32> to vector<32x64xf32>
    %cst_98 = arith.constant dense<0.000000e+00> : vector<32x64xf32>
    %220 = tpu.matmul %217, %219, %cst_98 {dimension_numbers = #tpu.dot_dimension_numbers<[1], [0], [0], [1], [0, 0, 1, 1], [], []>} : vector<32x32xf32>, vector<32x64xf32>, vector<32x64xf32> -> vector<32x64xf32>
    %221 = arith.addf %215, %220 : vector<32x64xf32>
    %c0_99 = arith.constant 0 : index
    %c9 = arith.constant 9 : index
    %c0_100 = arith.constant 0 : index
    %222 = vector.load %arg16[%c0_99, %c9, %c0_100] : memref<2x28x32xf32, #tpu.memory_space<vmem>>, vector<2x16x32xf32>
    %223 = vector.shape_cast %222 : vector<2x16x32xf32> to vector<32x32xf32>
    %c5_101 = arith.constant 5 : index
    %c0_102 = arith.constant 0 : index
    %c0_103 = arith.constant 0 : index
    %224 = vector.load %arg9[%c5_101, %c0_102, %c0_103] : memref<9x32x64xf32, #tpu.memory_space<vmem>>, vector<1x32x64xf32>
    %225 = vector.shape_cast %224 : vector<1x32x64xf32> to vector<32x64xf32>
    %cst_104 = arith.constant dense<0.000000e+00> : vector<32x64xf32>
    %226 = tpu.matmul %223, %225, %cst_104 {dimension_numbers = #tpu.dot_dimension_numbers<[1], [0], [0], [1], [0, 0, 1, 1], [], []>} : vector<32x32xf32>, vector<32x64xf32>, vector<32x64xf32> -> vector<32x64xf32>
    %227 = arith.addf %221, %226 : vector<32x64xf32>
    %c0_105 = arith.constant 0 : index
    %c10 = arith.constant 10 : index
    %c0_106 = arith.constant 0 : index
    %228 = vector.load %arg16[%c0_105, %c10, %c0_106] : memref<2x28x32xf32, #tpu.memory_space<vmem>>, vector<2x16x32xf32>
    %229 = vector.shape_cast %228 : vector<2x16x32xf32> to vector<32x32xf32>
    %c6_107 = arith.constant 6 : index
    %c0_108 = arith.constant 0 : index
    %c0_109 = arith.constant 0 : index
    %230 = vector.load %arg9[%c6_107, %c0_108, %c0_109] : memref<9x32x64xf32, #tpu.memory_space<vmem>>, vector<1x32x64xf32>
    %231 = vector.shape_cast %230 : vector<1x32x64xf32> to vector<32x64xf32>
    %cst_110 = arith.constant dense<0.000000e+00> : vector<32x64xf32>
    %232 = tpu.matmul %229, %231, %cst_110 {dimension_numbers = #tpu.dot_dimension_numbers<[1], [0], [0], [1], [0, 0, 1, 1], [], []>} : vector<32x32xf32>, vector<32x64xf32>, vector<32x64xf32> -> vector<32x64xf32>
    %233 = arith.addf %227, %232 : vector<32x64xf32>
    %c0_111 = arith.constant 0 : index
    %c11 = arith.constant 11 : index
    %c0_112 = arith.constant 0 : index
    %234 = vector.load %arg16[%c0_111, %c11, %c0_112] : memref<2x28x32xf32, #tpu.memory_space<vmem>>, vector<2x16x32xf32>
    %235 = vector.shape_cast %234 : vector<2x16x32xf32> to vector<32x32xf32>
    %c7_113 = arith.constant 7 : index
    %c0_114 = arith.constant 0 : index
    %c0_115 = arith.constant 0 : index
    %236 = vector.load %arg9[%c7_113, %c0_114, %c0_115] : memref<9x32x64xf32, #tpu.memory_space<vmem>>, vector<1x32x64xf32>
    %237 = vector.shape_cast %236 : vector<1x32x64xf32> to vector<32x64xf32>
    %cst_116 = arith.constant dense<0.000000e+00> : vector<32x64xf32>
    %238 = tpu.matmul %235, %237, %cst_116 {dimension_numbers = #tpu.dot_dimension_numbers<[1], [0], [0], [1], [0, 0, 1, 1], [], []>} : vector<32x32xf32>, vector<32x64xf32>, vector<32x64xf32> -> vector<32x64xf32>
    %239 = arith.addf %233, %238 : vector<32x64xf32>
    %c0_117 = arith.constant 0 : index
    %c12 = arith.constant 12 : index
    %c0_118 = arith.constant 0 : index
    %240 = vector.load %arg16[%c0_117, %c12, %c0_118] : memref<2x28x32xf32, #tpu.memory_space<vmem>>, vector<2x16x32xf32>
    %241 = vector.shape_cast %240 : vector<2x16x32xf32> to vector<32x32xf32>
    %c8_119 = arith.constant 8 : index
    %c0_120 = arith.constant 0 : index
    %c0_121 = arith.constant 0 : index
    %242 = vector.load %arg9[%c8_119, %c0_120, %c0_121] : memref<9x32x64xf32, #tpu.memory_space<vmem>>, vector<1x32x64xf32>
    %243 = vector.shape_cast %242 : vector<1x32x64xf32> to vector<32x64xf32>
    %cst_122 = arith.constant dense<0.000000e+00> : vector<32x64xf32>
    %244 = tpu.matmul %241, %243, %cst_122 {dimension_numbers = #tpu.dot_dimension_numbers<[1], [0], [0], [1], [0, 0, 1, 1], [], []>} : vector<32x32xf32>, vector<32x64xf32>, vector<32x64xf32> -> vector<32x64xf32>
    %245 = arith.addf %239, %244 : vector<32x64xf32>
    %c0_123 = arith.constant 0 : index
    %c0_124 = arith.constant 0 : index
    %246 = vector.load %arg10[%c0_123, %c0_124] : memref<1x64xf32, #tpu.memory_space<vmem>>, vector<1x64xf32>
    %247 = vector.broadcast %246 : vector<1x64xf32> to vector<32x64xf32>
    %248 = arith.addf %245, %247 : vector<32x64xf32>
    %cst_125 = arith.constant 0.000000e+00 : f32
    %249 = vector.broadcast %cst_125 : f32 to vector<32x64xf32>
    %250 = arith.maximumf %248, %249 : vector<32x64xf32>
    %c0_126 = arith.constant 0 : index
    %c0_127 = arith.constant 0 : index
    %251 = vector.load %arg11[%c0_126, %c0_127] : memref<64x32xf32, #tpu.memory_space<vmem>>, vector<64x32xf32>
    %cst_128 = arith.constant dense<0.000000e+00> : vector<32x32xf32>
    %252 = tpu.matmul %250, %251, %cst_128 {dimension_numbers = #tpu.dot_dimension_numbers<[1], [0], [0], [1], [0, 0, 1, 1], [], []>} : vector<32x64xf32>, vector<64x32xf32>, vector<32x32xf32> -> vector<32x32xf32>
    %c0_129 = arith.constant 0 : index
    %c0_130 = arith.constant 0 : index
    %253 = vector.load %arg12[%c0_129, %c0_130] : memref<1x32xf32, #tpu.memory_space<vmem>>, vector<1x32xf32>
    %254 = vector.broadcast %253 : vector<1x32xf32> to vector<32x32xf32>
    %255 = arith.addf %252, %254 : vector<32x32xf32>
    %256 = vector.shape_cast %189 : vector<2x16x32xf32> to vector<32x32xf32>
    %257 = arith.addf %255, %256 : vector<32x32xf32>
    %c0_131 = arith.constant 0 : index
    %c0_132 = arith.constant 0 : index
    %258 = vector.load %arg13[%c0_131, %c0_132] : memref<1x32xf32, #tpu.memory_space<vmem>>, vector<1x32xf32>
    %c0_133 = arith.constant 0 : index
    %c0_134 = arith.constant 0 : index
    %259 = vector.load %arg14[%c0_133, %c0_134] : memref<1x32xf32, #tpu.memory_space<vmem>>, vector<1x32xf32>
    %cst_135 = arith.constant dense<0.000000e+00> : vector<32xf32>
    %260 = vector.multi_reduction <add>, %257, %cst_135 [1] : vector<32x32xf32> to vector<32xf32>
    %261 = vector.shape_cast %260 : vector<32xf32> to vector<32x1xf32>
    %cst_136 = arith.constant 3.200000e+01 : f32
    %262 = vector.broadcast %cst_136 : f32 to vector<32x1xf32>
    %263 = arith.divf %261, %262 : vector<32x1xf32>
    %264 = vector.broadcast %263 : vector<32x1xf32> to vector<32x32xf32>
    %265 = arith.subf %257, %264 : vector<32x32xf32>
    %266 = arith.mulf %265, %265 : vector<32x32xf32>
    %cst_137 = arith.constant dense<0.000000e+00> : vector<32xf32>
    %267 = vector.multi_reduction <add>, %266, %cst_137 [1] : vector<32x32xf32> to vector<32xf32>
    %268 = vector.shape_cast %267 : vector<32xf32> to vector<32x1xf32>
    %cst_138 = arith.constant 3.200000e+01 : f32
    %269 = vector.broadcast %cst_138 : f32 to vector<32x1xf32>
    %270 = arith.divf %268, %269 : vector<32x1xf32>
    %cst_139 = arith.constant 9.99999974E-6 : f32
    %271 = vector.broadcast %cst_139 : f32 to vector<32x1xf32>
    %272 = arith.addf %270, %271 : vector<32x1xf32>
    %273 = math.rsqrt %272 : vector<32x1xf32>
    %274 = vector.broadcast %273 : vector<32x1xf32> to vector<32x32xf32>
    %275 = arith.mulf %265, %274 : vector<32x32xf32>
    %276 = vector.broadcast %258 : vector<1x32xf32> to vector<32x32xf32>
    %277 = arith.mulf %275, %276 : vector<32x32xf32>
    %278 = vector.broadcast %259 : vector<1x32xf32> to vector<32x32xf32>
    %279 = arith.addf %277, %278 : vector<32x32xf32>
    %280 = vector.shape_cast %279 : vector<32x32xf32> to vector<2x16x32xf32>
    %281 = vector.broadcast %188 : vector<2x16x1xf32> to vector<2x16x32xf32>
    %282 = arith.mulf %280, %281 : vector<2x16x32xf32>
    %c0_140 = arith.constant 0 : index
    %c0_141 = arith.constant 0 : index
    %c0_142 = arith.constant 0 : index
    %283 = vector.load %arg15[%c0_140, %c0_141, %c0_142] : memref<2x16x32xf32, #tpu.memory_space<vmem>>, vector<2x16x32xf32>
    tpu.vector_store %arg15[%c0_140, %c0_141, %c0_142], %282 {strides = array<i32>} : memref<2x16x32xf32, #tpu.memory_space<vmem>>, vector<2x16x32xf32>,
    return
  }
  func.func @transform_0(%arg0: i32, %arg1: memref<2xi32, #tpu.memory_space<smem>>) -> (i32, i32, i32) {
    %c0_i32 = arith.constant 0 : i32
    %c0_i32_0 = arith.constant 0 : i32
    %c0_i32_1 = arith.constant 0 : i32
    %c0_i32_2 = arith.constant 0 : i32
    return %c0_i32, %c0_i32_0, %c0_i32_1 : i32, i32, i32
  }
  func.func @transform_1(%arg0: i32, %arg1: memref<2xi32, #tpu.memory_space<smem>>) -> (i32, i32) {
    %c0_i32 = arith.constant 0 : i32
    %c0_i32_0 = arith.constant 0 : i32
    %c0_i32_1 = arith.constant 0 : i32
    return %c0_i32, %c0_i32_0 : i32, i32
  }
  func.func @transform_2(%arg0: i32, %arg1: memref<2xi32, #tpu.memory_space<smem>>) -> (i32, i32) {
    %c0_i32 = arith.constant 0 : i32
    %c0_i32_0 = arith.constant 0 : i32
    %c0_i32_1 = arith.constant 0 : i32
    return %c0_i32, %c0_i32_0 : i32, i32
  }
  func.func @transform_3(%arg0: i32, %arg1: memref<2xi32, #tpu.memory_space<smem>>) -> (i32, i32) {
    %c0_i32 = arith.constant 0 : i32
    %c0_i32_0 = arith.constant 0 : i32
    %c0_i32_1 = arith.constant 0 : i32
    return %c0_i32, %c0_i32_0 : i32, i32
  }
  func.func @transform_4(%arg0: i32, %arg1: memref<2xi32, #tpu.memory_space<smem>>) -> (i32, i32) {
    %c0_i32 = arith.constant 0 : i32
    %c0_i32_0 = arith.constant 0 : i32
    %c0_i32_1 = arith.constant 0 : i32
    return %c0_i32, %c0_i32_0 : i32, i32
  }
  func.func @transform_5(%arg0: i32, %arg1: memref<2xi32, #tpu.memory_space<smem>>) -> (i32, i32) {
    %c0_i32 = arith.constant 0 : i32
    %c0_i32_0 = arith.constant 0 : i32
    %c0_i32_1 = arith.constant 0 : i32
    return %c0_i32, %c0_i32_0 : i32, i32
  }
  func.func @transform_6(%arg0: i32, %arg1: memref<2xi32, #tpu.memory_space<smem>>) -> (i32, i32) {
    %c0_i32 = arith.constant 0 : i32
    %c0_i32_0 = arith.constant 0 : i32
    %c0_i32_1 = arith.constant 0 : i32
    return %c0_i32, %c0_i32_0 : i32, i32
  }
  func.func @transform_7(%arg0: i32, %arg1: memref<2xi32, #tpu.memory_space<smem>>) -> (i32, i32, i32) {
    %c0_i32 = arith.constant 0 : i32
    %c0_i32_0 = arith.constant 0 : i32
    %c0_i32_1 = arith.constant 0 : i32
    %c0_i32_2 = arith.constant 0 : i32
    return %c0_i32, %c0_i32_0, %c0_i32_1 : i32, i32, i32
  }
  func.func @transform_8(%arg0: i32, %arg1: memref<2xi32, #tpu.memory_space<smem>>) -> (i32, i32) {
    %c0_i32 = arith.constant 0 : i32
    %c0_i32_0 = arith.constant 0 : i32
    %c0_i32_1 = arith.constant 0 : i32
    return %c0_i32, %c0_i32_0 : i32, i32
  }
  func.func @transform_9(%arg0: i32, %arg1: memref<2xi32, #tpu.memory_space<smem>>) -> (i32, i32) {
    %c0_i32 = arith.constant 0 : i32
    %c0_i32_0 = arith.constant 0 : i32
    %c0_i32_1 = arith.constant 0 : i32
    return %c0_i32, %c0_i32_0 : i32, i32
  }
  func.func @transform_10(%arg0: i32, %arg1: memref<2xi32, #tpu.memory_space<smem>>) -> (i32, i32) {
    %c0_i32 = arith.constant 0 : i32
    %c0_i32_0 = arith.constant 0 : i32
    %c0_i32_1 = arith.constant 0 : i32
    return %c0_i32, %c0_i32_0 : i32, i32
  }
  func.func @transform_11(%arg0: i32, %arg1: memref<2xi32, #tpu.memory_space<smem>>) -> (i32, i32) {
    %c0_i32 = arith.constant 0 : i32
    %c0_i32_0 = arith.constant 0 : i32
    %c0_i32_1 = arith.constant 0 : i32
    return %c0_i32, %c0_i32_0 : i32, i32
  }
  func.func @transform_12(%arg0: i32, %arg1: memref<2xi32, #tpu.memory_space<smem>>) -> (i32, i32) {
    %c0_i32 = arith.constant 0 : i32
    %c0_i32_0 = arith.constant 0 : i32
    %c0_i32_1 = arith.constant 0 : i32
    return %c0_i32, %c0_i32_0 : i32, i32
  }
  func.func @transform_13(%arg0: i32, %arg1: memref<2xi32, #tpu.memory_space<smem>>) -> (i32, i32, i32) {
    %c0_i32 = arith.constant 0 : i32
    %c0_i32_0 = arith.constant 0 : i32
    %c0_i32_1 = arith.constant 0 : i32
    %c0_i32_2 = arith.constant 0 : i32
    return %c0_i32, %c0_i32_0, %c0_i32_1 : i32, i32, i32
  }
}

module attributes {stable_mosaic.version = 11 : i64} {
  func.func @kernel(%arg0: i32, %arg1: memref<2x16x32xf32, #tpu.memory_space<vmem>>, %arg2: memref<32x16xf32, #tpu.memory_space<vmem>>, %arg3: memref<1x16xf32, #tpu.memory_space<vmem>>, %arg4: memref<5x5x32x32xf32, #tpu.memory_space<vmem>>, %arg5: memref<5x1x32xf32, #tpu.memory_space<vmem>>, %arg6: memref<5x1x32xf32, #tpu.memory_space<vmem>>, %arg7: memref<2x16x16xf32, #tpu.memory_space<vmem>>, %arg8: memref<2x16x16xf32, #tpu.memory_space<vmem>>, %arg9: memref<2x26x32xf32, #tpu.memory_space<vmem>>) attributes {dimension_semantics = [#tpu.dimension_semantics<arbitrary>], iteration_bounds = array<i64: 1>, scalar_prefetch = 0 : i64, scratch_operands = 1 : i64, tpu.core_type = #tpu.core_type<tc>, window_params = [{pipeline_mode = #tpu.pipeline_mode<synchronous>, transform_indices = @transform_0, window_bounds = array<i64: 2, 16, 32>}, {pipeline_mode = #tpu.pipeline_mode<synchronous>, transform_indices = @transform_1, window_bounds = array<i64: 32, 16>}, {pipeline_mode = #tpu.pipeline_mode<synchronous>, transform_indices = @transform_2, window_bounds = array<i64: 1, 16>}, {pipeline_mode = #tpu.pipeline_mode<synchronous>, transform_indices = @transform_3, window_bounds = array<i64: 5, 5, 32, 32>}, {pipeline_mode = #tpu.pipeline_mode<synchronous>, transform_indices = @transform_4, window_bounds = array<i64: 5, 1, 32>}, {pipeline_mode = #tpu.pipeline_mode<synchronous>, transform_indices = @transform_5, window_bounds = array<i64: 5, 1, 32>}, {pipeline_mode = #tpu.pipeline_mode<synchronous>, transform_indices = @transform_6, window_bounds = array<i64: 2, 16, 16>}, {pipeline_mode = #tpu.pipeline_mode<synchronous>, transform_indices = @transform_7, window_bounds = array<i64: 2, 16, 16>}]} {
    %cst = arith.constant 0.000000e+00 : f32
    %0 = vector.broadcast %cst : f32 to vector<2x26x32xf32>
    %c0 = arith.constant 0 : index
    %c0_0 = arith.constant 0 : index
    %c0_1 = arith.constant 0 : index
    %1 = vector.load %arg9[%c0, %c0_0, %c0_1] : memref<2x26x32xf32, #tpu.memory_space<vmem>>, vector<2x26x32xf32>
    tpu.vector_store %arg9[%c0, %c0_0, %c0_1], %0 {strides = array<i32>} : memref<2x26x32xf32, #tpu.memory_space<vmem>>, vector<2x26x32xf32>,
    %c0_2 = arith.constant 0 : index
    %c0_3 = arith.constant 0 : index
    %c0_4 = arith.constant 0 : index
    %2 = vector.load %arg1[%c0_2, %c0_3, %c0_4] : memref<2x16x32xf32, #tpu.memory_space<vmem>>, vector<2x16x32xf32>
    %3 = vector.shape_cast %2 : vector<2x16x32xf32> to vector<32x32xf32>
    %c0_5 = arith.constant 0 : index
    %c0_6 = arith.constant 0 : index
    %4 = vector.load %arg2[%c0_5, %c0_6] : memref<32x16xf32, #tpu.memory_space<vmem>>, vector<32x16xf32>
    %cst_7 = arith.constant dense<0.000000e+00> : vector<32x16xf32>
    %5 = tpu.matmul %3, %4, %cst_7 {dimension_numbers = #tpu.dot_dimension_numbers<[1], [0], [0], [1], [0, 0, 1, 1], [], []>} : vector<32x32xf32>, vector<32x16xf32>, vector<32x16xf32> -> vector<32x16xf32>
    %c0_8 = arith.constant 0 : index
    %c0_9 = arith.constant 0 : index
    %6 = vector.load %arg3[%c0_8, %c0_9] : memref<1x16xf32, #tpu.memory_space<vmem>>, vector<1x16xf32>
    %7 = vector.broadcast %6 : vector<1x16xf32> to vector<32x16xf32>
    %8 = arith.addf %5, %7 : vector<32x16xf32>
    %9 = vector.shape_cast %8 : vector<32x16xf32> to vector<2x16x16xf32>
    %c0_10 = arith.constant 0 : index
    %c0_11 = arith.constant 0 : index
    %c0_12 = arith.constant 0 : index
    %10 = vector.load %arg7[%c0_10, %c0_11, %c0_12] : memref<2x16x16xf32, #tpu.memory_space<vmem>>, vector<2x16x16xf32>
    tpu.vector_store %arg7[%c0_10, %c0_11, %c0_12], %9 {strides = array<i32>} : memref<2x16x16xf32, #tpu.memory_space<vmem>>, vector<2x16x16xf32>,
    %c0_13 = arith.constant 0 : index
    %c8 = arith.constant 8 : index
    %c0_14 = arith.constant 0 : index
    %11 = vector.load %arg9[%c0_13, %c8, %c0_14] : memref<2x26x32xf32, #tpu.memory_space<vmem>>, vector<2x16x16xf32>
    tpu.vector_store %arg9[%c0_13, %c8, %c0_14], %9 {strides = array<i32>} : memref<2x26x32xf32, #tpu.memory_space<vmem>>, vector<2x16x16xf32>,
    %cst_15 = arith.constant 0.000000e+00 : f32
    %12 = vector.broadcast %cst_15 : f32 to vector<32x32xf32>
    %c0_16 = arith.constant 0 : index
    %c6 = arith.constant 6 : index
    %c0_17 = arith.constant 0 : index
    %13 = vector.load %arg9[%c0_16, %c6, %c0_17] : memref<2x26x32xf32, #tpu.memory_space<vmem>>, vector<2x16x32xf32>
    %14 = vector.shape_cast %13 : vector<2x16x32xf32> to vector<32x32xf32>
    %c0_18 = arith.constant 0 : index
    %c0_19 = arith.constant 0 : index
    %c0_20 = arith.constant 0 : index
    %c0_21 = arith.constant 0 : index
    %15 = vector.load %arg4[%c0_18, %c0_19, %c0_20, %c0_21] : memref<5x5x32x32xf32, #tpu.memory_space<vmem>>, vector<1x1x32x32xf32>
    %16 = vector.shape_cast %15 : vector<1x1x32x32xf32> to vector<32x32xf32>
    %cst_22 = arith.constant dense<0.000000e+00> : vector<32x32xf32>
    %17 = tpu.matmul %14, %16, %cst_22 {dimension_numbers = #tpu.dot_dimension_numbers<[1], [0], [0], [1], [0, 0, 1, 1], [], []>} : vector<32x32xf32>, vector<32x32xf32>, vector<32x32xf32> -> vector<32x32xf32>
    %18 = arith.addf %12, %17 : vector<32x32xf32>
    %c0_23 = arith.constant 0 : index
    %c7 = arith.constant 7 : index
    %c0_24 = arith.constant 0 : index
    %19 = vector.load %arg9[%c0_23, %c7, %c0_24] : memref<2x26x32xf32, #tpu.memory_space<vmem>>, vector<2x16x32xf32>
    %20 = vector.shape_cast %19 : vector<2x16x32xf32> to vector<32x32xf32>
    %c0_25 = arith.constant 0 : index
    %c1 = arith.constant 1 : index
    %c0_26 = arith.constant 0 : index
    %c0_27 = arith.constant 0 : index
    %21 = vector.load %arg4[%c0_25, %c1, %c0_26, %c0_27] : memref<5x5x32x32xf32, #tpu.memory_space<vmem>>, vector<1x1x32x32xf32>
    %22 = vector.shape_cast %21 : vector<1x1x32x32xf32> to vector<32x32xf32>
    %cst_28 = arith.constant dense<0.000000e+00> : vector<32x32xf32>
    %23 = tpu.matmul %20, %22, %cst_28 {dimension_numbers = #tpu.dot_dimension_numbers<[1], [0], [0], [1], [0, 0, 1, 1], [], []>} : vector<32x32xf32>, vector<32x32xf32>, vector<32x32xf32> -> vector<32x32xf32>
    %24 = arith.addf %18, %23 : vector<32x32xf32>
    %c0_29 = arith.constant 0 : index
    %c8_30 = arith.constant 8 : index
    %c0_31 = arith.constant 0 : index
    %25 = vector.load %arg9[%c0_29, %c8_30, %c0_31] : memref<2x26x32xf32, #tpu.memory_space<vmem>>, vector<2x16x32xf32>
    %26 = vector.shape_cast %25 : vector<2x16x32xf32> to vector<32x32xf32>
    %c0_32 = arith.constant 0 : index
    %c2 = arith.constant 2 : index
    %c0_33 = arith.constant 0 : index
    %c0_34 = arith.constant 0 : index
    %27 = vector.load %arg4[%c0_32, %c2, %c0_33, %c0_34] : memref<5x5x32x32xf32, #tpu.memory_space<vmem>>, vector<1x1x32x32xf32>
    %28 = vector.shape_cast %27 : vector<1x1x32x32xf32> to vector<32x32xf32>
    %cst_35 = arith.constant dense<0.000000e+00> : vector<32x32xf32>
    %29 = tpu.matmul %26, %28, %cst_35 {dimension_numbers = #tpu.dot_dimension_numbers<[1], [0], [0], [1], [0, 0, 1, 1], [], []>} : vector<32x32xf32>, vector<32x32xf32>, vector<32x32xf32> -> vector<32x32xf32>
    %30 = arith.addf %24, %29 : vector<32x32xf32>
    %c0_36 = arith.constant 0 : index
    %c9 = arith.constant 9 : index
    %c0_37 = arith.constant 0 : index
    %31 = vector.load %arg9[%c0_36, %c9, %c0_37] : memref<2x26x32xf32, #tpu.memory_space<vmem>>, vector<2x16x32xf32>
    %32 = vector.shape_cast %31 : vector<2x16x32xf32> to vector<32x32xf32>
    %c0_38 = arith.constant 0 : index
    %c3 = arith.constant 3 : index
    %c0_39 = arith.constant 0 : index
    %c0_40 = arith.constant 0 : index
    %33 = vector.load %arg4[%c0_38, %c3, %c0_39, %c0_40] : memref<5x5x32x32xf32, #tpu.memory_space<vmem>>, vector<1x1x32x32xf32>
    %34 = vector.shape_cast %33 : vector<1x1x32x32xf32> to vector<32x32xf32>
    %cst_41 = arith.constant dense<0.000000e+00> : vector<32x32xf32>
    %35 = tpu.matmul %32, %34, %cst_41 {dimension_numbers = #tpu.dot_dimension_numbers<[1], [0], [0], [1], [0, 0, 1, 1], [], []>} : vector<32x32xf32>, vector<32x32xf32>, vector<32x32xf32> -> vector<32x32xf32>
    %36 = arith.addf %30, %35 : vector<32x32xf32>
    %c0_42 = arith.constant 0 : index
    %c10 = arith.constant 10 : index
    %c0_43 = arith.constant 0 : index
    %37 = vector.load %arg9[%c0_42, %c10, %c0_43] : memref<2x26x32xf32, #tpu.memory_space<vmem>>, vector<2x16x32xf32>
    %38 = vector.shape_cast %37 : vector<2x16x32xf32> to vector<32x32xf32>
    %c0_44 = arith.constant 0 : index
    %c4 = arith.constant 4 : index
    %c0_45 = arith.constant 0 : index
    %c0_46 = arith.constant 0 : index
    %39 = vector.load %arg4[%c0_44, %c4, %c0_45, %c0_46] : memref<5x5x32x32xf32, #tpu.memory_space<vmem>>, vector<1x1x32x32xf32>
    %40 = vector.shape_cast %39 : vector<1x1x32x32xf32> to vector<32x32xf32>
    %cst_47 = arith.constant dense<0.000000e+00> : vector<32x32xf32>
    %41 = tpu.matmul %38, %40, %cst_47 {dimension_numbers = #tpu.dot_dimension_numbers<[1], [0], [0], [1], [0, 0, 1, 1], [], []>} : vector<32x32xf32>, vector<32x32xf32>, vector<32x32xf32> -> vector<32x32xf32>
    %42 = arith.addf %36, %41 : vector<32x32xf32>
    %c0_48 = arith.constant 0 : index
    %c0_49 = arith.constant 0 : index
    %c0_50 = arith.constant 0 : index
    %43 = vector.load %arg5[%c0_48, %c0_49, %c0_50] : memref<5x1x32xf32, #tpu.memory_space<vmem>>, vector<1x1x32xf32>
    %44 = vector.shape_cast %43 : vector<1x1x32xf32> to vector<1x32xf32>
    %45 = vector.broadcast %44 : vector<1x32xf32> to vector<32x32xf32>
    %46 = arith.mulf %42, %45 : vector<32x32xf32>
    %c0_51 = arith.constant 0 : index
    %c0_52 = arith.constant 0 : index
    %c0_53 = arith.constant 0 : index
    %47 = vector.load %arg6[%c0_51, %c0_52, %c0_53] : memref<5x1x32xf32, #tpu.memory_space<vmem>>, vector<1x1x32xf32>
    %48 = vector.shape_cast %47 : vector<1x1x32xf32> to vector<1x32xf32>
    %49 = vector.broadcast %48 : vector<1x32xf32> to vector<32x32xf32>
    %50 = arith.addf %46, %49 : vector<32x32xf32>
    %51 = math.tanh %50 : vector<32x32xf32>
    %52 = vector.shape_cast %51 : vector<32x32xf32> to vector<2x16x32xf32>
    %c0_54 = arith.constant 0 : index
    %c8_55 = arith.constant 8 : index
    %c0_56 = arith.constant 0 : index
    %53 = vector.load %arg9[%c0_54, %c8_55, %c0_56] : memref<2x26x32xf32, #tpu.memory_space<vmem>>, vector<2x16x32xf32>
    tpu.vector_store %arg9[%c0_54, %c8_55, %c0_56], %52 {strides = array<i32>} : memref<2x26x32xf32, #tpu.memory_space<vmem>>, vector<2x16x32xf32>,
    %cst_57 = arith.constant 0.000000e+00 : f32
    %54 = vector.broadcast %cst_57 : f32 to vector<32x32xf32>
    %c0_58 = arith.constant 0 : index
    %c6_59 = arith.constant 6 : index
    %c0_60 = arith.constant 0 : index
    %55 = vector.load %arg9[%c0_58, %c6_59, %c0_60] : memref<2x26x32xf32, #tpu.memory_space<vmem>>, vector<2x16x32xf32>
    %56 = vector.shape_cast %55 : vector<2x16x32xf32> to vector<32x32xf32>
    %c1_61 = arith.constant 1 : index
    %c0_62 = arith.constant 0 : index
    %c0_63 = arith.constant 0 : index
    %c0_64 = arith.constant 0 : index
    %57 = vector.load %arg4[%c1_61, %c0_62, %c0_63, %c0_64] : memref<5x5x32x32xf32, #tpu.memory_space<vmem>>, vector<1x1x32x32xf32>
    %58 = vector.shape_cast %57 : vector<1x1x32x32xf32> to vector<32x32xf32>
    %cst_65 = arith.constant dense<0.000000e+00> : vector<32x32xf32>
    %59 = tpu.matmul %56, %58, %cst_65 {dimension_numbers = #tpu.dot_dimension_numbers<[1], [0], [0], [1], [0, 0, 1, 1], [], []>} : vector<32x32xf32>, vector<32x32xf32>, vector<32x32xf32> -> vector<32x32xf32>
    %60 = arith.addf %54, %59 : vector<32x32xf32>
    %c0_66 = arith.constant 0 : index
    %c7_67 = arith.constant 7 : index
    %c0_68 = arith.constant 0 : index
    %61 = vector.load %arg9[%c0_66, %c7_67, %c0_68] : memref<2x26x32xf32, #tpu.memory_space<vmem>>, vector<2x16x32xf32>
    %62 = vector.shape_cast %61 : vector<2x16x32xf32> to vector<32x32xf32>
    %c1_69 = arith.constant 1 : index
    %c1_70 = arith.constant 1 : index
    %c0_71 = arith.constant 0 : index
    %c0_72 = arith.constant 0 : index
    %63 = vector.load %arg4[%c1_69, %c1_70, %c0_71, %c0_72] : memref<5x5x32x32xf32, #tpu.memory_space<vmem>>, vector<1x1x32x32xf32>
    %64 = vector.shape_cast %63 : vector<1x1x32x32xf32> to vector<32x32xf32>
    %cst_73 = arith.constant dense<0.000000e+00> : vector<32x32xf32>
    %65 = tpu.matmul %62, %64, %cst_73 {dimension_numbers = #tpu.dot_dimension_numbers<[1], [0], [0], [1], [0, 0, 1, 1], [], []>} : vector<32x32xf32>, vector<32x32xf32>, vector<32x32xf32> -> vector<32x32xf32>
    %66 = arith.addf %60, %65 : vector<32x32xf32>
    %c0_74 = arith.constant 0 : index
    %c8_75 = arith.constant 8 : index
    %c0_76 = arith.constant 0 : index
    %67 = vector.load %arg9[%c0_74, %c8_75, %c0_76] : memref<2x26x32xf32, #tpu.memory_space<vmem>>, vector<2x16x32xf32>
    %68 = vector.shape_cast %67 : vector<2x16x32xf32> to vector<32x32xf32>
    %c1_77 = arith.constant 1 : index
    %c2_78 = arith.constant 2 : index
    %c0_79 = arith.constant 0 : index
    %c0_80 = arith.constant 0 : index
    %69 = vector.load %arg4[%c1_77, %c2_78, %c0_79, %c0_80] : memref<5x5x32x32xf32, #tpu.memory_space<vmem>>, vector<1x1x32x32xf32>
    %70 = vector.shape_cast %69 : vector<1x1x32x32xf32> to vector<32x32xf32>
    %cst_81 = arith.constant dense<0.000000e+00> : vector<32x32xf32>
    %71 = tpu.matmul %68, %70, %cst_81 {dimension_numbers = #tpu.dot_dimension_numbers<[1], [0], [0], [1], [0, 0, 1, 1], [], []>} : vector<32x32xf32>, vector<32x32xf32>, vector<32x32xf32> -> vector<32x32xf32>
    %72 = arith.addf %66, %71 : vector<32x32xf32>
    %c0_82 = arith.constant 0 : index
    %c9_83 = arith.constant 9 : index
    %c0_84 = arith.constant 0 : index
    %73 = vector.load %arg9[%c0_82, %c9_83, %c0_84] : memref<2x26x32xf32, #tpu.memory_space<vmem>>, vector<2x16x32xf32>
    %74 = vector.shape_cast %73 : vector<2x16x32xf32> to vector<32x32xf32>
    %c1_85 = arith.constant 1 : index
    %c3_86 = arith.constant 3 : index
    %c0_87 = arith.constant 0 : index
    %c0_88 = arith.constant 0 : index
    %75 = vector.load %arg4[%c1_85, %c3_86, %c0_87, %c0_88] : memref<5x5x32x32xf32, #tpu.memory_space<vmem>>, vector<1x1x32x32xf32>
    %76 = vector.shape_cast %75 : vector<1x1x32x32xf32> to vector<32x32xf32>
    %cst_89 = arith.constant dense<0.000000e+00> : vector<32x32xf32>
    %77 = tpu.matmul %74, %76, %cst_89 {dimension_numbers = #tpu.dot_dimension_numbers<[1], [0], [0], [1], [0, 0, 1, 1], [], []>} : vector<32x32xf32>, vector<32x32xf32>, vector<32x32xf32> -> vector<32x32xf32>
    %78 = arith.addf %72, %77 : vector<32x32xf32>
    %c0_90 = arith.constant 0 : index
    %c10_91 = arith.constant 10 : index
    %c0_92 = arith.constant 0 : index
    %79 = vector.load %arg9[%c0_90, %c10_91, %c0_92] : memref<2x26x32xf32, #tpu.memory_space<vmem>>, vector<2x16x32xf32>
    %80 = vector.shape_cast %79 : vector<2x16x32xf32> to vector<32x32xf32>
    %c1_93 = arith.constant 1 : index
    %c4_94 = arith.constant 4 : index
    %c0_95 = arith.constant 0 : index
    %c0_96 = arith.constant 0 : index
    %81 = vector.load %arg4[%c1_93, %c4_94, %c0_95, %c0_96] : memref<5x5x32x32xf32, #tpu.memory_space<vmem>>, vector<1x1x32x32xf32>
    %82 = vector.shape_cast %81 : vector<1x1x32x32xf32> to vector<32x32xf32>
    %cst_97 = arith.constant dense<0.000000e+00> : vector<32x32xf32>
    %83 = tpu.matmul %80, %82, %cst_97 {dimension_numbers = #tpu.dot_dimension_numbers<[1], [0], [0], [1], [0, 0, 1, 1], [], []>} : vector<32x32xf32>, vector<32x32xf32>, vector<32x32xf32> -> vector<32x32xf32>
    %84 = arith.addf %78, %83 : vector<32x32xf32>
    %c1_98 = arith.constant 1 : index
    %c0_99 = arith.constant 0 : index
    %c0_100 = arith.constant 0 : index
    %85 = vector.load %arg5[%c1_98, %c0_99, %c0_100] : memref<5x1x32xf32, #tpu.memory_space<vmem>>, vector<1x1x32xf32>
    %86 = vector.shape_cast %85 : vector<1x1x32xf32> to vector<1x32xf32>
    %87 = vector.broadcast %86 : vector<1x32xf32> to vector<32x32xf32>
    %88 = arith.mulf %84, %87 : vector<32x32xf32>
    %c1_101 = arith.constant 1 : index
    %c0_102 = arith.constant 0 : index
    %c0_103 = arith.constant 0 : index
    %89 = vector.load %arg6[%c1_101, %c0_102, %c0_103] : memref<5x1x32xf32, #tpu.memory_space<vmem>>, vector<1x1x32xf32>
    %90 = vector.shape_cast %89 : vector<1x1x32xf32> to vector<1x32xf32>
    %91 = vector.broadcast %90 : vector<1x32xf32> to vector<32x32xf32>
    %92 = arith.addf %88, %91 : vector<32x32xf32>
    %93 = math.tanh %92 : vector<32x32xf32>
    %94 = vector.shape_cast %93 : vector<32x32xf32> to vector<2x16x32xf32>
    %c0_104 = arith.constant 0 : index
    %c8_105 = arith.constant 8 : index
    %c0_106 = arith.constant 0 : index
    %95 = vector.load %arg9[%c0_104, %c8_105, %c0_106] : memref<2x26x32xf32, #tpu.memory_space<vmem>>, vector<2x16x32xf32>
    tpu.vector_store %arg9[%c0_104, %c8_105, %c0_106], %94 {strides = array<i32>} : memref<2x26x32xf32, #tpu.memory_space<vmem>>, vector<2x16x32xf32>,
    %cst_107 = arith.constant 0.000000e+00 : f32
    %96 = vector.broadcast %cst_107 : f32 to vector<32x32xf32>
    %c0_108 = arith.constant 0 : index
    %c6_109 = arith.constant 6 : index
    %c0_110 = arith.constant 0 : index
    %97 = vector.load %arg9[%c0_108, %c6_109, %c0_110] : memref<2x26x32xf32, #tpu.memory_space<vmem>>, vector<2x16x32xf32>
    %98 = vector.shape_cast %97 : vector<2x16x32xf32> to vector<32x32xf32>
    %c2_111 = arith.constant 2 : index
    %c0_112 = arith.constant 0 : index
    %c0_113 = arith.constant 0 : index
    %c0_114 = arith.constant 0 : index
    %99 = vector.load %arg4[%c2_111, %c0_112, %c0_113, %c0_114] : memref<5x5x32x32xf32, #tpu.memory_space<vmem>>, vector<1x1x32x32xf32>
    %100 = vector.shape_cast %99 : vector<1x1x32x32xf32> to vector<32x32xf32>
    %cst_115 = arith.constant dense<0.000000e+00> : vector<32x32xf32>
    %101 = tpu.matmul %98, %100, %cst_115 {dimension_numbers = #tpu.dot_dimension_numbers<[1], [0], [0], [1], [0, 0, 1, 1], [], []>} : vector<32x32xf32>, vector<32x32xf32>, vector<32x32xf32> -> vector<32x32xf32>
    %102 = arith.addf %96, %101 : vector<32x32xf32>
    %c0_116 = arith.constant 0 : index
    %c7_117 = arith.constant 7 : index
    %c0_118 = arith.constant 0 : index
    %103 = vector.load %arg9[%c0_116, %c7_117, %c0_118] : memref<2x26x32xf32, #tpu.memory_space<vmem>>, vector<2x16x32xf32>
    %104 = vector.shape_cast %103 : vector<2x16x32xf32> to vector<32x32xf32>
    %c2_119 = arith.constant 2 : index
    %c1_120 = arith.constant 1 : index
    %c0_121 = arith.constant 0 : index
    %c0_122 = arith.constant 0 : index
    %105 = vector.load %arg4[%c2_119, %c1_120, %c0_121, %c0_122] : memref<5x5x32x32xf32, #tpu.memory_space<vmem>>, vector<1x1x32x32xf32>
    %106 = vector.shape_cast %105 : vector<1x1x32x32xf32> to vector<32x32xf32>
    %cst_123 = arith.constant dense<0.000000e+00> : vector<32x32xf32>
    %107 = tpu.matmul %104, %106, %cst_123 {dimension_numbers = #tpu.dot_dimension_numbers<[1], [0], [0], [1], [0, 0, 1, 1], [], []>} : vector<32x32xf32>, vector<32x32xf32>, vector<32x32xf32> -> vector<32x32xf32>
    %108 = arith.addf %102, %107 : vector<32x32xf32>
    %c0_124 = arith.constant 0 : index
    %c8_125 = arith.constant 8 : index
    %c0_126 = arith.constant 0 : index
    %109 = vector.load %arg9[%c0_124, %c8_125, %c0_126] : memref<2x26x32xf32, #tpu.memory_space<vmem>>, vector<2x16x32xf32>
    %110 = vector.shape_cast %109 : vector<2x16x32xf32> to vector<32x32xf32>
    %c2_127 = arith.constant 2 : index
    %c2_128 = arith.constant 2 : index
    %c0_129 = arith.constant 0 : index
    %c0_130 = arith.constant 0 : index
    %111 = vector.load %arg4[%c2_127, %c2_128, %c0_129, %c0_130] : memref<5x5x32x32xf32, #tpu.memory_space<vmem>>, vector<1x1x32x32xf32>
    %112 = vector.shape_cast %111 : vector<1x1x32x32xf32> to vector<32x32xf32>
    %cst_131 = arith.constant dense<0.000000e+00> : vector<32x32xf32>
    %113 = tpu.matmul %110, %112, %cst_131 {dimension_numbers = #tpu.dot_dimension_numbers<[1], [0], [0], [1], [0, 0, 1, 1], [], []>} : vector<32x32xf32>, vector<32x32xf32>, vector<32x32xf32> -> vector<32x32xf32>
    %114 = arith.addf %108, %113 : vector<32x32xf32>
    %c0_132 = arith.constant 0 : index
    %c9_133 = arith.constant 9 : index
    %c0_134 = arith.constant 0 : index
    %115 = vector.load %arg9[%c0_132, %c9_133, %c0_134] : memref<2x26x32xf32, #tpu.memory_space<vmem>>, vector<2x16x32xf32>
    %116 = vector.shape_cast %115 : vector<2x16x32xf32> to vector<32x32xf32>
    %c2_135 = arith.constant 2 : index
    %c3_136 = arith.constant 3 : index
    %c0_137 = arith.constant 0 : index
    %c0_138 = arith.constant 0 : index
    %117 = vector.load %arg4[%c2_135, %c3_136, %c0_137, %c0_138] : memref<5x5x32x32xf32, #tpu.memory_space<vmem>>, vector<1x1x32x32xf32>
    %118 = vector.shape_cast %117 : vector<1x1x32x32xf32> to vector<32x32xf32>
    %cst_139 = arith.constant dense<0.000000e+00> : vector<32x32xf32>
    %119 = tpu.matmul %116, %118, %cst_139 {dimension_numbers = #tpu.dot_dimension_numbers<[1], [0], [0], [1], [0, 0, 1, 1], [], []>} : vector<32x32xf32>, vector<32x32xf32>, vector<32x32xf32> -> vector<32x32xf32>
    %120 = arith.addf %114, %119 : vector<32x32xf32>
    %c0_140 = arith.constant 0 : index
    %c10_141 = arith.constant 10 : index
    %c0_142 = arith.constant 0 : index
    %121 = vector.load %arg9[%c0_140, %c10_141, %c0_142] : memref<2x26x32xf32, #tpu.memory_space<vmem>>, vector<2x16x32xf32>
    %122 = vector.shape_cast %121 : vector<2x16x32xf32> to vector<32x32xf32>
    %c2_143 = arith.constant 2 : index
    %c4_144 = arith.constant 4 : index
    %c0_145 = arith.constant 0 : index
    %c0_146 = arith.constant 0 : index
    %123 = vector.load %arg4[%c2_143, %c4_144, %c0_145, %c0_146] : memref<5x5x32x32xf32, #tpu.memory_space<vmem>>, vector<1x1x32x32xf32>
    %124 = vector.shape_cast %123 : vector<1x1x32x32xf32> to vector<32x32xf32>
    %cst_147 = arith.constant dense<0.000000e+00> : vector<32x32xf32>
    %125 = tpu.matmul %122, %124, %cst_147 {dimension_numbers = #tpu.dot_dimension_numbers<[1], [0], [0], [1], [0, 0, 1, 1], [], []>} : vector<32x32xf32>, vector<32x32xf32>, vector<32x32xf32> -> vector<32x32xf32>
    %126 = arith.addf %120, %125 : vector<32x32xf32>
    %c2_148 = arith.constant 2 : index
    %c0_149 = arith.constant 0 : index
    %c0_150 = arith.constant 0 : index
    %127 = vector.load %arg5[%c2_148, %c0_149, %c0_150] : memref<5x1x32xf32, #tpu.memory_space<vmem>>, vector<1x1x32xf32>
    %128 = vector.shape_cast %127 : vector<1x1x32xf32> to vector<1x32xf32>
    %129 = vector.broadcast %128 : vector<1x32xf32> to vector<32x32xf32>
    %130 = arith.mulf %126, %129 : vector<32x32xf32>
    %c2_151 = arith.constant 2 : index
    %c0_152 = arith.constant 0 : index
    %c0_153 = arith.constant 0 : index
    %131 = vector.load %arg6[%c2_151, %c0_152, %c0_153] : memref<5x1x32xf32, #tpu.memory_space<vmem>>, vector<1x1x32xf32>
    %132 = vector.shape_cast %131 : vector<1x1x32xf32> to vector<1x32xf32>
    %133 = vector.broadcast %132 : vector<1x32xf32> to vector<32x32xf32>
    %134 = arith.addf %130, %133 : vector<32x32xf32>
    %135 = math.tanh %134 : vector<32x32xf32>
    %136 = vector.shape_cast %135 : vector<32x32xf32> to vector<2x16x32xf32>
    %c0_154 = arith.constant 0 : index
    %c8_155 = arith.constant 8 : index
    %c0_156 = arith.constant 0 : index
    %137 = vector.load %arg9[%c0_154, %c8_155, %c0_156] : memref<2x26x32xf32, #tpu.memory_space<vmem>>, vector<2x16x32xf32>
    tpu.vector_store %arg9[%c0_154, %c8_155, %c0_156], %136 {strides = array<i32>} : memref<2x26x32xf32, #tpu.memory_space<vmem>>, vector<2x16x32xf32>,
    %cst_157 = arith.constant 0.000000e+00 : f32
    %138 = vector.broadcast %cst_157 : f32 to vector<32x32xf32>
    %c0_158 = arith.constant 0 : index
    %c6_159 = arith.constant 6 : index
    %c0_160 = arith.constant 0 : index
    %139 = vector.load %arg9[%c0_158, %c6_159, %c0_160] : memref<2x26x32xf32, #tpu.memory_space<vmem>>, vector<2x16x32xf32>
    %140 = vector.shape_cast %139 : vector<2x16x32xf32> to vector<32x32xf32>
    %c3_161 = arith.constant 3 : index
    %c0_162 = arith.constant 0 : index
    %c0_163 = arith.constant 0 : index
    %c0_164 = arith.constant 0 : index
    %141 = vector.load %arg4[%c3_161, %c0_162, %c0_163, %c0_164] : memref<5x5x32x32xf32, #tpu.memory_space<vmem>>, vector<1x1x32x32xf32>
    %142 = vector.shape_cast %141 : vector<1x1x32x32xf32> to vector<32x32xf32>
    %cst_165 = arith.constant dense<0.000000e+00> : vector<32x32xf32>
    %143 = tpu.matmul %140, %142, %cst_165 {dimension_numbers = #tpu.dot_dimension_numbers<[1], [0], [0], [1], [0, 0, 1, 1], [], []>} : vector<32x32xf32>, vector<32x32xf32>, vector<32x32xf32> -> vector<32x32xf32>
    %144 = arith.addf %138, %143 : vector<32x32xf32>
    %c0_166 = arith.constant 0 : index
    %c7_167 = arith.constant 7 : index
    %c0_168 = arith.constant 0 : index
    %145 = vector.load %arg9[%c0_166, %c7_167, %c0_168] : memref<2x26x32xf32, #tpu.memory_space<vmem>>, vector<2x16x32xf32>
    %146 = vector.shape_cast %145 : vector<2x16x32xf32> to vector<32x32xf32>
    %c3_169 = arith.constant 3 : index
    %c1_170 = arith.constant 1 : index
    %c0_171 = arith.constant 0 : index
    %c0_172 = arith.constant 0 : index
    %147 = vector.load %arg4[%c3_169, %c1_170, %c0_171, %c0_172] : memref<5x5x32x32xf32, #tpu.memory_space<vmem>>, vector<1x1x32x32xf32>
    %148 = vector.shape_cast %147 : vector<1x1x32x32xf32> to vector<32x32xf32>
    %cst_173 = arith.constant dense<0.000000e+00> : vector<32x32xf32>
    %149 = tpu.matmul %146, %148, %cst_173 {dimension_numbers = #tpu.dot_dimension_numbers<[1], [0], [0], [1], [0, 0, 1, 1], [], []>} : vector<32x32xf32>, vector<32x32xf32>, vector<32x32xf32> -> vector<32x32xf32>
    %150 = arith.addf %144, %149 : vector<32x32xf32>
    %c0_174 = arith.constant 0 : index
    %c8_175 = arith.constant 8 : index
    %c0_176 = arith.constant 0 : index
    %151 = vector.load %arg9[%c0_174, %c8_175, %c0_176] : memref<2x26x32xf32, #tpu.memory_space<vmem>>, vector<2x16x32xf32>
    %152 = vector.shape_cast %151 : vector<2x16x32xf32> to vector<32x32xf32>
    %c3_177 = arith.constant 3 : index
    %c2_178 = arith.constant 2 : index
    %c0_179 = arith.constant 0 : index
    %c0_180 = arith.constant 0 : index
    %153 = vector.load %arg4[%c3_177, %c2_178, %c0_179, %c0_180] : memref<5x5x32x32xf32, #tpu.memory_space<vmem>>, vector<1x1x32x32xf32>
    %154 = vector.shape_cast %153 : vector<1x1x32x32xf32> to vector<32x32xf32>
    %cst_181 = arith.constant dense<0.000000e+00> : vector<32x32xf32>
    %155 = tpu.matmul %152, %154, %cst_181 {dimension_numbers = #tpu.dot_dimension_numbers<[1], [0], [0], [1], [0, 0, 1, 1], [], []>} : vector<32x32xf32>, vector<32x32xf32>, vector<32x32xf32> -> vector<32x32xf32>
    %156 = arith.addf %150, %155 : vector<32x32xf32>
    %c0_182 = arith.constant 0 : index
    %c9_183 = arith.constant 9 : index
    %c0_184 = arith.constant 0 : index
    %157 = vector.load %arg9[%c0_182, %c9_183, %c0_184] : memref<2x26x32xf32, #tpu.memory_space<vmem>>, vector<2x16x32xf32>
    %158 = vector.shape_cast %157 : vector<2x16x32xf32> to vector<32x32xf32>
    %c3_185 = arith.constant 3 : index
    %c3_186 = arith.constant 3 : index
    %c0_187 = arith.constant 0 : index
    %c0_188 = arith.constant 0 : index
    %159 = vector.load %arg4[%c3_185, %c3_186, %c0_187, %c0_188] : memref<5x5x32x32xf32, #tpu.memory_space<vmem>>, vector<1x1x32x32xf32>
    %160 = vector.shape_cast %159 : vector<1x1x32x32xf32> to vector<32x32xf32>
    %cst_189 = arith.constant dense<0.000000e+00> : vector<32x32xf32>
    %161 = tpu.matmul %158, %160, %cst_189 {dimension_numbers = #tpu.dot_dimension_numbers<[1], [0], [0], [1], [0, 0, 1, 1], [], []>} : vector<32x32xf32>, vector<32x32xf32>, vector<32x32xf32> -> vector<32x32xf32>
    %162 = arith.addf %156, %161 : vector<32x32xf32>
    %c0_190 = arith.constant 0 : index
    %c10_191 = arith.constant 10 : index
    %c0_192 = arith.constant 0 : index
    %163 = vector.load %arg9[%c0_190, %c10_191, %c0_192] : memref<2x26x32xf32, #tpu.memory_space<vmem>>, vector<2x16x32xf32>
    %164 = vector.shape_cast %163 : vector<2x16x32xf32> to vector<32x32xf32>
    %c3_193 = arith.constant 3 : index
    %c4_194 = arith.constant 4 : index
    %c0_195 = arith.constant 0 : index
    %c0_196 = arith.constant 0 : index
    %165 = vector.load %arg4[%c3_193, %c4_194, %c0_195, %c0_196] : memref<5x5x32x32xf32, #tpu.memory_space<vmem>>, vector<1x1x32x32xf32>
    %166 = vector.shape_cast %165 : vector<1x1x32x32xf32> to vector<32x32xf32>
    %cst_197 = arith.constant dense<0.000000e+00> : vector<32x32xf32>
    %167 = tpu.matmul %164, %166, %cst_197 {dimension_numbers = #tpu.dot_dimension_numbers<[1], [0], [0], [1], [0, 0, 1, 1], [], []>} : vector<32x32xf32>, vector<32x32xf32>, vector<32x32xf32> -> vector<32x32xf32>
    %168 = arith.addf %162, %167 : vector<32x32xf32>
    %c3_198 = arith.constant 3 : index
    %c0_199 = arith.constant 0 : index
    %c0_200 = arith.constant 0 : index
    %169 = vector.load %arg5[%c3_198, %c0_199, %c0_200] : memref<5x1x32xf32, #tpu.memory_space<vmem>>, vector<1x1x32xf32>
    %170 = vector.shape_cast %169 : vector<1x1x32xf32> to vector<1x32xf32>
    %171 = vector.broadcast %170 : vector<1x32xf32> to vector<32x32xf32>
    %172 = arith.mulf %168, %171 : vector<32x32xf32>
    %c3_201 = arith.constant 3 : index
    %c0_202 = arith.constant 0 : index
    %c0_203 = arith.constant 0 : index
    %173 = vector.load %arg6[%c3_201, %c0_202, %c0_203] : memref<5x1x32xf32, #tpu.memory_space<vmem>>, vector<1x1x32xf32>
    %174 = vector.shape_cast %173 : vector<1x1x32xf32> to vector<1x32xf32>
    %175 = vector.broadcast %174 : vector<1x32xf32> to vector<32x32xf32>
    %176 = arith.addf %172, %175 : vector<32x32xf32>
    %177 = math.tanh %176 : vector<32x32xf32>
    %178 = vector.shape_cast %177 : vector<32x32xf32> to vector<2x16x32xf32>
    %c0_204 = arith.constant 0 : index
    %c8_205 = arith.constant 8 : index
    %c0_206 = arith.constant 0 : index
    %179 = vector.load %arg9[%c0_204, %c8_205, %c0_206] : memref<2x26x32xf32, #tpu.memory_space<vmem>>, vector<2x16x32xf32>
    tpu.vector_store %arg9[%c0_204, %c8_205, %c0_206], %178 {strides = array<i32>} : memref<2x26x32xf32, #tpu.memory_space<vmem>>, vector<2x16x32xf32>,
    %cst_207 = arith.constant 0.000000e+00 : f32
    %180 = vector.broadcast %cst_207 : f32 to vector<32x32xf32>
    %c0_208 = arith.constant 0 : index
    %c6_209 = arith.constant 6 : index
    %c0_210 = arith.constant 0 : index
    %181 = vector.load %arg9[%c0_208, %c6_209, %c0_210] : memref<2x26x32xf32, #tpu.memory_space<vmem>>, vector<2x16x32xf32>
    %182 = vector.shape_cast %181 : vector<2x16x32xf32> to vector<32x32xf32>
    %c4_211 = arith.constant 4 : index
    %c0_212 = arith.constant 0 : index
    %c0_213 = arith.constant 0 : index
    %c0_214 = arith.constant 0 : index
    %183 = vector.load %arg4[%c4_211, %c0_212, %c0_213, %c0_214] : memref<5x5x32x32xf32, #tpu.memory_space<vmem>>, vector<1x1x32x32xf32>
    %184 = vector.shape_cast %183 : vector<1x1x32x32xf32> to vector<32x32xf32>
    %cst_215 = arith.constant dense<0.000000e+00> : vector<32x32xf32>
    %185 = tpu.matmul %182, %184, %cst_215 {dimension_numbers = #tpu.dot_dimension_numbers<[1], [0], [0], [1], [0, 0, 1, 1], [], []>} : vector<32x32xf32>, vector<32x32xf32>, vector<32x32xf32> -> vector<32x32xf32>
    %186 = arith.addf %180, %185 : vector<32x32xf32>
    %c0_216 = arith.constant 0 : index
    %c7_217 = arith.constant 7 : index
    %c0_218 = arith.constant 0 : index
    %187 = vector.load %arg9[%c0_216, %c7_217, %c0_218] : memref<2x26x32xf32, #tpu.memory_space<vmem>>, vector<2x16x32xf32>
    %188 = vector.shape_cast %187 : vector<2x16x32xf32> to vector<32x32xf32>
    %c4_219 = arith.constant 4 : index
    %c1_220 = arith.constant 1 : index
    %c0_221 = arith.constant 0 : index
    %c0_222 = arith.constant 0 : index
    %189 = vector.load %arg4[%c4_219, %c1_220, %c0_221, %c0_222] : memref<5x5x32x32xf32, #tpu.memory_space<vmem>>, vector<1x1x32x32xf32>
    %190 = vector.shape_cast %189 : vector<1x1x32x32xf32> to vector<32x32xf32>
    %cst_223 = arith.constant dense<0.000000e+00> : vector<32x32xf32>
    %191 = tpu.matmul %188, %190, %cst_223 {dimension_numbers = #tpu.dot_dimension_numbers<[1], [0], [0], [1], [0, 0, 1, 1], [], []>} : vector<32x32xf32>, vector<32x32xf32>, vector<32x32xf32> -> vector<32x32xf32>
    %192 = arith.addf %186, %191 : vector<32x32xf32>
    %c0_224 = arith.constant 0 : index
    %c8_225 = arith.constant 8 : index
    %c0_226 = arith.constant 0 : index
    %193 = vector.load %arg9[%c0_224, %c8_225, %c0_226] : memref<2x26x32xf32, #tpu.memory_space<vmem>>, vector<2x16x32xf32>
    %194 = vector.shape_cast %193 : vector<2x16x32xf32> to vector<32x32xf32>
    %c4_227 = arith.constant 4 : index
    %c2_228 = arith.constant 2 : index
    %c0_229 = arith.constant 0 : index
    %c0_230 = arith.constant 0 : index
    %195 = vector.load %arg4[%c4_227, %c2_228, %c0_229, %c0_230] : memref<5x5x32x32xf32, #tpu.memory_space<vmem>>, vector<1x1x32x32xf32>
    %196 = vector.shape_cast %195 : vector<1x1x32x32xf32> to vector<32x32xf32>
    %cst_231 = arith.constant dense<0.000000e+00> : vector<32x32xf32>
    %197 = tpu.matmul %194, %196, %cst_231 {dimension_numbers = #tpu.dot_dimension_numbers<[1], [0], [0], [1], [0, 0, 1, 1], [], []>} : vector<32x32xf32>, vector<32x32xf32>, vector<32x32xf32> -> vector<32x32xf32>
    %198 = arith.addf %192, %197 : vector<32x32xf32>
    %c0_232 = arith.constant 0 : index
    %c9_233 = arith.constant 9 : index
    %c0_234 = arith.constant 0 : index
    %199 = vector.load %arg9[%c0_232, %c9_233, %c0_234] : memref<2x26x32xf32, #tpu.memory_space<vmem>>, vector<2x16x32xf32>
    %200 = vector.shape_cast %199 : vector<2x16x32xf32> to vector<32x32xf32>
    %c4_235 = arith.constant 4 : index
    %c3_236 = arith.constant 3 : index
    %c0_237 = arith.constant 0 : index
    %c0_238 = arith.constant 0 : index
    %201 = vector.load %arg4[%c4_235, %c3_236, %c0_237, %c0_238] : memref<5x5x32x32xf32, #tpu.memory_space<vmem>>, vector<1x1x32x32xf32>
    %202 = vector.shape_cast %201 : vector<1x1x32x32xf32> to vector<32x32xf32>
    %cst_239 = arith.constant dense<0.000000e+00> : vector<32x32xf32>
    %203 = tpu.matmul %200, %202, %cst_239 {dimension_numbers = #tpu.dot_dimension_numbers<[1], [0], [0], [1], [0, 0, 1, 1], [], []>} : vector<32x32xf32>, vector<32x32xf32>, vector<32x32xf32> -> vector<32x32xf32>
    %204 = arith.addf %198, %203 : vector<32x32xf32>
    %c0_240 = arith.constant 0 : index
    %c10_241 = arith.constant 10 : index
    %c0_242 = arith.constant 0 : index
    %205 = vector.load %arg9[%c0_240, %c10_241, %c0_242] : memref<2x26x32xf32, #tpu.memory_space<vmem>>, vector<2x16x32xf32>
    %206 = vector.shape_cast %205 : vector<2x16x32xf32> to vector<32x32xf32>
    %c4_243 = arith.constant 4 : index
    %c4_244 = arith.constant 4 : index
    %c0_245 = arith.constant 0 : index
    %c0_246 = arith.constant 0 : index
    %207 = vector.load %arg4[%c4_243, %c4_244, %c0_245, %c0_246] : memref<5x5x32x32xf32, #tpu.memory_space<vmem>>, vector<1x1x32x32xf32>
    %208 = vector.shape_cast %207 : vector<1x1x32x32xf32> to vector<32x32xf32>
    %cst_247 = arith.constant dense<0.000000e+00> : vector<32x32xf32>
    %209 = tpu.matmul %206, %208, %cst_247 {dimension_numbers = #tpu.dot_dimension_numbers<[1], [0], [0], [1], [0, 0, 1, 1], [], []>} : vector<32x32xf32>, vector<32x32xf32>, vector<32x32xf32> -> vector<32x32xf32>
    %210 = arith.addf %204, %209 : vector<32x32xf32>
    %c4_248 = arith.constant 4 : index
    %c0_249 = arith.constant 0 : index
    %c0_250 = arith.constant 0 : index
    %211 = vector.load %arg5[%c4_248, %c0_249, %c0_250] : memref<5x1x32xf32, #tpu.memory_space<vmem>>, vector<1x1x32xf32>
    %212 = vector.shape_cast %211 : vector<1x1x32xf32> to vector<1x32xf32>
    %213 = vector.broadcast %212 : vector<1x32xf32> to vector<32x32xf32>
    %214 = arith.mulf %210, %213 : vector<32x32xf32>
    %c4_251 = arith.constant 4 : index
    %c0_252 = arith.constant 0 : index
    %c0_253 = arith.constant 0 : index
    %215 = vector.load %arg6[%c4_251, %c0_252, %c0_253] : memref<5x1x32xf32, #tpu.memory_space<vmem>>, vector<1x1x32xf32>
    %216 = vector.shape_cast %215 : vector<1x1x32xf32> to vector<1x32xf32>
    %217 = vector.broadcast %216 : vector<1x32xf32> to vector<32x32xf32>
    %218 = arith.addf %214, %217 : vector<32x32xf32>
    %219 = vector.shape_cast %218 : vector<32x32xf32> to vector<2x16x32xf32>
    %220 = vector.extract_strided_slice %219 {offsets = [0, 0, 0], sizes = [2, 16, 16], strides = [1, 1, 1]} : vector<2x16x32xf32> to vector<2x16x16xf32>
    %221 = arith.addf %220, %9 : vector<2x16x16xf32>
    %c0_254 = arith.constant 0 : index
    %c0_255 = arith.constant 0 : index
    %c0_256 = arith.constant 0 : index
    %222 = vector.load %arg8[%c0_254, %c0_255, %c0_256] : memref<2x16x16xf32, #tpu.memory_space<vmem>>, vector<2x16x16xf32>
    tpu.vector_store %arg8[%c0_254, %c0_255, %c0_256], %221 {strides = array<i32>} : memref<2x16x16xf32, #tpu.memory_space<vmem>>, vector<2x16x16xf32>,
    return
  }
  func.func @transform_0(%arg0: i32) -> (i32, i32, i32) {
    %c0_i32 = arith.constant 0 : i32
    %c0_i32_0 = arith.constant 0 : i32
    %c0_i32_1 = arith.constant 0 : i32
    %c0_i32_2 = arith.constant 0 : i32
    return %c0_i32, %c0_i32_0, %c0_i32_1 : i32, i32, i32
  }
  func.func @transform_1(%arg0: i32) -> (i32, i32) {
    %c0_i32 = arith.constant 0 : i32
    %c0_i32_0 = arith.constant 0 : i32
    %c0_i32_1 = arith.constant 0 : i32
    return %c0_i32, %c0_i32_0 : i32, i32
  }
  func.func @transform_2(%arg0: i32) -> (i32, i32) {
    %c0_i32 = arith.constant 0 : i32
    %c0_i32_0 = arith.constant 0 : i32
    %c0_i32_1 = arith.constant 0 : i32
    return %c0_i32, %c0_i32_0 : i32, i32
  }
  func.func @transform_3(%arg0: i32) -> (i32, i32, i32, i32) {
    %c0_i32 = arith.constant 0 : i32
    %c0_i32_0 = arith.constant 0 : i32
    %c0_i32_1 = arith.constant 0 : i32
    %c0_i32_2 = arith.constant 0 : i32
    %c0_i32_3 = arith.constant 0 : i32
    return %c0_i32, %c0_i32_0, %c0_i32_1, %c0_i32_2 : i32, i32, i32, i32
  }
  func.func @transform_4(%arg0: i32) -> (i32, i32, i32) {
    %c0_i32 = arith.constant 0 : i32
    %c0_i32_0 = arith.constant 0 : i32
    %c0_i32_1 = arith.constant 0 : i32
    %c0_i32_2 = arith.constant 0 : i32
    return %c0_i32, %c0_i32_0, %c0_i32_1 : i32, i32, i32
  }
  func.func @transform_5(%arg0: i32) -> (i32, i32, i32) {
    %c0_i32 = arith.constant 0 : i32
    %c0_i32_0 = arith.constant 0 : i32
    %c0_i32_1 = arith.constant 0 : i32
    %c0_i32_2 = arith.constant 0 : i32
    return %c0_i32, %c0_i32_0, %c0_i32_1 : i32, i32, i32
  }
  func.func @transform_6(%arg0: i32) -> (i32, i32, i32) {
    %c0_i32 = arith.constant 0 : i32
    %c0_i32_0 = arith.constant 0 : i32
    %c0_i32_1 = arith.constant 0 : i32
    %c0_i32_2 = arith.constant 0 : i32
    return %c0_i32, %c0_i32_0, %c0_i32_1 : i32, i32, i32
  }
  func.func @transform_7(%arg0: i32) -> (i32, i32, i32) {
    %c0_i32 = arith.constant 0 : i32
    %c0_i32_0 = arith.constant 0 : i32
    %c0_i32_1 = arith.constant 0 : i32
    %c0_i32_2 = arith.constant 0 : i32
    return %c0_i32, %c0_i32_0, %c0_i32_1 : i32, i32, i32
  }
}

</mosaic_0001>

<bundles_post_ra>
// kernel: custom-call.4
= control target key start
LH: loop header
LB: loop body
LE: loop exit
PB: predicated region body
PF: predicated region fallthrough
CT: control target
= control target key end

     0   :  { %s6_s0 = inlined_call_operand.vmem [shape: u32[2,8], index: 0, kind: output, shape index: {}]  }

// kernel: ne.7
= control target key start
LH: loop header
LB: loop body
LE: loop exit
PB: predicated region body
PF: predicated region fallthrough
CT: control target
= control target key end

     0   :  { %v15_v2 = vmov 0   ;;  %s40_s0 = inlined_call_operand.vmem [shape: f32[2,8], index: 0, kind: input, shape index: {}, may-alias: {0,1}]   ;;  %s41_s1 = inlined_call_operand.vmem [shape: f32[2,8], index: 1, kind: input, shape index: {}, may-alias: {0,1}]   ;;  %s42_s2 = inlined_call_operand.vmem [shape: pred[2,8], index: 2, kind: output, shape index: {}]  }
   0x1   :  { %v3_v0 = vld [vmem:[%s40_s0] sm:$0x3] }
   0x2   :  { %v4_v1 = vld [vmem:[%s41_s1] sm:$0x3] }
   0x3   :  { %vm7_vm0 = vcmp.ne.f32.partialorder %v3_v0, %v4_v1 }
   0x4   :  { %v8_v3 = vsel %vm7_vm0, 1, %v15_v2 }
   0x5   :  { %v10_v4 = vpack.c.b16 %v15_v2, %v8_v3 }
   0x7   :  { %v11_v5 = vpack.c.b8 %v15_v2, %v10_v4 }
   0x9   :  { %13 = vst [vmem:[%s42_s2] sm:$0x1] %v11_v5 }

// kernel: squeeze.17
= control target key start
LH: loop header
LB: loop body
LE: loop exit
PB: predicated region body
PF: predicated region fallthrough
CT: control target
= control target key end

     0   :  { %vm7_vm0 = vcmask 64512   ;;  %s39_s0 = inlined_call_operand.vmem [shape: f32[16], index: 0, kind: input, shape index: {}]   ;;  %s40_s1 = inlined_call_operand.vmem [shape: f32[2,8], index: 1, kind: output, shape index: {}]  }
   0x1   :  { %v4_v0 = vld [vmem:[%s39_s0] sm:$0x1]  ;;  %s22_s0 = smov 120  }
   0x2   :  { %5 = vst [vmem:[#allocation1] sm:$0x1] %v4_v0 }
   0x9   :  { %v9_v1 = vld [vmem:[#allocation1] sm:$0x1]  }
   0xa   :  { %v6_v2 = vld [vmem:[#allocation1] sm:$0x1]   ;;  %10 = vrot.lane.b32.xlu0 %v9_v1, %s22_s0 }
   0xb   :  { %8 = vst.msk [vmem:[#allocation0] sm:$0x1] %vm7_vm0, %v6_v2  }
  0x7c   :  { %v11_v3 = vpop.permute.xlu0 %10  }
  0x7d   :  { %14 = vst.msk [vmem:[#allocation0 + $0x1] sm:$0x1] %vm7_vm0, %v11_v3  }
  0x84   :  { %v18_v4 = vld [vmem:[#allocation0] sm:$0x3] }
  0x85   :  { %20 = vst [vmem:[%s40_s1] sm:$0x3] %v18_v4 }

// kernel: _lambda_.7
= control target key start
LH: loop header
LB: loop body
LE: loop exit
PB: predicated region body
PF: predicated region fallthrough
CT: control target
= control target key end

     0   :  { %s1261_s0 = inlined_call_operand.vmem [shape: s32[2], index: 0, kind: input, shape index: {}]   ;;  %s1262_s1 = inlined_call_operand.vmem [shape: f32[2,8,32], index: 1, kind: input, shape index: {}]   ;;  %s1263_s2 = inlined_call_operand.vmem [shape: f32[1,3,32,32], index: 2, kind: input, shape index: {}]   ;;  %s1264_s3 = inlined_call_operand.vmem [shape: f32[1,1,32], index: 3, kind: input, shape index: {}]   ;;  %s1265_s4 = inlined_call_operand.vmem [shape: f32[1,1,32], index: 4, kind: input, shape index: {}]   ;;  %s1266_s5 = inlined_call_operand.vmem [shape: f32[1,1,32], index: 5, kind: input, shape index: {}]   ;;  %s1267_s6 = inlined_call_operand.vmem [shape: f32[1,3,32,32], index: 6, kind: input, shape index: {}]   ;;  %s1268_s7 = inlined_call_operand.vmem [shape: f32[1,1,32], index: 7, kind: input, shape index: {}]   ;;  %s1269_s8 = inlined_call_operand.vmem [shape: f32[1,1,32], index: 8, kind: input, shape index: {}]   ;;  %s1270_s9 = inlined_call_operand.vmem [shape: f32[1,1,32], index: 9, kind: input, shape index: {}]   ;;  %s1271_s10 = inlined_call_operand.vmem [shape: f32[1,1,32], index: 10, kind: input, shape index: {}]   ;;  %s1272_s12 = inlined_call_operand.hbm [shape: f32[1,2,8], index: 12, kind: output, shape index: {}]   ;;  %s1273_s11 = inlined_call_operand.<no memory space> [shape: f32[1,1,1], index: 11, kind: input, shape index: {}]  }
   0x1   :  { %s17_s23 = sshll.u32 %s1261_s0, 4  ;;  %v21_v0 = vstv %s1273_s11  ;;  %s18_s23 = int_to_ptr.vmem [resolvable:$true] %s17_s23 }
   0x2   :  { %22 = vst [vmem:[#allocation5] sm:$0x1] %v21_v0  ;;  %s1006_s26 = scalar_lea.vmem %s18_s23, 16  ;;  %p1011_p1 = scmp.lt.s32.totalorder %s18_s23, %s18_s23 }
   0x3   :  { %p1007_p0 = scmp.ne.s32.totalorder %s18_s23, %s1006_s26  ;;  %p1012_p2 = scmp.lt.s32.totalorder %s1006_s26, %s1006_s26 }
   0x5   :  { %p1013_p3 = por %p1012_p2, %p1011_p1 }
   0x7   :  { %p1014_p4 = pnand %p1013_p3, %p1007_p0 }
   0x9   :  { %1017 = shalt.err (!%p1014_p4)  }
   0xa   :  { %s1044_s27 = smov [#allocation4]  }
   0xb   :  { %20 = dma.vmem_to_smem %s18_s23, 16, %s1044_s27, [#allocation3] }
   0xc   :  { %1040 = dma.done.wait [#allocation3], 16 }
   0xd   :  { %1041 = vsyncadd [#allocation3], 4294967280 }
   0xe   :  { %24 = sfence }
   0xf   :  { %v797_v1 = vld [vmem:[%s1263_s2 + $0x20] sm:$0xff]  ;;  %v798_v2 = vld [vmem:[%s1263_s2 + $0x28] sm:$0xff]  ;;  %v799_v3 = vld [vmem:[%s1263_s2 + $0x30] sm:$0xff]  ;;  %vm48_vm0 = vcmask 261120   ;;  %vm51_vm1 = vcmask 253952   ;;  %v1045_v6 = vmov 0.0  }
  0x10   :  { %v935_v4 = vpack.c.bf16 %v798_v2, %v797_v1  ;;  %v800_v5 = vld [vmem:[%s1263_s2 + $0x38] sm:$0xff]  ;;  %50 = vst.msk [vmem:[#allocation2 + $0x8] sm:$0xff] %vm48_vm0, %v1045_v6  ;;  %v56_v7 = vld [vmem:[%s1262_s1] sm:$0xff]  ;;  %49 = vst.msk [vmem:[#allocation2] sm:$0xff] %vm48_vm0, %v1045_v6 }
  0x11   :  { %53 = vst.msk [vmem:[#allocation2 + $0x18] sm:$0xff] %vm48_vm0, %v1045_v6  ;;  %54 = vst.msk [vmem:[#allocation2 + $0x20] sm:$0xff] %vm48_vm0, %v1045_v6  ;;  %v57_v8 = vld [vmem:[%s1262_s1 + $0x8] sm:$0xff]  ;;  %v939_v9 = vpack.c.bf16 %v800_v5, %v799_v3  ;;  %v74_v10 = vld [vmem:[%s1263_s2] sm:$0xff] }
  0x12   :  { %52 = vst.msk [vmem:[#allocation2 + $0x10] sm:$0x1] %vm51_vm1, %v1045_v6  ;;  %55 = vst.msk [vmem:[#allocation2 + $0x28] sm:$0x1] %vm51_vm1, %v1045_v6  ;;  %v75_v11 = vld [vmem:[%s1263_s2 + $0x8] sm:$0xff]  ;;  %936 = vmatprep.subr.bf16.mxu0 %v935_v4 }
  0x13   :  { %70 = vst.msk [vmem:[#allocation2 + $0x8] sm:$0xff] %vm48_vm0, %v56_v7  ;;  %71 = vst.msk [vmem:[#allocation2 + $0x20] sm:$0xff] %vm48_vm0, %v57_v8  ;;  %938 = vmatpush3.bf16.msra.mxu0 %v935_v4 }
  0x14   :  { %25 = vsyncpa [#allocation7], 0  ;;  %940 = vmatprep.subr.bf16.mxu0 %v939_v9  ;;  %v943_v12 = vpack.c.bf16 %v75_v11, %v74_v10  ;;  %v76_v13 = vld [vmem:[%s1263_s2 + $0x10] sm:$0xff]  ;;  %v77_v14 = vld [vmem:[%s1263_s2 + $0x18] sm:$0xff]  ;;  %s60_s22 = sld [smem:[#allocation4]]  ;;  %s796_s23 = sld [smem:[#allocation4 + $0x1]] }
  0x15   :  { %v947_v17 = vpack.c.bf16 %v77_v14, %v76_v13  ;;  %v805_v19 = vld [vmem:[%s1263_s2 + $0x40] sm:$0xff]  ;;  %v806_v20 = vld [vmem:[%s1263_s2 + $0x48] sm:$0xff]  ;;  %v807_v22 = vld [vmem:[%s1263_s2 + $0x50] sm:$0xff]  ;;  %vm68_vm4 = vcmask 1040384   ;;  %vm777_vm5 = vcmask 1041409   ;;  %vm780_vm6 = vcmask 58368  }
  0x16   :  { %v951_v21 = vpack.c.bf16 %v806_v20, %v805_v19  ;;  %v808_v23 = vld [vmem:[%s1263_s2 + $0x58] sm:$0xff]  ;;  %v811_v28 = vld [vmem:[%s1264_s3] ss:$0 sm:$0xff]  ;;  %v815_v48 = vld [vmem:[%s1267_s6 + $0x28] sm:$0xff] }
  0x17   :  { %942 = vmatpush3.bf16.msra.mxu0 %v939_v9  ;;  %v955_v25 = vpack.c.bf16 %v808_v23, %v807_v22  ;;  %v814_v47 = vld [vmem:[%s1267_s6 + $0x20] sm:$0xff]  ;;  %v816_v50 = vld [vmem:[%s1267_s6 + $0x30] sm:$0xff]  ;;  %v817_v51 = vld [vmem:[%s1267_s6 + $0x38] sm:$0xff] }
  0x18   :  { %944 = vmatprep.subr.bf16.mxu0 %v943_v12  ;;  %v959_v49 = vpack.c.bf16 %v815_v48, %v814_v47  ;;  %v963_v52 = vpack.c.bf16 %v817_v51, %v816_v50  ;;  %v397_v53 = vld [vmem:[%s1267_s6] sm:$0xff]  ;;  %v398_v54 = vld [vmem:[%s1267_s6 + $0x8] sm:$0xff]  ;;  %v399_v9 = vld [vmem:[%s1267_s6 + $0x10] sm:$0xff] }
  0x19   :  { %v967_v55 = vpack.c.bf16 %v398_v54, %v397_v53  ;;  %v812_v63 = vld [vmem:[%s1265_s4] ss:$0 sm:$0xff]  ;;  %v400_v10 = vld [vmem:[%s1267_s6 + $0x18] sm:$0xff]  ;;  %v823_v14 = vld [vmem:[%s1267_s6 + $0x48] sm:$0xff] }
  0x1a   :  { %v78_v15 = vld [vmem:[#allocation2 + $0x8] sm:$0xff]  ;;  %v79_v16 = vld [vmem:[#allocation2 + $0x20] sm:$0xff]  ;;  %960 = vmatprep.subr.bf16.mxu1 %v959_v49  ;;  %v971_v11 = vpack.c.bf16 %v400_v10, %v399_v9 }
  0x1b   :  { %v72_v18 = vld [vmem:[#allocation2 + $0x7] sm:$0xff]  ;;  %877 = vmatprep.mubr.msk.f32.mxu0 %vm48_vm0, %v78_v15  ;;  %v73_v24 = vld [vmem:[#allocation2 + $0x1f] sm:$0xff]  ;;  %962 = vmatpush3.bf16.msra.mxu1 %v959_v49 }
  0x1c   :  { %878 = vmatmul.mubr.msk.f32.vlgmr.msra.gmra.mrb[0].mxu0 %vm48_vm0, %v79_v16  ;;  %v247_v26 = vld [vmem:[#allocation2 + $0x9] sm:$0xff]  ;;  %v248_v27 = vld [vmem:[#allocation2 + $0x21] sm:$0xff]  ;;  %964 = vmatprep.subr.bf16.mxu1 %v963_v52  ;;  %v813_v1 = vld [vmem:[%s1266_s5] ss:$0 sm:$0xff] }
  0x1d   :  { %946 = vmatpush3.bf16.msra.mxu0 %v943_v12  ;;  %888 = vmatprep.mubr.msk.f32.mxu0 %vm48_vm0, %v72_v18  ;;  %v822_v13 = vld [vmem:[%s1267_s6 + $0x40] sm:$0xff]  ;;  %v825_v18 = vld [vmem:[%s1267_s6 + $0x58] sm:$0xff] }
  0x1e   :  { %948 = vmatprep.subr.bf16.mxu0 %v947_v17  ;;  %v975_v16 = vpack.c.bf16 %v823_v14, %v822_v13  ;;  %v828_v23 = vld [vmem:[%s1268_s7] ss:$0 sm:$0xff]  ;;  %v832_v13 = vld [vmem:[#allocation5] ss:$0 sm:$0xff] }
  0x1f   :  { %966 = vmatpush3.bf16.msra.mxu1 %v963_v52  ;;  %v829_v50 = vld [vmem:[%s1269_s8] ss:$0 sm:$0xff]  ;;  %s1048_s8 = smov [#allocation6]  }
  0x20   :  { %968 = vmatprep.subr.bf16.mxu1 %v967_v55  ;;  %v830_v53 = vld [vmem:[%s1270_s9] ss:$0 sm:$0xff]  ;;  %s788_s9 = sshll.u32 %s1048_s8, 4  ;;  %s789_s9 = int_to_ptr.vmem [resolvable:$true] %s788_s9 }
  0x21   :  { %950 = vmatpush3.bf16.msra.mxu0 %v947_v17  ;;  %v824_v17 = vld [vmem:[%s1267_s6 + $0x50] sm:$0xff]  ;;  %p1023_p6 = scmp.lt.s32.totalorder %s789_s9, %s789_s9 }
  0x22   :  { %952 = vmatprep.subr.bf16.mxu0 %v951_v21  ;;  %v979_v19 = vpack.c.bf16 %v825_v18, %v824_v17 }
  0x24   :  { %889 = vmatmul.mubr.msk.f32.vlgmr.msra.gmra.mrb[0].mxu0 %vm48_vm0, %v73_v24 }
  0x25   :  { %954 = vmatpush3.bf16.msra.mxu0 %v951_v21  ;;  %899 = vmatprep.mubr.msk.f32.mxu0 %vm48_vm0, %v247_v26 }
  0x26   :  { %956 = vmatprep.subr.bf16.mxu0 %v955_v25 }
  0x29   :  { %958 = vmatpush3.bf16.msra.mxu0 %v955_v25 }
  0x2c   :  { %900 = vmatmul.mubr.msk.f32.vlgmr.msra.gmra.mrb[0].mxu0 %vm48_vm0, %v248_v27 }
  0xff   :  { %v901_v29 = vpop.f32.mrb[0].mxu0 }
 0x100   :  { %v326_v30 = vpop.f32.mrb[1].mxu0  ;;  %v345_v31 = vadd.f32 %v901_v29, %v811_v28 }
 0x101   :  { %v344_v32 = vadd.f32 %v811_v28, %v326_v30 }
 0x102   :  { %v347_v34 = vmax.f32 %v345_v31, 0.0 }
 0x103   :  { %v346_v33 = vmax.f32 %v344_v32, 0.0 }
 0x104   :  { %v353_v36 = vsel %vm48_vm0, %v347_v34, 0.0 }
 0x105   :  { %v350_v35 = vsel %vm48_vm0, %v346_v33, 0.0 }
 0x106   :  { %351 = vadd.xlane.f32.xlu0 %v350_v35 }
 0x10a   :  { %354 = vadd.xlane.f32.xlu0 %v353_v36 }
 0x193   :  { %v352_v37 = vpop.xlane.xlu0 %351 }
 0x194   :  { %v357_v38 = vmul.f32 0.03125, %v352_v37 }
 0x196   :  { %v359_v39 = vsub.f32 %v346_v33, %v357_v38 }
 0x197   :  { %v355_v40 = vpop.xlane.xlu0 %354 }
 0x198   :  { %v358_v41 = vmul.f32 0.03125, %v355_v40  ;;  %v361_v42 = vmul.f32 %v359_v39, %v359_v39 }
 0x19a   :  { %v360_v43 = vsub.f32 %v347_v34, %v358_v41  ;;  %v363_v44 = vsel %vm48_vm0, %v361_v42, 0.0  ;;  %v1046_v42 = vmov 0  }
 0x19b   :  { %364 = vadd.xlane.f32.xlu1 %v363_v44  ;;  %996 = vset.pattern.permute.xlu0 %v1046_v42 }
 0x19c   :  { %v362_v45 = vmul.f32 %v360_v43, %v360_v43  ;;  %997 = vset.pattern.permute.xlu1 %v1046_v42 }
 0x19e   :  { %v366_v46 = vsel %vm48_vm0, %v362_v45, 0.0 }
 0x19f   :  { %367 = vadd.xlane.f32.xlu1 %v366_v46 }
 0x228   :  { %v365_v56 = vpop.xlane.xlu1 %364 }
 0x229   :  { %v369_v57 = vmul.f32 0.03125, %v365_v56  ;;  %v831_v56 = vld [vmem:[%s1271_s10] ss:$0 sm:$0xff]  ;;  %s1018_s10 = scalar_lea.vmem %s789_s9, 32 }
 0x22a   :  { %p1019_p5 = scmp.ne.s32.totalorder %s789_s9, %s1018_s10  ;;  %p1024_p7 = scmp.lt.s32.totalorder %s1018_s10, %s1018_s10 }
 0x22b   :  { %v371_v58 = vadd.f32 1e-05, %v369_v57 }
 0x22c   :  { %v368_v59 = vpop.xlane.xlu1 %367  ;;  %p1025_p8 = por %p1024_p7, %p1023_p6 }
 0x22d   :  { %998 = vrsqrt.f32 %v371_v58  ;;  %v370_v60 = vmul.f32 0.03125, %v368_v59 }
 0x22e   :  { %p1026_p9 = pnand %p1025_p8, %p1019_p5 }
 0x22f   :  { %v372_v61 = vadd.f32 1e-05, %v370_v60  ;;  %v58_v60 = vlaneseq }
 0x231   :  { %1000 = vrsqrt.f32 %v372_v61 }
 0x237   :  { %v999_v62 = vpop.eup %998 }
 0x238   :  { %v375_v0 = vmul.f32 %v999_v62, %v359_v39 }
 0x23a   :  { %v383_v2 = vmul.f32 %v812_v63, %v375_v0 }
 0x23b   :  { %v1001_v3 = vpop.eup %1000 }
 0x23c   :  { %v391_v4 = vadd.f32 %v813_v1, %v383_v2  ;;  %v376_v5 = vmul.f32 %v1001_v3, %v360_v43  ;;  %v61_v2 = vstv %s60_s22  ;;  %v65_v3 = vstv %s796_s23 }
 0x23e   :  { %393 = vst.msk [vmem:[#allocation2 + $0x8] sm:$0xff] %vm48_vm0, %v391_v4  ;;  %v384_v6 = vmul.f32 %v812_v63, %v376_v5  ;;  %v744_v4 = vshrl.u32 %v58_v60, 7  ;;  %v1047_v5 = vmov 1.0  }
 0x240   :  { %v392_v7 = vadd.f32 %v813_v1, %v384_v6  ;;  %v59_v1 = vand.u32 127, %v58_v60 }
 0x242   :  { %394 = vst.msk [vmem:[#allocation2 + $0x20] sm:$0xff] %vm48_vm0, %v392_v7  ;;  %vm62_vm2 = vcmp.ge.s32.totalorder %v59_v1, %v61_v2  ;;  %vm66_vm3 = vcmp.ge.s32.totalorder %v59_v1, %v65_v3 }
 0x243   :  { %v63_v6 = vsel %vm62_vm2, 0.0, %v1047_v5  ;;  %v67_v7 = vsel %vm66_vm3, 0.0, %v1047_v5 }
 0x244   :  { %v69_v9 = vsel %vm68_vm4, %v63_v6, %v67_v7 }
 0x245   :  { %v401_v8 = vld [vmem:[#allocation2 + $0x8] sm:$0xff] }
 0x246   :  { %910 = vmatprep.mubr.msk.f32.mxu1 %vm48_vm0, %v401_v8  ;;  %v395_v15 = vld [vmem:[#allocation2 + $0x7] sm:$0xff]  ;;  %v745_v8 = vsub.s32 0, %v744_v4 }
 0x247   :  { %v570_v21 = vld [vmem:[#allocation2 + $0x9] sm:$0xff] }
 0x248   :  { %v746_v10 = vrot.slane %v69_v9, %v745_v8 }
 0x249   :  { %v402_v12 = vld [vmem:[#allocation2 + $0x20] sm:$0xff] }
 0x24a   :  { %911 = vmatmul.mubr.msk.f32.vlgmr.msra.gmra.mrb[0].mxu1 %vm48_vm0, %v402_v12  ;;  %v396_v20 = vld [vmem:[#allocation2 + $0x1f] sm:$0xff] }
 0x24b   :  { %970 = vmatpush3.bf16.msra.mxu1 %v967_v55  ;;  %921 = vmatprep.mubr.msk.f32.mxu1 %vm48_vm0, %v395_v15  ;;  %v571_v22 = vld [vmem:[#allocation2 + $0x21] sm:$0xff] }
 0x24c   :  { %972 = vmatprep.subr.bf16.mxu1 %v971_v11 }
 0x24f   :  { %974 = vmatpush3.bf16.msra.mxu1 %v971_v11  ;;  %v752_v11 = vsub.s32 1, %v744_v4 }
 0x250   :  { %976 = vmatprep.subr.bf16.mxu1 %v975_v16 }
 0x251   :  { %v753_v12 = vrot.slane %v69_v9, %v752_v11 }
 0x252   :  { %922 = vmatmul.mubr.msk.f32.vlgmr.msra.gmra.mrb[0].mxu1 %vm48_vm0, %v396_v20 }
 0x253   :  { %978 = vmatpush3.bf16.msra.mxu1 %v975_v16  ;;  %932 = vmatprep.mubr.msk.f32.mxu1 %vm48_vm0, %v570_v21 }
 0x254   :  { %980 = vmatprep.subr.bf16.mxu1 %v979_v19 }
 0x257   :  { %982 = vmatpush3.bf16.msra.mxu1 %v979_v19 }
 0x25a   :  { %933 = vmatmul.mubr.msk.f32.vlgmr.msra.gmra.mrb[0].mxu1 %vm48_vm0, %v571_v22 }
 0x32d   :  { %v934_v24 = vpop.f32.mrb[0].mxu1 }
 0x32e   :  { %v668_v25 = vadd.f32 %v934_v24, %v828_v23  ;;  %v649_v26 = vpop.f32.mrb[1].mxu1  ;;  %v771_v24 = vsub.s32 %v59_v1, %v744_v4 }
 0x32f   :  { %v667_v27 = vadd.f32 %v828_v23, %v649_v26 }
 0x330   :  { %v670_v28 = vmax.f32 %v668_v25, 0.0 }
 0x331   :  { %v669_v29 = vmax.f32 %v667_v27, 0.0 }
 0x332   :  { %v676_v30 = vsel %vm48_vm0, %v670_v28, 0.0 }
 0x333   :  { %677 = vadd.xlane.f32.xlu1 %v676_v30  ;;  %v673_v31 = vsel %vm48_vm0, %v669_v29, 0.0 }
 0x334   :  { %674 = vadd.xlane.f32.xlu0 %v673_v31 }
 0x3c0   :  { %v678_v32 = vpop.xlane.xlu1 %677 }
 0x3c1   :  { %v680_v33 = vmul.f32 0.03125, %v678_v32  ;;  %v675_v34 = vpop.xlane.xlu0 %674 }
 0x3c2   :  { %v679_v35 = vmul.f32 0.03125, %v675_v34 }
 0x3c3   :  { %v682_v36 = vsub.f32 %v670_v28, %v680_v33 }
 0x3c4   :  { %v681_v37 = vsub.f32 %v669_v29, %v679_v35 }
 0x3c5   :  { %v684_v38 = vmul.f32 %v682_v36, %v682_v36 }
 0x3c6   :  { %v683_v39 = vmul.f32 %v681_v37, %v681_v37 }
 0x3c7   :  { %v688_v40 = vsel %vm48_vm0, %v684_v38, 0.0 }
 0x3c8   :  { %689 = vadd.xlane.f32.xlu1 %v688_v40  ;;  %v685_v41 = vsel %vm48_vm0, %v683_v39, 0.0 }
 0x3c9   :  { %686 = vadd.xlane.f32.xlu0 %v685_v41 }
 0x455   :  { %v690_v43 = vpop.xlane.xlu1 %689 }
 0x456   :  { %v692_v44 = vmul.f32 0.03125, %v690_v43  ;;  %v687_v45 = vpop.xlane.xlu0 %686 }
 0x457   :  { %v691_v46 = vmul.f32 0.03125, %v687_v45 }
 0x458   :  { %v694_v47 = vadd.f32 1e-05, %v692_v44 }
 0x459   :  { %v693_v48 = vadd.f32 1e-05, %v691_v46 }
 0x45a   :  { %1002 = vrsqrt.f32 %v694_v47 }
 0x45b   :  { %1004 = vrsqrt.f32 %v693_v48 }
 0x464   :  { %v1003_v49 = vpop.eup %1002 }
 0x465   :  { %v1005_v51 = vpop.eup %1004  ;;  %v698_v52 = vmul.f32 %v1003_v49, %v682_v36 }
 0x466   :  { %v697_v54 = vmul.f32 %v1005_v51, %v681_v37 }
 0x467   :  { %v706_v55 = vmul.f32 %v829_v50, %v698_v52 }
 0x468   :  { %v705_v57 = vmul.f32 %v829_v50, %v697_v54 }
 0x469   :  { %v714_v58 = vadd.f32 %v830_v53, %v706_v55 }
 0x46a   :  { %v713_v59 = vadd.f32 %v830_v53, %v705_v57 }
 0x46b   :  { %v723_v61 = vmul.f32 %v831_v56, %v714_v58 }
 0x46c   :  { %v722_v62 = vmul.f32 %v831_v56, %v713_v59 }
 0x46d   :  { %v727_v63 = vsel %vm48_vm0, %v723_v61, 0.0 }
 0x46e   :  { %728 = vadd.xlane.f32.xlu1 %v727_v63  ;;  %v724_v0 = vsel %vm48_vm0, %v722_v62, 0.0 }
 0x46f   :  { %725 = vadd.xlane.f32.xlu0 %v724_v0 }
 0x47f   :  { %748 = vbcast.lane.b32.xlu1 %v746_v10, 256 }
 0x483   :  { %755 = vbcast.lane.b32.xlu1 %v753_v12, 256 }
 0x485   :  { %737 = vperm.xlu0 %996, %v832_v13  }
 0x4fb   :  { %v729_v14 = vpop.xlane.xlu1 %728 }
 0x4fc   :  { %v726_v15 = vpop.xlane.xlu0 %725 }
 0x4ff   :  { %v749_v16 = vpop.permute.xlu1 %748 }
 0x503   :  { %v756_v21 = vpop.permute.xlu1 %755 }
 0x504   :  { %v738_v17 = vpop.permute.xlu0 %737 }
 0x505   :  { %v740_v18 = vadd.f32 %v738_v17, %v726_v15  ;;  %v741_v19 = vadd.f32 %v738_v17, %v729_v14 }
 0x507   :  { %v759_v20 = vmul.f32 %v749_v16, %v740_v18  ;;  %v760_v22 = vmul.f32 %v756_v21, %v741_v19 }
 0x509   :  { %764 = vperm.xlu1 %997, %v759_v20  }
 0x50d   :  { %767 = vperm.xlu1 %997, %v760_v22  }
 0x588   :  { %v765_v23 = vpop.permute.xlu1 %764 }
 0x589   :  { %v772_v26 = vrot.slane %v765_v23, %v771_v24 }
 0x58c   :  { %v768_v25 = vpop.permute.xlu1 %767 }
 0x58d   :  { %v776_v27 = vrot.slane %v768_v25, %v771_v24 }
 0x58f   :  { %v778_v28 = vsel %vm777_vm5, %v776_v27, %v772_v26 }
 0x590   :  { %781 = vst.msk [vmem:[#allocation6] sm:$0x3] %vm780_vm6, %v778_v28 }
 0x591   :  { %1029 = shalt.err (!%p1026_p9)
}
 0x592   :  { %s1030_s27 = scalar_lea.hbm %s1272_s12, 32 }
 0x593   :  { %p1031_p10 = scmp.ne.s32.totalorder %s1272_s12, %s1030_s27  ;;  %p1034_p11 = scmp.lt.u32.totalorder %s1030_s27, %s1272_s12 }
 0x595   :  { %p1036_p12 = pnand %p1034_p11, %p1031_p10 }
 0x597   :  { %1039 = shalt.err (!%p1036_p12)
}
 0x598   :  { %791 = dma.vmem_to_hbm [thread:$0]  %s789_s9, 32, %s1272_s12, [#allocation7]  }
 0x599   :  { %1042 = dma.done.wait [#allocation7], 32  }
 0x59a   :  { %1043 = vsyncadd [#allocation7], 4294967264 }
 0x59b   :  { %795 = vsyncpa [#allocation7], 1 }

// kernel: _lambda_.6
= control target key start
LH: loop header
LB: loop body
LE: loop exit
PB: predicated region body
PF: predicated region fallthrough
CT: control target
= control target key end

     0   :  { %s2282_s0 = inlined_call_operand.vmem [shape: s32[2], index: 0, kind: input, shape index: {}]   ;;  %s2283_s1 = inlined_call_operand.vmem [shape: f32[2,8,32], index: 1, kind: input, shape index: {}]   ;;  %s2284_s2 = inlined_call_operand.vmem [shape: f32[2,3,32,32], index: 2, kind: input, shape index: {}]   ;;  %s2285_s3 = inlined_call_operand.vmem [shape: f32[2,1,32], index: 3, kind: input, shape index: {}]   ;;  %s2286_s4 = inlined_call_operand.vmem [shape: f32[2,1,32], index: 4, kind: input, shape index: {}]   ;;  %s2287_s5 = inlined_call_operand.vmem [shape: f32[2,1,32], index: 5, kind: input, shape index: {}]   ;;  %s2288_s6 = inlined_call_operand.vmem [shape: f32[2,3,32,32], index: 6, kind: input, shape index: {}]   ;;  %s2289_s7 = inlined_call_operand.vmem [shape: f32[2,1,32], index: 7, kind: input, shape index: {}]   ;;  %s2290_s8 = inlined_call_operand.vmem [shape: f32[2,1,32], index: 8, kind: input, shape index: {}]   ;;  %s2291_s9 = inlined_call_operand.vmem [shape: f32[2,1,32], index: 9, kind: input, shape index: {}]   ;;  %s2292_s10 = inlined_call_operand.vmem [shape: f32[2,1,32], index: 10, kind: input, shape index: {}]   ;;  %s2293_s11 = inlined_call_operand.vmem [shape: f32[2,1,1], index: 11, kind: input, shape index: {}]   ;;  %s2294_s12 = inlined_call_operand.vmem [shape: f32[2,2,8], index: 12, kind: output, shape index: {}]  }
   0x1   :  { %s17_s23 = sshll.u32 %s2282_s0, 4  ;;  %s18_s23 = int_to_ptr.vmem [resolvable:$true] %s17_s23 }
   0x2   :  { %s1914_s24 = scalar_lea.vmem %s18_s23, 16  ;;  %p1919_p1 = scmp.lt.s32.totalorder %s18_s23, %s18_s23 }
   0x3   :  { %p1915_p0 = scmp.ne.s32.totalorder %s18_s23, %s1914_s24  ;;  %p1920_p2 = scmp.lt.s32.totalorder %s1914_s24, %s1914_s24 }
   0x5   :  { %p1921_p3 = por %p1920_p2, %p1919_p1 }
   0x7   :  { %p1922_p4 = pnand %p1921_p3, %p1915_p0 }
   0x9   :  { %1925 = shalt.err (!%p1922_p4)  }
   0xa   :  { %s1928_s25 = smov [#allocation4]  }
   0xb   :  { %20 = dma.vmem_to_smem %s18_s23, 16, %s1928_s25, [#allocation3] }
   0xc   :  { %1926 = dma.done.wait [#allocation3], 16 }
   0xd   :  { %1927 = vsyncadd [#allocation3], 4294967280 }
   0xe   :  { %22 = sfence }
   0xf   :  { %v1487_v0 = vld [vmem:[%s2284_s2 + $0x20] sm:$0xff]  ;;  %v1488_v1 = vld [vmem:[%s2284_s2 + $0x28] sm:$0xff]  ;;  %v1489_v2 = vld [vmem:[%s2284_s2 + $0x30] sm:$0xff]  ;;  %vm45_vm0 = vcmask 261120   ;;  %vm48_vm1 = vcmask 253952   ;;  %v1929_v5 = vmov 0.0  }
  0x10   :  { %v1780_v3 = vpack.c.bf16 %v1488_v1, %v1487_v0  ;;  %v1490_v4 = vld [vmem:[%s2284_s2 + $0x38] sm:$0xff]  ;;  %47 = vst.msk [vmem:[#allocation2 + $0x8] sm:$0xff] %vm45_vm0, %v1929_v5  ;;  %v2016_v6 = vld [vmem:[%s2283_s1] sm:$0xff]  ;;  %46 = vst.msk [vmem:[#allocation2] sm:$0xff] %vm45_vm0, %v1929_v5  ;;  %s57_s26 = sld [smem:[#allocation4]]  ;;  %s1486_s27 = sld [smem:[#allocation4 + $0x1]] }
  0x11   :  { %50 = vst.msk [vmem:[#allocation2 + $0x18] sm:$0xff] %vm45_vm0, %v1929_v5  ;;  %51 = vst.msk [vmem:[#allocation2 + $0x20] sm:$0xff] %vm45_vm0, %v1929_v5  ;;  %v2024_v7 = vld [vmem:[%s2283_s1 + $0x8] sm:$0xff]  ;;  %v1784_v8 = vpack.c.bf16 %v1490_v4, %v1489_v2  ;;  %v71_v9 = vld [vmem:[%s2284_s2] sm:$0xff]  ;;  %vm65_vm4 = vcmask 1040384   ;;  %vm774_vm5 = vcmask 1041409  }
  0x12   :  { %49 = vst.msk [vmem:[#allocation2 + $0x10] sm:$0x1] %vm48_vm1, %v1929_v5  ;;  %52 = vst.msk [vmem:[#allocation2 + $0x28] sm:$0x1] %vm48_vm1, %v1929_v5  ;;  %v72_v10 = vld [vmem:[%s2284_s2 + $0x8] sm:$0xff]  ;;  %1781 = vmatprep.subr.bf16.mxu0 %v1780_v3  ;;  %v73_v12 = vld [vmem:[%s2284_s2 + $0x10] sm:$0xff] }
  0x13   :  { %67 = vst.msk [vmem:[#allocation2 + $0x8] sm:$0xff] %vm45_vm0, %v2016_v6  ;;  %68 = vst.msk [vmem:[#allocation2 + $0x20] sm:$0xff] %vm45_vm0, %v2024_v7  ;;  %1783 = vmatpush3.bf16.msra.mxu0 %v1780_v3  ;;  %v1788_v11 = vpack.c.bf16 %v72_v10, %v71_v9  ;;  %v74_v13 = vld [vmem:[%s2284_s2 + $0x18] sm:$0xff]  ;;  %v1495_v18 = vld [vmem:[%s2284_s2 + $0x40] sm:$0xff]  ;;  %vm777_vm6 = vcmask 58368  }
  0x14   :  { %1785 = vmatprep.subr.bf16.mxu0 %v1784_v8  ;;  %v1792_v16 = vpack.c.bf16 %v74_v13, %v73_v12  ;;  %v1496_v19 = vld [vmem:[%s2284_s2 + $0x48] sm:$0xff]  ;;  %v1497_v21 = vld [vmem:[%s2284_s2 + $0x50] sm:$0xff]  ;;  %v1498_v22 = vld [vmem:[%s2284_s2 + $0x58] sm:$0xff] }
  0x15   :  { %v1796_v20 = vpack.c.bf16 %v1496_v19, %v1495_v18  ;;  %v1800_v24 = vpack.c.bf16 %v1498_v22, %v1497_v21  ;;  %v1501_v27 = vld [vmem:[%s2285_s3] ss:$0 sm:$0xff]  ;;  %v1505_v47 = vld [vmem:[%s2288_s6 + $0x28] sm:$0xff]  ;;  %v1506_v49 = vld [vmem:[%s2288_s6 + $0x30] sm:$0xff] }
  0x16   :  { %v1504_v46 = vld [vmem:[%s2288_s6 + $0x20] sm:$0xff]  ;;  %v1507_v50 = vld [vmem:[%s2288_s6 + $0x38] sm:$0xff]  ;;  %v395_v53 = vld [vmem:[%s2288_s6 + $0x8] sm:$0xff] }
  0x17   :  { %1787 = vmatpush3.bf16.msra.mxu0 %v1784_v8  ;;  %v1804_v48 = vpack.c.bf16 %v1505_v47, %v1504_v46  ;;  %v1808_v51 = vpack.c.bf16 %v1507_v50, %v1506_v49  ;;  %v394_v52 = vld [vmem:[%s2288_s6] sm:$0xff]  ;;  %v1528_v56 = vld [vmem:[%s2284_s2 + $0x88] sm:$0xff]  ;;  %v1529_v58 = vld [vmem:[%s2284_s2 + $0x90] sm:$0xff] }
  0x18   :  { %1789 = vmatprep.subr.bf16.mxu0 %v1788_v11  ;;  %v1527_v54 = vld [vmem:[%s2284_s2 + $0x80] sm:$0xff]  ;;  %v1812_v55 = vpack.c.bf16 %v395_v53, %v394_v52  ;;  %v1530_v59 = vld [vmem:[%s2284_s2 + $0x98] sm:$0xff]  ;;  %v1524_v62 = vld [vmem:[%s2284_s2 + $0x68] sm:$0xff] }
  0x19   :  { %1805 = vmatprep.subr.bf16.mxu1 %v1804_v48  ;;  %v1828_v57 = vpack.c.bf16 %v1528_v56, %v1527_v54  ;;  %v1832_v60 = vpack.c.bf16 %v1530_v59, %v1529_v58  ;;  %v1523_v61 = vld [vmem:[%s2284_s2 + $0x60] sm:$0xff]  ;;  %v396_v18 = vld [vmem:[%s2288_s6 + $0x10] sm:$0xff]  ;;  %v397_v19 = vld [vmem:[%s2288_s6 + $0x18] sm:$0xff] }
  0x1a   :  { %v75_v14 = vld [vmem:[#allocation2 + $0x8] sm:$0xff]  ;;  %v76_v15 = vld [vmem:[#allocation2 + $0x20] sm:$0xff]  ;;  %1807 = vmatpush3.bf16.msra.mxu1 %v1804_v48  ;;  %v1836_v63 = vpack.c.bf16 %v1524_v62, %v1523_v61 }
  0x1b   :  { %v69_v17 = vld [vmem:[#allocation2 + $0x7] sm:$0xff]  ;;  %1656 = vmatprep.mubr.msk.f32.mxu0 %vm45_vm0, %v75_v14  ;;  %v70_v23 = vld [vmem:[#allocation2 + $0x1f] sm:$0xff]  ;;  %1809 = vmatprep.subr.bf16.mxu1 %v1808_v51 }
  0x1c   :  { %1657 = vmatmul.mubr.msk.f32.vlgmr.msra.gmra.mrb[0].mxu0 %vm45_vm0, %v76_v15  ;;  %v244_v25 = vld [vmem:[#allocation2 + $0x9] sm:$0xff]  ;;  %v245_v26 = vld [vmem:[#allocation2 + $0x21] sm:$0xff]  ;;  %v1502_v9 = vld [vmem:[%s2286_s4] ss:$0 sm:$0xff] }
  0x1d   :  { %1791 = vmatpush3.bf16.msra.mxu0 %v1788_v11  ;;  %1667 = vmatprep.mubr.msk.f32.mxu0 %vm45_vm0, %v69_v17  ;;  %v1503_v11 = vld [vmem:[%s2287_s5] ss:$0 sm:$0xff]  ;;  %v1542_v48 = vld [vmem:[%s2285_s3 + $0x1] ss:$0 sm:$0xff] }
  0x1e   :  { %1793 = vmatprep.subr.bf16.mxu0 %v1792_v16  ;;  %1811 = vmatpush3.bf16.msra.mxu1 %v1808_v51 }
  0x1f   :  { %1813 = vmatprep.subr.bf16.mxu1 %v1812_v55 }
  0x21   :  { %1795 = vmatpush3.bf16.msra.mxu0 %v1792_v16 }
  0x22   :  { %1797 = vmatprep.subr.bf16.mxu0 %v1796_v20 }
  0x24   :  { %1668 = vmatmul.mubr.msk.f32.vlgmr.msra.gmra.mrb[0].mxu0 %vm45_vm0, %v70_v23  ;;  %v1816_v23 = vpack.c.bf16 %v397_v19, %v396_v18  ;;  %v1547_v18 = vld [vmem:[%s2288_s6 + $0x60] sm:$0xff]  ;;  %v1548_v19 = vld [vmem:[%s2288_s6 + $0x68] sm:$0xff] }
  0x25   :  { %1799 = vmatpush3.bf16.msra.mxu0 %v1796_v20  ;;  %1678 = vmatprep.mubr.msk.f32.mxu0 %vm45_vm0, %v244_v25  ;;  %v1513_v25 = vld [vmem:[%s2288_s6 + $0x48] sm:$0xff] }
  0x26   :  { %1801 = vmatprep.subr.bf16.mxu0 %v1800_v24 }
  0x29   :  { %1803 = vmatpush3.bf16.msra.mxu0 %v1800_v24  ;;  %v1512_v24 = vld [vmem:[%s2288_s6 + $0x40] sm:$0xff] }
  0x2a   :  { %1829 = vmatprep.subr.bf16.mxu0 %v1828_v57 }
  0x2c   :  { %1679 = vmatmul.mubr.msk.f32.vlgmr.msra.gmra.mrb[0].mxu0 %vm45_vm0, %v245_v26 }
  0x2d   :  { %1831 = vmatpush3.bf16.msra.mxu0 %v1828_v57  ;;  %v1518_v57 = vld [vmem:[%s2289_s7] ss:$0 sm:$0xff] }
  0x2e   :  { %1833 = vmatprep.subr.bf16.mxu0 %v1832_v60 }
  0x31   :  { %1835 = vmatpush3.bf16.msra.mxu0 %v1832_v60 }
  0x32   :  { %1837 = vmatprep.subr.bf16.mxu0 %v1836_v63 }
  0xff   :  { %v1680_v28 = vpop.f32.mrb[0].mxu0 }
 0x100   :  { %v323_v29 = vpop.f32.mrb[1].mxu0  ;;  %v342_v30 = vadd.f32 %v1680_v28, %v1501_v27 }
 0x101   :  { %v341_v31 = vadd.f32 %v1501_v27, %v323_v29 }
 0x102   :  { %v344_v33 = vmax.f32 %v342_v30, 0.0  ;;  %v1514_v30 = vld [vmem:[%s2288_s6 + $0x50] sm:$0xff] }
 0x103   :  { %v343_v32 = vmax.f32 %v341_v31, 0.0  ;;  %v1515_v31 = vld [vmem:[%s2288_s6 + $0x58] sm:$0xff] }
 0x104   :  { %v350_v35 = vsel %vm45_vm0, %v344_v33, 0.0 }
 0x105   :  { %v347_v34 = vsel %vm45_vm0, %v343_v32, 0.0 }
 0x106   :  { %348 = vadd.xlane.f32.xlu0 %v347_v34 }
 0x10a   :  { %351 = vadd.xlane.f32.xlu0 %v350_v35 }
 0x193   :  { %v349_v36 = vpop.xlane.xlu0 %348 }
 0x194   :  { %v354_v37 = vmul.f32 0.03125, %v349_v36 }
 0x196   :  { %v356_v38 = vsub.f32 %v343_v32, %v354_v37  ;;  %v1526_v32 = vld [vmem:[%s2284_s2 + $0x78] sm:$0xff]  ;;  %v1535_v37 = vld [vmem:[%s2284_s2 + $0xa0] sm:$0xff] }
 0x197   :  { %v352_v39 = vpop.xlane.xlu0 %351 }
 0x198   :  { %v355_v40 = vmul.f32 0.03125, %v352_v39  ;;  %v358_v41 = vmul.f32 %v356_v38, %v356_v38 }
 0x19a   :  { %v357_v42 = vsub.f32 %v344_v33, %v355_v40  ;;  %v360_v43 = vsel %vm45_vm0, %v358_v41, 0.0  ;;  %v1824_v33 = vpack.c.bf16 %v1515_v31, %v1514_v30  ;;  %v1537_v40 = vld [vmem:[%s2284_s2 + $0xb0] sm:$0xff]  ;;  %v1538_v41 = vld [vmem:[%s2284_s2 + $0xb8] sm:$0xff]  ;;  %v1546_v30 = vld [vmem:[%s2287_s5 + $0x1] ss:$0 sm:$0xff] }
 0x19b   :  { %361 = vadd.xlane.f32.xlu1 %v360_v43  ;;  %v1848_v43 = vpack.c.bf16 %v1538_v41, %v1537_v40  ;;  %v1559_v40 = vld [vmem:[%s2288_s6 + $0xa0] sm:$0xff]  ;;  %v1560_v41 = vld [vmem:[%s2288_s6 + $0xa8] sm:$0xff] }
 0x19c   :  { %v359_v44 = vmul.f32 %v357_v42, %v357_v42 }
 0x19e   :  { %v363_v45 = vsel %vm45_vm0, %v359_v44, 0.0 }
 0x19f   :  { %364 = vadd.xlane.f32.xlu1 %v363_v45 }
 0x228   :  { %v362_v0 = vpop.xlane.xlu1 %361 }
 0x229   :  { %v366_v1 = vmul.f32 0.03125, %v362_v0 }
 0x22b   :  { %v368_v2 = vadd.f32 1e-05, %v366_v1 }
 0x22c   :  { %v365_v3 = vpop.xlane.xlu1 %364 }
 0x22d   :  { %1898 = vrsqrt.f32 %v368_v2  ;;  %v367_v4 = vmul.f32 0.03125, %v365_v3 }
 0x22f   :  { %v369_v5 = vadd.f32 1e-05, %v367_v4 }
 0x231   :  { %1900 = vrsqrt.f32 %v369_v5 }
 0x237   :  { %v1899_v8 = vpop.eup %1898 }
 0x238   :  { %v372_v10 = vmul.f32 %v1899_v8, %v356_v38  ;;  %v1536_v38 = vld [vmem:[%s2284_s2 + $0xa8] sm:$0xff] }
 0x239   :  { %v1844_v39 = vpack.c.bf16 %v1536_v38, %v1535_v37 }
 0x23a   :  { %v380_v12 = vmul.f32 %v1502_v9, %v372_v10 }
 0x23b   :  { %v1901_v13 = vpop.eup %1900 }
 0x23c   :  { %v388_v14 = vadd.f32 %v1503_v11, %v380_v12  ;;  %v373_v15 = vmul.f32 %v1901_v13, %v357_v42  ;;  %v1551_v12 = vld [vmem:[%s2288_s6 + $0x80] sm:$0xff]  ;;  %v1552_v13 = vld [vmem:[%s2288_s6 + $0x88] sm:$0xff] }
 0x23e   :  { %390 = vst.msk [vmem:[#allocation2 + $0x8] sm:$0xff] %vm45_vm0, %v388_v14  ;;  %v381_v16 = vmul.f32 %v1502_v9, %v373_v15  ;;  %v1852_v14 = vpack.c.bf16 %v1552_v13, %v1551_v12  ;;  %v1553_v15 = vld [vmem:[%s2288_s6 + $0x90] sm:$0xff] }
 0x240   :  { %v389_v17 = vadd.f32 %v1503_v11, %v381_v16  ;;  %v1554_v16 = vld [vmem:[%s2288_s6 + $0x98] sm:$0xff] }
 0x242   :  { %391 = vst.msk [vmem:[#allocation2 + $0x20] sm:$0xff] %vm45_vm0, %v389_v17  ;;  %v1856_v17 = vpack.c.bf16 %v1554_v16, %v1553_v15 }
 0x245   :  { %v398_v20 = vld [vmem:[#allocation2 + $0x8] sm:$0xff] }
 0x246   :  { %v392_v21 = vld [vmem:[#allocation2 + $0x7] sm:$0xff]  ;;  %1689 = vmatprep.mubr.msk.f32.mxu1 %vm45_vm0, %v398_v20  ;;  %v1860_v20 = vpack.c.bf16 %v1548_v19, %v1547_v18 }
 0x247   :  { %v567_v22 = vld [vmem:[#allocation2 + $0x9] sm:$0xff] }
 0x248   :  { %779 = vst.msk [vmem:[#allocation2 + $0x8] sm:$0xff] %vm45_vm0, %v2016_v6  ;;  %v1820_v6 = vpack.c.bf16 %v1513_v25, %v1512_v24 }
 0x249   :  { %v399_v26 = vld [vmem:[#allocation2 + $0x20] sm:$0xff] }
 0x24a   :  { %v393_v27 = vld [vmem:[#allocation2 + $0x1f] sm:$0xff]  ;;  %1690 = vmatmul.mubr.msk.f32.vlgmr.msra.gmra.mrb[0].mxu1 %vm45_vm0, %v399_v26 }
 0x24b   :  { %v568_v28 = vld [vmem:[#allocation2 + $0x21] sm:$0xff]  ;;  %1815 = vmatpush3.bf16.msra.mxu1 %v1812_v55  ;;  %1700 = vmatprep.mubr.msk.f32.mxu1 %vm45_vm0, %v392_v21 }
 0x24c   :  { %780 = vst.msk [vmem:[#allocation2 + $0x20] sm:$0xff] %vm45_vm0, %v2024_v7  ;;  %1817 = vmatprep.subr.bf16.mxu1 %v1816_v23  ;;  %v1525_v7 = vld [vmem:[%s2284_s2 + $0x70] sm:$0xff] }
 0x24d   :  { %v1840_v35 = vpack.c.bf16 %v1526_v32, %v1525_v7 }
 0x24f   :  { %v788_v29 = vld [vmem:[#allocation2 + $0x8] sm:$0xff]  ;;  %1819 = vmatpush3.bf16.msra.mxu1 %v1816_v23 }
 0x250   :  { %1722 = vmatprep.mubr.msk.f32.mxu0 %vm45_vm0, %v788_v29  ;;  %1821 = vmatprep.subr.bf16.mxu1 %v1820_v6  ;;  %v781_v36 = vld [vmem:[#allocation2 + $0x7] sm:$0xff] }
 0x251   :  { %v957_v44 = vld [vmem:[#allocation2 + $0x9] sm:$0xff] }
 0x252   :  { %1701 = vmatmul.mubr.msk.f32.vlgmr.msra.gmra.mrb[0].mxu1 %vm45_vm0, %v393_v27 }
 0x253   :  { %v789_v34 = vld [vmem:[#allocation2 + $0x20] sm:$0xff]  ;;  %1823 = vmatpush3.bf16.msra.mxu1 %v1820_v6  ;;  %1711 = vmatprep.mubr.msk.f32.mxu1 %vm45_vm0, %v567_v22 }
 0x254   :  { %1723 = vmatmul.mubr.msk.f32.vlgmr.msra.gmra.mrb[2].mxu0 %vm45_vm0, %v789_v34  ;;  %1825 = vmatprep.subr.bf16.mxu1 %v1824_v33  ;;  %v782_v42 = vld [vmem:[#allocation2 + $0x1f] sm:$0xff] }
 0x255   :  { %1839 = vmatpush3.bf16.msra.mxu0 %v1836_v63  ;;  %1733 = vmatprep.mubr.msk.f32.mxu0 %vm45_vm0, %v781_v36  ;;  %v958_v45 = vld [vmem:[#allocation2 + $0x21] sm:$0xff]  ;;  %v1550_v36 = vld [vmem:[%s2288_s6 + $0x78] sm:$0xff] }
 0x256   :  { %1841 = vmatprep.subr.bf16.mxu0 %v1840_v35 }
 0x257   :  { %1827 = vmatpush3.bf16.msra.mxu1 %v1824_v33 }
 0x258   :  { %1853 = vmatprep.subr.bf16.mxu1 %v1852_v14 }
 0x259   :  { %1843 = vmatpush3.bf16.msra.mxu0 %v1840_v35  ;;  %v1549_v35 = vld [vmem:[%s2288_s6 + $0x70] sm:$0xff] }
 0x25a   :  { %1845 = vmatprep.subr.bf16.mxu0 %v1844_v39  ;;  %1712 = vmatmul.mubr.msk.f32.vlgmr.msra.gmra.mrb[0].mxu1 %vm45_vm0, %v568_v28  ;;  %v1545_v28 = vld [vmem:[%s2286_s4 + $0x1] ss:$0 sm:$0xff]  ;;  %v1864_v38 = vpack.c.bf16 %v1550_v36, %v1549_v35  ;;  %v1930_v36 = vmov 0  }
 0x25b   :  { %1855 = vmatpush3.bf16.msra.mxu1 %v1852_v14  ;;  %1897 = vset.pattern.permute.xlu1 %v1930_v36 }
 0x25c   :  { %1734 = vmatmul.mubr.msk.f32.vlgmr.msra.gmra.mrb[2].mxu0 %vm45_vm0, %v782_v42  ;;  %1857 = vmatprep.subr.bf16.mxu1 %v1856_v17 }
 0x25d   :  { %1847 = vmatpush3.bf16.msra.mxu0 %v1844_v39  ;;  %1744 = vmatprep.mubr.msk.f32.mxu0 %vm45_vm0, %v957_v44  ;;  %v1561_v44 = vld [vmem:[%s2288_s6 + $0xb0] sm:$0xff] }
 0x25e   :  { %1849 = vmatprep.subr.bf16.mxu0 %v1848_v43  ;;  %1896 = vset.pattern.permute.xlu0 %v1930_v36 }
 0x25f   :  { %1859 = vmatpush3.bf16.msra.mxu1 %v1856_v17 }
 0x260   :  { %1861 = vmatprep.subr.bf16.mxu1 %v1860_v20 }
 0x261   :  { %1851 = vmatpush3.bf16.msra.mxu0 %v1848_v43  ;;  %v1868_v43 = vpack.c.bf16 %v1560_v41, %v1559_v40 }
 0x264   :  { %1745 = vmatmul.mubr.msk.f32.vlgmr.msra.gmra.mrb[2].mxu0 %vm45_vm0, %v958_v45  ;;  %v1562_v45 = vld [vmem:[%s2288_s6 + $0xb8] sm:$0xff] }
 0x32d   :  { %v1713_v46 = vpop.f32.mrb[0].mxu1 }
 0x32e   :  { %v646_v47 = vpop.f32.mrb[1].mxu1  ;;  %v2171_v62 = vadd.f32 %v1713_v46, %v1518_v57  ;;  %v1872_v46 = vpack.c.bf16 %v1562_v45, %v1561_v44  ;;  %v1569_v44 = vld [vmem:[%s2290_s8 + $0x1] ss:$0 sm:$0xff] }
 0x32f   :  { %v2173_v0 = vadd.f32 %v1518_v57, %v646_v47 }
 0x330   :  { %v667_v4 = vmax.f32 %v2171_v62, 0.0 }
 0x331   :  { %v666_v8 = vmax.f32 %v2173_v0, 0.0 }
 0x332   :  { %v673_v10 = vsel %vm45_vm0, %v667_v4, 0.0 }
 0x333   :  { %v670_v11 = vsel %vm45_vm0, %v666_v8, 0.0 }
 0x337   :  { %v1746_v49 = vpop.f32.mrb[2].mxu0 }
 0x338   :  { %v1056_v50 = vadd.f32 %v1746_v49, %v1542_v48  ;;  %v1036_v51 = vpop.f32.mrb[3].mxu0 }
 0x339   :  { %v1055_v52 = vadd.f32 %v1542_v48, %v1036_v51 }
 0x33a   :  { %v1058_v53 = vmax.f32 %v1056_v50, 0.0 }
 0x33b   :  { %v1057_v54 = vmax.f32 %v1055_v52, 0.0 }
 0x33c   :  { %v1066_v55 = vsel %vm45_vm0, %v1058_v53, 0.0 }
 0x33d   :  { %1067 = vadd.xlane.f32.xlu1 %v1066_v55  ;;  %v1063_v56 = vsel %vm45_vm0, %v1057_v54, 0.0 }
 0x33e   :  { %1064 = vadd.xlane.f32.xlu0 %v1063_v56 }
 0x3ca   :  { %v1068_v58 = vpop.xlane.xlu1 %1067 }
 0x3cb   :  { %v1070_v59 = vmul.f32 0.03125, %v1068_v58  ;;  %v1065_v60 = vpop.xlane.xlu0 %1064 }
 0x3cc   :  { %v1069_v61 = vmul.f32 0.03125, %v1065_v60 }
 0x3cd   :  { %v1072_v63 = vsub.f32 %v1058_v53, %v1070_v59 }
 0x3ce   :  { %v1071_v1 = vsub.f32 %v1057_v54, %v1069_v61  ;;  %v1566_v54 = vld [vmem:[%s2289_s7 + $0x1] ss:$0 sm:$0xff] }
 0x3cf   :  { %v1074_v2 = vmul.f32 %v1072_v63, %v1072_v63 }
 0x3d0   :  { %v1073_v3 = vmul.f32 %v1071_v1, %v1071_v1 }
 0x3d1   :  { %v1078_v5 = vsel %vm45_vm0, %v1074_v2, 0.0 }
 0x3d2   :  { %1079 = vadd.xlane.f32.xlu1 %v1078_v5  ;;  %v1075_v9 = vsel %vm45_vm0, %v1073_v3, 0.0 }
 0x3d3   :  { %1076 = vadd.xlane.f32.xlu0 %v1075_v9 }
 0x3d6   :  { %674 = vadd.xlane.f32.xlu1 %v673_v10 }
 0x3d7   :  { %671 = vadd.xlane.f32.xlu0 %v670_v11 }
 0x45f   :  { %v1080_v21 = vpop.xlane.xlu1 %1079 }
 0x460   :  { %v1082_v22 = vmul.f32 0.03125, %v1080_v21  ;;  %v1077_v23 = vpop.xlane.xlu0 %1076 }
 0x461   :  { %v1081_v24 = vmul.f32 0.03125, %v1077_v23 }
 0x462   :  { %v1084_v25 = vadd.f32 1e-05, %v1082_v22 }
 0x463   :  { %v1083_v26 = vadd.f32 1e-05, %v1081_v24  ;;  %v675_v50 = vpop.xlane.xlu1 %674  ;;  %v1519_v24 = vld [vmem:[%s2290_s8] ss:$0 sm:$0xff] }
 0x464   :  { %1902 = vrsqrt.f32 %v1084_v25  ;;  %v672_v51 = vpop.xlane.xlu0 %671  ;;  %v677_v52 = vmul.f32 0.03125, %v675_v50  ;;  %v1572_v50 = vld [vmem:[%s2292_s10 + $0x1] ss:$0 sm:$0xff] }
 0x465   :  { %1904 = vrsqrt.f32 %v1083_v26  ;;  %v676_v53 = vmul.f32 0.03125, %v672_v51 }
 0x466   :  { %v679_v56 = vsub.f32 %v667_v4, %v677_v52 }
 0x467   :  { %v678_v59 = vsub.f32 %v666_v8, %v676_v53 }
 0x468   :  { %v681_v2 = vmul.f32 %v679_v56, %v679_v56 }
 0x469   :  { %v680_v5 = vmul.f32 %v678_v59, %v678_v59 }
 0x46a   :  { %v685_v9 = vsel %vm45_vm0, %v681_v2, 0.0 }
 0x46b   :  { %v682_v62 = vsel %vm45_vm0, %v680_v5, 0.0 }
 0x46e   :  { %v1903_v27 = vpop.eup %1902 }
 0x46f   :  { %v1905_v6 = vpop.eup %1904  ;;  %v1088_v29 = vmul.f32 %v1903_v27, %v1072_v63  ;;  %v1520_v27 = vld [vmem:[%s2291_s9] ss:$0 sm:$0xff] }
 0x470   :  { %v1087_v31 = vmul.f32 %v1905_v6, %v1071_v1 }
 0x471   :  { %v1096_v7 = vmul.f32 %v1545_v28, %v1088_v29  ;;  %v1521_v29 = vld [vmem:[%s2292_s10] ss:$0 sm:$0xff] }
 0x472   :  { %v1095_v32 = vmul.f32 %v1545_v28, %v1087_v31 }
 0x473   :  { %v1104_v33 = vadd.f32 %v1546_v30, %v1096_v7 }
 0x474   :  { %v1103_v34 = vadd.f32 %v1546_v30, %v1095_v32 }
 0x475   :  { %1106 = vst.msk [vmem:[#allocation2 + $0x20] sm:$0xff] %vm45_vm0, %v1104_v33 }
 0x476   :  { %1105 = vst.msk [vmem:[#allocation2 + $0x8] sm:$0xff] %vm45_vm0, %v1103_v34 }
 0x47c   :  { %v1115_v39 = vld [vmem:[#allocation2 + $0x20] sm:$0xff] }
 0x47d   :  { %v1114_v37 = vld [vmem:[#allocation2 + $0x8] sm:$0xff]  ;;  %v1108_v47 = vld [vmem:[#allocation2 + $0x1f] sm:$0xff] }
 0x47e   :  { %1755 = vmatprep.mubr.msk.f32.mxu1 %vm45_vm0, %v1114_v37  ;;  %v1107_v42 = vld [vmem:[#allocation2 + $0x7] sm:$0xff] }
 0x47f   :  { %1756 = vmatmul.mubr.msk.f32.vlgmr.msra.gmra.mrb[2].mxu1 %vm45_vm0, %v1115_v39  ;;  %v1283_v48 = vld [vmem:[#allocation2 + $0x9] sm:$0xff]  ;;  %v1284_v49 = vld [vmem:[#allocation2 + $0x21] sm:$0xff] }
 0x480   :  { %1863 = vmatpush3.bf16.msra.mxu1 %v1860_v20  ;;  %1766 = vmatprep.mubr.msk.f32.mxu1 %vm45_vm0, %v1107_v42 }
 0x481   :  { %1865 = vmatprep.subr.bf16.mxu1 %v1864_v38 }
 0x484   :  { %1867 = vmatpush3.bf16.msra.mxu1 %v1864_v38 }
 0x485   :  { %1869 = vmatprep.subr.bf16.mxu1 %v1868_v43 }
 0x487   :  { %1767 = vmatmul.mubr.msk.f32.vlgmr.msra.gmra.mrb[2].mxu1 %vm45_vm0, %v1108_v47  ;;  %v1570_v47 = vld [vmem:[%s2291_s9 + $0x1] ss:$0 sm:$0xff] }
 0x488   :  { %1871 = vmatpush3.bf16.msra.mxu1 %v1868_v43  ;;  %1777 = vmatprep.mubr.msk.f32.mxu1 %vm45_vm0, %v1283_v48 }
 0x489   :  { %1873 = vmatprep.subr.bf16.mxu1 %v1872_v46 }
 0x48c   :  { %1875 = vmatpush3.bf16.msra.mxu1 %v1872_v46 }
 0x48f   :  { %1778 = vmatmul.mubr.msk.f32.vlgmr.msra.gmra.mrb[2].mxu1 %vm45_vm0, %v1284_v49 }
 0x562   :  { %v1779_v55 = vpop.f32.mrb[2].mxu1 }
 0x563   :  { %v1382_v57 = vadd.f32 %v1779_v55, %v1566_v54  ;;  %v1362_v58 = vpop.f32.mrb[3].mxu1 }
 0x564   :  { %v1381_v60 = vadd.f32 %v1566_v54, %v1362_v58  ;;  %v55_v58 = vlaneseq }
 0x565   :  { %v1384_v61 = vmax.f32 %v1382_v57, 0.0 }
 0x566   :  { %v1383_v63 = vmax.f32 %v1381_v60, 0.0  ;;  %v58_v60 = vstv %s57_s26 }
 0x567   :  { %v1392_v1 = vsel %vm45_vm0, %v1384_v61, 0.0 }
 0x568   :  { %1393 = vadd.xlane.f32.xlu1 %v1392_v1  ;;  %v1389_v3 = vsel %vm45_vm0, %v1383_v63, 0.0  ;;  %v1931_v1 = vmov 1.0  }
 0x569   :  { %1390 = vadd.xlane.f32.xlu0 %v1389_v3 }
 0x56c   :  { %686 = vadd.xlane.f32.xlu1 %v685_v9  ;;  %v1574_v9 = vld [vmem:[%s2293_s11 + $0x1] ss:$0 sm:$0xff] }
 0x56d   :  { %683 = vadd.xlane.f32.xlu0 %v682_v62 }
 0x5f5   :  { %v1394_v4 = vpop.xlane.xlu1 %1393 }
 0x5f6   :  { %v1396_v0 = vmul.f32 0.03125, %v1394_v4  ;;  %v1391_v8 = vpop.xlane.xlu0 %1390 }
 0x5f7   :  { %v1395_v10 = vmul.f32 0.03125, %v1391_v8  ;;  %v1522_v8 = vld [vmem:[%s2293_s11] ss:$0 sm:$0xff] }
 0x5f8   :  { %v1398_v11 = vsub.f32 %v1384_v61, %v1396_v0  ;;  %v62_v61 = vstv %s1486_s27 }
 0x5f9   :  { %v1397_v12 = vsub.f32 %v1383_v63, %v1395_v10  ;;  %v687_v13 = vpop.xlane.xlu1 %686  ;;  %v741_v63 = vshrl.u32 %v55_v58, 7 }
 0x5fa   :  { %v689_v14 = vmul.f32 0.03125, %v687_v13  ;;  %v684_v15 = vpop.xlane.xlu0 %683  ;;  %v1400_v16 = vmul.f32 %v1398_v11, %v1398_v11 }
 0x5fb   :  { %v688_v17 = vmul.f32 0.03125, %v684_v15  ;;  %v1399_v18 = vmul.f32 %v1397_v12, %v1397_v12  ;;  %v742_v5 = vsub.s32 0, %v741_v63  ;;  %v749_v0 = vsub.s32 1, %v741_v63 }
 0x5fc   :  { %v691_v19 = vadd.f32 1e-05, %v689_v14  ;;  %v1404_v20 = vsel %vm45_vm0, %v1400_v16, 0.0 }
 0x5fd   :  { %v690_v21 = vadd.f32 1e-05, %v688_v17  ;;  %1405 = vadd.xlane.f32.xlu1 %v1404_v20  ;;  %v1401_v22 = vsel %vm45_vm0, %v1399_v18, 0.0 }
 0x5fe   :  { %1906 = vrsqrt.f32 %v691_v19  ;;  %1402 = vadd.xlane.f32.xlu0 %v1401_v22 }
 0x5ff   :  { %1908 = vrsqrt.f32 %v690_v21 }
 0x608   :  { %v1907_v23 = vpop.eup %1906 }
 0x609   :  { %v1909_v25 = vpop.eup %1908  ;;  %v695_v26 = vmul.f32 %v1907_v23, %v679_v56 }
 0x60a   :  { %v694_v28 = vmul.f32 %v1909_v25, %v678_v59  ;;  %v56_v59 = vand.u32 127, %v55_v58 }
 0x60b   :  { %v703_v6 = vmul.f32 %v1519_v24, %v695_v26 }
 0x60c   :  { %v702_v30 = vmul.f32 %v1519_v24, %v694_v28  ;;  %vm59_vm2 = vcmp.ge.s32.totalorder %v56_v59, %v58_v60  ;;  %vm63_vm3 = vcmp.ge.s32.totalorder %v56_v59, %v62_v61  ;;  %v768_v28 = vsub.s32 %v56_v59, %v741_v63 }
 0x60d   :  { %v711_v31 = vadd.f32 %v1520_v27, %v703_v6  ;;  %v60_v2 = vsel %vm59_vm2, 0.0, %v1931_v1  ;;  %v64_v3 = vsel %vm63_vm3, 0.0, %v1931_v1 }
 0x60e   :  { %v710_v7 = vadd.f32 %v1520_v27, %v702_v30  ;;  %v66_v62 = vsel %vm65_vm4, %v60_v2, %v64_v3 }
 0x60f   :  { %v720_v32 = vmul.f32 %v1521_v29, %v711_v31  ;;  %v743_v4 = vrot.slane %v66_v62, %v742_v5  ;;  %v750_v10 = vrot.slane %v66_v62, %v749_v0 }
 0x610   :  { %v719_v33 = vmul.f32 %v1521_v29, %v710_v7 }
 0x611   :  { %v724_v34 = vsel %vm45_vm0, %v720_v32, 0.0 }
 0x612   :  { %725 = vadd.xlane.f32.xlu1 %v724_v34  ;;  %v721_v35 = vsel %vm45_vm0, %v719_v33, 0.0 }
 0x613   :  { %722 = vadd.xlane.f32.xlu0 %v721_v35 }
 0x68a   :  { %v1406_v37 = vpop.xlane.xlu1 %1405 }
 0x68b   :  { %v1408_v38 = vmul.f32 0.03125, %v1406_v37  ;;  %v1403_v39 = vpop.xlane.xlu0 %1402 }
 0x68c   :  { %v1407_v40 = vmul.f32 0.03125, %v1403_v39 }
 0x68d   :  { %v1410_v41 = vadd.f32 1e-05, %v1408_v38 }
 0x68e   :  { %v1409_v42 = vadd.f32 1e-05, %v1407_v40 }
 0x68f   :  { %1910 = vrsqrt.f32 %v1410_v41 }
 0x690   :  { %1912 = vrsqrt.f32 %v1409_v42 }
 0x699   :  { %v1911_v43 = vpop.eup %1910 }
 0x69a   :  { %v1913_v45 = vpop.eup %1912  ;;  %v1414_v46 = vmul.f32 %v1911_v43, %v1398_v11 }
 0x69b   :  { %v1413_v48 = vmul.f32 %v1913_v45, %v1397_v12 }
 0x69c   :  { %v1422_v49 = vmul.f32 %v1569_v44, %v1414_v46 }
 0x69d   :  { %v1421_v51 = vmul.f32 %v1569_v44, %v1413_v48 }
 0x69e   :  { %v1430_v52 = vadd.f32 %v1570_v47, %v1422_v49 }
 0x69f   :  { %v1429_v53 = vadd.f32 %v1570_v47, %v1421_v51  ;;  %v726_v11 = vpop.xlane.xlu1 %725 }
 0x6a0   :  { %v1440_v54 = vmul.f32 %v1572_v50, %v1430_v52  ;;  %v723_v13 = vpop.xlane.xlu0 %722 }
 0x6a1   :  { %v1439_v55 = vmul.f32 %v1572_v50, %v1429_v53 }
 0x6a2   :  { %v1444_v56 = vsel %vm45_vm0, %v1440_v54, 0.0 }
 0x6a3   :  { %1445 = vadd.xlane.f32.xlu1 %v1444_v56  ;;  %v1441_v57 = vsel %vm45_vm0, %v1439_v55, 0.0 }
 0x6a4   :  { %1442 = vadd.xlane.f32.xlu0 %v1441_v57 }
 0x6b4   :  { %1455 = vperm.xlu1 %1897, %v1574_v9  }
 0x6b8   :  { %745 = vbcast.lane.b32.xlu1 %v743_v4, 256 }
 0x6ba   :  { %734 = vperm.xlu0 %1896, %v1522_v8  }
 0x6bc   :  { %752 = vbcast.lane.b32.xlu1 %v750_v10, 256 }
 0x730   :  { %v1446_v12 = vpop.xlane.xlu1 %1445 }
 0x731   :  { %v1443_v15 = vpop.xlane.xlu0 %1442 }
 0x734   :  { %v1456_v14 = vpop.permute.xlu1 %1455 }
 0x735   :  { %v1458_v23 = vadd.f32 %v1456_v14, %v1443_v15  ;;  %v1459_v25 = vadd.f32 %v1456_v14, %v1446_v12 }
 0x738   :  { %v746_v16 = vpop.permute.xlu1 %745 }
 0x739   :  { %v735_v17 = vpop.permute.xlu0 %734  ;;  %v1460_v24 = vmul.f32 %v1458_v23, %v746_v16 }
 0x73a   :  { %v737_v18 = vadd.f32 %v735_v17, %v723_v13  ;;  %v738_v19 = vadd.f32 %v735_v17, %v726_v11 }
 0x73c   :  { %v756_v20 = vmul.f32 %v746_v16, %v737_v18  ;;  %v753_v21 = vpop.permute.xlu1 %752 }
 0x73d   :  { %v757_v22 = vmul.f32 %v753_v21, %v738_v19  ;;  %v1461_v26 = vmul.f32 %v1459_v25, %v753_v21 }
 0x73e   :  { %761 = vperm.xlu1 %1897, %v756_v20  }
 0x742   :  { %764 = vperm.xlu1 %1897, %v757_v22  }
 0x746   :  { %1465 = vperm.xlu1 %1897, %v1460_v24  }
 0x74a   :  { %1468 = vperm.xlu1 %1897, %v1461_v26  }
 0x7bd   :  { %v762_v27 = vpop.permute.xlu1 %761 }
 0x7be   :  { %v769_v29 = vrot.slane %v762_v27, %v768_v28 }
 0x7c1   :  { %v765_v6 = vpop.permute.xlu1 %764 }
 0x7c2   :  { %v773_v30 = vrot.slane %v765_v6, %v768_v28 }
 0x7c4   :  { %v775_v31 = vsel %vm774_vm5, %v773_v30, %v769_v29 }
 0x7c5   :  { %778 = vst.msk [vmem:[%s2294_s12] sm:$0x3] %vm777_vm6, %v775_v31  ;;  %v1466_v7 = vpop.permute.xlu1 %1465 }
 0x7c6   :  { %v1473_v33 = vrot.slane %v1466_v7, %v768_v28 }
 0x7c9   :  { %v1469_v32 = vpop.permute.xlu1 %1468 }
 0x7ca   :  { %v1477_v34 = vrot.slane %v1469_v32, %v768_v28 }
 0x7cc   :  { %v1478_v35 = vsel %vm774_vm5, %v1477_v34, %v1473_v33 }
 0x7cd   :  { %1575 = vst.msk [vmem:[%s2294_s12 + $0x2] sm:$0x3] %vm777_vm6, %v1478_v35 }

// kernel: _lambda_.5
= control target key start
LH: loop header
LB: loop body
LE: loop exit
PB: predicated region body
PF: predicated region fallthrough
CT: control target
= control target key end

     0   :  { %s3037_s0 = inlined_call_operand.vmem [shape: s32[2], index: 0, kind: input, shape index: {}]   ;;  %s3038_s1 = inlined_call_operand.vmem [shape: f32[2,8,32], index: 1, kind: input, shape index: {}]   ;;  %s3039_s2 = inlined_call_operand.vmem [shape: f32[32,96], index: 2, kind: input, shape index: {}]   ;;  %s3040_s3 = inlined_call_operand.vmem [shape: f32[1,96], index: 3, kind: input, shape index: {}]   ;;  %s3041_s4 = inlined_call_operand.vmem [shape: f32[32,32], index: 4, kind: input, shape index: {}]   ;;  %s3042_s5 = inlined_call_operand.vmem [shape: f32[1,32], index: 5, kind: input, shape index: {}]   ;;  %s3043_s6 = inlined_call_operand.vmem [shape: f32[1,32], index: 6, kind: input, shape index: {}]   ;;  %s3044_s7 = inlined_call_operand.vmem [shape: f32[1,32], index: 7, kind: input, shape index: {}]   ;;  %s3045_s8 = inlined_call_operand.vmem [shape: f32[9,32,64], index: 8, kind: input, shape index: {}]   ;;  %s3046_s9 = inlined_call_operand.vmem [shape: f32[1,64], index: 9, kind: input, shape index: {}]   ;;  %s3047_s10 = inlined_call_operand.vmem [shape: f32[64,32], index: 10, kind: input, shape index: {}]   ;;  %s3048_s11 = inlined_call_operand.vmem [shape: f32[1,32], index: 11, kind: input, shape index: {}]   ;;  %s3049_s12 = inlined_call_operand.vmem [shape: f32[1,32], index: 12, kind: input, shape index: {}]   ;;  %s3050_s13 = inlined_call_operand.vmem [shape: f32[1,32], index: 13, kind: input, shape index: {}]   ;;  %s3051_s14 = inlined_call_operand.vmem [shape: f32[2,8,32], index: 14, kind: output, shape index: {}]  }
   0x1   :  { %s19_s15 = sshll.u32 %s3037_s0, 4  ;;  %s20_s15 = int_to_ptr.vmem [resolvable:$true] %s19_s15 }
   0x2   :  { %s2563_s16 = scalar_lea.vmem %s20_s15, 16  ;;  %p2568_p1 = scmp.lt.s32.totalorder %s20_s15, %s20_s15 }
   0x3   :  { %p2564_p0 = scmp.ne.s32.totalorder %s20_s15, %s2563_s16  ;;  %p2569_p2 = scmp.lt.s32.totalorder %s2563_s16, %s2563_s16 }
   0x5   :  { %p2570_p3 = por %p2569_p2, %p2568_p1 }
   0x7   :  { %p2571_p4 = pnand %p2570_p3, %p2564_p0 }
   0x9   :  { %2574 = shalt.err (!%p2571_p4)  }
   0xa   :  { %s2577_s17 = smov [#allocation4]  }
   0xb   :  { %22 = dma.vmem_to_smem %s20_s15, 16, %s2577_s17, [#allocation3] }
   0xc   :  { %2575 = dma.done.wait [#allocation3], 16 }
   0xd   :  { %2576 = vsyncadd [#allocation3], 4294967280 }
   0xe   :  { %24 = sfence }
   0xf   :  { %v61_v0 = vld [vmem:[%s3039_s2] sm:$0xff]  ;;  %v62_v1 = vld [vmem:[%s3039_s2 + $0x8] sm:$0xff]  ;;  %v63_v2 = vld [vmem:[%s3039_s2 + $0x10] sm:$0xff]  ;;  %vm51_vm0 = vcmask 261120   ;;  %v2578_v8 = vmov 0.0   ;;  %vm2579_vm1 = vmmov 0   ;;  %v153_v17 = vlaneseq }
  0x10   :  { %v2396_v3 = vpack.c.bf16 %v62_v1, %v61_v0  ;;  %v64_v4 = vld [vmem:[%s3039_s2 + $0x18] sm:$0xff]  ;;  %v2682_v5 = vld [vmem:[%s3038_s1] sm:$0xff]  ;;  %v2689_v7 = vld [vmem:[%s3038_s1 + $0x8] sm:$0xff]  ;;  %2216 = vmatprep.subr.mxu1 %v2578_v8  ;;  %52 = vst.msk [vmem:[#allocation2] sm:$0xff] %vm51_vm0, %v2578_v8  ;;  %2218 = vmatprep.mubr.msk.f32.mxu1 %vm2579_vm1, %v2578_v8  ;;  %s2580_s29 = smov 112   ;;  %s2581_s30 = smov 96  }
  0x11   :  { %v2400_v6 = vpack.c.bf16 %v64_v4, %v63_v2  ;;  %2213 = vmatprep.mubr.msk.f32.mxu0 %vm51_vm0, %v2682_v5  ;;  %53 = vst.msk [vmem:[#allocation2 + $0x8] sm:$0xff] %vm51_vm0, %v2578_v8  ;;  %56 = vst.msk [vmem:[#allocation2 + $0x18] sm:$0xff] %vm51_vm0, %v2578_v8  ;;  %v2032_v9 = vld [vmem:[%s3040_s3] ss:$0 sm:$0xff]  ;;  %s2582_s15 = smov 80   ;;  %vm166_vm2 = vcmask 130048  }
  0x12   :  { %2397 = vmatprep.subr.bf16.mxu0 %v2396_v3  ;;  %57 = vst.msk [vmem:[#allocation2 + $0x20] sm:$0xff] %vm51_vm0, %v2578_v8  ;;  %s2724_s3 = sld [smem:[#allocation4]]  ;;  %v2727_v18 = vand.u32 127, %v153_v17  ;;  %vm243_vm4 = vcmask 64512   ;;  %s2583_s16 = smov 48   ;;  %v503_v50 = vld [vmem:[%s3041_s4] sm:$0xff] }
  0x13   :  { %2399 = vmatpush3.bf16.msra.mxu0 %v2396_v3  ;;  %s2584_s17 = smov 64   ;;  %v504_v51 = vld [vmem:[%s3041_s4 + $0x8] sm:$0xff]  ;;  %v505_v52 = vld [vmem:[%s3041_s4 + $0x10] sm:$0xff]  ;;  %v2585_v53 = vmov 0.0|0.0   ;;  %v506_v55 = vld [vmem:[%s3041_s4 + $0x18] sm:$0xff]  ;;  %s2771_s25 = sld [smem:[#allocation4 + $0x1]] }
  0x14   :  { %2401 = vmatprep.subr.bf16.mxu0 %v2400_v6  ;;  %v2405_v54 = vpack.c.bf16 %v504_v51, %v503_v50  ;;  %v2408_v56 = vpack.c.bf16 %v506_v55, %v505_v52  ;;  %s2586_s26 = smov 16   ;;  %vm54_vm6 = vcmask 257024   ;;  %v2827_v52 = vld [vmem:[%s3044_s7] ss:$0 sm:$0xff]  ;;  %vm1886_vm9 = vcmask 523264  }
  0x15   :  { %55 = vst.msk [vmem:[#allocation2 + $0x10] sm:$0xf] %vm54_vm6, %v2578_v8  ;;  %58 = vst.msk [vmem:[#allocation2 + $0x28] sm:$0xf] %vm54_vm6, %v2578_v8 }
  0x17   :  { %2403 = vmatpush3.bf16.msra.mxu0 %v2400_v6 }
  0x18   :  { %2226 = vmatprep.subr.mxu0 %v2578_v8  ;;  %v158_v19 = vstv %s2724_s3 }
  0x19   :  { %vm159_vm3 = vcmp.ge.s32.totalorder %v2727_v18, %v158_v19  ;;  %v620_v61 = vstv %s2771_s25 }
  0x1a   :  { %2214 = vmatmul.mubr.msk.f32.vlgmr.msra.gmra.mrb[0].mxu0 %vm51_vm0, %v2689_v7  ;;  %v160_v21 = vsel %vm159_vm3, -1e+09, %v2578_v8  ;;  %vm621_vm5 = vcmp.ge.s32.totalorder %v2727_v18, %v620_v61 }
  0x1b   :  { %2228 = vmatprep.mubr.msk.f32.mxu0 %vm2579_vm1, %v2578_v8  ;;  %v622_v63 = vsel %vm621_vm5, -1e+09, %v2578_v8 }
  0xed   :  { %v2215_v10 = vpop.f32.mrb[0].mxu0 }
  0xee   :  { %v2710_v11 = vadd.f32 %v2215_v10, %v2032_v9  ;;  %v144_v12 = vpop.f32.mrb[1].mxu0 }
  0xef   :  { %v145_v13 = vadd.f32 %v2032_v9, %v144_v12 }
  0xf1   :  { %331 = vrot.lane.b32.xlu1 %v145_v13, %s2580_s29  ;;  %164 = vrot.lane.b32.xlu0 %v145_v13, %s2581_s30 }
  0xf5   :  { %333 = vrot.lane.b32.xlu0 %v145_v13, %s2582_s15 }
 0x163   :  { %v165_v14 = vpop.permute.xlu0 %164  ;;  %v332_v16 = vpop.permute.xlu1 %331 }
 0x164   :  { %2217 = vmatpush3.xpose.msk.msra.mxu1 %vm166_vm2, %v165_v14 }
 0x165   :  { %2221 = vmatprep.subr.mxu1 %v2578_v8 }
 0x167   :  { %2219 = vmatmul.mubr.msk.f32.vlgmr.msra.gmra.mrb[0].mxu1 %vm166_vm2, %v145_v13  ;;  %v334_v15 = vpop.permute.xlu0 %333 }
 0x168   :  { %2227 = vmatpush3.xpose.msk.msra.mxu0 %vm166_vm2, %v334_v15  ;;  %2223 = vmatprep.mubr.msk.f32.mxu1 %vm2579_vm1, %v2578_v8 }
 0x169   :  { %2404 = vmatprep.subr.bf16.mxu0 %v2585_v53 }
 0x16b   :  { %2229 = vmatmul.mubr.msk.f32.vlgmr.msra.gmra.mrb[2].mxu0 %vm166_vm2, %v332_v16 }
 0x16c   :  { %2244 = vmatprep.mubr.msk.f32.mxu0 %vm2579_vm1, %v2578_v8  ;;  %2406 = vmatpush3.bf16.msra.mxu0 %v2405_v54 }
 0x16d   :  { %2407 = vmatprep.subr.bf16.mxu0 %v2585_v53 }
 0x170   :  { %2409 = vmatpush3.bf16.msra.mxu0 %v2408_v56 }
 0x171   :  { %2257 = vmatprep.subr.mxu0 %v2578_v8 }
 0x23a   :  { %v237_v20 = vpop.f32.mrb[0].mxu1 }
 0x23b   :  { %v241_v22 = vmul.f32 0.25, %v237_v20  ;;  %v2220_v23 = vpop.f32.mrb[1].mxu1 }
 0x23d   :  { %v242_v24 = vadd.f32 %v241_v22, %v160_v21 }
 0x23e   :  { %v405_v25 = vpop.f32.mrb[2].mxu0 }
 0x23f   :  { %v409_v26 = vmul.f32 0.25, %v405_v25  ;;  %v2230_v27 = vpop.f32.mrb[3].mxu0  ;;  %v244_v28 = vsel %vm243_vm4, %v242_v24, -inf }
 0x240   :  { %245 = vmax.xlane.f32.xlu1 %v244_v28 }
 0x241   :  { %v410_v29 = vadd.f32 %v409_v26, %v160_v21  ;;  %v2797_v26 = vld [vmem:[%s3042_s5] ss:$0 sm:$0xff] }
 0x243   :  { %v411_v30 = vsel %vm243_vm4, %v410_v29, -inf }
 0x244   :  { %412 = vmax.xlane.f32.xlu0 %v411_v30 }
 0x2cd   :  { %v246_v31 = vpop.xlane.xlu1 %245 }
 0x2ce   :  { %v247_v32 = vsub.f32 %v242_v24, %v246_v31 }
 0x2d0   :  { %v248_v33 = vmul.f32 1.442695, %v247_v32 }
 0x2d1   :  { %v413_v34 = vpop.xlane.xlu0 %412 }
 0x2d2   :  { %2539 = vpow2.f32 %v248_v33  ;;  %v414_v35 = vsub.f32 %v410_v29, %v413_v34 }
 0x2d4   :  { %v415_v36 = vmul.f32 1.442695, %v414_v35 }
 0x2d6   :  { %2541 = vpow2.f32 %v415_v36 }
 0x2dc   :  { %v2540_v37 = vpop.eup %2539 }
 0x2dd   :  { %v250_v38 = vsel %vm243_vm4, %v2540_v37, 0.0 }
 0x2de   :  { %251 = vadd.xlane.f32.xlu0 %v250_v38 }
 0x2e0   :  { %v2542_v39 = vpop.eup %2541 }
 0x2e1   :  { %v417_v40 = vsel %vm243_vm4, %v2542_v39, 0.0 }
 0x2e2   :  { %418 = vadd.xlane.f32.xlu1 %v417_v40 }
 0x2f3   :  { %422 = vrot.lane.b32.xlu1 %v145_v13, %s2583_s16 }
 0x2f4   :  { %255 = vrot.lane.b32.xlu0 %v145_v13, %s2584_s17 }
 0x2f7   :  { %626 = vrot.lane.b32.xlu1 %v2710_v11, %s2581_s30 }
 0x2fb   :  { %793 = vrot.lane.b32.xlu1 %v2710_v11, %s2582_s15 }
 0x36b   :  { %v252_v41 = vpop.xlane.xlu0 %251 }
 0x36c   :  { %2543 = vrcp.f32 %v252_v41 }
 0x36f   :  { %v419_v42 = vpop.xlane.xlu1 %418  ;;  %v256_v43 = vpop.permute.xlu0 %255 }
 0x370   :  { %2545 = vrcp.f32 %v419_v42  ;;  %2222 = vmatpush3.msra.mxu1 %v256_v43 }
 0x371   :  { %2231 = vmatprep.subr.mxu1 %v2578_v8 }
 0x373   :  { %v423_v46 = vpop.permute.xlu1 %422 }
 0x376   :  { %v2544_v44 = vpop.eup %2543 }
 0x377   :  { %v254_v45 = vmul.f32 %v2544_v44, %v2540_v37  ;;  %v627_v49 = vpop.permute.xlu1 %626 }
 0x379   :  { %2224 = vmatmul.mubr.msk.f32.vlgmr.msra.gmra.mrb[2].mxu1 %vm243_vm4, %v254_v45 }
 0x37a   :  { %v2546_v47 = vpop.eup %2545  ;;  %2232 = vmatpush3.msra.mxu1 %v423_v46  ;;  %2233 = vmatprep.mubr.msk.f32.mxu1 %vm2579_vm1, %v2578_v8 }
 0x37b   :  { %v421_v48 = vmul.f32 %v2546_v47, %v2542_v39  ;;  %2247 = vmatprep.subr.mxu1 %v2578_v8  ;;  %v794_v9 = vpop.permute.xlu1 %793 }
 0x37d   :  { %2234 = vmatmul.mubr.msk.f32.vlgmr.msra.gmra.mrb[4].mxu1 %vm243_vm4, %v421_v48 }
 0x37e   :  { %2249 = vmatprep.mubr.msk.f32.mxu1 %vm2579_vm1, %v2578_v8 }
 0x381   :  { %2248 = vmatpush3.xpose.msk.msra.mxu1 %vm166_vm2, %v627_v49  ;;  %v2814_v49 = vshrl.u32 %v153_v17, 7 }
 0x382   :  { %2252 = vmatprep.subr.mxu1 %v2578_v8 }
 0x383   :  { %vm161_vm7 = vcmp.ge.s32.totalorder %v2814_v49, %v158_v19  ;;  %vm623_vm8 = vcmp.ge.s32.totalorder %v2814_v49, %v620_v61  ;;  %v1060_v61 = vld [vmem:[%s3045_s8 + $0x18] sm:$0xff]  ;;  %v2062_v49 = vld [vmem:[%s3045_s8 + $0x48] sm:$0xff] }
 0x384   :  { %2250 = vmatmul.mubr.msk.f32.vlgmr.msra.gmra.mrb[6].mxu1 %vm166_vm2, %v2710_v11 }
 0x385   :  { %2254 = vmatprep.mubr.msk.f32.mxu1 %vm2579_vm1, %v2578_v8 }
 0x44c   :  { %v327_v57 = vpop.f32.mrb[2].mxu1 }
 0x44d   :  { %v2225_v58 = vpop.f32.mrb[3].mxu1 }
 0x450   :  { %v494_v59 = vpop.f32.mrb[4].mxu1 }
 0x451   :  { %499 = vrot.lane.b32.xlu0 %v494_v59, %s2586_s26  ;;  %v2235_v60 = vpop.f32.mrb[5].mxu1 }
 0x455   :  { %791 = vrot.lane.b32.xlu0 %v2710_v11, %s2580_s29 }
 0x457   :  { %v698_v62 = vpop.f32.mrb[6].mxu1 }
 0x458   :  { %v702_v0 = vmul.f32 0.25, %v698_v62  ;;  %v2251_v1 = vpop.f32.mrb[7].mxu1 }
 0x45a   :  { %v703_v2 = vadd.f32 %v702_v0, %v622_v63 }
 0x45c   :  { %v704_v3 = vsel %vm243_vm4, %v703_v2, -inf }
 0x45d   :  { %705 = vmax.xlane.f32.xlu1 %v704_v3 }
 0x4c3   :  { %v500_v4 = vpop.permute.xlu0 %499 }
 0x4c4   :  { %v502_v6 = vsel %vm166_vm2, %v327_v57, %v500_v4 }
 0x4c5   :  { %2245 = vmatmul.mubr.msk.f32.vlgmr.msra.gmra.mrb[4].mxu0 %vm51_vm0, %v502_v6 }
 0x4c6   :  { %2258 = vmatpush3.xpose.msk.msra.mxu0 %vm166_vm2, %v794_v9  ;;  %2259 = vmatprep.mubr.msk.f32.mxu0 %vm2579_vm1, %v2578_v8 }
 0x4c7   :  { %v792_v10 = vpop.permute.xlu0 %791  ;;  %2410 = vmatprep.subr.bf16.mxu0 %v2585_v53 }
 0x4c9   :  { %2260 = vmatmul.mubr.msk.f32.vlgmr.msra.gmra.mrb[6].mxu0 %vm166_vm2, %v792_v10 }
 0x4ca   :  { %2412 = vmatpush3.bf16.msra.mxu0 %v2405_v54  ;;  %2275 = vmatprep.mubr.msk.f32.mxu0 %vm2579_vm1, %v2578_v8  ;;  %v2587_v54 = vmov 1.0  }
 0x4cb   :  { %2413 = vmatprep.subr.bf16.mxu0 %v2585_v53  ;;  %v2831_v17 = vsel %vm161_vm7, 0.0, %v2587_v54 }
 0x4ce   :  { %2415 = vmatpush3.bf16.msra.mxu0 %v2408_v56 }
 0x4ea   :  { %v706_v12 = vpop.xlane.xlu1 %705 }
 0x4eb   :  { %v707_v13 = vsub.f32 %v703_v2, %v706_v12 }
 0x4ed   :  { %v708_v14 = vmul.f32 1.442695, %v707_v13 }
 0x4ef   :  { %2547 = vpow2.f32 %v708_v14 }
 0x4f9   :  { %v2548_v24 = vpop.eup %2547 }
 0x4fa   :  { %v710_v25 = vsel %vm243_vm4, %v2548_v24, 0.0 }
 0x598   :  { %v583_v15 = vpop.f32.mrb[4].mxu0 }
 0x599   :  { %v2246_v16 = vpop.f32.mrb[5].mxu0  ;;  %v584_v27 = vadd.f32 %v2797_v26, %v583_v15  ;;  %v2053_v15 = vld [vmem:[%s3045_s8 + $0x20] sm:$0xff] }
 0x59a   :  { %v2054_v16 = vld [vmem:[%s3045_s8 + $0x28] sm:$0xff] }
 0x59b   :  { %v587_v28 = vadd.f32 %v584_v27, %v2682_v5 }
 0x59c   :  { %v865_v18 = vpop.f32.mrb[6].mxu0 }
 0x59d   :  { %v869_v20 = vmul.f32 0.25, %v865_v18  ;;  %v2261_v21 = vpop.f32.mrb[7].mxu0  ;;  %v590_v29 = vsel %vm51_vm0, %v587_v28, 0.0  ;;  %v2416_v18 = vpack.c.bf16 %v2054_v16, %v2053_v15  ;;  %v2092_v15 = vld [vmem:[%s3045_s8 + $0xe8] sm:$0xff] }
 0x59f   :  { %v870_v22 = vadd.f32 %v869_v20, %v622_v63  ;;  %v2068_v20 = vld [vmem:[%s3045_s8 + $0x68] sm:$0xff]  ;;  %2417 = vmatprep.subr.bf16.mxu0 %v2416_v18 }
 0x5a1   :  { %v871_v23 = vsel %vm243_vm4, %v870_v22, -inf }
 0x5a2   :  { %872 = vmax.xlane.f32.xlu0 %v871_v23  ;;  %v2056_v23 = vld [vmem:[%s3045_s8 + $0x38] sm:$0xff] }
 0x5a6   :  { %711 = vadd.xlane.f32.xlu0 %v710_v25 }
 0x5bc   :  { %715 = vrot.lane.b32.xlu0 %v2710_v11, %s2584_s17 }
 0x5db   :  { %591 = vadd.xlane.f32.xlu0 %v590_v29  ;;  %v1058_v29 = vld [vmem:[%s3045_s8 + $0x8] sm:$0xff] }
 0x62f   :  { %v873_v30 = vpop.xlane.xlu0 %872 }
 0x630   :  { %v874_v31 = vsub.f32 %v870_v22, %v873_v30  ;;  %v2055_v22 = vld [vmem:[%s3045_s8 + $0x30] sm:$0xff]  ;;  %v2073_v30 = vld [vmem:[%s3045_s8 + $0x80] sm:$0xff] }
 0x631   :  { %v2420_v25 = vpack.c.bf16 %v2056_v23, %v2055_v22  ;;  %v2097_v23 = vld [vmem:[%s3045_s8 + $0x100] sm:$0xff] }
 0x632   :  { %v875_v32 = vmul.f32 1.442695, %v874_v31 }
 0x633   :  { %v712_v33 = vpop.xlane.xlu0 %711 }
 0x634   :  { %2549 = vpow2.f32 %v875_v32  ;;  %v2074_v32 = vld [vmem:[%s3045_s8 + $0x88] sm:$0xff] }
 0x635   :  { %2551 = vrcp.f32 %v712_v33  ;;  %v2448_v33 = vpack.c.bf16 %v2074_v32, %v2073_v30 }
 0x637   :  { %v716_v34 = vpop.permute.xlu0 %715 }
 0x638   :  { %2253 = vmatpush3.msra.mxu1 %v716_v34 }
 0x639   :  { %2262 = vmatprep.subr.mxu1 %v2578_v8 }
 0x63e   :  { %v2550_v35 = vpop.eup %2549 }
 0x63f   :  { %v2552_v36 = vpop.eup %2551  ;;  %v877_v37 = vsel %vm243_vm4, %v2550_v35, 0.0 }
 0x640   :  { %v714_v38 = vmul.f32 %v2552_v36, %v2548_v24  ;;  %878 = vadd.xlane.f32.xlu1 %v877_v37  ;;  %v2069_v24 = vld [vmem:[%s3045_s8 + $0x70] sm:$0xff] }
 0x642   :  { %2255 = vmatmul.mubr.msk.f32.vlgmr.msra.gmra.mrb[8].mxu1 %vm243_vm4, %v714_v38 }
 0x643   :  { %2264 = vmatprep.mubr.msk.f32.mxu1 %vm2579_vm1, %v2578_v8  ;;  %v2819_v8 = vld [vmem:[%s3043_s6] ss:$0 sm:$0xff] }
 0x651   :  { %882 = vrot.lane.b32.xlu1 %v2710_v11, %s2583_s16 }
 0x668   :  { %v592_v5 = vpop.xlane.xlu0 %591 }
 0x669   :  { %v594_v39 = vmul.f32 0.03125, %v592_v5 }
 0x66b   :  { %v595_v40 = vsub.f32 %v587_v28, %v594_v39  ;;  %v1057_v28 = vld [vmem:[%s3045_s8] sm:$0xff]  ;;  %v2889_v39 = vsel %vm623_vm8, 0.0, %v2587_v54 }
 0x66c   :  { %v2424_v31 = vpack.c.bf16 %v1058_v29, %v1057_v28  ;;  %v2100_v28 = vld [vmem:[%s3045_s8 + $0x118] sm:$0xff] }
 0x66d   :  { %v596_v41 = vmul.f32 %v595_v40, %v595_v40 }
 0x66f   :  { %v597_v42 = vsel %vm51_vm0, %v596_v41, 0.0 }
 0x670   :  { %598 = vadd.xlane.f32.xlu0 %v597_v42  ;;  %v1059_v42 = vld [vmem:[%s3045_s8 + $0x10] sm:$0xff] }
 0x6cd   :  { %v879_v43 = vpop.xlane.xlu1 %878 }
 0x6ce   :  { %2553 = vrcp.f32 %v879_v43  ;;  %v2075_v43 = vld [vmem:[%s3045_s8 + $0x90] sm:$0xff] }
 0x6d1   :  { %v883_v44 = vpop.permute.xlu1 %882 }
 0x6d2   :  { %2263 = vmatpush3.msra.mxu1 %v883_v44  ;;  %v2076_v44 = vld [vmem:[%s3045_s8 + $0x98] sm:$0xff] }
 0x6d8   :  { %v2554_v45 = vpop.eup %2553 }
 0x6d9   :  { %v881_v46 = vmul.f32 %v2554_v45, %v2550_v35  ;;  %v2061_v45 = vld [vmem:[%s3045_s8 + $0x40] sm:$0xff] }
 0x6db   :  { %2265 = vmatmul.mubr.msk.f32.vlgmr.msra.gmra.mrb[10].mxu1 %vm243_vm4, %v881_v46 }
 0x6fd   :  { %v599_v11 = vpop.xlane.xlu0 %598 }
 0x6fe   :  { %v600_v47 = vmul.f32 0.03125, %v599_v11 }
 0x700   :  { %v601_v48 = vadd.f32 1e-05, %v600_v47  ;;  %v2428_v47 = vpack.c.bf16 %v1060_v61, %v1059_v42  ;;  %v1877_v61 = vld [vmem:[%s3047_s10 + $0x30] sm:$0xff] }
 0x702   :  { %2555 = vrsqrt.f32 %v601_v48  ;;  %v2452_v48 = vpack.c.bf16 %v2076_v44, %v2075_v43  ;;  %v1878_v43 = vld [vmem:[%s3047_s10 + $0x38] sm:$0xff] }
 0x703   :  { %v2500_v44 = vpack.c.bf16 %v1878_v43, %v1877_v61 }
 0x70c   :  { %v2556_v50 = vpop.eup %2555 }
 0x70d   :  { %v603_v51 = vmul.f32 %v2556_v50, %v595_v40 }
 0x70f   :  { %v610_v53 = vmul.f32 %v2819_v8, %v603_v51  ;;  %v2080_v51 = vld [vmem:[%s3045_s8 + $0xa8] sm:$0xff] }
 0x711   :  { %v617_v55 = vadd.f32 %v2827_v52, %v610_v53  ;;  %v2432_v53 = vpack.c.bf16 %v2062_v49, %v2061_v45 }
 0x713   :  { %v2835_v56 = vmul.f32 %v617_v55, %v2831_v17  ;;  %v2063_v55 = vld [vmem:[%s3045_s8 + $0x50] sm:$0xff] }
 0x715   :  { %1053 = vst.msk [vmem:[#allocation2 + $0x8] sm:$0xff] %vm51_vm0, %v2835_v56  ;;  %v787_v19 = vpop.f32.mrb[8].mxu1 }
 0x716   :  { %v2256_v57 = vpop.f32.mrb[9].mxu1 }
 0x717   :  { %v2081_v57 = vld [vmem:[%s3045_s8 + $0xb0] sm:$0xff] }
 0x71c   :  { %v1320_v58 = vld [vmem:[#allocation2 + $0x7] sm:$0xff] }
 0x71d   :  { %2319 = vmatprep.mubr.msk.f32.mxu1 %vm51_vm0, %v1320_v58  ;;  %v1061_v0 = vld [vmem:[#allocation2 + $0x5] sm:$0xff]  ;;  %v2082_v58 = vld [vmem:[%s3045_s8 + $0xb8] sm:$0xff] }
 0x71e   :  { %v1055_v50 = vld [vmem:[#allocation2 + $0x4] sm:$0xff] }
 0x71f   :  { %v1590_v16 = vld [vmem:[#allocation2 + $0xa] sm:$0xff] }
 0x7ae   :  { %v954_v59 = vpop.f32.mrb[10].mxu1 }
 0x7af   :  { %959 = vrot.lane.b32.xlu1 %v954_v59, %s2586_s26  ;;  %v2266_v60 = vpop.f32.mrb[11].mxu1 }
 0x821   :  { %v960_v62 = vpop.permute.xlu1 %959 }
 0x822   :  { %v962_v63 = vsel %vm166_vm2, %v787_v19, %v960_v62  ;;  %v2064_v19 = vld [vmem:[%s3045_s8 + $0x58] sm:$0xff] }
 0x823   :  { %2276 = vmatmul.mubr.msk.f32.vlgmr.msra.gmra.mrb[8].mxu0 %vm51_vm0, %v962_v63  ;;  %v2436_v60 = vpack.c.bf16 %v2064_v19, %v2063_v55  ;;  %v2460_v63 = vpack.c.bf16 %v2082_v58, %v2081_v57 }
 0x824   :  { %2286 = vmatprep.mubr.msk.f32.mxu0 %vm51_vm0, %v1061_v0  ;;  %2419 = vmatpush3.bf16.msra.mxu0 %v2416_v18  ;;  %v2085_v0 = vld [vmem:[%s3045_s8 + $0xc0] sm:$0xff]  ;;  %v2093_v18 = vld [vmem:[%s3045_s8 + $0xf0] sm:$0xff] }
 0x825   :  { %2421 = vmatprep.subr.bf16.mxu0 %v2420_v25 }
 0x828   :  { %2423 = vmatpush3.bf16.msra.mxu0 %v2420_v25  ;;  %v1680_v25 = vld [vmem:[#allocation2 + $0xb] sm:$0xff] }
 0x829   :  { %2425 = vmatprep.subr.bf16.mxu0 %v2424_v31 }
 0x8f6   :  { %v1032_v1 = vpop.f32.mrb[8].mxu0 }
 0x8f7   :  { %v1033_v2 = vadd.f32 %v2797_v26, %v1032_v1  ;;  %v2277_v3 = vpop.f32.mrb[9].mxu0  ;;  %v2070_v26 = vld [vmem:[%s3045_s8 + $0x78] sm:$0xff]  ;;  %v2086_v1 = vld [vmem:[%s3045_s8 + $0xc8] sm:$0xff] }
 0x8f8   :  { %v2444_v27 = vpack.c.bf16 %v2070_v26, %v2069_v24  ;;  %v1500_v3 = vld [vmem:[#allocation2 + $0x9] sm:$0xff] }
 0x8f9   :  { %v1036_v4 = vadd.f32 %v1033_v2, %v2689_v7  ;;  %v2067_v7 = vld [vmem:[%s3045_s8 + $0x60] sm:$0xff]  ;;  %v2098_v24 = vld [vmem:[%s3045_s8 + $0x108] sm:$0xff] }
 0x8fa   :  { %v2440_v21 = vpack.c.bf16 %v2068_v20, %v2067_v7  ;;  %v1230_v2 = vld [vmem:[#allocation2 + $0x6] sm:$0xff]  ;;  %v2094_v20 = vld [vmem:[%s3045_s8 + $0xf8] sm:$0xff]  ;;  %v2480_v26 = vpack.c.bf16 %v2098_v24, %v2097_v23 }
 0x8fb   :  { %v1037_v6 = vsel %vm51_vm0, %v1036_v4, 0.0 }
 0x8fc   :  { %1038 = vadd.xlane.f32.xlu1 %v1037_v6  ;;  %2441 = vmatprep.subr.bf16.mxu1 %v2440_v21  ;;  %v2087_v6 = vld [vmem:[%s3045_s8 + $0xd0] sm:$0xff] }
 0x8fd   :  { %2443 = vmatpush3.bf16.msra.mxu1 %v2440_v21  ;;  %v2476_v21 = vpack.c.bf16 %v2094_v20, %v2093_v18 }
 0x8fe   :  { %2445 = vmatprep.subr.bf16.mxu1 %v2444_v27 }
 0x901   :  { %2447 = vmatpush3.bf16.msra.mxu1 %v2444_v27  ;;  %v2099_v27 = vld [vmem:[%s3045_s8 + $0x110] sm:$0xff] }
 0x902   :  { %2449 = vmatprep.subr.bf16.mxu1 %v2448_v33  ;;  %v2484_v29 = vpack.c.bf16 %v2100_v28, %v2099_v27 }
 0x989   :  { %v1039_v9 = vpop.xlane.xlu1 %1038 }
 0x98a   :  { %v1040_v10 = vmul.f32 0.03125, %v1039_v9  ;;  %v2088_v9 = vld [vmem:[%s3045_s8 + $0xd8] sm:$0xff] }
 0x98c   :  { %v1041_v12 = vsub.f32 %v1036_v4, %v1040_v10  ;;  %v2464_v4 = vpack.c.bf16 %v2086_v1, %v2085_v0  ;;  %v2588_v0 = vmov 0  }
 0x98d   :  { %2532 = vset.pattern.permute.xlu1 %v2588_v0  ;;  %2538 = vset.pattern.permute.xlu0 %v2588_v0 }
 0x98e   :  { %v1042_v13 = vmul.f32 %v1041_v12, %v1041_v12 }
 0x990   :  { %v1043_v14 = vsel %vm51_vm0, %v1042_v13, 0.0 }
 0x991   :  { %1044 = vadd.xlane.f32.xlu0 %v1043_v14  ;;  %v2091_v14 = vld [vmem:[%s3045_s8 + $0xe0] sm:$0xff] }
 0x992   :  { %v2472_v7 = vpack.c.bf16 %v2092_v15, %v2091_v14 }
 0xa1e   :  { %v1045_v34 = vpop.xlane.xlu0 %1044 }
 0xa1f   :  { %v1046_v35 = vmul.f32 0.03125, %v1045_v34  ;;  %v1872_v34 = vld [vmem:[%s3047_s10 + $0x8] sm:$0xff] }
 0xa21   :  { %v1047_v36 = vadd.f32 1e-05, %v1046_v35  ;;  %v1873_v35 = vld [vmem:[%s3047_s10 + $0x10] sm:$0xff] }
 0xa23   :  { %2557 = vrsqrt.f32 %v1047_v36 }
 0xa2d   :  { %v2558_v37 = vpop.eup %2557 }
 0xa2e   :  { %v1049_v38 = vmul.f32 %v2558_v37, %v1041_v12  ;;  %v2468_v12 = vpack.c.bf16 %v2088_v9, %v2087_v6  ;;  %v1874_v37 = vld [vmem:[%s3047_s10 + $0x18] sm:$0xff] }
 0xa30   :  { %v1050_v5 = vmul.f32 %v2819_v8, %v1049_v38  ;;  %v2079_v8 = vld [vmem:[%s3045_s8 + $0xa0] sm:$0xff]  ;;  %v2492_v38 = vpack.c.bf16 %v1874_v37, %v1873_v35 }
 0xa31   :  { %v2456_v54 = vpack.c.bf16 %v2080_v51, %v2079_v8 }
 0xa32   :  { %v1051_v40 = vadd.f32 %v2827_v52, %v1050_v5  ;;  %v1410_v52 = vld [vmem:[#allocation2 + $0x8] sm:$0xff]  ;;  %v1875_v5 = vld [vmem:[%s3047_s10 + $0x20] sm:$0xff] }
 0xa34   :  { %v2893_v41 = vmul.f32 %v1051_v40, %v2889_v39  ;;  %v1876_v40 = vld [vmem:[%s3047_s10 + $0x28] sm:$0xff] }
 0xa35   :  { %v2496_v42 = vpack.c.bf16 %v1876_v40, %v1875_v5 }
 0xa36   :  { %1054 = vst.msk [vmem:[#allocation2 + $0x20] sm:$0xff] %vm51_vm0, %v2893_v41 }
 0xa3d   :  { %v1062_v46 = vld [vmem:[#allocation2 + $0x1d] sm:$0xff] }
 0xa3e   :  { %v1321_v11 = vld [vmem:[#allocation2 + $0x1f] sm:$0xff]  ;;  %2287 = vmatmul.mubr.msk.f32.vlgmr.msra.gmra.mrb[10].mxu0 %vm51_vm0, %v1062_v46 }
 0xa3f   :  { %2320 = vmatmul.mubr.msk.f32.vlgmr.msra.gmra.mrb[12].mxu1 %vm51_vm0, %v1321_v11  ;;  %2427 = vmatpush3.bf16.msra.mxu0 %v2424_v31  ;;  %v1056_v59 = vld [vmem:[#allocation2 + $0x1c] sm:$0xff]  ;;  %v1770_v31 = vld [vmem:[#allocation2 + $0xc] sm:$0xff]  ;;  %v1771_v32 = vld [vmem:[#allocation2 + $0x24] sm:$0xff] }
 0xa40   :  { %2297 = vmatprep.mubr.msk.f32.mxu0 %vm51_vm0, %v1055_v50  ;;  %2451 = vmatpush3.bf16.msra.mxu1 %v2448_v33  ;;  %v1411_v62 = vld [vmem:[#allocation2 + $0x20] sm:$0xff] }
 0xa41   :  { %2330 = vmatprep.mubr.msk.f32.mxu1 %vm51_vm0, %v1410_v52  ;;  %2429 = vmatprep.subr.bf16.mxu0 %v2428_v47  ;;  %v1231_v10 = vld [vmem:[#allocation2 + $0x1e] sm:$0xff] }
 0xa42   :  { %2453 = vmatprep.subr.bf16.mxu1 %v2452_v48  ;;  %v1501_v13 = vld [vmem:[#allocation2 + $0x21] sm:$0xff] }
 0xa43   :  { %2431 = vmatpush3.bf16.msra.mxu0 %v2428_v47  ;;  %v1591_v22 = vld [vmem:[#allocation2 + $0x22] sm:$0xff]  ;;  %v2103_v47 = vld [vmem:[%s3046_s9] ss:$0 sm:$0xff] }
 0xa44   :  { %2455 = vmatpush3.bf16.msra.mxu1 %v2452_v48  ;;  %2433 = vmatprep.subr.bf16.mxu0 %v2432_v53  ;;  %v1681_v30 = vld [vmem:[#allocation2 + $0x23] sm:$0xff] }
 0xa45   :  { %2457 = vmatprep.subr.bf16.mxu1 %v2456_v54  ;;  %v1871_v33 = vld [vmem:[%s3047_s10] sm:$0xff] }
 0xa46   :  { %2298 = vmatmul.mubr.msk.f32.vlgmr.msra.gmra.mrb[10].mxu0 %vm51_vm0, %v1056_v59  ;;  %v2488_v36 = vpack.c.bf16 %v1872_v34, %v1871_v33 }
 0xa47   :  { %2331 = vmatmul.mubr.msk.f32.vlgmr.msra.gmra.mrb[12].mxu1 %vm51_vm0, %v1411_v62  ;;  %2435 = vmatpush3.bf16.msra.mxu0 %v2432_v53 }
 0xa48   :  { %2308 = vmatprep.mubr.msk.f32.mxu0 %vm51_vm0, %v1230_v2  ;;  %2459 = vmatpush3.bf16.msra.mxu1 %v2456_v54  ;;  %v2104_v54 = vld [vmem:[%s3048_s11] ss:$0 sm:$0xff] }
 0xa49   :  { %2341 = vmatprep.mubr.msk.f32.mxu1 %vm51_vm0, %v1500_v3  ;;  %2437 = vmatprep.subr.bf16.mxu0 %v2436_v60 }
 0xa4a   :  { %2461 = vmatprep.subr.bf16.mxu1 %v2460_v63 }
 0xa4b   :  { %2439 = vmatpush3.bf16.msra.mxu0 %v2436_v60 }
 0xa4c   :  { %2463 = vmatpush3.bf16.msra.mxu1 %v2460_v63  ;;  %2489 = vmatprep.subr.bf16.mxu0 %v2488_v36 }
 0xa4d   :  { %2465 = vmatprep.subr.bf16.mxu1 %v2464_v4 }
 0xa4e   :  { %2309 = vmatmul.mubr.msk.f32.vlgmr.msra.gmra.mrb[10].mxu0 %vm51_vm0, %v1231_v10 }
 0xa4f   :  { %2342 = vmatmul.mubr.msk.f32.vlgmr.msra.gmra.mrb[12].mxu1 %vm51_vm0, %v1501_v13  ;;  %2491 = vmatpush3.bf16.msra.mxu0 %v2488_v36  ;;  %v2533_v13 = vpack.i.bf16 %v2889_v39, %v2831_v17  ;;  %v2108_v17 = vld [vmem:[%s3050_s13] ss:$0 sm:$0xff] }
 0xa50   :  { %2467 = vmatpush3.bf16.msra.mxu1 %v2464_v4  ;;  %2352 = vmatprep.mubr.msk.f32.mxu1 %vm51_vm0, %v1590_v16 }
 0xa51   :  { %2469 = vmatprep.subr.bf16.mxu1 %v2468_v12  ;;  %2493 = vmatprep.subr.bf16.mxu0 %v2492_v38 }
 0xa53   :  { %2495 = vmatpush3.bf16.msra.mxu0 %v2492_v38 }
 0xa54   :  { %2471 = vmatpush3.bf16.msra.mxu1 %v2468_v12  ;;  %2497 = vmatprep.subr.bf16.mxu0 %v2496_v42 }
 0xa55   :  { %2473 = vmatprep.subr.bf16.mxu1 %v2472_v7 }
 0xa57   :  { %2353 = vmatmul.mubr.msk.f32.vlgmr.msra.gmra.mrb[12].mxu1 %vm51_vm0, %v1591_v22  ;;  %2499 = vmatpush3.bf16.msra.mxu0 %v2496_v42  ;;  %v2107_v22 = vld [vmem:[%s3049_s12] ss:$0 sm:$0xff] }
 0xa58   :  { %2475 = vmatpush3.bf16.msra.mxu1 %v2472_v7  ;;  %2363 = vmatprep.mubr.msk.f32.mxu1 %vm51_vm0, %v1680_v25 }
 0xa59   :  { %2477 = vmatprep.subr.bf16.mxu1 %v2476_v21  ;;  %2501 = vmatprep.subr.bf16.mxu0 %v2500_v44 }
 0xa5b   :  { %2503 = vmatpush3.bf16.msra.mxu0 %v2500_v44 }
 0xa5c   :  { %2479 = vmatpush3.bf16.msra.mxu1 %v2476_v21 }
 0xa5d   :  { %2481 = vmatprep.subr.bf16.mxu1 %v2480_v26 }
 0xa5f   :  { %2364 = vmatmul.mubr.msk.f32.vlgmr.msra.gmra.mrb[12].mxu1 %vm51_vm0, %v1681_v30 }
 0xa60   :  { %2483 = vmatpush3.bf16.msra.mxu1 %v2480_v26  ;;  %2374 = vmatprep.mubr.msk.f32.mxu1 %vm51_vm0, %v1770_v31 }
 0xa61   :  { %2485 = vmatprep.subr.bf16.mxu1 %v2484_v29 }
 0xa64   :  { %2487 = vmatpush3.bf16.msra.mxu1 %v2484_v29 }
 0xa67   :  { %2375 = vmatmul.mubr.msk.f32.vlgmr.msra.gmra.mrb[12].mxu1 %vm51_vm0, %v1771_v32 }
 0xb21   :  { %v2310_v45 = vpop.f32.mrb[10].mxu0 }
 0xb22   :  { %v1309_v46 = vpop.f32.mrb[11].mxu0 }
 0xb3a   :  { %v2376_v11 = vpop.f32.mrb[12].mxu1 }
 0xb3b   :  { %v2504_v48 = vadd.f32 %v2376_v11, %v2310_v45  ;;  %v1849_v49 = vpop.f32.mrb[13].mxu1 }
 0xb3c   :  { %v2505_v50 = vadd.f32 %v1849_v49, %v1309_v46 }
 0xb3d   :  { %v1868_v8 = vadd.f32 %v2504_v48, %v2103_v47 }
 0xb3e   :  { %v1867_v51 = vadd.f32 %v2505_v50, %v2103_v47 }
 0xb3f   :  { %v1870_v53 = vmax.f32 %v1868_v8, 0.0 }
 0xb40   :  { %v1869_v52 = vmax.f32 %v1867_v51, 0.0 }
 0xb42   :  { %2393 = vmatprep.mubr.msk.f32.mxu0 %vm1886_vm9, %v1869_v52 }
 0xb43   :  { %2394 = vmatmul.mubr.msk.f32.vlgmr.msra.gmra.mrb[12].mxu0 %vm1886_vm9, %v1870_v53 }
 0xc16   :  { %v2395_v55 = vpop.f32.mrb[12].mxu0 }
 0xc17   :  { %v1965_v19 = vadd.f32 %v2395_v55, %v2104_v54  ;;  %v1959_v57 = vpop.f32.mrb[13].mxu0 }
 0xc18   :  { %v1960_v58 = vadd.f32 %v2104_v54, %v1959_v57 }
 0xc19   :  { %v1969_v59 = vadd.f32 %v1965_v19, %v2893_v41 }
 0xc1a   :  { %v1968_v60 = vadd.f32 %v1960_v58, %v2835_v56 }
 0xc1b   :  { %v1975_v62 = vsel %vm51_vm0, %v1969_v59, 0.0 }
 0xc1c   :  { %1976 = vadd.xlane.f32.xlu0 %v1975_v62  ;;  %v1972_v63 = vsel %vm51_vm0, %v1968_v60, 0.0 }
 0xc1d   :  { %1973 = vadd.xlane.f32.xlu1 %v1972_v63 }
 0xca9   :  { %v1977_v1 = vpop.xlane.xlu0 %1976 }
 0xcaa   :  { %v1979_v2 = vmul.f32 0.03125, %v1977_v1  ;;  %v1974_v3 = vpop.xlane.xlu1 %1973 }
 0xcab   :  { %v1978_v4 = vmul.f32 0.03125, %v1974_v3 }
 0xcac   :  { %v1981_v6 = vsub.f32 %v1969_v59, %v1979_v2 }
 0xcad   :  { %v1980_v9 = vsub.f32 %v1968_v60, %v1978_v4 }
 0xcae   :  { %v1983_v10 = vmul.f32 %v1981_v6, %v1981_v6 }
 0xcaf   :  { %v1982_v12 = vmul.f32 %v1980_v9, %v1980_v9 }
 0xcb0   :  { %v1987_v41 = vsel %vm51_vm0, %v1983_v10, 0.0 }
 0xcb1   :  { %1988 = vadd.xlane.f32.xlu0 %v1987_v41  ;;  %v1984_v56 = vsel %vm51_vm0, %v1982_v12, 0.0 }
 0xcb2   :  { %1985 = vadd.xlane.f32.xlu1 %v1984_v56 }
 0xcc3   :  { %2534 = vperm.xlu1 %2532, %v2533_v13  }
 0xd3e   :  { %v1989_v14 = vpop.xlane.xlu0 %1988 }
 0xd3f   :  { %v1991_v15 = vmul.f32 0.03125, %v1989_v14  ;;  %v1986_v16 = vpop.xlane.xlu1 %1985 }
 0xd40   :  { %v1990_v7 = vmul.f32 0.03125, %v1986_v16 }
 0xd41   :  { %v1993_v18 = vadd.f32 1e-05, %v1991_v15 }
 0xd42   :  { %v1992_v20 = vadd.f32 1e-05, %v1990_v7 }
 0xd43   :  { %2559 = vrsqrt.f32 %v1993_v18  ;;  %v2535_v23 = vpop.permute.xlu1 %2534 }
 0xd44   :  { %2561 = vrsqrt.f32 %v1992_v20  ;;  %v2537_v27 = vunpack.i.h.bf16 %v2535_v23  ;;  %v2536_v29 = vunpack.i.l.bf16 %v2535_v23 }
 0xd4d   :  { %v2560_v21 = vpop.eup %2559 }
 0xd4e   :  { %v2562_v24 = vpop.eup %2561  ;;  %v1997_v25 = vmul.f32 %v2560_v21, %v1981_v6 }
 0xd4f   :  { %v1996_v39 = vmul.f32 %v2562_v24, %v1980_v9 }
 0xd50   :  { %v2005_v26 = vmul.f32 %v2107_v22, %v1997_v25 }
 0xd51   :  { %v2004_v28 = vmul.f32 %v2107_v22, %v1996_v39 }
 0xd52   :  { %v2013_v30 = vadd.f32 %v2108_v17, %v2005_v26 }
 0xd53   :  { %v2012_v31 = vadd.f32 %v2108_v17, %v2004_v28 }
 0xd54   :  { %v2025_v32 = vmul.f32 %v2537_v27, %v2013_v30 }
 0xd55   :  { %v2024_v33 = vmul.f32 %v2536_v29, %v2012_v31 }
 0xd56   :  { %2027 = vst.msk [vmem:[%s3051_s14 + $0x8] sm:$0xff] %vm51_vm0, %v2025_v32 }
 0xd57   :  { %2026 = vst.msk [vmem:[%s3051_s14] sm:$0xff] %vm51_vm0, %v2024_v33 }

// kernel: _lambda_.8
= control target key start
LH: loop header
LB: loop body
LE: loop exit
PB: predicated region body
PF: predicated region fallthrough
CT: control target
= control target key end

     0   :  { %s3920_s0 = inlined_call_operand.vmem [shape: s32[2], index: 0, kind: input, shape index: {}]   ;;  %s3921_s1 = inlined_call_operand.vmem [shape: f32[2,16,32], index: 1, kind: input, shape index: {}]   ;;  %s3922_s2 = inlined_call_operand.vmem [shape: f32[32,96], index: 2, kind: input, shape index: {}]   ;;  %s3923_s3 = inlined_call_operand.vmem [shape: f32[1,96], index: 3, kind: input, shape index: {}]   ;;  %s3924_s4 = inlined_call_operand.vmem [shape: f32[32,32], index: 4, kind: input, shape index: {}]   ;;  %s3925_s5 = inlined_call_operand.vmem [shape: f32[1,32], index: 5, kind: input, shape index: {}]   ;;  %s3926_s6 = inlined_call_operand.vmem [shape: f32[1,32], index: 6, kind: input, shape index: {}]   ;;  %s3927_s7 = inlined_call_operand.vmem [shape: f32[1,32], index: 7, kind: input, shape index: {}]   ;;  %s3928_s8 = inlined_call_operand.vmem [shape: f32[9,32,64], index: 8, kind: input, shape index: {}]   ;;  %s3929_s9 = inlined_call_operand.vmem [shape: f32[1,64], index: 9, kind: input, shape index: {}]   ;;  %s3930_s10 = inlined_call_operand.vmem [shape: f32[64,32], index: 10, kind: input, shape index: {}]   ;;  %s3931_s11 = inlined_call_operand.vmem [shape: f32[1,32], index: 11, kind: input, shape index: {}]   ;;  %s3932_s12 = inlined_call_operand.vmem [shape: f32[1,32], index: 12, kind: input, shape index: {}]   ;;  %s3933_s13 = inlined_call_operand.vmem [shape: f32[1,32], index: 13, kind: input, shape index: {}]   ;;  %s3934_s14 = inlined_call_operand.vmem [shape: f32[2,16,32], index: 14, kind: output, shape index: {}]  }
   0x1   :  { %s19_s15 = sshll.u32 %s3920_s0, 4  ;;  %s20_s15 = int_to_ptr.vmem [resolvable:$true] %s19_s15 }
   0x2   :  { %s3289_s16 = scalar_lea.vmem %s20_s15, 16  ;;  %p3294_p1 = scmp.lt.s32.totalorder %s20_s15, %s20_s15 }
   0x3   :  { %p3290_p0 = scmp.ne.s32.totalorder %s20_s15, %s3289_s16  ;;  %p3295_p2 = scmp.lt.s32.totalorder %s3289_s16, %s3289_s16 }
   0x5   :  { %p3296_p3 = por %p3295_p2, %p3294_p1 }
   0x7   :  { %p3297_p4 = pnand %p3296_p3, %p3290_p0 }
   0x9   :  { %3300 = shalt.err (!%p3297_p4)  }
   0xa   :  { %s3303_s17 = smov [#allocation4]  }
   0xb   :  { %22 = dma.vmem_to_smem %s20_s15, 16, %s3303_s17, [#allocation3] }
   0xc   :  { %3301 = dma.done.wait [#allocation3], 16 }
   0xd   :  { %3302 = vsyncadd [#allocation3], 4294967280 }
   0xe   :  { %24 = sfence }
   0xf   :  { %v65_v0 = vld [vmem:[%s3922_s2] sm:$0xff]  ;;  %v66_v1 = vld [vmem:[%s3922_s2 + $0x8] sm:$0xff]  ;;  %v67_v2 = vld [vmem:[%s3922_s2 + $0x10] sm:$0xff]  ;;  %vm51_vm0 = vcmask 261120   ;;  %vm192_vm1 = vcmask 130048   ;;  %s3304_s18 = smov 112   ;;  %v173_v30 = vlaneseq }
  0x10   :  { %v2995_v3 = vpack.c.bf16 %v66_v1, %v65_v0  ;;  %v68_v4 = vld [vmem:[%s3922_s2 + $0x18] sm:$0xff]  ;;  %v3406_v5 = vld [vmem:[%s3921_s1] sm:$0xff]  ;;  %v3413_v7 = vld [vmem:[%s3921_s1 + $0x8] sm:$0xff]  ;;  %v3307_v29 = vmov 0.0   ;;  %s178_s19 = sld [smem:[#allocation4]]  ;;  %s3308_s20 = smov 64  }
  0x11   :  { %v2999_v6 = vpack.c.bf16 %v68_v4, %v67_v2  ;;  %2763 = vmatprep.mubr.msk.f32.mxu0 %vm51_vm0, %v3406_v5  ;;  %v3420_v8 = vld [vmem:[%s3921_s1 + $0x10] sm:$0xff]  ;;  %v3427_v9 = vld [vmem:[%s3921_s1 + $0x18] sm:$0xff]  ;;  %v3434_v10 = vld [vmem:[%s3923_s3] ss:$0 sm:$0xff]  ;;  %s3305_s1 = smov 96   ;;  %s3306_s3 = smov 80  }
  0x12   :  { %2996 = vmatprep.subr.bf16.mxu0 %v2995_v3  ;;  %vm3453_vm2 = vmpackc.low %vm192_vm1, %vm192_vm1  ;;  %52 = vst.msk [vmem:[#allocation2] sm:$0xff] %vm51_vm0, %v3307_v29  ;;  %v3481_v31 = vand.u32 127, %v173_v30  ;;  %s3309_s28 = smov 48   ;;  %s2528_s2 = sld [smem:[#allocation4 + $0x1]]  ;;  %vm55_vm6 = vcmask 257024   ;;  %vm2298_vm10 = vcmask 523264  }
  0x13   :  { %2998 = vmatpush3.bf16.msra.mxu0 %v2995_v3  ;;  %53 = vst.msk [vmem:[#allocation2 + $0x8] sm:$0xff] %vm51_vm0, %v3307_v29  ;;  %54 = vst.msk [vmem:[#allocation2 + $0x10] sm:$0xff] %vm51_vm0, %v3307_v29 }
  0x14   :  { %3000 = vmatprep.subr.bf16.mxu0 %v2999_v6  ;;  %57 = vst.msk [vmem:[#allocation2 + $0x20] sm:$0xff] %vm51_vm0, %v3307_v29  ;;  %58 = vst.msk [vmem:[#allocation2 + $0x28] sm:$0xff] %vm51_vm0, %v3307_v29 }
  0x15   :  { %59 = vst.msk [vmem:[#allocation2 + $0x30] sm:$0xff] %vm51_vm0, %v3307_v29 }
  0x16   :  { %v3483_v32 = vstv %s178_s19  ;;  %56 = vst.msk [vmem:[#allocation2 + $0x18] sm:$0xf] %vm55_vm6, %v3307_v29  ;;  %60 = vst.msk [vmem:[#allocation2 + $0x38] sm:$0xf] %vm55_vm6, %v3307_v29 }
  0x17   :  { %3002 = vmatpush3.bf16.msra.mxu0 %v2999_v6  ;;  %vm180_vm3 = vcmp.ge.s32.totalorder %v3481_v31, %v3483_v32 }
  0x18   :  { %v181_v34 = vsel %vm180_vm3, -1e+09, %v3307_v29 }
  0x1a   :  { %2764 = vmatmul.mubr.msk.f32.vlgmr.msra.gmra.mrb[0].mxu0 %vm51_vm0, %v3413_v7 }
  0x1b   :  { %2766 = vmatprep.mubr.msk.f32.mxu0 %vm51_vm0, %v3420_v8 }
  0x1e   :  { %2767 = vmatmul.mubr.msk.f32.gmra.mrb[2].mxu0 %vm51_vm0, %v3427_v9 }
  0xed   :  { %v2765_v11 = vpop.f32.mrb[0].mxu0 }
  0xee   :  { %v160_v12 = vadd.f32 %v2765_v11, %v3434_v10  ;;  %v154_v13 = vpop.f32.mrb[1].mxu0 }
  0xef   :  { %v155_v14 = vadd.f32 %v3434_v10, %v154_v13  ;;  %v603_v13 = vld [vmem:[%s3924_s4] sm:$0xff] }
  0xf1   :  { %389 = vrot.lane.b32.xlu1 %v155_v14, %s3304_s18  ;;  %2773 = vmatprep.mubr.msk.f32.mxu0 %vm192_vm1, %v155_v14  ;;  %v3440_v15 = vpack.i.bf16 %v160_v12, %v155_v14  ;;  %v3447_v16 = vpop.f32.mrb[2].mxu0  ;;  %v604_v14 = vld [vmem:[%s3924_s4 + $0x8] sm:$0xff] }
  0xf2   :  { %v3449_v17 = vpop.f32.mrb[3].mxu0  ;;  %v3498_v11 = vadd.f32 %v3447_v16, %v3434_v10 }
  0xf3   :  { %3190 = vrot.lane.b32.xlu0 %v3440_v15, %s3305_s1 }
  0xf5   :  { %391 = vrot.lane.b32.xlu1 %v160_v12, %s3304_s18 }
  0xf7   :  { %3195 = vrot.lane.b32.xlu0 %v3440_v15, %s3306_s3 }
 0x163   :  { %v390_v27 = vpop.permute.xlu1 %389 }
 0x165   :  { %v3191_v18 = vpop.permute.xlu0 %3190 }
 0x166   :  { %v3193_v19 = vunpack.i.h.bf16 %v3191_v18  ;;  %v3192_v20 = vunpack.i.l.bf16 %v3191_v18  ;;  %v3516_v18 = vpack.c.bf16 %v604_v14, %v603_v13 }
 0x167   :  { %v392_v28 = vpop.permute.xlu1 %391 }
 0x168   :  { %v3003_v22 = vpack.c.bf16 %v3193_v19, %v3192_v20 }
 0x169   :  { %v3196_v23 = vpop.permute.xlu0 %3195 }
 0x16a   :  { %v3198_v24 = vunpack.i.h.bf16 %v3196_v23  ;;  %v3197_v25 = vunpack.i.l.bf16 %v3196_v23  ;;  %3005 = vmatprep.subr.msk.bf16.mxu0 %vm3453_vm2, %v3003_v22 }
 0x16b   :  { %3008 = vmatpush3.bf16.xpose.msk.msra.mxu0 %vm3453_vm2, %v3003_v22 }
 0x16c   :  { %v3013_v26 = vpack.c.bf16 %v3198_v24, %v3197_v25 }
 0x16e   :  { %3015 = vmatprep.subr.msk.bf16.mxu0 %vm3453_vm2, %v3013_v26 }
 0x172   :  { %2774 = vmatmul.mubr.msk.f32.vlgmr.msra.gmra.mrb[4].mxu0 %vm192_vm1, %v160_v12  ;;  %v3502_v12 = vadd.f32 %v3434_v10, %v3449_v17  ;;  %v605_v10 = vld [vmem:[%s3924_s4 + $0x10] sm:$0xff]  ;;  %v606_v17 = vld [vmem:[%s3924_s4 + $0x18] sm:$0xff]  ;;  %s3310_s4 = smov 16  }
 0x173   :  { %3018 = vmatpush3.bf16.xpose.msk.msra.mxu0 %vm3453_vm2, %v3013_v26  ;;  %2787 = vmatprep.mubr.msk.f32.mxu0 %vm192_vm1, %v390_v27  ;;  %v3528_v19 = vpack.c.bf16 %v606_v17, %v605_v10 }
 0x174   :  { %v3514_v16 = vpack.i.bf16 %v3498_v11, %v3502_v12  ;;  %3024 = vmatprep.subr.bf16.mxu0 %v3516_v18 }
 0x17a   :  { %2788 = vmatmul.mubr.msk.f32.vlgmr.msra.gmra.mrb[6].mxu0 %vm192_vm1, %v392_v28 }
 0x17b   :  { %3026 = vmatpush3.bf16.msra.mxu0 %v3516_v18 }
 0x17c   :  { %3028 = vmatprep.subr.bf16.mxu0 %v3528_v19 }
 0x17f   :  { %3030 = vmatpush3.bf16.msra.mxu0 %v3528_v19 }
 0x245   :  { %v2775_v33 = vpop.f32.mrb[4].mxu0 }
 0x246   :  { %v277_v35 = vmul.f32 0.25, %v2775_v33  ;;  %v267_v36 = vpop.f32.mrb[5].mxu0 }
 0x247   :  { %v276_v37 = vmul.f32 0.25, %v267_v36 }
 0x248   :  { %v279_v38 = vadd.f32 %v277_v35, %v181_v34 }
 0x249   :  { %v278_v39 = vadd.f32 %v276_v37, %v181_v34 }
 0x24a   :  { %v283_v40 = vsel %vm192_vm1, %v279_v38, -inf }
 0x24b   :  { %284 = vmax.xlane.f32.xlu1 %v283_v40  ;;  %v280_v41 = vsel %vm192_vm1, %v278_v39, -inf }
 0x24c   :  { %281 = vmax.xlane.f32.xlu0 %v280_v41 }
 0x24d   :  { %v2789_v42 = vpop.f32.mrb[6].mxu0 }
 0x24e   :  { %v471_v43 = vpop.f32.mrb[7].mxu0  ;;  %v481_v44 = vmul.f32 0.25, %v2789_v42 }
 0x24f   :  { %v480_v45 = vmul.f32 0.25, %v471_v43 }
 0x250   :  { %v483_v48 = vadd.f32 %v481_v44, %v181_v34 }
 0x251   :  { %v482_v46 = vadd.f32 %v480_v45, %v181_v34 }
 0x252   :  { %v487_v49 = vsel %vm192_vm1, %v483_v48, -inf }
 0x253   :  { %v484_v47 = vsel %vm192_vm1, %v482_v46, -inf }
 0x254   :  { %485 = vmax.xlane.f32.xlu0 %v484_v47 }
 0x258   :  { %488 = vmax.xlane.f32.xlu0 %v487_v49 }
 0x2d8   :  { %v285_v50 = vpop.xlane.xlu1 %284 }
 0x2d9   :  { %v287_v51 = vsub.f32 %v279_v38, %v285_v50  ;;  %v282_v52 = vpop.xlane.xlu0 %281 }
 0x2da   :  { %v286_v53 = vsub.f32 %v278_v39, %v282_v52 }
 0x2db   :  { %v290_v54 = vmul.f32 1.442695, %v287_v51 }
 0x2dc   :  { %v288_v55 = vmul.f32 1.442695, %v286_v53 }
 0x2dd   :  { %3241 = vpow2.f32 %v290_v54 }
 0x2de   :  { %3243 = vpow2.f32 %v288_v55 }
 0x2e1   :  { %v486_v56 = vpop.xlane.xlu0 %485 }
 0x2e2   :  { %v490_v57 = vsub.f32 %v482_v46, %v486_v56 }
 0x2e4   :  { %v492_v58 = vmul.f32 1.442695, %v490_v57 }
 0x2e5   :  { %v489_v59 = vpop.xlane.xlu0 %488 }
 0x2e6   :  { %3245 = vpow2.f32 %v492_v58  ;;  %v491_v60 = vsub.f32 %v483_v48, %v489_v59  ;;  %v3556_v58 = vstv %s2528_s2 }
 0x2e7   :  { %v3242_v61 = vpop.eup %3241  ;;  %vm746_vm4 = vcmp.ge.s32.totalorder %v3481_v31, %v3556_v58 }
 0x2e8   :  { %v3244_v62 = vpop.eup %3243  ;;  %v494_v63 = vmul.f32 1.442695, %v491_v60  ;;  %v295_v0 = vsel %vm192_vm1, %v3242_v61, 0.0  ;;  %v747_v60 = vsel %vm746_vm4, -1e+09, %v3307_v29 }
 0x2e9   :  { %296 = vadd.xlane.f32.xlu0 %v295_v0  ;;  %v292_v1 = vsel %vm192_vm1, %v3244_v62, 0.0 }
 0x2ea   :  { %3247 = vpow2.f32 %v494_v63  ;;  %293 = vadd.xlane.f32.xlu1 %v292_v1 }
 0x2f0   :  { %v3246_v2 = vpop.eup %3245 }
 0x2f1   :  { %v496_v3 = vsel %vm192_vm1, %v3246_v2, 0.0 }
 0x2f2   :  { %497 = vadd.xlane.f32.xlu1 %v496_v3 }
 0x2f4   :  { %v3248_v4 = vpop.eup %3247 }
 0x2f5   :  { %v499_v6 = vsel %vm192_vm1, %v3248_v4, 0.0 }
 0x2f6   :  { %500 = vadd.xlane.f32.xlu0 %v499_v6 }
 0x303   :  { %3200 = vrot.lane.b32.xlu1 %v3440_v15, %s3308_s20 }
 0x307   :  { %3210 = vrot.lane.b32.xlu1 %v3514_v16, %s3305_s1 }
 0x30c   :  { %3205 = vrot.lane.b32.xlu0 %v3440_v15, %s3309_s28 }
 0x376   :  { %v297_v22 = vpop.xlane.xlu0 %296 }
 0x377   :  { %v294_v20 = vpop.xlane.xlu1 %293 }
 0x378   :  { %3249 = vrcp.f32 %v294_v20 }
 0x379   :  { %3251 = vrcp.f32 %v297_v22 }
 0x37f   :  { %v498_v23 = vpop.xlane.xlu1 %497 }
 0x380   :  { %3253 = vrcp.f32 %v498_v23 }
 0x382   :  { %v3250_v24 = vpop.eup %3249 }
 0x383   :  { %v3201_v25 = vpop.permute.xlu1 %3200  ;;  %v501_v26 = vpop.xlane.xlu0 %500  ;;  %v300_v27 = vmul.f32 %v3250_v24, %v3244_v62 }
 0x384   :  { %v3203_v28 = vunpack.i.h.bf16 %v3201_v25  ;;  %v3202_v33 = vunpack.i.l.bf16 %v3201_v25  ;;  %3255 = vrcp.f32 %v501_v26  ;;  %v3252_v35 = vpop.eup %3251 }
 0x385   :  { %2780 = vmatprep.mubr.msk.f32.mxu1 %vm192_vm1, %v300_v27  ;;  %v301_v44 = vmul.f32 %v3252_v35, %v3242_v61 }
 0x386   :  { %v3009_v34 = vpack.c.bf16 %v3203_v28, %v3202_v33 }
 0x387   :  { %v3211_v15 = vpop.permute.xlu1 %3210  ;;  %v3206_v36 = vpop.permute.xlu0 %3205 }
 0x388   :  { %v3213_v37 = vunpack.i.h.bf16 %v3211_v15  ;;  %v3212_v38 = vunpack.i.l.bf16 %v3211_v15  ;;  %v3208_v39 = vunpack.i.h.bf16 %v3206_v36  ;;  %v3207_v40 = vunpack.i.l.bf16 %v3206_v36  ;;  %3010 = vmatprep.subr.bf16.mxu1 %v3009_v34 }
 0x389   :  { %3012 = vmatpush3.bf16.msra.mxu1 %v3009_v34 }
 0x38a   :  { %v3254_v41 = vpop.eup %3253  ;;  %v3031_v42 = vpack.c.bf16 %v3213_v37, %v3212_v38  ;;  %v3019_v43 = vpack.c.bf16 %v3208_v39, %v3207_v40 }
 0x38b   :  { %v504_v45 = vmul.f32 %v3254_v41, %v3246_v2 }
 0x38c   :  { %2781 = vmatmul.mubr.msk.f32.vlgmr.msra.gmra.mrb[0].mxu1 %vm192_vm1, %v301_v44  ;;  %3020 = vmatprep.subr.bf16.mxu1 %v3019_v43 }
 0x38d   :  { %3033 = vmatprep.subr.msk.bf16.mxu0 %vm3453_vm2, %v3031_v42  ;;  %3022 = vmatpush3.bf16.msra.mxu1 %v3019_v43 }
 0x38e   :  { %v3256_v46 = vpop.eup %3255  ;;  %2794 = vmatprep.mubr.msk.f32.mxu1 %vm192_vm1, %v504_v45 }
 0x38f   :  { %v505_v47 = vmul.f32 %v3256_v46, %v3248_v4 }
 0x391   :  { %2795 = vmatmul.mubr.msk.f32.vlgmr.msra.gmra.mrb[2].mxu1 %vm192_vm1, %v505_v47 }
 0x45f   :  { %v2782_v48 = vpop.f32.mrb[0].mxu1 }
 0x460   :  { %v380_v49 = vpop.f32.mrb[1].mxu1 }
 0x464   :  { %v2796_v50 = vpop.f32.mrb[2].mxu1 }
 0x465   :  { %597 = vrot.lane.b32.xlu0 %v2796_v50, %s3310_s4  ;;  %v584_v51 = vpop.f32.mrb[3].mxu1 }
 0x466   :  { %595 = vrot.lane.b32.xlu1 %v584_v51, %s3310_s4 }
 0x4d7   :  { %v598_v52 = vpop.permute.xlu0 %597 }
 0x4d8   :  { %v596_v53 = vpop.permute.xlu1 %595  ;;  %v602_v55 = vsel %vm192_vm1, %v2782_v48, %v598_v52 }
 0x4d9   :  { %v601_v54 = vsel %vm192_vm1, %v380_v49, %v596_v53 }
 0x4da   :  { %2805 = vmatprep.mubr.msk.f32.mxu0 %vm51_vm0, %v601_v54 }
 0x4db   :  { %2806 = vmatmul.mubr.msk.f32.vlgmr.msra.gmra.mrb[8].mxu0 %vm51_vm0, %v602_v55 }
 0x4dc   :  { %3036 = vmatpush3.bf16.xpose.msk.msra.mxu0 %vm3453_vm2, %v3031_v42  ;;  %2812 = vmatprep.mubr.msk.f32.mxu0 %vm192_vm1, %v3502_v12 }
 0x4e3   :  { %2813 = vmatmul.mubr.msk.f32.vlgmr.msra.gmra.mrb[10].mxu0 %vm192_vm1, %v3498_v11 }
 0x5ae   :  { %v3552_v56 = vpop.f32.mrb[8].mxu0 }
 0x5af   :  { %v3554_v57 = vpop.f32.mrb[9].mxu0 }
 0x5b6   :  { %v2814_v59 = vpop.f32.mrb[10].mxu0 }
 0x5b7   :  { %v842_v61 = vmul.f32 0.25, %v2814_v59  ;;  %v832_v62 = vpop.f32.mrb[11].mxu0 }
 0x5b8   :  { %v841_v63 = vmul.f32 0.25, %v832_v62 }
 0x5b9   :  { %v844_v0 = vadd.f32 %v842_v61, %v747_v60 }
 0x5ba   :  { %v843_v1 = vadd.f32 %v841_v63, %v747_v60  ;;  %v3594_v63 = vld [vmem:[%s3925_s5] ss:$0 sm:$0xff] }
 0x5bb   :  { %v848_v2 = vsel %vm192_vm1, %v844_v0, -inf }
 0x5bc   :  { %849 = vmax.xlane.f32.xlu0 %v848_v2  ;;  %v845_v3 = vsel %vm192_vm1, %v843_v1, -inf }
 0x5bd   :  { %846 = vmax.xlane.f32.xlu1 %v845_v3 }
 0x649   :  { %v850_v4 = vpop.xlane.xlu0 %849 }
 0x64a   :  { %v852_v6 = vsub.f32 %v844_v0, %v850_v4  ;;  %v847_v13 = vpop.xlane.xlu1 %846  ;;  %v687_v0 = vadd.f32 %v3594_v63, %v3554_v57 }
 0x64b   :  { %v851_v14 = vsub.f32 %v843_v1, %v847_v13 }
 0x64c   :  { %v855_v10 = vmul.f32 1.442695, %v852_v6  ;;  %v695_v1 = vadd.f32 %v687_v0, %v3406_v5 }
 0x64d   :  { %v853_v31 = vmul.f32 1.442695, %v851_v14 }
 0x64e   :  { %3257 = vpow2.f32 %v855_v10  ;;  %v699_v2 = vsel %vm51_vm0, %v695_v1, 0.0 }
 0x64f   :  { %3259 = vpow2.f32 %v853_v31 }
 0x658   :  { %v3258_v17 = vpop.eup %3257 }
 0x659   :  { %v3260_v20 = vpop.eup %3259  ;;  %v860_v22 = vsel %vm192_vm1, %v3258_v17, 0.0 }
 0x65a   :  { %861 = vadd.xlane.f32.xlu1 %v860_v22  ;;  %v857_v23 = vsel %vm192_vm1, %v3260_v20, 0.0 }
 0x65b   :  { %858 = vadd.xlane.f32.xlu0 %v857_v23  ;;  %v692_v23 = vadd.f32 %v3552_v56, %v3594_v63 }
 0x66b   :  { %3220 = vrot.lane.b32.xlu1 %v3514_v16, %s3306_s3 }
 0x66f   :  { %954 = vrot.lane.b32.xlu1 %v3502_v12, %s3304_s18 }
 0x671   :  { %3215 = vrot.lane.b32.xlu0 %v3514_v16, %s3308_s20 }
 0x675   :  { %956 = vrot.lane.b32.xlu0 %v3498_v11, %s3304_s18 }
 0x6e7   :  { %v862_v24 = vpop.xlane.xlu1 %861 }
 0x6e8   :  { %3261 = vrcp.f32 %v862_v24  ;;  %v859_v25 = vpop.xlane.xlu0 %858 }
 0x6e9   :  { %3263 = vrcp.f32 %v859_v25 }
 0x6eb   :  { %v3221_v26 = vpop.permute.xlu1 %3220 }
 0x6ec   :  { %v3216_v27 = vpop.permute.xlu0 %3215  ;;  %v3223_v28 = vunpack.i.h.bf16 %v3221_v26  ;;  %v3222_v33 = vunpack.i.l.bf16 %v3221_v26  ;;  %v696_v26 = vadd.f32 %v692_v23, %v3413_v7 }
 0x6ed   :  { %v3218_v34 = vunpack.i.h.bf16 %v3216_v27  ;;  %v3217_v35 = vunpack.i.l.bf16 %v3216_v27 }
 0x6ee   :  { %v3041_v36 = vpack.c.bf16 %v3223_v28, %v3222_v33 }
 0x6ef   :  { %v3037_v15 = vpack.c.bf16 %v3218_v34, %v3217_v35  ;;  %v955_v39 = vpop.permute.xlu1 %954 }
 0x6f0   :  { %v957_v40 = vpop.permute.xlu0 %956 }
 0x6f1   :  { %3038 = vmatprep.subr.bf16.mxu0 %v3037_v15 }
 0x6f2   :  { %v3262_v12 = vpop.eup %3261  ;;  %3040 = vmatpush3.bf16.msra.mxu0 %v3037_v15 }
 0x6f3   :  { %v3264_v37 = vpop.eup %3263  ;;  %3043 = vmatprep.subr.msk.bf16.mxu0 %vm3453_vm2, %v3041_v36  ;;  %v866_v38 = vmul.f32 %v3262_v12, %v3258_v17  ;;  %v3620_v12 = vshrl.u32 %v173_v30, 7 }
 0x6f4   :  { %v865_v11 = vmul.f32 %v3264_v37, %v3260_v20 }
 0x6f5   :  { %vm182_vm5 = vcmp.ge.s32.totalorder %v3620_v12, %v3483_v32  ;;  %vm748_vm8 = vcmp.ge.s32.totalorder %v3620_v12, %v3556_v58 }
 0x6f6   :  { %2819 = vmatprep.mubr.msk.f32.mxu0 %vm192_vm1, %v865_v11  ;;  %v3625_v11 = vld [vmem:[%s3926_s6] ss:$0 sm:$0xff] }
 0x6f7   :  { %2820 = vmatmul.mubr.msk.f32.vlgmr.msra.gmra.mrb[12].mxu0 %vm192_vm1, %v866_v38 }
 0x6f8   :  { %2826 = vmatprep.mubr.msk.f32.mxu0 %vm192_vm1, %v955_v39  ;;  %v3632_v39 = vld [vmem:[%s3927_s7] ss:$0 sm:$0xff] }
 0x6fb   :  { %3046 = vmatpush3.bf16.xpose.msk.msra.mxu0 %vm3453_vm2, %v3041_v36 }
 0x702   :  { %2827 = vmatmul.mubr.msk.f32.vlgmr.msra.gmra.mrb[14].mxu0 %vm192_vm1, %v957_v40 }
 0x7ca   :  { %v3581_v41 = vpop.f32.mrb[12].mxu0 }
 0x7cb   :  { %v3583_v42 = vpop.f32.mrb[13].mxu0 }
 0x7d5   :  { %v2828_v43 = vpop.f32.mrb[14].mxu0 }
 0x7d6   :  { %v1046_v44 = vmul.f32 0.25, %v2828_v43  ;;  %v1036_v45 = vpop.f32.mrb[15].mxu0 }
 0x7d7   :  { %v1045_v46 = vmul.f32 0.25, %v1036_v45 }
 0x7d8   :  { %v1048_v47 = vadd.f32 %v1046_v44, %v747_v60 }
 0x7d9   :  { %v1047_v48 = vadd.f32 %v1045_v46, %v747_v60 }
 0x7da   :  { %v1052_v49 = vsel %vm192_vm1, %v1048_v47, -inf }
 0x7db   :  { %1053 = vmax.xlane.f32.xlu0 %v1052_v49  ;;  %v1049_v50 = vsel %vm192_vm1, %v1047_v48, -inf }
 0x7dc   :  { %1050 = vmax.xlane.f32.xlu1 %v1049_v50 }
 0x868   :  { %v1054_v21 = vpop.xlane.xlu0 %1053 }
 0x869   :  { %v1056_v51 = vsub.f32 %v1048_v47, %v1054_v21  ;;  %v1051_v52 = vpop.xlane.xlu1 %1050 }
 0x86a   :  { %v1055_v53 = vsub.f32 %v1047_v48, %v1051_v52 }
 0x86b   :  { %v1059_v54 = vmul.f32 1.442695, %v1056_v51 }
 0x86c   :  { %v1057_v55 = vmul.f32 1.442695, %v1055_v53 }
 0x86d   :  { %3265 = vpow2.f32 %v1059_v54 }
 0x86e   :  { %3267 = vpow2.f32 %v1057_v55 }
 0x877   :  { %v3266_v59 = vpop.eup %3265 }
 0x878   :  { %v3268_v61 = vpop.eup %3267  ;;  %v1064_v62 = vsel %vm192_vm1, %v3266_v59, 0.0 }
 0x879   :  { %1065 = vadd.xlane.f32.xlu1 %v1064_v62  ;;  %v1061_v60 = vsel %vm192_vm1, %v3268_v61, 0.0  ;;  %v2546_v62 = vld [vmem:[%s3928_s8 + $0x38] sm:$0xff] }
 0x87a   :  { %1062 = vadd.xlane.f32.xlu0 %v1061_v60 }
 0x890   :  { %3225 = vrot.lane.b32.xlu0 %v3514_v16, %s3309_s28 }
 0x8af   :  { %700 = vadd.xlane.f32.xlu0 %v699_v2 }
 0x906   :  { %v1066_v3 = vpop.xlane.xlu1 %1065 }
 0x907   :  { %3269 = vrcp.f32 %v1066_v3  ;;  %v1063_v4 = vpop.xlane.xlu0 %1062 }
 0x908   :  { %3271 = vrcp.f32 %v1063_v4 }
 0x90b   :  { %v3226_v6 = vpop.permute.xlu0 %3225 }
 0x90c   :  { %v3228_v13 = vunpack.i.h.bf16 %v3226_v6  ;;  %v3227_v16 = vunpack.i.l.bf16 %v3226_v6 }
 0x90e   :  { %v3047_v14 = vpack.c.bf16 %v3228_v13, %v3227_v16 }
 0x910   :  { %3048 = vmatprep.subr.bf16.mxu0 %v3047_v14 }
 0x911   :  { %v3270_v10 = vpop.eup %3269  ;;  %3050 = vmatpush3.bf16.msra.mxu0 %v3047_v14 }
 0x912   :  { %v3272_v31 = vpop.eup %3271  ;;  %3052 = vmatprep.subr.bf16.mxu0 %v3516_v18  ;;  %v1070_v17 = vmul.f32 %v3270_v10, %v3266_v59  ;;  %v2543_v59 = vld [vmem:[%s3928_s8 + $0x20] sm:$0xff] }
 0x913   :  { %v1069_v57 = vmul.f32 %v3272_v31, %v3268_v61 }
 0x915   :  { %2833 = vmatprep.mubr.msk.f32.mxu0 %vm192_vm1, %v1069_v57  ;;  %v177_v57 = vadd.s32 8, %v3620_v12 }
 0x916   :  { %2834 = vmatmul.mubr.msk.f32.vlgmr.msra.gmra.mrb[16].mxu0 %vm192_vm1, %v1070_v17 }
 0x917   :  { %3054 = vmatpush3.bf16.msra.mxu0 %v3516_v18  ;;  %v702_v18 = vsel %vm51_vm0, %v696_v26, 0.0  ;;  %vm183_vm7 = vcmp.ge.s32.totalorder %v177_v57, %v3483_v32  ;;  %v1291_v32 = vld [vmem:[%s3928_s8] sm:$0xff]  ;;  %vm749_vm9 = vcmp.ge.s32.totalorder %v177_v57, %v3556_v58  ;;  %v2572_v57 = vld [vmem:[%s3928_s8 + $0x88] sm:$0xff] }
 0x918   :  { %3056 = vmatprep.subr.bf16.mxu0 %v3528_v19 }
 0x91b   :  { %3058 = vmatpush3.bf16.msra.mxu0 %v3528_v19 }
 0x93c   :  { %v701_v22 = vpop.xlane.xlu0 %700 }
 0x93d   :  { %v706_v24 = vmul.f32 0.03125, %v701_v22 }
 0x93f   :  { %v708_v25 = vsub.f32 %v695_v1, %v706_v24 }
 0x941   :  { %v710_v27 = vmul.f32 %v708_v25, %v708_v25 }
 0x943   :  { %v712_v19 = vsel %vm51_vm0, %v710_v27, 0.0  ;;  %v1293_v27 = vld [vmem:[%s3928_s8 + $0x10] sm:$0xff] }
 0x9e9   :  { %v2835_v5 = vpop.f32.mrb[16].mxu0 }
 0x9ea   :  { %v1149_v20 = vpop.f32.mrb[17].mxu0 }
 0x9eb   :  { %1160 = vrot.lane.b32.xlu1 %v1149_v20, %s3310_s4 }
 0x9ef   :  { %1162 = vrot.lane.b32.xlu1 %v2835_v5, %s3310_s4 }
 0xa13   :  { %703 = vadd.xlane.f32.xlu1 %v702_v18 }
 0xa17   :  { %713 = vadd.xlane.f32.xlu1 %v712_v19  ;;  %v1294_v19 = vld [vmem:[%s3928_s8 + $0x18] sm:$0xff] }
 0xa5d   :  { %v1161_v28 = vpop.permute.xlu1 %1160 }
 0xa5e   :  { %v1166_v33 = vsel %vm192_vm1, %v3583_v42, %v1161_v28  ;;  %v3071_v28 = vpack.c.bf16 %v1294_v19, %v1293_v27  ;;  %v2579_v27 = vld [vmem:[%s3928_s8 + $0xa0] sm:$0xff]  ;;  %v2580_v19 = vld [vmem:[%s3928_s8 + $0xa8] sm:$0xff] }
 0xa5f   :  { %2844 = vmatprep.mubr.msk.f32.mxu0 %vm51_vm0, %v1166_v33  ;;  %v2555_v33 = vld [vmem:[%s3928_s8 + $0x40] sm:$0xff] }
 0xa61   :  { %v1163_v34 = vpop.permute.xlu1 %1162 }
 0xa62   :  { %v1167_v56 = vsel %vm192_vm1, %v3581_v41, %v1163_v34  ;;  %v3311_v41 = vmov 1.0   ;;  %v2556_v34 = vld [vmem:[%s3928_s8 + $0x48] sm:$0xff] }
 0xa63   :  { %2845 = vmatmul.mubr.msk.f32.vlgmr.msra.gmra.mrb[18].mxu0 %vm51_vm0, %v1167_v56  ;;  %v3636_v30 = vsel %vm182_vm5, 0.0, %v3311_v41  ;;  %v3680_v22 = vsel %vm183_vm7, 0.0, %v3311_v41  ;;  %v3075_v56 = vpack.c.bf16 %v2556_v34, %v2555_v33  ;;  %v3740_v12 = vsel %vm749_vm9, 0.0, %v3311_v41 }
 0xa64   :  { %v3099_v33 = vpack.c.bf16 %v2580_v19, %v2579_v27 }
 0xaa0   :  { %v704_v7 = vpop.xlane.xlu1 %703 }
 0xaa1   :  { %v707_v47 = vmul.f32 0.03125, %v704_v7  ;;  %v2283_v7 = vld [vmem:[%s3930_s10] sm:$0xff] }
 0xaa3   :  { %v709_v21 = vsub.f32 %v696_v26, %v707_v47  ;;  %v1292_v26 = vld [vmem:[%s3928_s8 + $0x8] sm:$0xff] }
 0xaa4   :  { %v714_v35 = vpop.xlane.xlu1 %713  ;;  %v3067_v18 = vpack.c.bf16 %v1292_v26, %v1291_v32 }
 0xaa5   :  { %v718_v15 = vmul.f32 0.03125, %v714_v35  ;;  %v711_v54 = vmul.f32 %v709_v21, %v709_v21  ;;  %v2284_v35 = vld [vmem:[%s3930_s10 + $0x8] sm:$0xff] }
 0xaa7   :  { %v720_v36 = vadd.f32 1e-05, %v718_v15  ;;  %v715_v55 = vsel %vm51_vm0, %v711_v54, 0.0  ;;  %v2285_v15 = vld [vmem:[%s3930_s10 + $0x10] sm:$0xff]  ;;  %v3730_v54 = vsel %vm748_vm8, 0.0, %v3311_v41  ;;  %v2558_v41 = vld [vmem:[%s3928_s8 + $0x58] sm:$0xff] }
 0xaa9   :  { %3273 = vrsqrt.f32 %v720_v36  ;;  %v3131_v36 = vpack.c.bf16 %v2284_v35, %v2283_v7  ;;  %v2582_v7 = vld [vmem:[%s3928_s8 + $0xb8] sm:$0xff] }
 0xaab   :  { %3132 = vmatprep.subr.bf16.mxu0 %v3131_v36 }
 0xaac   :  { %3134 = vmatpush3.bf16.msra.mxu0 %v3131_v36 }
 0xab3   :  { %v3274_v37 = vpop.eup %3273 }
 0xab4   :  { %v724_v38 = vmul.f32 %v3274_v37, %v708_v25  ;;  %v2286_v37 = vld [vmem:[%s3930_s10 + $0x18] sm:$0xff] }
 0xab6   :  { %v732_v40 = vmul.f32 %v3625_v11, %v724_v38  ;;  %v3135_v38 = vpack.c.bf16 %v2286_v37, %v2285_v15  ;;  %v2587_v37 = vld [vmem:[%s3928_s8 + $0xc0] sm:$0xff] }
 0xab8   :  { %v740_v42 = vadd.f32 %v3632_v39, %v732_v40  ;;  %v2287_v40 = vld [vmem:[%s3930_s10 + $0x20] sm:$0xff]  ;;  %3136 = vmatprep.subr.bf16.mxu0 %v3135_v38 }
 0xab9   :  { %3138 = vmatpush3.bf16.msra.mxu0 %v3135_v38  ;;  %v2588_v38 = vld [vmem:[%s3928_s8 + $0xc8] sm:$0xff] }
 0xaba   :  { %v3640_v43 = vmul.f32 %v740_v42, %v3636_v30  ;;  %v2288_v42 = vld [vmem:[%s3930_s10 + $0x28] sm:$0xff] }
 0xabc   :  { %1283 = vst.msk [vmem:[#allocation2 + $0x8] sm:$0xff] %vm51_vm0, %v3640_v43 }
 0xac3   :  { %v1295_v44 = vld [vmem:[#allocation2 + $0x5] sm:$0xff] }
 0xac4   :  { %2855 = vmatprep.mubr.msk.f32.mxu1 %vm51_vm0, %v1295_v44  ;;  %v3139_v44 = vpack.c.bf16 %v2288_v42, %v2287_v40  ;;  %v1608_v32 = vld [vmem:[#allocation2 + $0x7] sm:$0xff]  ;;  %v3107_v42 = vpack.c.bf16 %v2588_v38, %v2587_v37 }
 0xac5   :  { %v1718_v35 = vld [vmem:[#allocation2 + $0x8] sm:$0xff] }
 0xac6   :  { %3140 = vmatprep.subr.bf16.mxu0 %v3139_v44 }
 0xac7   :  { %3142 = vmatpush3.bf16.msra.mxu0 %v3139_v44 }
 0xb36   :  { %v2846_v45 = vpop.f32.mrb[18].mxu0 }
 0xb37   :  { %v1240_v46 = vpop.f32.mrb[19].mxu0  ;;  %v1246_v48 = vadd.f32 %v2846_v45, %v3594_v63 }
 0xb38   :  { %v1241_v49 = vadd.f32 %v3594_v63, %v1240_v46 }
 0xb39   :  { %v1250_v52 = vadd.f32 %v1246_v48, %v3427_v9  ;;  %v2545_v9 = vld [vmem:[%s3928_s8 + $0x30] sm:$0xff] }
 0xb3a   :  { %v1249_v50 = vadd.f32 %v1241_v49, %v3420_v8  ;;  %v2544_v8 = vld [vmem:[%s3928_s8 + $0x28] sm:$0xff]  ;;  %v3063_v60 = vpack.c.bf16 %v2546_v62, %v2545_v9 }
 0xb3b   :  { %v1254_v53 = vsel %vm51_vm0, %v1250_v52, 0.0  ;;  %v3059_v61 = vpack.c.bf16 %v2544_v8, %v2543_v59 }
 0xb3c   :  { %v1251_v51 = vsel %vm51_vm0, %v1249_v50, 0.0 }
 0xb3d   :  { %1252 = vadd.xlane.f32.xlu0 %v1251_v51  ;;  %3060 = vmatprep.subr.bf16.mxu1 %v3059_v61 }
 0xb3e   :  { %3062 = vmatpush3.bf16.msra.mxu1 %v3059_v61 }
 0xb3f   :  { %3064 = vmatprep.subr.bf16.mxu1 %v3063_v60 }
 0xb41   :  { %1255 = vadd.xlane.f32.xlu0 %v1254_v53 }
 0xb42   :  { %3066 = vmatpush3.bf16.msra.mxu1 %v3063_v60 }
 0xb43   :  { %3068 = vmatprep.subr.bf16.mxu1 %v3067_v18 }
 0xb45   :  { %716 = vadd.xlane.f32.xlu0 %v715_v55 }
 0xbca   :  { %v1253_v63 = vpop.xlane.xlu0 %1252 }
 0xbcb   :  { %v1257_v0 = vmul.f32 0.03125, %v1253_v63 }
 0xbcd   :  { %v3666_v1 = vsub.f32 %v1249_v50, %v1257_v0 }
 0xbce   :  { %v1256_v2 = vpop.xlane.xlu0 %1255 }
 0xbcf   :  { %v1258_v3 = vmul.f32 0.03125, %v1256_v2  ;;  %v1261_v4 = vmul.f32 %v3666_v1, %v3666_v1  ;;  %v2564_v2 = vld [vmem:[%s3928_s8 + $0x68] sm:$0xff] }
 0xbd1   :  { %v3670_v6 = vsub.f32 %v1250_v52, %v1258_v3  ;;  %v1263_v13 = vsel %vm51_vm0, %v1261_v4, 0.0 }
 0xbd2   :  { %1264 = vadd.xlane.f32.xlu1 %v1263_v13  ;;  %v717_v16 = vpop.xlane.xlu0 %716  ;;  %v2565_v13 = vld [vmem:[%s3928_s8 + $0x70] sm:$0xff] }
 0xbd3   :  { %v719_v14 = vmul.f32 0.03125, %v717_v16  ;;  %v1262_v29 = vmul.f32 %v3670_v6, %v3670_v6  ;;  %v2566_v16 = vld [vmem:[%s3928_s8 + $0x78] sm:$0xff] }
 0xbd5   :  { %v721_v10 = vadd.f32 1e-05, %v719_v14  ;;  %v1266_v31 = vsel %vm51_vm0, %v1262_v29, 0.0  ;;  %v1498_v14 = vld [vmem:[#allocation2 + $0x6] sm:$0xff]  ;;  %v3087_v29 = vpack.c.bf16 %v2566_v16, %v2565_v13 }
 0xbd6   :  { %1267 = vadd.xlane.f32.xlu0 %v1266_v31  ;;  %v2571_v31 = vld [vmem:[%s3928_s8 + $0x80] sm:$0xff] }
 0xbd7   :  { %3275 = vrsqrt.f32 %v721_v10 }
 0xbe1   :  { %v3276_v17 = vpop.eup %3275 }
 0xbe2   :  { %v725_v5 = vmul.f32 %v3276_v17, %v709_v21 }
 0xbe4   :  { %v733_v20 = vmul.f32 %v3625_v11, %v725_v5  ;;  %v3091_v5 = vpack.c.bf16 %v2572_v57, %v2571_v31  ;;  %v2289_v31 = vld [vmem:[%s3930_s10 + $0x30] sm:$0xff]  ;;  %v2290_v57 = vld [vmem:[%s3930_s10 + $0x38] sm:$0xff] }
 0xbe6   :  { %v741_v23 = vadd.f32 %v3632_v39, %v733_v20 }
 0xbe8   :  { %v3684_v24 = vmul.f32 %v741_v23, %v3680_v22  ;;  %v2573_v23 = vld [vmem:[%s3928_s8 + $0x90] sm:$0xff] }
 0xbea   :  { %1284 = vst.msk [vmem:[#allocation2 + $0x10] sm:$0xff] %vm51_vm0, %v3684_v24 }
 0xbf1   :  { %v1296_v25 = vld [vmem:[#allocation2 + $0xd] sm:$0xff] }
 0xbf2   :  { %2856 = vmatmul.mubr.msk.f32.vlgmr.msra.gmra.mrb[4].mxu1 %vm51_vm0, %v1296_v25  ;;  %v3759_v0 = vld [vmem:[#allocation2 + $0xc] sm:$0xff]  ;;  %v2574_v25 = vld [vmem:[%s3928_s8 + $0x98] sm:$0xff] }
 0xbf3   :  { %3070 = vmatpush3.bf16.msra.mxu1 %v3067_v18  ;;  %v1499_v10 = vld [vmem:[#allocation2 + $0xe] sm:$0xff]  ;;  %v3095_v26 = vpack.c.bf16 %v2574_v25, %v2573_v23 }
 0xbf4   :  { %3072 = vmatprep.subr.bf16.mxu1 %v3071_v28  ;;  %v1609_v18 = vld [vmem:[#allocation2 + $0xf] sm:$0xff] }
 0xbf5   :  { %v1719_v36 = vld [vmem:[#allocation2 + $0x10] sm:$0xff] }
 0xbf6   :  { %v2049_v13 = vld [vmem:[#allocation2 + $0x13] sm:$0xff] }
 0xbf7   :  { %3074 = vmatpush3.bf16.msra.mxu1 %v3071_v28 }
 0xbf8   :  { %3076 = vmatprep.subr.bf16.mxu1 %v3075_v56 }
 0xc5f   :  { %v1265_v45 = vpop.xlane.xlu1 %1264 }
 0xc60   :  { %v1269_v46 = vmul.f32 0.03125, %v1265_v45  ;;  %v2589_v45 = vld [vmem:[%s3928_s8 + $0xd0] sm:$0xff] }
 0xc62   :  { %v1271_v47 = vadd.f32 1e-05, %v1269_v46  ;;  %v2590_v46 = vld [vmem:[%s3928_s8 + $0xd8] sm:$0xff] }
 0xc63   :  { %v1268_v48 = vpop.xlane.xlu0 %1267 }
 0xc64   :  { %3277 = vrsqrt.f32 %v1271_v47  ;;  %v1270_v49 = vmul.f32 0.03125, %v1268_v48  ;;  %v1828_v47 = vld [vmem:[#allocation2 + $0x9] sm:$0xff]  ;;  %v3111_v48 = vpack.c.bf16 %v2590_v46, %v2589_v45 }
 0xc66   :  { %v1272_v50 = vadd.f32 1e-05, %v1270_v49  ;;  %v1829_v49 = vld [vmem:[#allocation2 + $0x11] sm:$0xff] }
 0xc68   :  { %3279 = vrsqrt.f32 %v1272_v50  ;;  %v2595_v50 = vld [vmem:[%s3928_s8 + $0xe0] sm:$0xff] }
 0xc6e   :  { %v3278_v21 = vpop.eup %3277 }
 0xc6f   :  { %v1275_v51 = vmul.f32 %v3278_v21, %v3666_v1  ;;  %v2563_v1 = vld [vmem:[%s3928_s8 + $0x60] sm:$0xff]  ;;  %v2596_v21 = vld [vmem:[%s3928_s8 + $0xe8] sm:$0xff] }
 0xc70   :  { %v3083_v4 = vpack.c.bf16 %v2564_v2, %v2563_v1  ;;  %v2605_v1 = vld [vmem:[%s3928_s8 + $0x110] sm:$0xff]  ;;  %v2606_v2 = vld [vmem:[%s3928_s8 + $0x118] sm:$0xff] }
 0xc71   :  { %v1277_v52 = vmul.f32 %v3625_v11, %v1275_v51 }
 0xc72   :  { %v3280_v53 = vpop.eup %3279 }
 0xc73   :  { %v1279_v55 = vadd.f32 %v3632_v39, %v1277_v52  ;;  %v1276_v59 = vmul.f32 %v3280_v53, %v3670_v6  ;;  %v3115_v52 = vpack.c.bf16 %v2596_v21, %v2595_v50 }
 0xc75   :  { %v3736_v8 = vmul.f32 %v1279_v55, %v3730_v54  ;;  %v1278_v61 = vmul.f32 %v3625_v11, %v1276_v59  ;;  %v2557_v11 = vld [vmem:[%s3928_s8 + $0x50] sm:$0xff]  ;;  %v2598_v59 = vld [vmem:[%s3928_s8 + $0xf8] sm:$0xff] }
 0xc76   :  { %v3079_v63 = vpack.c.bf16 %v2558_v41, %v2557_v11  ;;  %v2597_v55 = vld [vmem:[%s3928_s8 + $0xf0] sm:$0xff]  ;;  %v2604_v11 = vld [vmem:[%s3928_s8 + $0x108] sm:$0xff] }
 0xc77   :  { %1285 = vst.msk [vmem:[#allocation2 + $0x28] sm:$0xff] %vm51_vm0, %v3736_v8  ;;  %v1280_v9 = vadd.f32 %v3632_v39, %v1278_v61  ;;  %v1287_v39 = vld [vmem:[#allocation2 + $0x4] sm:$0xff] }
 0xc78   :  { %v1938_v61 = vld [vmem:[#allocation2 + $0xa] sm:$0xff] }
 0xc79   :  { %v3746_v62 = vmul.f32 %v1280_v9, %v3740_v12  ;;  %v3119_v9 = vpack.c.bf16 %v2598_v59, %v2597_v55 }
 0xc7b   :  { %1286 = vst.msk [vmem:[#allocation2 + $0x30] sm:$0xff] %vm51_vm0, %v3746_v62 }
 0xc7e   :  { %v1297_v58 = vld [vmem:[#allocation2 + $0x25] sm:$0xff] }
 0xc7f   :  { %2858 = vmatprep.mubr.msk.f32.mxu1 %vm51_vm0, %v1297_v58  ;;  %v1289_v3 = vld [vmem:[#allocation2 + $0x24] sm:$0xff]  ;;  %v1939_v58 = vld [vmem:[#allocation2 + $0x12] sm:$0xff] }
 0xc80   :  { %v1500_v17 = vld [vmem:[#allocation2 + $0x26] sm:$0xff] }
 0xc81   :  { %v1610_v28 = vld [vmem:[#allocation2 + $0x27] sm:$0xff] }
 0xc82   :  { %v1298_v60 = vld [vmem:[#allocation2 + $0x2d] sm:$0xff] }
 0xc83   :  { %2859 = vmatmul.mubr.msk.f32.gmra.mrb[6].mxu1 %vm51_vm0, %v1298_v60  ;;  %v3770_v6 = vld [vmem:[#allocation2 + $0x2c] sm:$0xff]  ;;  %v2603_v60 = vld [vmem:[%s3928_s8 + $0x100] sm:$0xff] }
 0xc84   :  { %2869 = vmatprep.mubr.msk.f32.mxu1 %vm51_vm0, %v1287_v39  ;;  %v1501_v20 = vld [vmem:[#allocation2 + $0x2e] sm:$0xff]  ;;  %v3123_v39 = vpack.c.bf16 %v2604_v11, %v2603_v60 }
 0xc85   :  { %v1611_v34 = vld [vmem:[#allocation2 + $0x2f] sm:$0xff] }
 0xc86   :  { %v1720_v40 = vld [vmem:[#allocation2 + $0x28] sm:$0xff]  ;;  %v1721_v44 = vld [vmem:[#allocation2 + $0x30] sm:$0xff] }
 0xc87   :  { %2870 = vmatmul.mubr.msk.f32.vlgmr.msra.gmra.mrb[4].mxu1 %vm51_vm0, %v3759_v0  ;;  %v1830_v51 = vld [vmem:[#allocation2 + $0x29] sm:$0xff]  ;;  %v1831_v53 = vld [vmem:[#allocation2 + $0x31] sm:$0xff] }
 0xc88   :  { %3078 = vmatpush3.bf16.msra.mxu1 %v3075_v56  ;;  %2872 = vmatprep.mubr.msk.f32.mxu1 %vm51_vm0, %v1289_v3  ;;  %v2581_v56 = vld [vmem:[%s3928_s8 + $0xb0] sm:$0xff] }
 0xc89   :  { %3080 = vmatprep.subr.bf16.mxu1 %v3079_v63  ;;  %v3103_v15 = vpack.c.bf16 %v2582_v7, %v2581_v56  ;;  %v1940_v41 = vld [vmem:[#allocation2 + $0x2a] sm:$0xff] }
 0xc8a   :  { %v2048_v3 = vld [vmem:[#allocation2 + $0xb] sm:$0xff] }
 0xc8b   :  { %2873 = vmatmul.mubr.msk.f32.gmra.mrb[6].mxu1 %vm51_vm0, %v3770_v6  ;;  %v2050_v16 = vld [vmem:[#allocation2 + $0x2b] sm:$0xff] }
 0xc8c   :  { %3082 = vmatpush3.bf16.msra.mxu1 %v3079_v63  ;;  %2883 = vmatprep.mubr.msk.f32.mxu1 %vm51_vm0, %v1498_v14  ;;  %v1941_v63 = vld [vmem:[#allocation2 + $0x32] sm:$0xff] }
 0xc8d   :  { %3084 = vmatprep.subr.bf16.mxu1 %v3083_v4  ;;  %v2051_v14 = vld [vmem:[#allocation2 + $0x33] sm:$0xff] }
 0xc8f   :  { %2884 = vmatmul.mubr.msk.f32.vlgmr.msra.gmra.mrb[4].mxu1 %vm51_vm0, %v1499_v10  ;;  %v2161_v10 = vld [vmem:[#allocation2 + $0x34] sm:$0xff] }
 0xc90   :  { %3086 = vmatpush3.bf16.msra.mxu1 %v3083_v4  ;;  %2886 = vmatprep.mubr.msk.f32.mxu1 %vm51_vm0, %v1500_v17  ;;  %v3127_v4 = vpack.c.bf16 %v2606_v2, %v2605_v1  ;;  %v3143_v17 = vpack.c.bf16 %v2290_v57, %v2289_v31 }
 0xc91   :  { %3088 = vmatprep.subr.bf16.mxu1 %v3087_v29 }
 0xc92   :  { %3144 = vmatprep.subr.bf16.mxu0 %v3143_v17 }
 0xc93   :  { %2887 = vmatmul.mubr.msk.f32.gmra.mrb[6].mxu1 %vm51_vm0, %v1501_v20  ;;  %3146 = vmatpush3.bf16.msra.mxu0 %v3143_v17 }
 0xc94   :  { %3090 = vmatpush3.bf16.msra.mxu1 %v3087_v29  ;;  %2897 = vmatprep.mubr.msk.f32.mxu1 %vm51_vm0, %v1608_v32  ;;  %v2159_v29 = vld [vmem:[#allocation2 + $0x14] sm:$0xff] }
 0xc95   :  { %3092 = vmatprep.subr.bf16.mxu1 %v3091_v5 }
 0xc97   :  { %2898 = vmatmul.mubr.msk.f32.vlgmr.msra.gmra.mrb[4].mxu1 %vm51_vm0, %v1609_v18 }
 0xc98   :  { %3094 = vmatpush3.bf16.msra.mxu1 %v3091_v5  ;;  %2900 = vmatprep.mubr.msk.f32.mxu1 %vm51_vm0, %v1610_v28 }
 0xc99   :  { %3096 = vmatprep.subr.bf16.mxu1 %v3095_v26 }
 0xc9b   :  { %2901 = vmatmul.mubr.msk.f32.gmra.mrb[6].mxu1 %vm51_vm0, %v1611_v34  ;;  %v2612_v34 = vld [vmem:[%s3931_s11] ss:$0 sm:$0xff] }
 0xc9c   :  { %3098 = vmatpush3.bf16.msra.mxu1 %v3095_v26  ;;  %2911 = vmatprep.mubr.msk.f32.mxu1 %vm51_vm0, %v1718_v35 }
 0xc9d   :  { %3100 = vmatprep.subr.bf16.mxu1 %v3099_v33 }
 0xc9f   :  { %2912 = vmatmul.mubr.msk.f32.vlgmr.msra.gmra.mrb[4].mxu1 %vm51_vm0, %v1719_v36 }
 0xca0   :  { %3102 = vmatpush3.bf16.msra.mxu1 %v3099_v33  ;;  %2914 = vmatprep.mubr.msk.f32.mxu1 %vm51_vm0, %v1720_v40 }
 0xca1   :  { %3104 = vmatprep.subr.bf16.mxu1 %v3103_v15 }
 0xca3   :  { %2915 = vmatmul.mubr.msk.f32.gmra.mrb[6].mxu1 %vm51_vm0, %v1721_v44 }
 0xca4   :  { %3106 = vmatpush3.bf16.msra.mxu1 %v3103_v15  ;;  %2925 = vmatprep.mubr.msk.f32.mxu1 %vm51_vm0, %v1828_v47 }
 0xca5   :  { %3108 = vmatprep.subr.bf16.mxu1 %v3107_v42 }
 0xca7   :  { %2926 = vmatmul.mubr.msk.f32.vlgmr.msra.gmra.mrb[4].mxu1 %vm51_vm0, %v1829_v49 }
 0xca8   :  { %3110 = vmatpush3.bf16.msra.mxu1 %v3107_v42  ;;  %2928 = vmatprep.mubr.msk.f32.mxu1 %vm51_vm0, %v1830_v51 }
 0xca9   :  { %3112 = vmatprep.subr.bf16.mxu1 %v3111_v48 }
 0xcab   :  { %2929 = vmatmul.mubr.msk.f32.gmra.mrb[6].mxu1 %vm51_vm0, %v1831_v53 }
 0xcac   :  { %3114 = vmatpush3.bf16.msra.mxu1 %v3111_v48  ;;  %2939 = vmatprep.mubr.msk.f32.mxu1 %vm51_vm0, %v1938_v61 }
 0xcad   :  { %3116 = vmatprep.subr.bf16.mxu1 %v3115_v52 }
 0xcaf   :  { %2940 = vmatmul.mubr.msk.f32.vlgmr.msra.gmra.mrb[4].mxu1 %vm51_vm0, %v1939_v58 }
 0xcb0   :  { %3118 = vmatpush3.bf16.msra.mxu1 %v3115_v52  ;;  %2942 = vmatprep.mubr.msk.f32.mxu1 %vm51_vm0, %v1940_v41 }
 0xcb1   :  { %3120 = vmatprep.subr.bf16.mxu1 %v3119_v9 }
 0xcb3   :  { %2943 = vmatmul.mubr.msk.f32.gmra.mrb[6].mxu1 %vm51_vm0, %v1941_v63 }
 0xcb4   :  { %3122 = vmatpush3.bf16.msra.mxu1 %v3119_v9  ;;  %2953 = vmatprep.mubr.msk.f32.mxu1 %vm51_vm0, %v2048_v3 }
 0xcb5   :  { %3124 = vmatprep.subr.bf16.mxu1 %v3123_v39 }
 0xcb7   :  { %2954 = vmatmul.mubr.msk.f32.vlgmr.msra.gmra.mrb[4].mxu1 %vm51_vm0, %v2049_v13  ;;  %v3236_v13 = vpack.i.bf16 %v3740_v12, %v3730_v54 }
 0xcb8   :  { %3126 = vmatpush3.bf16.msra.mxu1 %v3123_v39  ;;  %2956 = vmatprep.mubr.msk.f32.mxu1 %vm51_vm0, %v2050_v16 }
 0xcb9   :  { %3128 = vmatprep.subr.bf16.mxu1 %v3127_v4 }
 0xcbb   :  { %2957 = vmatmul.mubr.msk.f32.gmra.mrb[6].mxu1 %vm51_vm0, %v2051_v14 }
 0xcbc   :  { %3130 = vmatpush3.bf16.msra.mxu1 %v3127_v4  ;;  %2967 = vmatprep.mubr.msk.f32.mxu1 %vm51_vm0, %v3759_v0  ;;  %v2611_v0 = vld [vmem:[%s3929_s9] ss:$0 sm:$0xff]  ;;  %v3230_v4 = vpack.i.bf16 %v3680_v22, %v3636_v30 }
 0xcbd   :  { %v2617_v22 = vld [vmem:[%s3932_s12] ss:$0 sm:$0xff] }
 0xcbf   :  { %2968 = vmatmul.mubr.msk.f32.vlgmr.msra.gmra.mrb[4].mxu1 %vm51_vm0, %v2159_v29 }
 0xcc0   :  { %2970 = vmatprep.mubr.msk.f32.mxu1 %vm51_vm0, %v3770_v6 }
 0xcc3   :  { %2971 = vmatmul.mubr.msk.f32.gmra.mrb[6].mxu1 %vm51_vm0, %v2161_v10 }
 0xd92   :  { %v2969_v5 = vpop.f32.mrb[4].mxu1 }
 0xd93   :  { %v2276_v6 = vadd.f32 %v2969_v5, %v2611_v0  ;;  %v2245_v20 = vpop.f32.mrb[5].mxu1 }
 0xd94   :  { %v2275_v23 = vadd.f32 %v2611_v0, %v2245_v20 }
 0xd95   :  { %v2280_v26 = vmax.f32 %v2276_v6, 0.0 }
 0xd96   :  { %v2279_v25 = vmax.f32 %v2275_v23, 0.0  ;;  %v2972_v32 = vpop.f32.mrb[6].mxu1 }
 0xd97   :  { %v2278_v18 = vadd.f32 %v2972_v32, %v2611_v0  ;;  %v2255_v27 = vpop.f32.mrb[7].mxu1  ;;  %v2618_v32 = vld [vmem:[%s3933_s13] ss:$0 sm:$0xff] }
 0xd98   :  { %v2277_v19 = vadd.f32 %v2611_v0, %v2255_v27  ;;  %2989 = vmatprep.mubr.msk.f32.mxu0 %vm2298_vm10, %v2279_v25 }
 0xd99   :  { %2990 = vmatmul.mubr.msk.f32.vlgmr.msra.gmra.mrb[20].mxu0 %vm2298_vm10, %v2280_v26  ;;  %v2282_v33 = vmax.f32 %v2278_v18, 0.0 }
 0xd9a   :  { %v2281_v28 = vmax.f32 %v2277_v19, 0.0 }
 0xd9c   :  { %2992 = vmatprep.mubr.msk.f32.mxu0 %vm2298_vm10, %v2281_v28 }
 0xd9d   :  { %2993 = vmatmul.mubr.msk.f32.gmra.mrb[22].mxu0 %vm2298_vm10, %v2282_v33 }
 0xe6c   :  { %v2991_v56 = vpop.f32.mrb[20].mxu0 }
 0xe6d   :  { %v2383_v7 = vadd.f32 %v2991_v56, %v2612_v34  ;;  %v2377_v35 = vpop.f32.mrb[21].mxu0 }
 0xe6e   :  { %v2378_v15 = vadd.f32 %v2612_v34, %v2377_v35 }
 0xe6f   :  { %v2397_v36 = vadd.f32 %v2383_v7, %v3684_v24 }
 0xe70   :  { %v2994_v37 = vpop.f32.mrb[22].mxu0  ;;  %v2396_v38 = vadd.f32 %v2378_v15, %v3640_v43  ;;  %v3312_v43 = vmov 0  }
 0xe71   :  { %v2393_v40 = vadd.f32 %v2994_v37, %v2612_v34  ;;  %v2387_v42 = vpop.f32.mrb[23].mxu0  ;;  %v2405_v44 = vsel %vm51_vm0, %v2397_v36, 0.0  ;;  %3229 = vset.pattern.permute.xlu1 %v3312_v43  ;;  %3235 = vset.pattern.permute.xlu0 %v3312_v43 }
 0xe72   :  { %v2388_v45 = vadd.f32 %v2612_v34, %v2387_v42  ;;  %2406 = vadd.xlane.f32.xlu0 %v2405_v44  ;;  %v2402_v46 = vsel %vm51_vm0, %v2396_v38, 0.0 }
 0xe73   :  { %2403 = vadd.xlane.f32.xlu1 %v2402_v46  ;;  %v2399_v47 = vadd.f32 %v2393_v40, %v3746_v62 }
 0xe74   :  { %v2398_v48 = vadd.f32 %v2388_v45, %v3736_v8 }
 0xe75   :  { %v2411_v49 = vsel %vm51_vm0, %v2399_v47, 0.0 }
 0xe76   :  { %2412 = vadd.xlane.f32.xlu0 %v2411_v49  ;;  %v2408_v24 = vsel %vm51_vm0, %v2398_v48, 0.0 }
 0xe77   :  { %2409 = vadd.xlane.f32.xlu1 %v2408_v24 }
 0xeff   :  { %v2407_v50 = vpop.xlane.xlu0 %2406 }
 0xf00   :  { %v2415_v21 = vmul.f32 0.03125, %v2407_v50  ;;  %v2404_v51 = vpop.xlane.xlu1 %2403 }
 0xf01   :  { %v2414_v52 = vmul.f32 0.03125, %v2404_v51 }
 0xf02   :  { %v2419_v53 = vsub.f32 %v2397_v36, %v2415_v21 }
 0xf03   :  { %v2418_v55 = vsub.f32 %v2396_v38, %v2414_v52  ;;  %v2413_v59 = vpop.xlane.xlu0 %2412 }
 0xf04   :  { %v2417_v61 = vmul.f32 0.03125, %v2413_v59  ;;  %v2410_v62 = vpop.xlane.xlu1 %2409  ;;  %v2423_v9 = vmul.f32 %v2419_v53, %v2419_v53 }
 0xf05   :  { %v2416_v8 = vmul.f32 0.03125, %v2410_v62  ;;  %v2422_v58 = vmul.f32 %v2418_v55, %v2418_v55 }
 0xf06   :  { %v2421_v60 = vsub.f32 %v2399_v47, %v2417_v61  ;;  %v2429_v11 = vsel %vm51_vm0, %v2423_v9, 0.0 }
 0xf07   :  { %v2420_v41 = vsub.f32 %v2398_v48, %v2416_v8  ;;  %2430 = vadd.xlane.f32.xlu0 %v2429_v11  ;;  %v2426_v39 = vsel %vm51_vm0, %v2422_v58, 0.0 }
 0xf08   :  { %2427 = vadd.xlane.f32.xlu1 %v2426_v39  ;;  %v2425_v63 = vmul.f32 %v2421_v60, %v2421_v60 }
 0xf09   :  { %v2424_v1 = vmul.f32 %v2420_v41, %v2420_v41 }
 0xf0a   :  { %v2435_v2 = vsel %vm51_vm0, %v2425_v63, 0.0 }
 0xf0b   :  { %2436 = vadd.xlane.f32.xlu0 %v2435_v2  ;;  %v2432_v3 = vsel %vm51_vm0, %v2424_v1, 0.0 }
 0xf0c   :  { %2433 = vadd.xlane.f32.xlu1 %v2432_v3 }
 0xf1d   :  { %3231 = vperm.xlu1 %3229, %v3230_v4  }
 0xf21   :  { %3237 = vperm.xlu0 %3235, %v3236_v13  }
 0xf94   :  { %v2431_v16 = vpop.xlane.xlu0 %2430 }
 0xf95   :  { %v2439_v14 = vmul.f32 0.03125, %v2431_v16  ;;  %v2428_v29 = vpop.xlane.xlu1 %2427 }
 0xf96   :  { %v2438_v10 = vmul.f32 0.03125, %v2428_v29 }
 0xf97   :  { %v2443_v31 = vadd.f32 1e-05, %v2439_v14 }
 0xf98   :  { %v2442_v57 = vadd.f32 1e-05, %v2438_v10  ;;  %v2437_v17 = vpop.xlane.xlu0 %2436 }
 0xf99   :  { %3281 = vrsqrt.f32 %v2443_v31  ;;  %v2441_v0 = vmul.f32 0.03125, %v2437_v17  ;;  %v2434_v5 = vpop.xlane.xlu1 %2433 }
 0xf9a   :  { %3283 = vrsqrt.f32 %v2442_v57  ;;  %v2440_v6 = vmul.f32 0.03125, %v2434_v5 }
 0xf9b   :  { %v2445_v20 = vadd.f32 1e-05, %v2441_v0 }
 0xf9c   :  { %v2444_v23 = vadd.f32 1e-05, %v2440_v6 }
 0xf9d   :  { %3285 = vrsqrt.f32 %v2445_v20  ;;  %v3232_v54 = vpop.permute.xlu1 %3231 }
 0xf9e   :  { %3287 = vrsqrt.f32 %v2444_v23  ;;  %v3234_v27 = vunpack.i.h.bf16 %v3232_v54  ;;  %v3233_v33 = vunpack.i.l.bf16 %v3232_v54 }
 0xfa0   :  { %v3238_v34 = vpop.permute.xlu0 %3237 }
 0xfa1   :  { %v3240_v40 = vunpack.i.h.bf16 %v3238_v34  ;;  %v3239_v44 = vunpack.i.l.bf16 %v3238_v34 }
 0xfa3   :  { %v3282_v30 = vpop.eup %3281 }
 0xfa4   :  { %v3284_v12 = vpop.eup %3283  ;;  %v2451_v25 = vmul.f32 %v3282_v30, %v2419_v53 }
 0xfa5   :  { %v2450_v26 = vmul.f32 %v3284_v12, %v2418_v55 }
 0xfa6   :  { %v2461_v18 = vmul.f32 %v2617_v22, %v2451_v25 }
 0xfa7   :  { %v3286_v19 = vpop.eup %3285  ;;  %v2460_v28 = vmul.f32 %v2617_v22, %v2450_v26 }
 0xfa8   :  { %v3288_v56 = vpop.eup %3287  ;;  %v2471_v7 = vadd.f32 %v2618_v32, %v2461_v18  ;;  %v2453_v35 = vmul.f32 %v3286_v19, %v2421_v60 }
 0xfa9   :  { %v2470_v15 = vadd.f32 %v2618_v32, %v2460_v28  ;;  %v2452_v36 = vmul.f32 %v3288_v56, %v2420_v41 }
 0xfaa   :  { %v2495_v37 = vmul.f32 %v3234_v27, %v2471_v7  ;;  %v2463_v38 = vmul.f32 %v2617_v22, %v2453_v35 }
 0xfab   :  { %v2494_v42 = vmul.f32 %v3233_v33, %v2470_v15  ;;  %v2462_v45 = vmul.f32 %v2617_v22, %v2452_v36 }
 0xfac   :  { %2499 = vst.msk [vmem:[%s3934_s14 + $0x8] sm:$0xff] %vm51_vm0, %v2495_v37  ;;  %v2473_v46 = vadd.f32 %v2618_v32, %v2463_v38 }
 0xfad   :  { %2498 = vst.msk [vmem:[%s3934_s14] sm:$0xff] %vm51_vm0, %v2494_v42  ;;  %v2472_v47 = vadd.f32 %v2618_v32, %v2462_v45 }
 0xfae   :  { %v2497_v48 = vmul.f32 %v3240_v40, %v2473_v46 }
 0xfaf   :  { %v2496_v49 = vmul.f32 %v3239_v44, %v2472_v47 }
 0xfb0   :  { %2501 = vst.msk [vmem:[%s3934_s14 + $0x18] sm:$0xff] %vm51_vm0, %v2497_v48 }
 0xfb1   :  { %2500 = vst.msk [vmem:[%s3934_s14 + $0x10] sm:$0xff] %vm51_vm0, %v2496_v49 }

// kernel: _lambda_.9
= control target key start
LH: loop header
LB: loop body
LE: loop exit
PB: predicated region body
PF: predicated region fallthrough
CT: control target
= control target key end

     0   :  { %13 = vsyncpa [#allocation4], 0  ;;  %vm27_vm0 = vcmask 261120   ;;  %vm31_vm1 = vcmask 254976   ;;  %v4221_v6 = vmov 0.0   ;;  %s4811_s0 = inlined_call_operand.vmem [shape: f32[2,16,32], index: 0, kind: input, shape index: {}]   ;;  %s4812_s1 = inlined_call_operand.vmem [shape: f32[32,16], index: 1, kind: input, shape index: {}]   ;;  %s4813_s2 = inlined_call_operand.vmem [shape: f32[1,16], index: 2, kind: input, shape index: {}]   ;;  %s4814_s3 = inlined_call_operand.vmem [shape: f32[5,5,32,32], index: 3, kind: input, shape index: {}]   ;;  %s4815_s4 = inlined_call_operand.vmem [shape: f32[5,1,32], index: 4, kind: input, shape index: {}]   ;;  %s4816_s5 = inlined_call_operand.vmem [shape: f32[5,1,32], index: 5, kind: input, shape index: {}]   ;;  %s4817_s6 = inlined_call_operand.hbm [shape: f32[2,16,16], index: 6, kind: output, shape index: {0}]   ;;  %s4818_s7 = inlined_call_operand.hbm [shape: f32[2,16,16], index: 7, kind: output, shape index: {1}]  }
   0x1   :  { %v41_v0 = vld [vmem:[%s4812_s1] sm:$0xff]  ;;  %v42_v1 = vld [vmem:[%s4812_s1 + $0x8] sm:$0xff]  ;;  %v43_v2 = vld [vmem:[%s4812_s1 + $0x10] sm:$0xff]  ;;  %30 = vst.msk [vmem:[#allocation2 + $0x10] sm:$0xff] %vm27_vm0, %v4221_v6 }
   0x2   :  { %v3848_v3 = vpack.c.bf16 %v42_v1, %v41_v0  ;;  %v44_v4 = vld [vmem:[%s4812_s1 + $0x18] sm:$0xff]  ;;  %v37_v5 = vld [vmem:[%s4811_s0] sm:$0xff]  ;;  %32 = vst.msk [vmem:[#allocation2 + $0x18] sm:$0x3] %vm31_vm1, %v4221_v6  ;;  %36 = vst.msk [vmem:[#allocation2 + $0x38] sm:$0x3] %vm31_vm1, %v4221_v6 }
   0x3   :  { %28 = vst.msk [vmem:[#allocation2] sm:$0xff] %vm27_vm0, %v4221_v6  ;;  %29 = vst.msk [vmem:[#allocation2 + $0x8] sm:$0xff] %vm27_vm0, %v4221_v6  ;;  %v3852_v7 = vpack.c.bf16 %v44_v4, %v43_v2  ;;  %3492 = vmatprep.mubr.msk.f32.mxu0 %vm27_vm0, %v37_v5 }
   0x4   :  { %33 = vst.msk [vmem:[#allocation2 + $0x20] sm:$0xff] %vm27_vm0, %v4221_v6  ;;  %34 = vst.msk [vmem:[#allocation2 + $0x28] sm:$0xff] %vm27_vm0, %v4221_v6 }
   0x5   :  { %35 = vst.msk [vmem:[#allocation2 + $0x30] sm:$0xff] %vm27_vm0, %v4221_v6 }
   0x6   :  { %14 = vsyncpa [#allocation6], 0  ;;  %3849 = vmatprep.subr.bf16.mxu0 %v3848_v3  ;;  %v38_v8 = vld [vmem:[%s4811_s0 + $0x8] sm:$0xff]  ;;  %v39_v9 = vld [vmem:[%s4811_s0 + $0x10] sm:$0xff]  ;;  %vm149_vm2 = vcmask 130048  }
   0x7   :  { %3851 = vmatpush3.bf16.msra.mxu0 %v3848_v3  ;;  %v40_v10 = vld [vmem:[%s4811_s0 + $0x18] sm:$0xff]  ;;  %v3074_v11 = vld [vmem:[%s4814_s3 + $0x40] sm:$0xff]  ;;  %v3075_v12 = vld [vmem:[%s4814_s3 + $0x48] sm:$0xff] }
   0x8   :  { %3853 = vmatprep.subr.bf16.mxu0 %v3852_v7  ;;  %v3062_v13 = vld [vmem:[%s4814_s3 + $0x20] sm:$0xff]  ;;  %v3872_v14 = vpack.c.bf16 %v3075_v12, %v3074_v11  ;;  %v3063_v15 = vld [vmem:[%s4814_s3 + $0x28] sm:$0xff]  ;;  %v3076_v17 = vld [vmem:[%s4814_s3 + $0x50] sm:$0xff] }
   0x9   :  { %v3856_v16 = vpack.c.bf16 %v3063_v15, %v3062_v13  ;;  %v3077_v18 = vld [vmem:[%s4814_s3 + $0x58] sm:$0xff]  ;;  %v3064_v19 = vld [vmem:[%s4814_s3 + $0x30] sm:$0xff]  ;;  %v3082_v23 = vld [vmem:[%s4814_s3 + $0x60] sm:$0xff] }
   0xa   :  { %3873 = vmatprep.subr.bf16.mxu1 %v3872_v14  ;;  %v3876_v20 = vpack.c.bf16 %v3077_v18, %v3076_v17  ;;  %v3065_v21 = vld [vmem:[%s4814_s3 + $0x38] sm:$0xff]  ;;  %v3083_v24 = vld [vmem:[%s4814_s3 + $0x68] sm:$0xff]  ;;  %v162_v25 = vld [vmem:[%s4814_s3] sm:$0xff] }
   0xb   :  { %3855 = vmatpush3.bf16.msra.mxu0 %v3852_v7  ;;  %3875 = vmatpush3.bf16.msra.mxu1 %v3872_v14  ;;  %v3860_v22 = vpack.c.bf16 %v3065_v21, %v3064_v19  ;;  %v3880_v26 = vpack.c.bf16 %v3083_v24, %v3082_v23  ;;  %v163_v27 = vld [vmem:[%s4814_s3 + $0x8] sm:$0xff]  ;;  %v3057_v29 = vld [vmem:[%s4813_s2] ss:$0 sm:$0xff]  ;;  %v3084_v38 = vld [vmem:[%s4814_s3 + $0x70] sm:$0xff] }
   0xc   :  { %3857 = vmatprep.subr.bf16.mxu0 %v3856_v16  ;;  %3877 = vmatprep.subr.bf16.mxu1 %v3876_v20  ;;  %v3864_v28 = vpack.c.bf16 %v163_v27, %v162_v25  ;;  %v3085_v39 = vld [vmem:[%s4814_s3 + $0x78] sm:$0xff]  ;;  %v164_v40 = vld [vmem:[%s4814_s3 + $0x10] sm:$0xff]  ;;  %v3090_v48 = vld [vmem:[%s4814_s3 + $0x80] sm:$0xff] }
   0xd   :  { %v165_v41 = vld [vmem:[%s4814_s3 + $0x18] sm:$0xff]  ;;  %v3884_v45 = vpack.c.bf16 %v3085_v39, %v3084_v38  ;;  %v3091_v49 = vld [vmem:[%s4814_s3 + $0x88] sm:$0xff]  ;;  %v3092_v55 = vld [vmem:[%s4814_s3 + $0x90] sm:$0xff] }
   0xe   :  { %3493 = vmatmul.mubr.msk.f32.vlgmr.msra.gmra.mrb[0].mxu0 %vm27_vm0, %v38_v8  ;;  %v3868_v46 = vpack.c.bf16 %v165_v41, %v164_v40  ;;  %v3888_v54 = vpack.c.bf16 %v3091_v49, %v3090_v48  ;;  %v3093_v56 = vld [vmem:[%s4814_s3 + $0x98] sm:$0xff]  ;;  %v3104_v6 = vld [vmem:[%s4814_s3 + $0xc0] sm:$0xff]  ;;  %v3105_v7 = vld [vmem:[%s4814_s3 + $0xc8] sm:$0xff] }
   0xf   :  { %3495 = vmatprep.mubr.msk.f32.mxu0 %vm27_vm0, %v39_v9  ;;  %3859 = vmatpush3.bf16.msra.mxu0 %v3856_v16  ;;  %v3892_v59 = vpack.c.bf16 %v3093_v56, %v3092_v55  ;;  %v3896_v8 = vpack.c.bf16 %v3105_v7, %v3104_v6  ;;  %v3106_v9 = vld [vmem:[%s4814_s3 + $0xd0] sm:$0xff]  ;;  %v3100_v12 = vld [vmem:[%s4814_s3 + $0xa0] sm:$0xff]  ;;  %v3101_v13 = vld [vmem:[%s4814_s3 + $0xa8] sm:$0xff] }
  0x10   :  { %3861 = vmatprep.subr.bf16.mxu0 %v3860_v22  ;;  %3879 = vmatpush3.bf16.msra.mxu1 %v3876_v20  ;;  %v3904_v14 = vpack.c.bf16 %v3101_v13, %v3100_v12  ;;  %v3098_v20 = vld [vmem:[%s4815_s4] ss:$0 sm:$0xff]  ;;  %v3118_v55 = vld [vmem:[%s4814_s3 + $0xf0] sm:$0xff]  ;;  %v3119_v56 = vld [vmem:[%s4814_s3 + $0xf8] sm:$0xff] }
  0x11   :  { %3881 = vmatprep.subr.bf16.mxu1 %v3880_v26  ;;  %v3099_v23 = vld [vmem:[%s4816_s5] ss:$0 sm:$0xff]  ;;  %v3133_v7 = vld [vmem:[%s4814_s3 + $0x128] sm:$0xff]  ;;  %v3135_v12 = vld [vmem:[%s4814_s3 + $0x138] sm:$0xff] }
  0x12   :  { %3496 = vmatmul.mubr.msk.f32.gmra.mrb[2].mxu0 %vm27_vm0, %v40_v10  ;;  %v3107_v10 = vld [vmem:[%s4814_s3 + $0xd8] sm:$0xff]  ;;  %v3132_v6 = vld [vmem:[%s4814_s3 + $0x120] sm:$0xff] }
  0x13   :  { %3863 = vmatpush3.bf16.msra.mxu0 %v3860_v22  ;;  %v3900_v11 = vpack.c.bf16 %v3107_v10, %v3106_v9  ;;  %v3928_v9 = vpack.c.bf16 %v3133_v7, %v3132_v6 }
  0x14   :  { %3865 = vmatprep.subr.bf16.mxu0 %v3864_v28 }
  0xe1   :  { %v3494_v30 = vpop.f32.mrb[0].mxu0 }
  0xe2   :  { %v4339_v31 = vadd.f32 %v3494_v30, %v3057_v29  ;;  %v130_v32 = vpop.f32.mrb[1].mxu0 }
  0xe3   :  { %v4341_v33 = vadd.f32 %v3057_v29, %v130_v32 }
  0xe4   :  { %151 = vst.msk [vmem:[#allocation3 + $0x8] sm:$0xff] %vm149_vm2, %v4339_v31  ;;  %155 = vst.msk [vmem:[#allocation2 + $0x10] sm:$0xff] %vm149_vm2, %v4339_v31 }
  0xe5   :  { %150 = vst.msk [vmem:[#allocation3] sm:$0xff] %vm149_vm2, %v4341_v33  ;;  %154 = vst.msk [vmem:[#allocation2 + $0x8] sm:$0xff] %vm149_vm2, %v4341_v33  ;;  %v3497_v34 = vpop.f32.mrb[2].mxu0 }
  0xe6   :  { %v4351_v35 = vadd.f32 %v3497_v34, %v3057_v29  ;;  %v140_v36 = vpop.f32.mrb[3].mxu0 }
  0xe7   :  { %v4353_v37 = vadd.f32 %v3057_v29, %v140_v36 }
  0xe8   :  { %153 = vst.msk [vmem:[#allocation3 + $0x18] sm:$0xff] %vm149_vm2, %v4351_v35  ;;  %157 = vst.msk [vmem:[#allocation2 + $0x30] sm:$0xff] %vm149_vm2, %v4351_v35 }
  0xe9   :  { %152 = vst.msk [vmem:[#allocation3 + $0x10] sm:$0xff] %vm149_vm2, %v4353_v37  ;;  %156 = vst.msk [vmem:[#allocation2 + $0x28] sm:$0xff] %vm149_vm2, %v4353_v37 }
  0xeb   :  { %v370_v47 = vld [vmem:[#allocation2 + $0x10] sm:$0xff] }
  0xec   :  { %v166_v42 = vld [vmem:[#allocation2 + $0x7] sm:$0xff]  ;;  %v167_v44 = vld [vmem:[#allocation2 + $0xf] sm:$0xff] }
  0xed   :  { %v369_v43 = vld [vmem:[#allocation2 + $0x8] sm:$0xff]  ;;  %3506 = vmatprep.mubr.msk.f32.mxu0 %vm27_vm0, %v166_v42  ;;  %v480_v61 = vld [vmem:[#allocation2 + $0x11] sm:$0xff] }
  0xee   :  { %3534 = vmatprep.mubr.msk.f32.mxu1 %vm27_vm0, %v369_v43  ;;  %3507 = vmatmul.mubr.msk.f32.vlgmr.msra.gmra.mrb[4].mxu0 %vm27_vm0, %v167_v44  ;;  %v158_v57 = vld [vmem:[#allocation2 + $0x6] sm:$0xff]  ;;  %v159_v60 = vld [vmem:[#allocation2 + $0xe] sm:$0xff] }
  0xef   :  { %3535 = vmatmul.mubr.msk.f32.vlgmr.msra.gmra.mrb[0].mxu1 %vm27_vm0, %v370_v47  ;;  %3867 = vmatpush3.bf16.msra.mxu0 %v3864_v28  ;;  %v372_v53 = vld [vmem:[#allocation2 + $0x30] sm:$0xff] }
  0xf0   :  { %3883 = vmatpush3.bf16.msra.mxu1 %v3880_v26  ;;  %v168_v50 = vld [vmem:[#allocation2 + $0x27] sm:$0xff]  ;;  %v169_v52 = vld [vmem:[#allocation2 + $0x2f] sm:$0xff]  ;;  %3869 = vmatprep.subr.bf16.mxu0 %v3868_v46 }
  0xf1   :  { %v371_v51 = vld [vmem:[#allocation2 + $0x28] sm:$0xff]  ;;  %3885 = vmatprep.subr.bf16.mxu1 %v3884_v45  ;;  %3509 = vmatprep.mubr.msk.f32.mxu0 %vm27_vm0, %v168_v50  ;;  %v482_v1 = vld [vmem:[#allocation2 + $0x31] sm:$0xff]  ;;  %v3116_v50 = vld [vmem:[%s4814_s3 + $0xe0] sm:$0xff] }
  0xf2   :  { %3537 = vmatprep.mubr.msk.f32.mxu1 %vm27_vm0, %v371_v51  ;;  %3510 = vmatmul.mubr.msk.f32.gmra.mrb[6].mxu0 %vm27_vm0, %v169_v52  ;;  %v479_v58 = vld [vmem:[#allocation2 + $0x9] sm:$0xff]  ;;  %v590_v3 = vld [vmem:[#allocation2 + $0x12] sm:$0xff] }
  0xf3   :  { %3538 = vmatmul.mubr.msk.f32.gmra.mrb[2].mxu1 %vm27_vm0, %v372_v53  ;;  %3871 = vmatpush3.bf16.msra.mxu0 %v3868_v46  ;;  %v160_v62 = vld [vmem:[#allocation2 + $0x26] sm:$0xff]  ;;  %v161_v0 = vld [vmem:[#allocation2 + $0x2e] sm:$0xff]  ;;  %v3103_v46 = vld [vmem:[%s4814_s3 + $0xb8] sm:$0xff] }
  0xf4   :  { %3887 = vmatpush3.bf16.msra.mxu1 %v3884_v45  ;;  %3520 = vmatprep.mubr.msk.f32.mxu0 %vm27_vm0, %v158_v57  ;;  %v481_v63 = vld [vmem:[#allocation2 + $0x29] sm:$0xff]  ;;  %v592_v5 = vld [vmem:[#allocation2 + $0x32] sm:$0xff] }
  0xf5   :  { %3548 = vmatprep.mubr.msk.f32.mxu1 %vm27_vm0, %v479_v58  ;;  %3889 = vmatprep.subr.bf16.mxu1 %v3888_v54  ;;  %v589_v2 = vld [vmem:[#allocation2 + $0xa] sm:$0xff]  ;;  %v3916_v58 = vpack.c.bf16 %v3119_v56, %v3118_v55 }
  0xf6   :  { %3521 = vmatmul.mubr.msk.f32.vlgmr.msra.gmra.mrb[4].mxu0 %vm27_vm0, %v159_v60  ;;  %v591_v4 = vld [vmem:[#allocation2 + $0x2a] sm:$0xff]  ;;  %3897 = vmatprep.subr.bf16.mxu0 %v3896_v8  ;;  %v3124_v60 = vld [vmem:[%s4814_s3 + $0x100] sm:$0xff] }
  0xf7   :  { %3549 = vmatmul.mubr.msk.f32.vlgmr.msra.gmra.mrb[0].mxu1 %vm27_vm0, %v480_v61  ;;  %3523 = vmatprep.mubr.msk.f32.mxu0 %vm27_vm0, %v160_v62  ;;  %v3102_v45 = vld [vmem:[%s4814_s3 + $0xb0] sm:$0xff]  ;;  %v3117_v51 = vld [vmem:[%s4814_s3 + $0xe8] sm:$0xff] }
  0xf8   :  { %3891 = vmatpush3.bf16.msra.mxu1 %v3888_v54  ;;  %3551 = vmatprep.mubr.msk.f32.mxu1 %vm27_vm0, %v481_v63  ;;  %v3908_v49 = vpack.c.bf16 %v3103_v46, %v3102_v45  ;;  %v3912_v54 = vpack.c.bf16 %v3117_v51, %v3116_v50  ;;  %v3125_v61 = vld [vmem:[%s4814_s3 + $0x108] sm:$0xff] }
  0xf9   :  { %3893 = vmatprep.subr.bf16.mxu1 %v3892_v59  ;;  %3899 = vmatpush3.bf16.msra.mxu0 %v3896_v8  ;;  %v3920_v63 = vpack.c.bf16 %v3125_v61, %v3124_v60 }
  0xfa   :  { %3524 = vmatmul.mubr.msk.f32.gmra.mrb[6].mxu0 %vm27_vm0, %v161_v0  ;;  %3901 = vmatprep.subr.bf16.mxu0 %v3900_v11 }
  0xfb   :  { %3552 = vmatmul.mubr.msk.f32.gmra.mrb[2].mxu1 %vm27_vm0, %v482_v1  ;;  %v3126_v1 = vld [vmem:[%s4814_s3 + $0x110] sm:$0xff] }
  0xfc   :  { %3895 = vmatpush3.bf16.msra.mxu1 %v3892_v59  ;;  %3562 = vmatprep.mubr.msk.f32.mxu1 %vm27_vm0, %v589_v2  ;;  %v3127_v2 = vld [vmem:[%s4814_s3 + $0x118] sm:$0xff] }
  0xfd   :  { %3903 = vmatpush3.bf16.msra.mxu0 %v3900_v11  ;;  %v3134_v11 = vld [vmem:[%s4814_s3 + $0x130] sm:$0xff] }
  0xfe   :  { %3905 = vmatprep.subr.bf16.mxu0 %v3904_v14 }
  0xff   :  { %3563 = vmatmul.mubr.msk.f32.vlgmr.msra.gmra.mrb[0].mxu1 %vm27_vm0, %v590_v3 }
 0x100   :  { %3565 = vmatprep.mubr.msk.f32.mxu1 %vm27_vm0, %v591_v4  ;;  %v3924_v4 = vpack.c.bf16 %v3127_v2, %v3126_v1 }
 0x103   :  { %3566 = vmatmul.mubr.msk.f32.gmra.mrb[2].mxu1 %vm27_vm0, %v592_v5 }
 0x1c9   :  { %v3522_v15 = vpop.f32.mrb[4].mxu0 }
 0x1ca   :  { %v350_v16 = vpop.f32.mrb[5].mxu0 }
 0x1cd   :  { %v3525_v17 = vpop.f32.mrb[6].mxu0 }
 0x1ce   :  { %v360_v18 = vpop.f32.mrb[7].mxu0 }
 0x1d2   :  { %v3564_v19 = vpop.f32.mrb[0].mxu1 }
 0x1d3   :  { %v4056_v21 = vadd.f32 %v3564_v19, %v3522_v15  ;;  %v676_v22 = vpop.f32.mrb[1].mxu1 }
 0x1d4   :  { %v4057_v24 = vadd.f32 %v676_v22, %v350_v16  ;;  %v3148_v22 = vld [vmem:[%s4814_s3 + $0x160] sm:$0xff] }
 0x1d5   :  { %v707_v25 = vmul.f32 %v4056_v21, %v3098_v20 }
 0x1d6   :  { %v706_v26 = vmul.f32 %v4057_v24, %v3098_v20  ;;  %v3567_v27 = vpop.f32.mrb[2].mxu1 }
 0x1d7   :  { %v718_v28 = vadd.f32 %v3099_v23, %v707_v25  ;;  %v4058_v29 = vadd.f32 %v3567_v27, %v3525_v17  ;;  %v686_v30 = vpop.f32.mrb[3].mxu1  ;;  %v3150_v25 = vld [vmem:[%s4814_s3 + $0x170] sm:$0xff] }
 0x1d8   :  { %v717_v32 = vadd.f32 %v3099_v23, %v706_v26  ;;  %v4059_v34 = vadd.f32 %v686_v30, %v360_v18  ;;  %v3151_v26 = vld [vmem:[%s4814_s3 + $0x178] sm:$0xff] }
 0x1d9   :  { %4141 = vtanh.f32 %v718_v28  ;;  %v709_v36 = vmul.f32 %v4058_v29, %v3098_v20  ;;  %v3940_v27 = vpack.c.bf16 %v3151_v26, %v3150_v25  ;;  %v3144_v28 = vld [vmem:[%s4814_s3 + $0x140] sm:$0xff]  ;;  %v3145_v29 = vld [vmem:[%s4814_s3 + $0x148] sm:$0xff] }
 0x1da   :  { %4143 = vtanh.f32 %v717_v32  ;;  %v708_v38 = vmul.f32 %v4059_v34, %v3098_v20  ;;  %v3944_v30 = vpack.c.bf16 %v3145_v29, %v3144_v28  ;;  %v3141_v32 = vld [vmem:[%s4815_s4 + $0x1] ss:$0 sm:$0xff] }
 0x1db   :  { %v720_v39 = vadd.f32 %v3099_v23, %v709_v36  ;;  %v3143_v36 = vld [vmem:[%s4816_s5 + $0x1] ss:$0 sm:$0xff] }
 0x1dc   :  { %v719_v40 = vadd.f32 %v3099_v23, %v708_v38  ;;  %v3149_v23 = vld [vmem:[%s4814_s3 + $0x168] sm:$0xff] }
 0x1dd   :  { %4145 = vtanh.f32 %v720_v39  ;;  %v3936_v24 = vpack.c.bf16 %v3149_v23, %v3148_v22 }
 0x1de   :  { %4147 = vtanh.f32 %v719_v40 }
 0x1df   :  { %3937 = vmatprep.subr.bf16.mxu1 %v3936_v24 }
 0x1e0   :  { %3939 = vmatpush3.bf16.msra.mxu1 %v3936_v24 }
 0x1e1   :  { %3941 = vmatprep.subr.bf16.mxu1 %v3940_v27 }
 0x1e3   :  { %v4142_v41 = vpop.eup %4141 }
 0x1e4   :  { %v4144_v42 = vpop.eup %4143  ;;  %726 = vst.msk [vmem:[#allocation2 + $0x10] sm:$0xff] %vm27_vm0, %v4142_v41  ;;  %3943 = vmatpush3.bf16.msra.mxu1 %v3940_v27 }
 0x1e5   :  { %725 = vst.msk [vmem:[#allocation2 + $0x8] sm:$0xff] %vm27_vm0, %v4144_v42  ;;  %3945 = vmatprep.subr.bf16.mxu1 %v3944_v30 }
 0x1e7   :  { %v4146_v43 = vpop.eup %4145 }
 0x1e8   :  { %v4148_v44 = vpop.eup %4147  ;;  %728 = vst.msk [vmem:[#allocation2 + $0x30] sm:$0xff] %vm27_vm0, %v4146_v43 }
 0x1e9   :  { %727 = vst.msk [vmem:[#allocation2 + $0x28] sm:$0xff] %vm27_vm0, %v4148_v44 }
 0x1eb   :  { %v942_v5 = vld [vmem:[#allocation2 + $0x10] sm:$0xff] }
 0x1ec   :  { %v738_v47 = vld [vmem:[#allocation2 + $0x7] sm:$0xff]  ;;  %v739_v48 = vld [vmem:[#allocation2 + $0xf] sm:$0xff] }
 0x1ed   :  { %3576 = vmatprep.mubr.msk.f32.mxu0 %vm27_vm0, %v738_v47  ;;  %v729_v57 = vld [vmem:[#allocation2 + $0x6] sm:$0xff]  ;;  %v730_v59 = vld [vmem:[#allocation2 + $0xe] sm:$0xff] }
 0x1ee   :  { %3577 = vmatmul.mubr.msk.f32.vlgmr.msra.gmra.mrb[8].mxu0 %vm27_vm0, %v739_v48  ;;  %v941_v3 = vld [vmem:[#allocation2 + $0x8] sm:$0xff]  ;;  %v1052_v15 = vld [vmem:[#allocation2 + $0x11] sm:$0xff] }
 0x1ef   :  { %3907 = vmatpush3.bf16.msra.mxu0 %v3904_v14  ;;  %v944_v10 = vld [vmem:[#allocation2 + $0x30] sm:$0xff]  ;;  %v3932_v14 = vpack.c.bf16 %v3135_v12, %v3134_v11 }
 0x1f0   :  { %v740_v52 = vld [vmem:[#allocation2 + $0x27] sm:$0xff]  ;;  %3909 = vmatprep.subr.bf16.mxu0 %v3908_v49  ;;  %v741_v53 = vld [vmem:[#allocation2 + $0x2f] sm:$0xff] }
 0x1f1   :  { %3579 = vmatprep.mubr.msk.f32.mxu0 %vm27_vm0, %v740_v52  ;;  %v731_v62 = vld [vmem:[#allocation2 + $0x26] sm:$0xff]  ;;  %v732_v0 = vld [vmem:[#allocation2 + $0x2e] sm:$0xff] }
 0x1f2   :  { %3580 = vmatmul.mubr.msk.f32.gmra.mrb[10].mxu0 %vm27_vm0, %v741_v53  ;;  %v943_v8 = vld [vmem:[#allocation2 + $0x28] sm:$0xff]  ;;  %v1054_v17 = vld [vmem:[#allocation2 + $0x31] sm:$0xff] }
 0x1f3   :  { %3911 = vmatpush3.bf16.msra.mxu0 %v3908_v49  ;;  %3590 = vmatprep.mubr.msk.f32.mxu0 %vm27_vm0, %v729_v57  ;;  %v1051_v13 = vld [vmem:[#allocation2 + $0x9] sm:$0xff]  ;;  %v1162_v19 = vld [vmem:[#allocation2 + $0x12] sm:$0xff] }
 0x1f4   :  { %3913 = vmatprep.subr.bf16.mxu0 %v3912_v54  ;;  %v1053_v16 = vld [vmem:[#allocation2 + $0x29] sm:$0xff]  ;;  %v1164_v21 = vld [vmem:[#allocation2 + $0x32] sm:$0xff] }
 0x1f5   :  { %v1161_v18 = vld [vmem:[#allocation2 + $0xa] sm:$0xff] }
 0x1f6   :  { %3591 = vmatmul.mubr.msk.f32.vlgmr.msra.gmra.mrb[8].mxu0 %vm27_vm0, %v730_v59  ;;  %v1163_v20 = vld [vmem:[#allocation2 + $0x2a] sm:$0xff] }
 0x1f7   :  { %3915 = vmatpush3.bf16.msra.mxu0 %v3912_v54  ;;  %3593 = vmatprep.mubr.msk.f32.mxu0 %vm27_vm0, %v731_v62  ;;  %v3146_v53 = vld [vmem:[%s4814_s3 + $0x150] sm:$0xff]  ;;  %v3147_v54 = vld [vmem:[%s4814_s3 + $0x158] sm:$0xff]  ;;  %v3161_v59 = vld [vmem:[%s4814_s3 + $0x188] sm:$0xff] }
 0x1f8   :  { %3917 = vmatprep.subr.bf16.mxu0 %v3916_v58  ;;  %v3948_v57 = vpack.c.bf16 %v3147_v54, %v3146_v53 }
 0x1fa   :  { %3594 = vmatmul.mubr.msk.f32.gmra.mrb[10].mxu0 %vm27_vm0, %v732_v0  ;;  %v3163_v0 = vld [vmem:[%s4814_s3 + $0x198] sm:$0xff] }
 0x1fb   :  { %3919 = vmatpush3.bf16.msra.mxu0 %v3916_v58  ;;  %3604 = vmatprep.mubr.msk.f32.mxu0 %vm27_vm0, %v941_v3  ;;  %v3160_v58 = vld [vmem:[%s4814_s3 + $0x180] sm:$0xff] }
 0x1fc   :  { %3921 = vmatprep.subr.bf16.mxu0 %v3920_v63  ;;  %v3952_v62 = vpack.c.bf16 %v3161_v59, %v3160_v58 }
 0x1fe   :  { %3605 = vmatmul.mubr.msk.f32.vlgmr.msra.gmra.mrb[8].mxu0 %vm27_vm0, %v942_v5  ;;  %v3169_v5 = vld [vmem:[%s4814_s3 + $0x1a8] sm:$0xff] }
 0x1ff   :  { %3923 = vmatpush3.bf16.msra.mxu0 %v3920_v63  ;;  %3607 = vmatprep.mubr.msk.f32.mxu0 %vm27_vm0, %v943_v8  ;;  %v3162_v63 = vld [vmem:[%s4814_s3 + $0x190] sm:$0xff] }
 0x200   :  { %3925 = vmatprep.subr.bf16.mxu0 %v3924_v4  ;;  %v3956_v2 = vpack.c.bf16 %v3163_v0, %v3162_v63 }
 0x202   :  { %3608 = vmatmul.mubr.msk.f32.gmra.mrb[10].mxu0 %vm27_vm0, %v944_v10  ;;  %v3171_v10 = vld [vmem:[%s4814_s3 + $0x1b8] sm:$0xff] }
 0x203   :  { %3927 = vmatpush3.bf16.msra.mxu0 %v3924_v4  ;;  %3618 = vmatprep.mubr.msk.f32.mxu0 %vm27_vm0, %v1051_v13  ;;  %v3168_v4 = vld [vmem:[%s4814_s3 + $0x1a0] sm:$0xff] }
 0x204   :  { %3929 = vmatprep.subr.bf16.mxu0 %v3928_v9  ;;  %v3960_v7 = vpack.c.bf16 %v3169_v5, %v3168_v4 }
 0x206   :  { %3619 = vmatmul.mubr.msk.f32.vlgmr.msra.gmra.mrb[8].mxu0 %vm27_vm0, %v1052_v15  ;;  %v3177_v15 = vld [vmem:[%s4814_s3 + $0x1c8] sm:$0xff] }
 0x207   :  { %3931 = vmatpush3.bf16.msra.mxu0 %v3928_v9  ;;  %3621 = vmatprep.mubr.msk.f32.mxu0 %vm27_vm0, %v1053_v16  ;;  %v3170_v9 = vld [vmem:[%s4814_s3 + $0x1b0] sm:$0xff] }
 0x208   :  { %3933 = vmatprep.subr.bf16.mxu0 %v3932_v14  ;;  %v3964_v12 = vpack.c.bf16 %v3171_v10, %v3170_v9 }
 0x20a   :  { %3622 = vmatmul.mubr.msk.f32.gmra.mrb[10].mxu0 %vm27_vm0, %v1054_v17 }
 0x20b   :  { %3935 = vmatpush3.bf16.msra.mxu0 %v3932_v14  ;;  %3632 = vmatprep.mubr.msk.f32.mxu0 %vm27_vm0, %v1161_v18  ;;  %v3176_v14 = vld [vmem:[%s4814_s3 + $0x1c0] sm:$0xff] }
 0x20c   :  { %v3968_v17 = vpack.c.bf16 %v3177_v15, %v3176_v14 }
 0x20e   :  { %3633 = vmatmul.mubr.msk.f32.vlgmr.msra.gmra.mrb[8].mxu0 %vm27_vm0, %v1162_v19  ;;  %v3178_v19 = vld [vmem:[%s4814_s3 + $0x1d0] sm:$0xff] }
 0x20f   :  { %3635 = vmatprep.mubr.msk.f32.mxu0 %vm27_vm0, %v1163_v20  ;;  %v3179_v20 = vld [vmem:[%s4814_s3 + $0x1d8] sm:$0xff] }
 0x210   :  { %v3972_v22 = vpack.c.bf16 %v3179_v20, %v3178_v19 }
 0x212   :  { %3636 = vmatmul.mubr.msk.f32.gmra.mrb[10].mxu0 %vm27_vm0, %v1164_v21 }
 0x2e1   :  { %v3634_v34 = vpop.f32.mrb[8].mxu0 }
 0x2e2   :  { %v1280_v38 = vmul.f32 %v3634_v34, %v3141_v32  ;;  %v1248_v39 = vpop.f32.mrb[9].mxu0 }
 0x2e3   :  { %v1279_v40 = vmul.f32 %v3141_v32, %v1248_v39 }
 0x2e4   :  { %v1292_v41 = vadd.f32 %v3143_v36, %v1280_v38  ;;  %v3195_v38 = vld [vmem:[%s4814_s3 + $0x218] sm:$0xff] }
 0x2e5   :  { %v1291_v42 = vadd.f32 %v3143_v36, %v1279_v40  ;;  %v3637_v43 = vpop.f32.mrb[10].mxu0  ;;  %v3188_v40 = vld [vmem:[%s4814_s3 + $0x1e0] sm:$0xff] }
 0x2e6   :  { %4149 = vtanh.f32 %v1292_v41  ;;  %v1282_v44 = vmul.f32 %v3637_v43, %v3141_v32  ;;  %v1258_v45 = vpop.f32.mrb[11].mxu0  ;;  %v3189_v41 = vld [vmem:[%s4814_s3 + $0x1e8] sm:$0xff]  ;;  %v3185_v43 = vld [vmem:[%s4815_s4 + $0x2] ss:$0 sm:$0xff] }
 0x2e7   :  { %4151 = vtanh.f32 %v1291_v42  ;;  %v1281_v46 = vmul.f32 %v3141_v32, %v1258_v45  ;;  %v3193_v32 = vld [vmem:[%s4814_s3 + $0x208] sm:$0xff]  ;;  %v3984_v42 = vpack.c.bf16 %v3189_v41, %v3188_v40  ;;  %v3187_v45 = vld [vmem:[%s4816_s5 + $0x2] ss:$0 sm:$0xff] }
 0x2e8   :  { %v1294_v47 = vadd.f32 %v3143_v36, %v1282_v44 }
 0x2e9   :  { %v1293_v48 = vadd.f32 %v3143_v36, %v1281_v46  ;;  %v3194_v36 = vld [vmem:[%s4814_s3 + $0x210] sm:$0xff] }
 0x2ea   :  { %4153 = vtanh.f32 %v1294_v47  ;;  %v3980_v39 = vpack.c.bf16 %v3195_v38, %v3194_v36 }
 0x2eb   :  { %4155 = vtanh.f32 %v1293_v48 }
 0x2f0   :  { %v4150_v49 = vpop.eup %4149 }
 0x2f1   :  { %v4152_v50 = vpop.eup %4151  ;;  %1300 = vst.msk [vmem:[#allocation2 + $0x10] sm:$0xff] %vm27_vm0, %v4150_v49 }
 0x2f2   :  { %1299 = vst.msk [vmem:[#allocation2 + $0x8] sm:$0xff] %vm27_vm0, %v4152_v50 }
 0x2f4   :  { %v4154_v51 = vpop.eup %4153 }
 0x2f5   :  { %v4156_v52 = vpop.eup %4155  ;;  %1302 = vst.msk [vmem:[#allocation2 + $0x30] sm:$0xff] %vm27_vm0, %v4154_v51 }
 0x2f6   :  { %1301 = vst.msk [vmem:[#allocation2 + $0x28] sm:$0xff] %vm27_vm0, %v4156_v52 }
 0x2f8   :  { %v1516_v13 = vld [vmem:[#allocation2 + $0x10] sm:$0xff] }
 0x2f9   :  { %v1312_v55 = vld [vmem:[#allocation2 + $0x7] sm:$0xff]  ;;  %v1313_v56 = vld [vmem:[#allocation2 + $0xf] sm:$0xff] }
 0x2fa   :  { %3646 = vmatprep.mubr.msk.f32.mxu1 %vm27_vm0, %v1312_v55  ;;  %v1303_v1 = vld [vmem:[#allocation2 + $0x6] sm:$0xff]  ;;  %v1304_v3 = vld [vmem:[#allocation2 + $0xe] sm:$0xff] }
 0x2fb   :  { %3647 = vmatmul.mubr.msk.f32.vlgmr.msra.gmra.mrb[4].mxu1 %vm27_vm0, %v1313_v56  ;;  %v1515_v11 = vld [vmem:[#allocation2 + $0x8] sm:$0xff]  ;;  %v1626_v23 = vld [vmem:[#allocation2 + $0x11] sm:$0xff] }
 0x2fc   :  { %3947 = vmatpush3.bf16.msra.mxu1 %v3944_v30  ;;  %v1518_v18 = vld [vmem:[#allocation2 + $0x30] sm:$0xff]  ;;  %v3192_v30 = vld [vmem:[%s4814_s3 + $0x200] sm:$0xff] }
 0x2fd   :  { %v1314_v60 = vld [vmem:[#allocation2 + $0x27] sm:$0xff]  ;;  %3949 = vmatprep.subr.bf16.mxu1 %v3948_v57  ;;  %v1315_v61 = vld [vmem:[#allocation2 + $0x2f] sm:$0xff]  ;;  %v3976_v34 = vpack.c.bf16 %v3193_v32, %v3192_v30 }
 0x2fe   :  { %3649 = vmatprep.mubr.msk.f32.mxu1 %vm27_vm0, %v1314_v60  ;;  %v1305_v6 = vld [vmem:[#allocation2 + $0x26] sm:$0xff]  ;;  %v1306_v8 = vld [vmem:[#allocation2 + $0x2e] sm:$0xff] }
 0x2ff   :  { %3650 = vmatmul.mubr.msk.f32.gmra.mrb[6].mxu1 %vm27_vm0, %v1315_v61  ;;  %v1517_v16 = vld [vmem:[#allocation2 + $0x28] sm:$0xff]  ;;  %v1628_v25 = vld [vmem:[#allocation2 + $0x31] sm:$0xff]  ;;  %3977 = vmatprep.subr.bf16.mxu0 %v3976_v34 }
 0x300   :  { %3951 = vmatpush3.bf16.msra.mxu1 %v3948_v57  ;;  %3660 = vmatprep.mubr.msk.f32.mxu1 %vm27_vm0, %v1303_v1  ;;  %v1625_v21 = vld [vmem:[#allocation2 + $0x9] sm:$0xff]  ;;  %v1736_v27 = vld [vmem:[#allocation2 + $0x12] sm:$0xff] }
 0x301   :  { %3953 = vmatprep.subr.bf16.mxu1 %v3952_v62  ;;  %v1627_v24 = vld [vmem:[#allocation2 + $0x29] sm:$0xff]  ;;  %v1738_v29 = vld [vmem:[#allocation2 + $0x32] sm:$0xff]  ;;  %3979 = vmatpush3.bf16.msra.mxu0 %v3976_v34 }
 0x302   :  { %v1735_v26 = vld [vmem:[#allocation2 + $0xa] sm:$0xff]  ;;  %3981 = vmatprep.subr.bf16.mxu0 %v3980_v39 }
 0x303   :  { %3661 = vmatmul.mubr.msk.f32.vlgmr.msra.gmra.mrb[4].mxu1 %vm27_vm0, %v1304_v3  ;;  %v1737_v28 = vld [vmem:[#allocation2 + $0x2a] sm:$0xff] }
 0x304   :  { %3955 = vmatpush3.bf16.msra.mxu1 %v3952_v62  ;;  %3663 = vmatprep.mubr.msk.f32.mxu1 %vm27_vm0, %v1305_v6  ;;  %v3190_v61 = vld [vmem:[%s4814_s3 + $0x1f0] sm:$0xff]  ;;  %v3191_v62 = vld [vmem:[%s4814_s3 + $0x1f8] sm:$0xff]  ;;  %v3205_v3 = vld [vmem:[%s4814_s3 + $0x228] sm:$0xff] }
 0x305   :  { %3957 = vmatprep.subr.bf16.mxu1 %v3956_v2  ;;  %3983 = vmatpush3.bf16.msra.mxu0 %v3980_v39  ;;  %v3988_v1 = vpack.c.bf16 %v3191_v62, %v3190_v61 }
 0x306   :  { %3985 = vmatprep.subr.bf16.mxu0 %v3984_v42 }
 0x307   :  { %3664 = vmatmul.mubr.msk.f32.gmra.mrb[6].mxu1 %vm27_vm0, %v1306_v8  ;;  %v3207_v8 = vld [vmem:[%s4814_s3 + $0x238] sm:$0xff] }
 0x308   :  { %3959 = vmatpush3.bf16.msra.mxu1 %v3956_v2  ;;  %3674 = vmatprep.mubr.msk.f32.mxu1 %vm27_vm0, %v1515_v11  ;;  %v3204_v2 = vld [vmem:[%s4814_s3 + $0x220] sm:$0xff] }
 0x309   :  { %3961 = vmatprep.subr.bf16.mxu1 %v3960_v7  ;;  %v3992_v6 = vpack.c.bf16 %v3205_v3, %v3204_v2 }
 0x30b   :  { %3675 = vmatmul.mubr.msk.f32.vlgmr.msra.gmra.mrb[4].mxu1 %vm27_vm0, %v1516_v13  ;;  %v3213_v13 = vld [vmem:[%s4814_s3 + $0x248] sm:$0xff] }
 0x30c   :  { %3963 = vmatpush3.bf16.msra.mxu1 %v3960_v7  ;;  %3677 = vmatprep.mubr.msk.f32.mxu1 %vm27_vm0, %v1517_v16  ;;  %v3206_v7 = vld [vmem:[%s4814_s3 + $0x230] sm:$0xff] }
 0x30d   :  { %3965 = vmatprep.subr.bf16.mxu1 %v3964_v12  ;;  %v3996_v10 = vpack.c.bf16 %v3207_v8, %v3206_v7 }
 0x30f   :  { %3678 = vmatmul.mubr.msk.f32.gmra.mrb[6].mxu1 %vm27_vm0, %v1518_v18  ;;  %v3215_v18 = vld [vmem:[%s4814_s3 + $0x258] sm:$0xff] }
 0x310   :  { %3967 = vmatpush3.bf16.msra.mxu1 %v3964_v12  ;;  %3688 = vmatprep.mubr.msk.f32.mxu1 %vm27_vm0, %v1625_v21  ;;  %v3212_v12 = vld [vmem:[%s4814_s3 + $0x240] sm:$0xff] }
 0x311   :  { %3969 = vmatprep.subr.bf16.mxu1 %v3968_v17  ;;  %v4000_v15 = vpack.c.bf16 %v3213_v13, %v3212_v12 }
 0x313   :  { %3689 = vmatmul.mubr.msk.f32.vlgmr.msra.gmra.mrb[4].mxu1 %vm27_vm0, %v1626_v23  ;;  %v3221_v23 = vld [vmem:[%s4814_s3 + $0x268] sm:$0xff] }
 0x314   :  { %3971 = vmatpush3.bf16.msra.mxu1 %v3968_v17  ;;  %3691 = vmatprep.mubr.msk.f32.mxu1 %vm27_vm0, %v1627_v24  ;;  %v3214_v17 = vld [vmem:[%s4814_s3 + $0x250] sm:$0xff] }
 0x315   :  { %3973 = vmatprep.subr.bf16.mxu1 %v3972_v22  ;;  %v4004_v20 = vpack.c.bf16 %v3215_v18, %v3214_v17 }
 0x317   :  { %3692 = vmatmul.mubr.msk.f32.gmra.mrb[6].mxu1 %vm27_vm0, %v1628_v25 }
 0x318   :  { %3975 = vmatpush3.bf16.msra.mxu1 %v3972_v22  ;;  %3702 = vmatprep.mubr.msk.f32.mxu1 %vm27_vm0, %v1735_v26  ;;  %v3220_v22 = vld [vmem:[%s4814_s3 + $0x260] sm:$0xff] }
 0x319   :  { %v4008_v25 = vpack.c.bf16 %v3221_v23, %v3220_v22 }
 0x31b   :  { %3703 = vmatmul.mubr.msk.f32.vlgmr.msra.gmra.mrb[4].mxu1 %vm27_vm0, %v1736_v27  ;;  %v3222_v27 = vld [vmem:[%s4814_s3 + $0x270] sm:$0xff] }
 0x31c   :  { %3705 = vmatprep.mubr.msk.f32.mxu1 %vm27_vm0, %v1737_v28  ;;  %v3223_v28 = vld [vmem:[%s4814_s3 + $0x278] sm:$0xff] }
 0x31d   :  { %v4012_v30 = vpack.c.bf16 %v3223_v28, %v3222_v27 }
 0x31f   :  { %3706 = vmatmul.mubr.msk.f32.gmra.mrb[6].mxu1 %vm27_vm0, %v1738_v29 }
 0x3ee   :  { %v3704_v44 = vpop.f32.mrb[4].mxu1 }
 0x3ef   :  { %v1854_v46 = vmul.f32 %v3704_v44, %v3185_v43  ;;  %v1822_v47 = vpop.f32.mrb[5].mxu1 }
 0x3f0   :  { %v1853_v48 = vmul.f32 %v3185_v43, %v1822_v47 }
 0x3f1   :  { %v1866_v49 = vadd.f32 %v3187_v45, %v1854_v46  ;;  %v3239_v46 = vld [vmem:[%s4814_s3 + $0x2b8] sm:$0xff] }
 0x3f2   :  { %v1865_v50 = vadd.f32 %v3187_v45, %v1853_v48  ;;  %v3707_v51 = vpop.f32.mrb[6].mxu1  ;;  %v3232_v48 = vld [vmem:[%s4814_s3 + $0x280] sm:$0xff] }
 0x3f3   :  { %4157 = vtanh.f32 %v1866_v49  ;;  %v1856_v52 = vmul.f32 %v3707_v51, %v3185_v43  ;;  %v1832_v53 = vpop.f32.mrb[7].mxu1  ;;  %v3233_v49 = vld [vmem:[%s4814_s3 + $0x288] sm:$0xff]  ;;  %v3229_v51 = vld [vmem:[%s4815_s4 + $0x3] ss:$0 sm:$0xff] }
 0x3f4   :  { %4159 = vtanh.f32 %v1865_v50  ;;  %v1855_v54 = vmul.f32 %v3185_v43, %v1832_v53  ;;  %v3237_v43 = vld [vmem:[%s4814_s3 + $0x2a8] sm:$0xff]  ;;  %v4024_v50 = vpack.c.bf16 %v3233_v49, %v3232_v48  ;;  %v3231_v53 = vld [vmem:[%s4816_s5 + $0x3] ss:$0 sm:$0xff] }
 0x3f5   :  { %v1868_v55 = vadd.f32 %v3187_v45, %v1856_v52 }
 0x3f6   :  { %v1867_v56 = vadd.f32 %v3187_v45, %v1855_v54  ;;  %v3238_v45 = vld [vmem:[%s4814_s3 + $0x2b0] sm:$0xff] }
 0x3f7   :  { %4161 = vtanh.f32 %v1868_v55  ;;  %v4020_v47 = vpack.c.bf16 %v3239_v46, %v3238_v45 }
 0x3f8   :  { %4163 = vtanh.f32 %v1867_v56 }
 0x3fd   :  { %v4158_v57 = vpop.eup %4157 }
 0x3fe   :  { %v4160_v58 = vpop.eup %4159  ;;  %1874 = vst.msk [vmem:[#allocation2 + $0x10] sm:$0xff] %vm27_vm0, %v4158_v57 }
 0x3ff   :  { %1873 = vst.msk [vmem:[#allocation2 + $0x8] sm:$0xff] %vm27_vm0, %v4160_v58 }
 0x401   :  { %v4162_v59 = vpop.eup %4161 }
 0x402   :  { %v4164_v60 = vpop.eup %4163  ;;  %1876 = vst.msk [vmem:[#allocation2 + $0x30] sm:$0xff] %vm27_vm0, %v4162_v59 }
 0x403   :  { %1875 = vst.msk [vmem:[#allocation2 + $0x28] sm:$0xff] %vm27_vm0, %v4164_v60 }
 0x405   :  { %v2090_v21 = vld [vmem:[#allocation2 + $0x10] sm:$0xff] }
 0x406   :  { %v1886_v63 = vld [vmem:[#allocation2 + $0x7] sm:$0xff]  ;;  %v1887_v0 = vld [vmem:[#allocation2 + $0xf] sm:$0xff] }
 0x407   :  { %3716 = vmatprep.mubr.msk.f32.mxu0 %vm27_vm0, %v1886_v63  ;;  %v1877_v9 = vld [vmem:[#allocation2 + $0x6] sm:$0xff]  ;;  %v1878_v11 = vld [vmem:[#allocation2 + $0xe] sm:$0xff] }
 0x408   :  { %3717 = vmatmul.mubr.msk.f32.vlgmr.msra.gmra.mrb[12].mxu0 %vm27_vm0, %v1887_v0  ;;  %v2089_v19 = vld [vmem:[#allocation2 + $0x8] sm:$0xff]  ;;  %v2200_v32 = vld [vmem:[#allocation2 + $0x11] sm:$0xff] }
 0x409   :  { %3987 = vmatpush3.bf16.msra.mxu0 %v3984_v42  ;;  %v2092_v26 = vld [vmem:[#allocation2 + $0x30] sm:$0xff]  ;;  %v3236_v42 = vld [vmem:[%s4814_s3 + $0x2a0] sm:$0xff] }
 0x40a   :  { %v1888_v4 = vld [vmem:[#allocation2 + $0x27] sm:$0xff]  ;;  %3989 = vmatprep.subr.bf16.mxu0 %v3988_v1  ;;  %v1889_v5 = vld [vmem:[#allocation2 + $0x2f] sm:$0xff]  ;;  %v4016_v44 = vpack.c.bf16 %v3237_v43, %v3236_v42 }
 0x40b   :  { %3719 = vmatprep.mubr.msk.f32.mxu0 %vm27_vm0, %v1888_v4  ;;  %v1879_v14 = vld [vmem:[#allocation2 + $0x26] sm:$0xff]  ;;  %v1880_v16 = vld [vmem:[#allocation2 + $0x2e] sm:$0xff] }
 0x40c   :  { %3720 = vmatmul.mubr.msk.f32.gmra.mrb[14].mxu0 %vm27_vm0, %v1889_v5  ;;  %v2091_v24 = vld [vmem:[#allocation2 + $0x28] sm:$0xff]  ;;  %v2202_v36 = vld [vmem:[#allocation2 + $0x31] sm:$0xff]  ;;  %4017 = vmatprep.subr.bf16.mxu1 %v4016_v44 }
 0x40d   :  { %3991 = vmatpush3.bf16.msra.mxu0 %v3988_v1  ;;  %3730 = vmatprep.mubr.msk.f32.mxu0 %vm27_vm0, %v1877_v9  ;;  %v2199_v29 = vld [vmem:[#allocation2 + $0x9] sm:$0xff]  ;;  %v2310_v39 = vld [vmem:[#allocation2 + $0x12] sm:$0xff] }
 0x40e   :  { %3993 = vmatprep.subr.bf16.mxu0 %v3992_v6  ;;  %v2201_v34 = vld [vmem:[#allocation2 + $0x29] sm:$0xff]  ;;  %v2312_v41 = vld [vmem:[#allocation2 + $0x32] sm:$0xff]  ;;  %4019 = vmatpush3.bf16.msra.mxu1 %v4016_v44 }
 0x40f   :  { %v2309_v38 = vld [vmem:[#allocation2 + $0xa] sm:$0xff]  ;;  %4021 = vmatprep.subr.bf16.mxu1 %v4020_v47 }
 0x410   :  { %3731 = vmatmul.mubr.msk.f32.vlgmr.msra.gmra.mrb[12].mxu0 %vm27_vm0, %v1878_v11  ;;  %v2311_v40 = vld [vmem:[#allocation2 + $0x2a] sm:$0xff] }
 0x411   :  { %3995 = vmatpush3.bf16.msra.mxu0 %v3992_v6  ;;  %3733 = vmatprep.mubr.msk.f32.mxu0 %vm27_vm0, %v1879_v14  ;;  %v3234_v5 = vld [vmem:[%s4814_s3 + $0x290] sm:$0xff]  ;;  %v3235_v6 = vld [vmem:[%s4814_s3 + $0x298] sm:$0xff]  ;;  %v3249_v11 = vld [vmem:[%s4814_s3 + $0x2c8] sm:$0xff] }
 0x412   :  { %3997 = vmatprep.subr.bf16.mxu0 %v3996_v10  ;;  %4023 = vmatpush3.bf16.msra.mxu1 %v4020_v47  ;;  %v4028_v9 = vpack.c.bf16 %v3235_v6, %v3234_v5 }
 0x413   :  { %4025 = vmatprep.subr.bf16.mxu1 %v4024_v50 }
 0x414   :  { %3734 = vmatmul.mubr.msk.f32.gmra.mrb[14].mxu0 %vm27_vm0, %v1880_v16  ;;  %v3251_v16 = vld [vmem:[%s4814_s3 + $0x2d8] sm:$0xff] }
 0x415   :  { %3999 = vmatpush3.bf16.msra.mxu0 %v3996_v10  ;;  %3744 = vmatprep.mubr.msk.f32.mxu0 %vm27_vm0, %v2089_v19  ;;  %v3248_v10 = vld [vmem:[%s4814_s3 + $0x2c0] sm:$0xff] }
 0x416   :  { %4001 = vmatprep.subr.bf16.mxu0 %v4000_v15  ;;  %v4032_v14 = vpack.c.bf16 %v3249_v11, %v3248_v10 }
 0x418   :  { %3745 = vmatmul.mubr.msk.f32.vlgmr.msra.gmra.mrb[12].mxu0 %vm27_vm0, %v2090_v21  ;;  %v3257_v21 = vld [vmem:[%s4814_s3 + $0x2e8] sm:$0xff] }
 0x419   :  { %4003 = vmatpush3.bf16.msra.mxu0 %v4000_v15  ;;  %3747 = vmatprep.mubr.msk.f32.mxu0 %vm27_vm0, %v2091_v24  ;;  %v3250_v15 = vld [vmem:[%s4814_s3 + $0x2d0] sm:$0xff] }
 0x41a   :  { %4005 = vmatprep.subr.bf16.mxu0 %v4004_v20  ;;  %v4036_v18 = vpack.c.bf16 %v3251_v16, %v3250_v15 }
 0x41c   :  { %3748 = vmatmul.mubr.msk.f32.gmra.mrb[14].mxu0 %vm27_vm0, %v2092_v26  ;;  %v3259_v26 = vld [vmem:[%s4814_s3 + $0x2f8] sm:$0xff] }
 0x41d   :  { %4007 = vmatpush3.bf16.msra.mxu0 %v4004_v20  ;;  %3758 = vmatprep.mubr.msk.f32.mxu0 %vm27_vm0, %v2199_v29  ;;  %v3256_v20 = vld [vmem:[%s4814_s3 + $0x2e0] sm:$0xff] }
 0x41e   :  { %4009 = vmatprep.subr.bf16.mxu0 %v4008_v25  ;;  %v4040_v23 = vpack.c.bf16 %v3257_v21, %v3256_v20 }
 0x420   :  { %3759 = vmatmul.mubr.msk.f32.vlgmr.msra.gmra.mrb[12].mxu0 %vm27_vm0, %v2200_v32  ;;  %v3265_v32 = vld [vmem:[%s4814_s3 + $0x308] sm:$0xff] }
 0x421   :  { %4011 = vmatpush3.bf16.msra.mxu0 %v4008_v25  ;;  %3761 = vmatprep.mubr.msk.f32.mxu0 %vm27_vm0, %v2201_v34  ;;  %v3258_v25 = vld [vmem:[%s4814_s3 + $0x2f0] sm:$0xff] }
 0x422   :  { %4013 = vmatprep.subr.bf16.mxu0 %v4012_v30  ;;  %v4044_v28 = vpack.c.bf16 %v3259_v26, %v3258_v25 }
 0x424   :  { %3762 = vmatmul.mubr.msk.f32.gmra.mrb[14].mxu0 %vm27_vm0, %v2202_v36 }
 0x425   :  { %4015 = vmatpush3.bf16.msra.mxu0 %v4012_v30  ;;  %3772 = vmatprep.mubr.msk.f32.mxu0 %vm27_vm0, %v2309_v38  ;;  %v3264_v30 = vld [vmem:[%s4814_s3 + $0x300] sm:$0xff] }
 0x426   :  { %v4048_v36 = vpack.c.bf16 %v3265_v32, %v3264_v30 }
 0x428   :  { %3773 = vmatmul.mubr.msk.f32.vlgmr.msra.gmra.mrb[12].mxu0 %vm27_vm0, %v2310_v39  ;;  %v3266_v39 = vld [vmem:[%s4814_s3 + $0x310] sm:$0xff] }
 0x429   :  { %3775 = vmatprep.mubr.msk.f32.mxu0 %vm27_vm0, %v2311_v40  ;;  %v3267_v40 = vld [vmem:[%s4814_s3 + $0x318] sm:$0xff]  ;;  %s4222_s3 = smov [#allocation3]  }
 0x42a   :  { %v4052_v42 = vpack.c.bf16 %v3267_v40, %v3266_v39  ;;  %s3030_s25 = sshll.u32 %s4222_s3, 4  ;;  %s3031_s25 = int_to_ptr.vmem [resolvable:$true] %s3030_s25 }
 0x42b   :  { %s4173_s26 = scalar_lea.vmem %s3031_s25, 512  ;;  %p4178_p1 = scmp.lt.s32.totalorder %s3031_s25, %s3031_s25 }
 0x42c   :  { %3776 = vmatmul.mubr.msk.f32.gmra.mrb[14].mxu0 %vm27_vm0, %v2312_v41  ;;  %p4174_p0 = scmp.ne.s32.totalorder %s3031_s25, %s4173_s26  ;;  %p4179_p2 = scmp.lt.s32.totalorder %s4173_s26, %s4173_s26 }
 0x42e   :  { %p4180_p3 = por %p4179_p2, %p4178_p1 }
 0x430   :  { %p4181_p4 = pnand %p4180_p3, %p4174_p0 }
 0x4fb   :  { %v3774_v52 = vpop.f32.mrb[12].mxu0 }
 0x4fc   :  { %v2428_v54 = vmul.f32 %v3774_v52, %v3229_v51  ;;  %v2396_v55 = vpop.f32.mrb[13].mxu0 }
 0x4fd   :  { %v2427_v56 = vmul.f32 %v3229_v51, %v2396_v55 }
 0x4fe   :  { %v2440_v57 = vadd.f32 %v3231_v53, %v2428_v54 }
 0x4ff   :  { %v2439_v58 = vadd.f32 %v3231_v53, %v2427_v56  ;;  %v3777_v59 = vpop.f32.mrb[14].mxu0 }
 0x500   :  { %4165 = vtanh.f32 %v2440_v57  ;;  %v2430_v60 = vmul.f32 %v3777_v59, %v3229_v51  ;;  %v2406_v61 = vpop.f32.mrb[15].mxu0 }
 0x501   :  { %4167 = vtanh.f32 %v2439_v58  ;;  %v2429_v62 = vmul.f32 %v3229_v51, %v2406_v61 }
 0x502   :  { %v2442_v63 = vadd.f32 %v3231_v53, %v2430_v60 }
 0x503   :  { %v2441_v0 = vadd.f32 %v3231_v53, %v2429_v62 }
 0x504   :  { %4169 = vtanh.f32 %v2442_v63 }
 0x505   :  { %4171 = vtanh.f32 %v2441_v0 }
 0x50a   :  { %v4166_v1 = vpop.eup %4165 }
 0x50b   :  { %v4168_v2 = vpop.eup %4167  ;;  %2448 = vst.msk [vmem:[#allocation2 + $0x10] sm:$0xff] %vm27_vm0, %v4166_v1 }
 0x50c   :  { %2447 = vst.msk [vmem:[#allocation2 + $0x8] sm:$0xff] %vm27_vm0, %v4168_v2 }
 0x50e   :  { %v4170_v3 = vpop.eup %4169 }
 0x50f   :  { %v4172_v4 = vpop.eup %4171  ;;  %2450 = vst.msk [vmem:[#allocation2 + $0x30] sm:$0xff] %vm27_vm0, %v4170_v3 }
 0x510   :  { %2449 = vst.msk [vmem:[#allocation2 + $0x28] sm:$0xff] %vm27_vm0, %v4172_v4 }
 0x512   :  { %v2664_v29 = vld [vmem:[#allocation2 + $0x10] sm:$0xff] }
 0x513   :  { %v2460_v7 = vld [vmem:[#allocation2 + $0x7] sm:$0xff]  ;;  %v2461_v8 = vld [vmem:[#allocation2 + $0xf] sm:$0xff] }
 0x514   :  { %3786 = vmatprep.mubr.msk.f32.mxu1 %vm27_vm0, %v2460_v7  ;;  %v2451_v17 = vld [vmem:[#allocation2 + $0x6] sm:$0xff]  ;;  %v2452_v19 = vld [vmem:[#allocation2 + $0xe] sm:$0xff] }
 0x515   :  { %3787 = vmatmul.mubr.msk.f32.vlgmr.msra.gmra.mrb[8].mxu1 %vm27_vm0, %v2461_v8  ;;  %v2663_v27 = vld [vmem:[#allocation2 + $0x8] sm:$0xff]  ;;  %v2774_v43 = vld [vmem:[#allocation2 + $0x11] sm:$0xff] }
 0x516   :  { %4027 = vmatpush3.bf16.msra.mxu1 %v4024_v50  ;;  %v2666_v38 = vld [vmem:[#allocation2 + $0x30] sm:$0xff] }
 0x517   :  { %v2462_v12 = vld [vmem:[#allocation2 + $0x27] sm:$0xff]  ;;  %4029 = vmatprep.subr.bf16.mxu1 %v4028_v9  ;;  %v2463_v13 = vld [vmem:[#allocation2 + $0x2f] sm:$0xff] }
 0x518   :  { %3789 = vmatprep.mubr.msk.f32.mxu1 %vm27_vm0, %v2462_v12  ;;  %v2453_v22 = vld [vmem:[#allocation2 + $0x26] sm:$0xff]  ;;  %v2454_v24 = vld [vmem:[#allocation2 + $0x2e] sm:$0xff] }
 0x519   :  { %3790 = vmatmul.mubr.msk.f32.gmra.mrb[10].mxu1 %vm27_vm0, %v2463_v13  ;;  %v2665_v34 = vld [vmem:[#allocation2 + $0x28] sm:$0xff]  ;;  %v2776_v45 = vld [vmem:[#allocation2 + $0x31] sm:$0xff] }
 0x51a   :  { %4031 = vmatpush3.bf16.msra.mxu1 %v4028_v9  ;;  %3800 = vmatprep.mubr.msk.f32.mxu1 %vm27_vm0, %v2451_v17  ;;  %v2773_v41 = vld [vmem:[#allocation2 + $0x9] sm:$0xff]  ;;  %v2884_v47 = vld [vmem:[#allocation2 + $0x12] sm:$0xff] }
 0x51b   :  { %4033 = vmatprep.subr.bf16.mxu1 %v4032_v14  ;;  %v2775_v44 = vld [vmem:[#allocation2 + $0x29] sm:$0xff]  ;;  %v2886_v49 = vld [vmem:[#allocation2 + $0x32] sm:$0xff] }
 0x51c   :  { %v2883_v46 = vld [vmem:[#allocation2 + $0xa] sm:$0xff] }
 0x51d   :  { %3801 = vmatmul.mubr.msk.f32.vlgmr.msra.gmra.mrb[8].mxu1 %vm27_vm0, %v2452_v19  ;;  %v2885_v48 = vld [vmem:[#allocation2 + $0x2a] sm:$0xff] }
 0x51e   :  { %4035 = vmatpush3.bf16.msra.mxu1 %v4032_v14  ;;  %3803 = vmatprep.mubr.msk.f32.mxu1 %vm27_vm0, %v2453_v22 }
 0x51f   :  { %4037 = vmatprep.subr.bf16.mxu1 %v4036_v18 }
 0x521   :  { %3804 = vmatmul.mubr.msk.f32.gmra.mrb[10].mxu1 %vm27_vm0, %v2454_v24 }
 0x522   :  { %4039 = vmatpush3.bf16.msra.mxu1 %v4036_v18  ;;  %3814 = vmatprep.mubr.msk.f32.mxu1 %vm27_vm0, %v2663_v27 }
 0x523   :  { %4041 = vmatprep.subr.bf16.mxu1 %v4040_v23 }
 0x525   :  { %3815 = vmatmul.mubr.msk.f32.vlgmr.msra.gmra.mrb[8].mxu1 %vm27_vm0, %v2664_v29 }
 0x526   :  { %4043 = vmatpush3.bf16.msra.mxu1 %v4040_v23  ;;  %3817 = vmatprep.mubr.msk.f32.mxu1 %vm27_vm0, %v2665_v34 }
 0x527   :  { %4045 = vmatprep.subr.bf16.mxu1 %v4044_v28 }
 0x529   :  { %3818 = vmatmul.mubr.msk.f32.gmra.mrb[10].mxu1 %vm27_vm0, %v2666_v38 }
 0x52a   :  { %4047 = vmatpush3.bf16.msra.mxu1 %v4044_v28  ;;  %3828 = vmatprep.mubr.msk.f32.mxu1 %vm27_vm0, %v2773_v41 }
 0x52b   :  { %4049 = vmatprep.subr.bf16.mxu1 %v4048_v36 }
 0x52d   :  { %3829 = vmatmul.mubr.msk.f32.vlgmr.msra.gmra.mrb[8].mxu1 %vm27_vm0, %v2774_v43 }
 0x52e   :  { %4051 = vmatpush3.bf16.msra.mxu1 %v4048_v36  ;;  %3831 = vmatprep.mubr.msk.f32.mxu1 %vm27_vm0, %v2775_v44 }
 0x52f   :  { %4053 = vmatprep.subr.bf16.mxu1 %v4052_v42 }
 0x531   :  { %3832 = vmatmul.mubr.msk.f32.gmra.mrb[10].mxu1 %vm27_vm0, %v2776_v45 }
 0x532   :  { %4055 = vmatpush3.bf16.msra.mxu1 %v4052_v42  ;;  %3842 = vmatprep.mubr.msk.f32.mxu1 %vm27_vm0, %v2883_v46 }
 0x535   :  { %3843 = vmatmul.mubr.msk.f32.vlgmr.msra.gmra.mrb[8].mxu1 %vm27_vm0, %v2884_v47 }
 0x536   :  { %3845 = vmatprep.mubr.msk.f32.mxu1 %vm27_vm0, %v2885_v48 }
 0x539   :  { %3846 = vmatmul.mubr.msk.f32.gmra.mrb[10].mxu1 %vm27_vm0, %v2886_v49 }
 0x53a   :  { %4184 = shalt.err (!%p4181_p4)
}
 0x53b   :  { %s4185_s29 = scalar_lea.hbm %s4817_s6, 512 }
 0x53c   :  { %p4186_p5 = scmp.ne.s32.totalorder %s4817_s6, %s4185_s29  ;;  %p4189_p6 = scmp.lt.u32.totalorder %s4185_s29, %s4817_s6 }
 0x53e   :  { %p4191_p7 = pnand %p4189_p6, %p4186_p5 }
 0x540   :  { %4194 = shalt.err (!%p4191_p7)
}
 0x541   :  { %s4223_s1 = smov 128   ;;  %s4224_s11 = smov 8   ;;  %v3273_v50 = vld [vmem:[%s4815_s4 + $0x4] ss:$0 sm:$0xff] }
 0x542   :  { %3036 = dma.vmem_to_hbm [thread:$0]  %s3031_s25, 512, %s4817_s6, [#allocation4], %s4223_s1, %s4223_s1, %s4224_s11  }
 0x543   :  { %v3275_v52 = vld [vmem:[%s4816_s5 + $0x4] ss:$0 sm:$0xff]  ;;  %s4225_s4 = smov [#allocation5]  }
 0x544   :  { %s3042_s6 = sshll.u32 %s4225_s4, 4  ;;  %s3043_s6 = int_to_ptr.vmem [resolvable:$true] %s3042_s6 }
 0x545   :  { %s4195_s5 = scalar_lea.vmem %s3043_s6, 512  ;;  %p4200_p9 = scmp.lt.s32.totalorder %s3043_s6, %s3043_s6 }
 0x546   :  { %p4196_p8 = scmp.ne.s32.totalorder %s3043_s6, %s4195_s5  ;;  %p4201_p10 = scmp.lt.s32.totalorder %s4195_s5, %s4195_s5 }
 0x548   :  { %p4202_p11 = por %p4201_p10, %p4200_p9 }
 0x54a   :  { %p4203_p12 = pnand %p4202_p11, %p4196_p8 }
 0x608   :  { %v3844_v51 = vpop.f32.mrb[8].mxu1 }
 0x609   :  { %v3002_v53 = vmul.f32 %v3844_v51, %v3273_v50  ;;  %v2970_v54 = vpop.f32.mrb[9].mxu1 }
 0x60a   :  { %v3001_v55 = vmul.f32 %v3273_v50, %v2970_v54 }
 0x60b   :  { %v3014_v56 = vadd.f32 %v3275_v52, %v3002_v53 }
 0x60c   :  { %v3013_v57 = vadd.f32 %v3275_v52, %v3001_v55  ;;  %v3847_v58 = vpop.f32.mrb[10].mxu1 }
 0x60d   :  { %v3018_v59 = vadd.f32 %v3014_v56, %v4339_v31  ;;  %v3004_v60 = vmul.f32 %v3847_v58, %v3273_v50  ;;  %v2980_v61 = vpop.f32.mrb[11].mxu1 }
 0x60e   :  { %v3017_v62 = vadd.f32 %v3013_v57, %v4341_v33  ;;  %v3003_v63 = vmul.f32 %v3273_v50, %v2980_v61 }
 0x60f   :  { %3022 = vst.msk [vmem:[#allocation5 + $0x8] sm:$0xff] %vm149_vm2, %v3018_v59  ;;  %v3016_v0 = vadd.f32 %v3275_v52, %v3004_v60 }
 0x610   :  { %3021 = vst.msk [vmem:[#allocation5] sm:$0xff] %vm149_vm2, %v3017_v62  ;;  %v3015_v1 = vadd.f32 %v3275_v52, %v3003_v63 }
 0x611   :  { %v3020_v2 = vadd.f32 %v3016_v0, %v4351_v35 }
 0x612   :  { %v3019_v3 = vadd.f32 %v3015_v1, %v4353_v37 }
 0x613   :  { %3024 = vst.msk [vmem:[#allocation5 + $0x18] sm:$0xff] %vm149_vm2, %v3020_v2 }
 0x614   :  { %3023 = vst.msk [vmem:[#allocation5 + $0x10] sm:$0xff] %vm149_vm2, %v3019_v3 }
 0x615   :  { %4206 = shalt.err (!%p4203_p12)
}
 0x616   :  { %s4207_s19 = scalar_lea.hbm %s4818_s7, 512 }
 0x617   :  { %p4208_p13 = scmp.ne.s32.totalorder %s4818_s7, %s4207_s19  ;;  %p4211_p0 = scmp.lt.u32.totalorder %s4207_s19, %s4818_s7 }
 0x619   :  { %p4213_p1 = pnand %p4211_p0, %p4208_p13 }
 0x61b   :  { %4216 = shalt.err (!%p4213_p1)
}
 0x61c   :  { %3048 = dma.vmem_to_hbm [thread:$0]  %s3043_s6, 512, %s4818_s7, [#allocation6], %s4223_s1, %s4223_s1, %s4224_s11  }
 0x61d   :  { %4217 = dma.done.wait [#allocation4], 512  }
 0x61e   :  { %4218 = vsyncadd [#allocation4], 4294966784 }
 0x61f   :  { %4219 = dma.done.wait [#allocation6], 512  }
 0x620   :  { %4220 = vsyncadd [#allocation6], 4294966784 }
 0x621   :  { %3055 = vsyncpa [#allocation4], 1 }
 0x622   :  { %3056 = vsyncpa [#allocation6], 1 }

</bundles_post_ra>
